<compile_context>
chip_gen: v7x
topology: tpu7x:2x2x1
jax: 0.10.0
libtpu: 0.0.40
codegen_flags: <defaults>
</compile_context>

<pallas_src>
import jax
import jax.numpy as jnp
import numpy as np
from jax.experimental import pallas as pl
from jax.experimental.pallas import tpu as pltpu


# ----------------------------------------------------------------------------
# Wrapper-side (trace-time) weight expansions
# ----------------------------------------------------------------------------
def _pool1_select_matrix():
    """(755, 196) 0/1 matrix selecting the 14x14 pooled lanes out of the
    shifted-max slab (lane 56*i + 2*j -> lane i*14 + j)."""
    i, j = np.meshgrid(np.arange(14), np.arange(14), indexing="ij")
    s = np.zeros((755, 196), np.float32)
    s[(56 * i + 2 * j).ravel(), (i * 14 + j).ravel()] = 1.0
    return jnp.asarray(s)


def _conv2_toeplitz_matrix(w2):
    """Expand conv2 (16,6,5,5) OIHW weights into a (1176, 1600) matrix so the
    whole 5x5 conv over the 14x14x6 pooled map is one matmul.
    Rows: lane c*196 + i*14 + j of p1.  Cols: lane oy*160 + ox*16 + co of z2."""
    oy, ox, kh, kw, c, co = np.meshgrid(
        np.arange(10), np.arange(10), np.arange(5), np.arange(5),
        np.arange(6), np.arange(16), indexing="ij")
    rows = (c * 196 + (oy + kh) * 14 + (ox + kw)).ravel()
    cols = (oy * 160 + ox * 16 + co).ravel()
    vals = w2[co.ravel(), c.ravel(), kh.ravel(), kw.ravel()]
    return jnp.zeros((1176, 1600), jnp.float32).at[rows, cols].set(vals)


def _conv3_matrix(w3):
    """Expand conv3 (120,16,5,5) into a (1424, 120) matrix whose rows pick the
    2x2-pooled lanes (320*i + 32*j + co) of the shifted-max conv2 slab,
    folding the second pool's lane compaction into the conv3 matmul."""
    i, j, co, o = np.meshgrid(np.arange(5), np.arange(5), np.arange(16),
                              np.arange(120), indexing="ij")
    rows = (320 * i + 32 * j + co).ravel()
    vals = w3[o.ravel(), co.ravel(), i.ravel(), j.ravel()]
    return jnp.zeros((1424, 120), jnp.float32).at[rows, o.ravel()].set(vals)


# ----------------------------------------------------------------------------
# Fused Pallas kernel (one batch tile per grid step)
# ----------------------------------------------------------------------------
def _lenet_fused_kernel(x_ref, w1_ref, b1_ref, s1_ref, w2_ref, b2_ref,
                        w3_ref, b3_ref, w4_ref, b4_ref, w5_ref, b5_ref, o_ref):
    f32 = jnp.float32
    cin = w1_ref.shape[0]

    x = x_ref[...]                                        # (TB, cin*784), NCHW-flat
    xs = [x[:, c * 784:(c + 1) * 784] for c in range(cin)]
    s1 = s1_ref[...]                                      # (755, 196)

    # ---- C1 (1x1 conv, VPU FMAs) + ReLU + S2 (2x2 maxpool), per channel ----
    pooled1 = []
    for c1 in range(6):
        a = xs[0] * w1_ref[0, c1] + b1_ref[c1]
        for c in range(1, cin):
            a = a + xs[c] * w1_ref[c, c1]
        a = jnp.maximum(a, 0.0)                           # (TB, 784), lane = h*28+w
        m = jnp.maximum(a[:, :783], a[:, 1:])             # pair along w
        m = jnp.maximum(m[:, :755], m[:, 28:])            # pair along h -> (TB, 755)
        # stride-2 lane compaction to the 14x14 pooled map (tiny MXU matmul)
        pooled1.append(jnp.dot(m, s1, preferred_element_type=f32))   # (TB, 196)
    p1 = jnp.concatenate(pooled1, axis=1)                 # (TB, 1176), lanes=(c,i,j)

    # ---- C3 (5x5 conv) as ONE Toeplitz matmul + bias + ReLU ----------------
    z = jnp.dot(p1, w2_ref[...], preferred_element_type=f32) + b2_ref[...]
    z = jnp.maximum(z, 0.0)                               # (TB, 1600), lanes=(oy,ox,co)

    # ---- S4 (2x2 maxpool) as shifted-view maxima on the lane-dense slab ----
    m = jnp.maximum(z[:, :1584], z[:, 16:])               # pair along ox
    m = jnp.maximum(m[:, :1424], m[:, 160:])              # pair along oy -> (TB, 1424)

    # ---- C5 (5x5 conv on 5x5 map) = one matmul (pool compaction folded in) -
    h = jnp.dot(m, w3_ref[...], preferred_element_type=f32) + b3_ref[...]
    h = jnp.maximum(h, 0.0)                               # (TB, 120)

    # ---- F6 + ReLU ----------------------------------------------------------
    h = jnp.dot(h, w4_ref[...], preferred_element_type=f32) + b4_ref[...]
    h = jnp.maximum(h, 0.0)                               # (TB, 84)

    # ---- F7 + log-softmax over the 10 real classes (lanes >= 10 = padding) -
    y = jnp.dot(h, w5_ref[...], preferred_element_type=f32) + b5_ref[...]  # (TB,128)
    lane = jax.lax.broadcasted_iota(jnp.int32, y.shape, 1)
    valid = lane < 10
    mx = jnp.max(jnp.where(valid, y, -1e30), axis=-1, keepdims=True)
    e = jnp.where(valid, jnp.exp(y - mx), 0.0)
    s = jnp.sum(e, axis=-1, keepdims=True)
    o_ref[...] = (y - mx - jnp.log(s)).astype(o_ref.dtype)


# ----------------------------------------------------------------------------
# Wrapper: layout plumbing + single pallas_call
# ----------------------------------------------------------------------------
def modded_lenet5_forward(x_nchw, params, *, batch_tile=64):
    B, Cin, H, W = x_nchw.shape
    assert (H, W) == (28, 28), "ModdedLeNet5Net expects 28x28 spatial input"
    f32 = jnp.float32

    # Lane-dense input block: flattened NCHW (channel-major) rows.
    x = x_nchw.astype(f32).reshape(B, Cin * H * W)

    # Batch tile: multiple of 8; keep >= 2 grid steps when possible (v7x 2 TCs).
    B8 = ((B + 7) // 8) * 8
    tb = max(8, min((int(batch_tile) // 8) * 8, B8))
    if B8 >= 16 and B8 < 2 * tb:
        tb = max(8, ((B8 // 2) // 8) * 8)
    B_pad = ((B + tb - 1) // tb) * tb
    if B_pad != B:
        x = jnp.pad(x, ((0, B_pad - B), (0, 0)))

    # ---- weights -> MXU/VPU friendly operands (tiny, one-time under jit) ----
    w1 = params["conv1_w"].astype(f32).reshape(6, Cin).T            # (Cin, 6) SMEM
    b1 = params["conv1_b"].astype(f32)                              # (6,)     SMEM
    s1 = _pool1_select_matrix()                                     # (755, 196)
    w2 = _conv2_toeplitz_matrix(params["conv2_w"].astype(f32))      # (1176, 1600)
    b2 = jnp.tile(params["conv2_b"].astype(f32), 100).reshape(1, 1600)
    w3 = _conv3_matrix(params["conv3_w"].astype(f32))               # (1424, 120)
    b3 = params["conv3_b"].astype(f32).reshape(1, 120)
    w4 = params["fc1_w"].astype(f32).T                              # (120, 84)
    b4 = params["fc1_b"].astype(f32).reshape(1, 84)
    w5 = jnp.zeros((84, 128), f32).at[:, :10].set(params["fc2_w"].astype(f32).T)
    b5 = jnp.zeros((1, 128), f32).at[:, :10].set(
        params["fc2_b"].astype(f32).reshape(1, 10))

    grid = (B_pad // tb,)
    const2 = lambda i: (0, 0)   # resident weights (same block every step)

    per_img = (2 * 784 * Cin * 6 + 6 * 2 * 755 * 196 + 2 * 1176 * 1600
               + 2 * 1424 * 120 + 2 * 120 * 84 + 2 * 84 * 128)
    flops = B_pad * per_img
    bytes_accessed = 4 * (x.size + w1.size + b1.size + s1.size + w2.size
                          + b2.size + w3.size + b3.size + w4.size + b4.size
                          + w5.size + b5.size + B_pad * 128)

    out = pl.pallas_call(
        _lenet_fused_kernel,
        out_shape=jax.ShapeDtypeStruct((B_pad, 128), f32),
        grid=grid,
        in_specs=[
            pl.BlockSpec((tb, Cin * 784), lambda i: (i, 0)),         # x (lane-dense)
            pl.BlockSpec(memory_space=pltpu.MemorySpace.SMEM),       # w1 scalars
            pl.BlockSpec(memory_space=pltpu.MemorySpace.SMEM),       # b1 scalars
            pl.BlockSpec(s1.shape, const2),
            pl.BlockSpec(w2.shape, const2),
            pl.BlockSpec(b2.shape, const2),
            pl.BlockSpec(w3.shape, const2),
            pl.BlockSpec(b3.shape, const2),
            pl.BlockSpec(w4.shape, const2),
            pl.BlockSpec(b4.shape, const2),
            pl.BlockSpec(w5.shape, const2),
            pl.BlockSpec(b5.shape, const2),
        ],
        out_specs=pl.BlockSpec((tb, 128), lambda i: (i, 0)),         # lane-dense out
        compiler_params=pltpu.CompilerParams(
            dimension_semantics=("parallel",),      # shard batch tiles across TCs
            vmem_limit_bytes=48 * 1024 * 1024,      # < v7x 64 MiB physical VMEM
        ),
        cost_estimate=pl.CostEstimate(
            flops=flops, transcendentals=129 * B_pad,
            bytes_accessed=bytes_accessed),
    )(x, w1, b1, s1, w2, b2, w3, b3, w4, b4, w5, b5)

    return out[:B, :10]


# ----------------------------------------------------------------------------
# Deterministic parameter init (PyTorch-style uniform(-1/sqrt(fan_in), ...))
# ----------------------------------------------------------------------------
def init_params(key, channels=3):
    def uni(key, shape, fan_in):
        bound = 1.0 / jnp.sqrt(jnp.float32(fan_in))
        return jax.random.uniform(key, shape, jnp.float32, -bound, bound)

    keys = jax.random.split(key, 10)
    return {
        "conv1_w": uni(keys[0], (6, channels, 1, 1), channels),
        "conv1_b": uni(keys[1], (6,), channels),
        "conv2_w": uni(keys[2], (16, 6, 5, 5), 6 * 25),
        "conv2_b": uni(keys[3], (16,), 6 * 25),
        "conv3_w": uni(keys[4], (120, 16, 5, 5), 16 * 25),
        "conv3_b": uni(keys[5], (120,), 16 * 25),
        "fc1_w": uni(keys[6], (84, 120), 120),
        "fc1_b": uni(keys[7], (84,), 120),
        "fc2_w": uni(keys[8], (10, 84), 84),
        "fc2_b": uni(keys[9], (10,), 84),
    }


# ----------------------------------------------------------------------------
# Pure-JAX reference (same semantics as the PyTorch module) for verification
# ----------------------------------------------------------------------------
def reference_forward(x, p):
    dn = ("NCHW", "OIHW", "NCHW")

    def conv(x, w, b):
        y = jax.lax.conv_general_dilated(
            x, w, (1, 1), "VALID", dimension_numbers=dn,
            precision=jax.lax.Precision.HIGHEST)
        return y + b.reshape(1, -1, 1, 1)

    def maxpool(x):
        return jax.lax.reduce_window(
            x, -jnp.inf, jax.lax.max, (1, 1, 2, 2), (1, 1, 2, 2), "VALID")

    h = maxpool(jax.nn.relu(conv(x, p["conv1_w"], p["conv1_b"])))
    h = maxpool(jax.nn.relu(conv(h, p["conv2_w"], p["conv2_b"])))
    h = jax.nn.relu(conv(h, p["conv3_w"], p["conv3_b"])).reshape(x.shape[0], -1)
    h = jax.nn.relu(jnp.dot(h, p["fc1_w"].T, precision="highest") + p["fc1_b"])
    h = jnp.dot(h, p["fc2_w"].T, precision="highest") + p["fc2_b"]
    return jax.nn.log_softmax(h, axis=-1)


if __name__ == "__main__":
    key = jax.random.PRNGKey(0)
    k_x, k_p, k_x2 = jax.random.split(key, 3)

    # Architecture requires 28x28 spatial input (C5 reduces 5x5 -> 1x1).
    params = init_params(k_p, channels=3)
    fwd = jax.jit(modded_lenet5_forward)

    # Small batch (padded up to one batch tile internally).
    x = jax.random.normal(k_x, (2, 3, 28, 28), jnp.float32)
    out = jax.block_until_ready(fwd(x, params))
    ref = jax.block_until_ready(reference_forward(x, params))
    assert out.shape == (2, 10)
    assert jnp.allclose(out, ref, atol=2e-3, rtol=2e-3), "mismatch vs JAX reference"

    # Larger batch exercising a multi-step (parallel) grid with resident weights.
    x2 = jax.random.normal(k_x2, (16, 3, 28, 28), jnp.float32)
    out2 = jax.block_until_ready(fwd(x2, params))
    ref2 = jax.block_until_ready(reference_forward(x2, params))
    assert out2.shape == (16, 10)
    assert jnp.allclose(out2, ref2, atol=2e-3, rtol=2e-3), "mismatch vs JAX reference (B=16)"

    print("KERNEL_OK")
</pallas_src>

<mosaic_0001>
module attributes {stable_mosaic.version = 11 : i64} {
  func.func private @main(%arg0: i32) attributes {dimension_semantics = [#tpu.dimension_semantics<core_parallel>], iteration_bounds = array<i64: 2>, tpu.core_type = #tpu.core_type<sc_scalar_subcore>, window_params = []} {
    return
  }
}

module attributes {stable_mosaic.version = 11 : i64} {
  func.func private @main(%arg0: i32) attributes {dimension_semantics = [#tpu.dimension_semantics<core_parallel>], iteration_bounds = array<i64: 2>, tpu.core_type = #tpu.core_type<sc_scalar_subcore>, window_params = []} {
    return
  }
}

module attributes {stable_mosaic.version = 11 : i64} {
  func.func @_lenet_fused_kernel(%arg0: i32, %arg1: memref<8x2352xf32, #tpu.memory_space<vmem>>, %arg2: memref<3x6xf32, #tpu.memory_space<smem>>, %arg3: memref<6xf32, #tpu.memory_space<smem>>, %arg4: memref<755x196xf32, #tpu.memory_space<vmem>>, %arg5: memref<1176x1600xf32, #tpu.memory_space<vmem>>, %arg6: memref<1x1600xf32, #tpu.memory_space<vmem>>, %arg7: memref<1424x120xf32, #tpu.memory_space<vmem>>, %arg8: memref<1x120xf32, #tpu.memory_space<vmem>>, %arg9: memref<120x84xf32, #tpu.memory_space<vmem>>, %arg10: memref<1x84xf32, #tpu.memory_space<vmem>>, %arg11: memref<84x128xf32, #tpu.memory_space<vmem>>, %arg12: memref<1x128xf32, #tpu.memory_space<vmem>>, %arg13: memref<8x128xf32, #tpu.memory_space<vmem>>) attributes {dimension_semantics = [#tpu.dimension_semantics<parallel>], iteration_bounds = array<i64: 1>, scalar_prefetch = 0 : i64, scratch_operands = 0 : i64, tpu.core_type = #tpu.core_type<tc>, window_params = [{transform_indices = @transform_0, window_bounds = array<i64: 8, 2352>}, {transform_indices = @transform_1, window_bounds = array<i64: 3, 6>}, {transform_indices = @transform_2, window_bounds = array<i64: 6>}, {pipeline_mode = #tpu.pipeline_mode<synchronous>, transform_indices = @transform_3, window_bounds = array<i64: 755, 196>}, {pipeline_mode = #tpu.pipeline_mode<synchronous>, transform_indices = @transform_4, window_bounds = array<i64: 1176, 1600>}, {pipeline_mode = #tpu.pipeline_mode<synchronous>, transform_indices = @transform_5, window_bounds = array<i64: 1, 1600>}, {pipeline_mode = #tpu.pipeline_mode<synchronous>, transform_indices = @transform_6, window_bounds = array<i64: 1424, 120>}, {pipeline_mode = #tpu.pipeline_mode<synchronous>, transform_indices = @transform_7, window_bounds = array<i64: 1, 120>}, {pipeline_mode = #tpu.pipeline_mode<synchronous>, transform_indices = @transform_8, window_bounds = array<i64: 120, 84>}, {pipeline_mode = #tpu.pipeline_mode<synchronous>, transform_indices = @transform_9, window_bounds = array<i64: 1, 84>}, {pipeline_mode = #tpu.pipeline_mode<synchronous>, transform_indices = @transform_10, window_bounds = array<i64: 84, 128>}, {pipeline_mode = #tpu.pipeline_mode<synchronous>, transform_indices = @transform_11, window_bounds = array<i64: 1, 128>}, {transform_indices = @transform_12, window_bounds = array<i64: 8, 128>}]} {
    %c0 = arith.constant 0 : index
    %c0_0 = arith.constant 0 : index
    %0 = vector.load %arg1[%c0, %c0_0] : memref<8x2352xf32, #tpu.memory_space<vmem>>, vector<8x2352xf32>
    %1 = vector.extract_strided_slice %0 {offsets = [0, 0], sizes = [8, 784], strides = [1, 1]} : vector<8x2352xf32> to vector<8x784xf32>
    %2 = vector.extract_strided_slice %0 {offsets = [0, 784], sizes = [8, 784], strides = [1, 1]} : vector<8x2352xf32> to vector<8x784xf32>
    %3 = vector.extract_strided_slice %0 {offsets = [0, 1568], sizes = [8, 784], strides = [1, 1]} : vector<8x2352xf32> to vector<8x784xf32>
    %c0_1 = arith.constant 0 : index
    %c0_2 = arith.constant 0 : index
    %4 = vector.load %arg4[%c0_1, %c0_2] : memref<755x196xf32, #tpu.memory_space<vmem>>, vector<755x196xf32>
    %c0_3 = arith.constant 0 : index
    %c0_4 = arith.constant 0 : index
    %5 = memref.load %arg2[%c0_3, %c0_4] : memref<3x6xf32, #tpu.memory_space<smem>>
    %6 = vector.broadcast %5 : f32 to vector<8x784xf32>
    %7 = arith.mulf %1, %6 : vector<8x784xf32>
    %c0_5 = arith.constant 0 : index
    %8 = memref.load %arg3[%c0_5] : memref<6xf32, #tpu.memory_space<smem>>
    %9 = vector.broadcast %8 : f32 to vector<8x784xf32>
    %10 = arith.addf %7, %9 : vector<8x784xf32>
    %c1 = arith.constant 1 : index
    %c0_6 = arith.constant 0 : index
    %11 = memref.load %arg2[%c1, %c0_6] : memref<3x6xf32, #tpu.memory_space<smem>>
    %12 = vector.broadcast %11 : f32 to vector<8x784xf32>
    %13 = arith.mulf %2, %12 : vector<8x784xf32>
    %14 = arith.addf %10, %13 : vector<8x784xf32>
    %c2 = arith.constant 2 : index
    %c0_7 = arith.constant 0 : index
    %15 = memref.load %arg2[%c2, %c0_7] : memref<3x6xf32, #tpu.memory_space<smem>>
    %16 = vector.broadcast %15 : f32 to vector<8x784xf32>
    %17 = arith.mulf %3, %16 : vector<8x784xf32>
    %18 = arith.addf %14, %17 : vector<8x784xf32>
    %cst = arith.constant 0.000000e+00 : f32
    %19 = vector.broadcast %cst : f32 to vector<8x784xf32>
    %20 = arith.maximumf %18, %19 : vector<8x784xf32>
    %21 = vector.extract_strided_slice %20 {offsets = [0, 0], sizes = [8, 783], strides = [1, 1]} : vector<8x784xf32> to vector<8x783xf32>
    %22 = vector.extract_strided_slice %20 {offsets = [0, 1], sizes = [8, 783], strides = [1, 1]} : vector<8x784xf32> to vector<8x783xf32>
    %23 = arith.maximumf %21, %22 : vector<8x783xf32>
    %24 = vector.extract_strided_slice %23 {offsets = [0, 0], sizes = [8, 755], strides = [1, 1]} : vector<8x783xf32> to vector<8x755xf32>
    %25 = vector.extract_strided_slice %23 {offsets = [0, 28], sizes = [8, 755], strides = [1, 1]} : vector<8x783xf32> to vector<8x755xf32>
    %26 = arith.maximumf %24, %25 : vector<8x755xf32>
    %cst_8 = arith.constant dense<0.000000e+00> : vector<8x196xf32>
    %27 = tpu.matmul %26, %4, %cst_8 {dimension_numbers = #tpu.dot_dimension_numbers<[1], [0], [0], [1], [0, 0, 1, 1], [], []>} : vector<8x755xf32>, vector<755x196xf32>, vector<8x196xf32> -> vector<8x196xf32>
    %c0_9 = arith.constant 0 : index
    %c1_10 = arith.constant 1 : index
    %28 = memref.load %arg2[%c0_9, %c1_10] : memref<3x6xf32, #tpu.memory_space<smem>>
    %29 = vector.broadcast %28 : f32 to vector<8x784xf32>
    %30 = arith.mulf %1, %29 : vector<8x784xf32>
    %c1_11 = arith.constant 1 : index
    %31 = memref.load %arg3[%c1_11] : memref<6xf32, #tpu.memory_space<smem>>
    %32 = vector.broadcast %31 : f32 to vector<8x784xf32>
    %33 = arith.addf %30, %32 : vector<8x784xf32>
    %c1_12 = arith.constant 1 : index
    %c1_13 = arith.constant 1 : index
    %34 = memref.load %arg2[%c1_12, %c1_13] : memref<3x6xf32, #tpu.memory_space<smem>>
    %35 = vector.broadcast %34 : f32 to vector<8x784xf32>
    %36 = arith.mulf %2, %35 : vector<8x784xf32>
    %37 = arith.addf %33, %36 : vector<8x784xf32>
    %c2_14 = arith.constant 2 : index
    %c1_15 = arith.constant 1 : index
    %38 = memref.load %arg2[%c2_14, %c1_15] : memref<3x6xf32, #tpu.memory_space<smem>>
    %39 = vector.broadcast %38 : f32 to vector<8x784xf32>
    %40 = arith.mulf %3, %39 : vector<8x784xf32>
    %41 = arith.addf %37, %40 : vector<8x784xf32>
    %cst_16 = arith.constant 0.000000e+00 : f32
    %42 = vector.broadcast %cst_16 : f32 to vector<8x784xf32>
    %43 = arith.maximumf %41, %42 : vector<8x784xf32>
    %44 = vector.extract_strided_slice %43 {offsets = [0, 0], sizes = [8, 783], strides = [1, 1]} : vector<8x784xf32> to vector<8x783xf32>
    %45 = vector.extract_strided_slice %43 {offsets = [0, 1], sizes = [8, 783], strides = [1, 1]} : vector<8x784xf32> to vector<8x783xf32>
    %46 = arith.maximumf %44, %45 : vector<8x783xf32>
    %47 = vector.extract_strided_slice %46 {offsets = [0, 0], sizes = [8, 755], strides = [1, 1]} : vector<8x783xf32> to vector<8x755xf32>
    %48 = vector.extract_strided_slice %46 {offsets = [0, 28], sizes = [8, 755], strides = [1, 1]} : vector<8x783xf32> to vector<8x755xf32>
    %49 = arith.maximumf %47, %48 : vector<8x755xf32>
    %cst_17 = arith.constant dense<0.000000e+00> : vector<8x196xf32>
    %50 = tpu.matmul %49, %4, %cst_17 {dimension_numbers = #tpu.dot_dimension_numbers<[1], [0], [0], [1], [0, 0, 1, 1], [], []>} : vector<8x755xf32>, vector<755x196xf32>, vector<8x196xf32> -> vector<8x196xf32>
    %c0_18 = arith.constant 0 : index
    %c2_19 = arith.constant 2 : index
    %51 = memref.load %arg2[%c0_18, %c2_19] : memref<3x6xf32, #tpu.memory_space<smem>>
    %52 = vector.broadcast %51 : f32 to vector<8x784xf32>
    %53 = arith.mulf %1, %52 : vector<8x784xf32>
    %c2_20 = arith.constant 2 : index
    %54 = memref.load %arg3[%c2_20] : memref<6xf32, #tpu.memory_space<smem>>
    %55 = vector.broadcast %54 : f32 to vector<8x784xf32>
    %56 = arith.addf %53, %55 : vector<8x784xf32>
    %c1_21 = arith.constant 1 : index
    %c2_22 = arith.constant 2 : index
    %57 = memref.load %arg2[%c1_21, %c2_22] : memref<3x6xf32, #tpu.memory_space<smem>>
    %58 = vector.broadcast %57 : f32 to vector<8x784xf32>
    %59 = arith.mulf %2, %58 : vector<8x784xf32>
    %60 = arith.addf %56, %59 : vector<8x784xf32>
    %c2_23 = arith.constant 2 : index
    %c2_24 = arith.constant 2 : index
    %61 = memref.load %arg2[%c2_23, %c2_24] : memref<3x6xf32, #tpu.memory_space<smem>>
    %62 = vector.broadcast %61 : f32 to vector<8x784xf32>
    %63 = arith.mulf %3, %62 : vector<8x784xf32>
    %64 = arith.addf %60, %63 : vector<8x784xf32>
    %cst_25 = arith.constant 0.000000e+00 : f32
    %65 = vector.broadcast %cst_25 : f32 to vector<8x784xf32>
    %66 = arith.maximumf %64, %65 : vector<8x784xf32>
    %67 = vector.extract_strided_slice %66 {offsets = [0, 0], sizes = [8, 783], strides = [1, 1]} : vector<8x784xf32> to vector<8x783xf32>
    %68 = vector.extract_strided_slice %66 {offsets = [0, 1], sizes = [8, 783], strides = [1, 1]} : vector<8x784xf32> to vector<8x783xf32>
    %69 = arith.maximumf %67, %68 : vector<8x783xf32>
    %70 = vector.extract_strided_slice %69 {offsets = [0, 0], sizes = [8, 755], strides = [1, 1]} : vector<8x783xf32> to vector<8x755xf32>
    %71 = vector.extract_strided_slice %69 {offsets = [0, 28], sizes = [8, 755], strides = [1, 1]} : vector<8x783xf32> to vector<8x755xf32>
    %72 = arith.maximumf %70, %71 : vector<8x755xf32>
    %cst_26 = arith.constant dense<0.000000e+00> : vector<8x196xf32>
    %73 = tpu.matmul %72, %4, %cst_26 {dimension_numbers = #tpu.dot_dimension_numbers<[1], [0], [0], [1], [0, 0, 1, 1], [], []>} : vector<8x755xf32>, vector<755x196xf32>, vector<8x196xf32> -> vector<8x196xf32>
    %c0_27 = arith.constant 0 : index
    %c3 = arith.constant 3 : index
    %74 = memref.load %arg2[%c0_27, %c3] : memref<3x6xf32, #tpu.memory_space<smem>>
    %75 = vector.broadcast %74 : f32 to vector<8x784xf32>
    %76 = arith.mulf %1, %75 : vector<8x784xf32>
    %c3_28 = arith.constant 3 : index
    %77 = memref.load %arg3[%c3_28] : memref<6xf32, #tpu.memory_space<smem>>
    %78 = vector.broadcast %77 : f32 to vector<8x784xf32>
    %79 = arith.addf %76, %78 : vector<8x784xf32>
    %c1_29 = arith.constant 1 : index
    %c3_30 = arith.constant 3 : index
    %80 = memref.load %arg2[%c1_29, %c3_30] : memref<3x6xf32, #tpu.memory_space<smem>>
    %81 = vector.broadcast %80 : f32 to vector<8x784xf32>
    %82 = arith.mulf %2, %81 : vector<8x784xf32>
    %83 = arith.addf %79, %82 : vector<8x784xf32>
    %c2_31 = arith.constant 2 : index
    %c3_32 = arith.constant 3 : index
    %84 = memref.load %arg2[%c2_31, %c3_32] : memref<3x6xf32, #tpu.memory_space<smem>>
    %85 = vector.broadcast %84 : f32 to vector<8x784xf32>
    %86 = arith.mulf %3, %85 : vector<8x784xf32>
    %87 = arith.addf %83, %86 : vector<8x784xf32>
    %cst_33 = arith.constant 0.000000e+00 : f32
    %88 = vector.broadcast %cst_33 : f32 to vector<8x784xf32>
    %89 = arith.maximumf %87, %88 : vector<8x784xf32>
    %90 = vector.extract_strided_slice %89 {offsets = [0, 0], sizes = [8, 783], strides = [1, 1]} : vector<8x784xf32> to vector<8x783xf32>
    %91 = vector.extract_strided_slice %89 {offsets = [0, 1], sizes = [8, 783], strides = [1, 1]} : vector<8x784xf32> to vector<8x783xf32>
    %92 = arith.maximumf %90, %91 : vector<8x783xf32>
    %93 = vector.extract_strided_slice %92 {offsets = [0, 0], sizes = [8, 755], strides = [1, 1]} : vector<8x783xf32> to vector<8x755xf32>
    %94 = vector.extract_strided_slice %92 {offsets = [0, 28], sizes = [8, 755], strides = [1, 1]} : vector<8x783xf32> to vector<8x755xf32>
    %95 = arith.maximumf %93, %94 : vector<8x755xf32>
    %cst_34 = arith.constant dense<0.000000e+00> : vector<8x196xf32>
    %96 = tpu.matmul %95, %4, %cst_34 {dimension_numbers = #tpu.dot_dimension_numbers<[1], [0], [0], [1], [0, 0, 1, 1], [], []>} : vector<8x755xf32>, vector<755x196xf32>, vector<8x196xf32> -> vector<8x196xf32>
    %c0_35 = arith.constant 0 : index
    %c4 = arith.constant 4 : index
    %97 = memref.load %arg2[%c0_35, %c4] : memref<3x6xf32, #tpu.memory_space<smem>>
    %98 = vector.broadcast %97 : f32 to vector<8x784xf32>
    %99 = arith.mulf %1, %98 : vector<8x784xf32>
    %c4_36 = arith.constant 4 : index
    %100 = memref.load %arg3[%c4_36] : memref<6xf32, #tpu.memory_space<smem>>
    %101 = vector.broadcast %100 : f32 to vector<8x784xf32>
    %102 = arith.addf %99, %101 : vector<8x784xf32>
    %c1_37 = arith.constant 1 : index
    %c4_38 = arith.constant 4 : index
    %103 = memref.load %arg2[%c1_37, %c4_38] : memref<3x6xf32, #tpu.memory_space<smem>>
    %104 = vector.broadcast %103 : f32 to vector<8x784xf32>
    %105 = arith.mulf %2, %104 : vector<8x784xf32>
    %106 = arith.addf %102, %105 : vector<8x784xf32>
    %c2_39 = arith.constant 2 : index
    %c4_40 = arith.constant 4 : index
    %107 = memref.load %arg2[%c2_39, %c4_40] : memref<3x6xf32, #tpu.memory_space<smem>>
    %108 = vector.broadcast %107 : f32 to vector<8x784xf32>
    %109 = arith.mulf %3, %108 : vector<8x784xf32>
    %110 = arith.addf %106, %109 : vector<8x784xf32>
    %cst_41 = arith.constant 0.000000e+00 : f32
    %111 = vector.broadcast %cst_41 : f32 to vector<8x784xf32>
    %112 = arith.maximumf %110, %111 : vector<8x784xf32>
    %113 = vector.extract_strided_slice %112 {offsets = [0, 0], sizes = [8, 783], strides = [1, 1]} : vector<8x784xf32> to vector<8x783xf32>
    %114 = vector.extract_strided_slice %112 {offsets = [0, 1], sizes = [8, 783], strides = [1, 1]} : vector<8x784xf32> to vector<8x783xf32>
    %115 = arith.maximumf %113, %114 : vector<8x783xf32>
    %116 = vector.extract_strided_slice %115 {offsets = [0, 0], sizes = [8, 755], strides = [1, 1]} : vector<8x783xf32> to vector<8x755xf32>
    %117 = vector.extract_strided_slice %115 {offsets = [0, 28], sizes = [8, 755], strides = [1, 1]} : vector<8x783xf32> to vector<8x755xf32>
    %118 = arith.maximumf %116, %117 : vector<8x755xf32>
    %cst_42 = arith.constant dense<0.000000e+00> : vector<8x196xf32>
    %119 = tpu.matmul %118, %4, %cst_42 {dimension_numbers = #tpu.dot_dimension_numbers<[1], [0], [0], [1], [0, 0, 1, 1], [], []>} : vector<8x755xf32>, vector<755x196xf32>, vector<8x196xf32> -> vector<8x196xf32>
    %c0_43 = arith.constant 0 : index
    %c5 = arith.constant 5 : index
    %120 = memref.load %arg2[%c0_43, %c5] : memref<3x6xf32, #tpu.memory_space<smem>>
    %121 = vector.broadcast %120 : f32 to vector<8x784xf32>
    %122 = arith.mulf %1, %121 : vector<8x784xf32>
    %c5_44 = arith.constant 5 : index
    %123 = memref.load %arg3[%c5_44] : memref<6xf32, #tpu.memory_space<smem>>
    %124 = vector.broadcast %123 : f32 to vector<8x784xf32>
    %125 = arith.addf %122, %124 : vector<8x784xf32>
    %c1_45 = arith.constant 1 : index
    %c5_46 = arith.constant 5 : index
    %126 = memref.load %arg2[%c1_45, %c5_46] : memref<3x6xf32, #tpu.memory_space<smem>>
    %127 = vector.broadcast %126 : f32 to vector<8x784xf32>
    %128 = arith.mulf %2, %127 : vector<8x784xf32>
    %129 = arith.addf %125, %128 : vector<8x784xf32>
    %c2_47 = arith.constant 2 : index
    %c5_48 = arith.constant 5 : index
    %130 = memref.load %arg2[%c2_47, %c5_48] : memref<3x6xf32, #tpu.memory_space<smem>>
    %131 = vector.broadcast %130 : f32 to vector<8x784xf32>
    %132 = arith.mulf %3, %131 : vector<8x784xf32>
    %133 = arith.addf %129, %132 : vector<8x784xf32>
    %cst_49 = arith.constant 0.000000e+00 : f32
    %134 = vector.broadcast %cst_49 : f32 to vector<8x784xf32>
    %135 = arith.maximumf %133, %134 : vector<8x784xf32>
    %136 = vector.extract_strided_slice %135 {offsets = [0, 0], sizes = [8, 783], strides = [1, 1]} : vector<8x784xf32> to vector<8x783xf32>
    %137 = vector.extract_strided_slice %135 {offsets = [0, 1], sizes = [8, 783], strides = [1, 1]} : vector<8x784xf32> to vector<8x783xf32>
    %138 = arith.maximumf %136, %137 : vector<8x783xf32>
    %139 = vector.extract_strided_slice %138 {offsets = [0, 0], sizes = [8, 755], strides = [1, 1]} : vector<8x783xf32> to vector<8x755xf32>
    %140 = vector.extract_strided_slice %138 {offsets = [0, 28], sizes = [8, 755], strides = [1, 1]} : vector<8x783xf32> to vector<8x755xf32>
    %141 = arith.maximumf %139, %140 : vector<8x755xf32>
    %cst_50 = arith.constant dense<0.000000e+00> : vector<8x196xf32>
    %142 = tpu.matmul %141, %4, %cst_50 {dimension_numbers = #tpu.dot_dimension_numbers<[1], [0], [0], [1], [0, 0, 1, 1], [], []>} : vector<8x755xf32>, vector<755x196xf32>, vector<8x196xf32> -> vector<8x196xf32>
    %143 = tpu.concatenate %27, %50, %73, %96, %119, %142 in 1 : vector<8x196xf32>, vector<8x196xf32>, vector<8x196xf32>, vector<8x196xf32>, vector<8x196xf32>, vector<8x196xf32> -> vector<8x1176xf32>
    %c0_51 = arith.constant 0 : index
    %c0_52 = arith.constant 0 : index
    %144 = vector.load %arg5[%c0_51, %c0_52] : memref<1176x1600xf32, #tpu.memory_space<vmem>>, vector<1176x1600xf32>
    %cst_53 = arith.constant dense<0.000000e+00> : vector<8x1600xf32>
    %145 = tpu.matmul %143, %144, %cst_53 {dimension_numbers = #tpu.dot_dimension_numbers<[1], [0], [0], [1], [0, 0, 1, 1], [], []>} : vector<8x1176xf32>, vector<1176x1600xf32>, vector<8x1600xf32> -> vector<8x1600xf32>
    %c0_54 = arith.constant 0 : index
    %c0_55 = arith.constant 0 : index
    %146 = vector.load %arg6[%c0_54, %c0_55] : memref<1x1600xf32, #tpu.memory_space<vmem>>, vector<1x1600xf32>
    %147 = vector.broadcast %146 : vector<1x1600xf32> to vector<8x1600xf32>
    %148 = arith.addf %145, %147 : vector<8x1600xf32>
    %cst_56 = arith.constant 0.000000e+00 : f32
    %149 = vector.broadcast %cst_56 : f32 to vector<8x1600xf32>
    %150 = arith.maximumf %148, %149 : vector<8x1600xf32>
    %151 = vector.extract_strided_slice %150 {offsets = [0, 0], sizes = [8, 1584], strides = [1, 1]} : vector<8x1600xf32> to vector<8x1584xf32>
    %152 = vector.extract_strided_slice %150 {offsets = [0, 16], sizes = [8, 1584], strides = [1, 1]} : vector<8x1600xf32> to vector<8x1584xf32>
    %153 = arith.maximumf %151, %152 : vector<8x1584xf32>
    %154 = vector.extract_strided_slice %153 {offsets = [0, 0], sizes = [8, 1424], strides = [1, 1]} : vector<8x1584xf32> to vector<8x1424xf32>
    %155 = vector.extract_strided_slice %153 {offsets = [0, 160], sizes = [8, 1424], strides = [1, 1]} : vector<8x1584xf32> to vector<8x1424xf32>
    %156 = arith.maximumf %154, %155 : vector<8x1424xf32>
    %c0_57 = arith.constant 0 : index
    %c0_58 = arith.constant 0 : index
    %157 = vector.load %arg7[%c0_57, %c0_58] : memref<1424x120xf32, #tpu.memory_space<vmem>>, vector<1424x120xf32>
    %cst_59 = arith.constant dense<0.000000e+00> : vector<8x120xf32>
    %158 = tpu.matmul %156, %157, %cst_59 {dimension_numbers = #tpu.dot_dimension_numbers<[1], [0], [0], [1], [0, 0, 1, 1], [], []>} : vector<8x1424xf32>, vector<1424x120xf32>, vector<8x120xf32> -> vector<8x120xf32>
    %c0_60 = arith.constant 0 : index
    %c0_61 = arith.constant 0 : index
    %159 = vector.load %arg8[%c0_60, %c0_61] : memref<1x120xf32, #tpu.memory_space<vmem>>, vector<1x120xf32>
    %160 = vector.broadcast %159 : vector<1x120xf32> to vector<8x120xf32>
    %161 = arith.addf %158, %160 : vector<8x120xf32>
    %cst_62 = arith.constant 0.000000e+00 : f32
    %162 = vector.broadcast %cst_62 : f32 to vector<8x120xf32>
    %163 = arith.maximumf %161, %162 : vector<8x120xf32>
    %c0_63 = arith.constant 0 : index
    %c0_64 = arith.constant 0 : index
    %164 = vector.load %arg9[%c0_63, %c0_64] : memref<120x84xf32, #tpu.memory_space<vmem>>, vector<120x84xf32>
    %cst_65 = arith.constant dense<0.000000e+00> : vector<8x84xf32>
    %165 = tpu.matmul %163, %164, %cst_65 {dimension_numbers = #tpu.dot_dimension_numbers<[1], [0], [0], [1], [0, 0, 1, 1], [], []>} : vector<8x120xf32>, vector<120x84xf32>, vector<8x84xf32> -> vector<8x84xf32>
    %c0_66 = arith.constant 0 : index
    %c0_67 = arith.constant 0 : index
    %166 = vector.load %arg10[%c0_66, %c0_67] : memref<1x84xf32, #tpu.memory_space<vmem>>, vector<1x84xf32>
    %167 = vector.broadcast %166 : vector<1x84xf32> to vector<8x84xf32>
    %168 = arith.addf %165, %167 : vector<8x84xf32>
    %cst_68 = arith.constant 0.000000e+00 : f32
    %169 = vector.broadcast %cst_68 : f32 to vector<8x84xf32>
    %170 = arith.maximumf %168, %169 : vector<8x84xf32>
    %c0_69 = arith.constant 0 : index
    %c0_70 = arith.constant 0 : index
    %171 = vector.load %arg11[%c0_69, %c0_70] : memref<84x128xf32, #tpu.memory_space<vmem>>, vector<84x128xf32>
    %cst_71 = arith.constant dense<0.000000e+00> : vector<8x128xf32>
    %172 = tpu.matmul %170, %171, %cst_71 {dimension_numbers = #tpu.dot_dimension_numbers<[1], [0], [0], [1], [0, 0, 1, 1], [], []>} : vector<8x84xf32>, vector<84x128xf32>, vector<8x128xf32> -> vector<8x128xf32>
    %c0_72 = arith.constant 0 : index
    %c0_73 = arith.constant 0 : index
    %173 = vector.load %arg12[%c0_72, %c0_73] : memref<1x128xf32, #tpu.memory_space<vmem>>, vector<1x128xf32>
    %174 = vector.broadcast %173 : vector<1x128xf32> to vector<8x128xf32>
    %175 = arith.addf %172, %174 : vector<8x128xf32>
    %176 = tpu.iota {dimensions = array<i32: 1>} : vector<8x128xi32>
    %c10_i32 = arith.constant 10 : i32
    %177 = vector.broadcast %c10_i32 : i32 to vector<8x128xi32>
    %178 = arith.cmpi slt, %176, %177 : vector<8x128xi32>
    %cst_74 = arith.constant -1.000000e+30 : f32
    %179 = vector.broadcast %cst_74 : f32 to vector<8x128xf32>
    %180 = arith.select %178, %175, %179 : vector<8x128xi1>, vector<8x128xf32>
    %cst_75 = arith.constant dense<0xFF800000> : vector<8xf32>
    %181 = vector.multi_reduction <maximumf>, %180, %cst_75 [1] : vector<8x128xf32> to vector<8xf32>
    %182 = vector.shape_cast %181 : vector<8xf32> to vector<8x1xf32>
    %183 = vector.broadcast %182 : vector<8x1xf32> to vector<8x128xf32>
    %184 = arith.subf %175, %183 : vector<8x128xf32>
    %185 = math.exp %184 : vector<8x128xf32>
    %cst_76 = arith.constant 0.000000e+00 : f32
    %186 = vector.broadcast %cst_76 : f32 to vector<8x128xf32>
    %187 = arith.select %178, %185, %186 : vector<8x128xi1>, vector<8x128xf32>
    %cst_77 = arith.constant dense<0.000000e+00> : vector<8xf32>
    %188 = vector.multi_reduction <add>, %187, %cst_77 [1] : vector<8x128xf32> to vector<8xf32>
    %189 = vector.shape_cast %188 : vector<8xf32> to vector<8x1xf32>
    %190 = vector.broadcast %182 : vector<8x1xf32> to vector<8x128xf32>
    %191 = arith.subf %175, %190 : vector<8x128xf32>
    %192 = math.log %189 : vector<8x1xf32>
    %193 = vector.broadcast %192 : vector<8x1xf32> to vector<8x128xf32>
    %194 = arith.subf %191, %193 : vector<8x128xf32>
    %c0_78 = arith.constant 0 : index
    %c0_79 = arith.constant 0 : index
    %195 = vector.load %arg13[%c0_78, %c0_79] : memref<8x128xf32, #tpu.memory_space<vmem>>, vector<8x128xf32>
    tpu.vector_store %arg13[%c0_78, %c0_79], %194 {strides = array<i32>} : memref<8x128xf32, #tpu.memory_space<vmem>>, vector<8x128xf32>,
    return
  }
  func.func @transform_0(%arg0: i32) -> (i32, i32) {
    %c0_i32 = arith.constant 0 : i32
    %c0_i32_0 = arith.constant 0 : i32
    return %arg0, %c0_i32 : i32, i32
  }
  func.func @transform_1(%arg0: i32) -> (i32, i32) {
    %c0_i32 = arith.constant 0 : i32
    %c0_i32_0 = arith.constant 0 : i32
    %c0_i32_1 = arith.constant 0 : i32
    return %c0_i32, %c0_i32_0 : i32, i32
  }
  func.func @transform_2(%arg0: i32) -> i32 {
    %c0_i32 = arith.constant 0 : i32
    %c0_i32_0 = arith.constant 0 : i32
    return %c0_i32 : i32
  }
  func.func @transform_3(%arg0: i32) -> (i32, i32) {
    %c0_i32 = arith.constant 0 : i32
    %c0_i32_0 = arith.constant 0 : i32
    %c0_i32_1 = arith.constant 0 : i32
    return %c0_i32, %c0_i32_0 : i32, i32
  }
  func.func @transform_4(%arg0: i32) -> (i32, i32) {
    %c0_i32 = arith.constant 0 : i32
    %c0_i32_0 = arith.constant 0 : i32
    %c0_i32_1 = arith.constant 0 : i32
    return %c0_i32, %c0_i32_0 : i32, i32
  }
  func.func @transform_5(%arg0: i32) -> (i32, i32) {
    %c0_i32 = arith.constant 0 : i32
    %c0_i32_0 = arith.constant 0 : i32
    %c0_i32_1 = arith.constant 0 : i32
    return %c0_i32, %c0_i32_0 : i32, i32
  }
  func.func @transform_6(%arg0: i32) -> (i32, i32) {
    %c0_i32 = arith.constant 0 : i32
    %c0_i32_0 = arith.constant 0 : i32
    %c0_i32_1 = arith.constant 0 : i32
    return %c0_i32, %c0_i32_0 : i32, i32
  }
  func.func @transform_7(%arg0: i32) -> (i32, i32) {
    %c0_i32 = arith.constant 0 : i32
    %c0_i32_0 = arith.constant 0 : i32
    %c0_i32_1 = arith.constant 0 : i32
    return %c0_i32, %c0_i32_0 : i32, i32
  }
  func.func @transform_8(%arg0: i32) -> (i32, i32) {
    %c0_i32 = arith.constant 0 : i32
    %c0_i32_0 = arith.constant 0 : i32
    %c0_i32_1 = arith.constant 0 : i32
    return %c0_i32, %c0_i32_0 : i32, i32
  }
  func.func @transform_9(%arg0: i32) -> (i32, i32) {
    %c0_i32 = arith.constant 0 : i32
    %c0_i32_0 = arith.constant 0 : i32
    %c0_i32_1 = arith.constant 0 : i32
    return %c0_i32, %c0_i32_0 : i32, i32
  }
  func.func @transform_10(%arg0: i32) -> (i32, i32) {
    %c0_i32 = arith.constant 0 : i32
    %c0_i32_0 = arith.constant 0 : i32
    %c0_i32_1 = arith.constant 0 : i32
    return %c0_i32, %c0_i32_0 : i32, i32
  }
  func.func @transform_11(%arg0: i32) -> (i32, i32) {
    %c0_i32 = arith.constant 0 : i32
    %c0_i32_0 = arith.constant 0 : i32
    %c0_i32_1 = arith.constant 0 : i32
    return %c0_i32, %c0_i32_0 : i32, i32
  }
  func.func @transform_12(%arg0: i32) -> (i32, i32) {
    %c0_i32 = arith.constant 0 : i32
    %c0_i32_0 = arith.constant 0 : i32
    return %arg0, %c0_i32 : i32, i32
  }
}

</mosaic_0001>

<bundles_post_ra>
// kernel: tile.8
= control target key start
LH: loop header
LB: loop body
LE: loop exit
PB: predicated region body
PF: predicated region fallthrough
CT: control target
= control target key end

     0   :  { %s94_s0 = inlined_call_operand.vmem [shape: f32[16], index: 0, kind: input, shape index: {}]   ;;  %s95_s1 = inlined_call_operand.vmem [shape: f32[100,16], index: 1, kind: output, shape index: {}]  }
   0x1   :  { %v4_v0 = vld [vmem:[%s94_s0] ss:$0 sm:$0xff] }
   0x2   :  { %5 = vst [vmem:[%s95_s1] sm:$0xff] %v4_v0  ;;  %30 = vst [vmem:[%s95_s1 + $0x8] sm:$0xff] %v4_v0 }
   0x3   :  { %31 = vst [vmem:[%s95_s1 + $0x10] sm:$0xff] %v4_v0  ;;  %32 = vst [vmem:[%s95_s1 + $0x18] sm:$0xff] %v4_v0 }
   0x4   :  { %33 = vst [vmem:[%s95_s1 + $0x20] sm:$0xff] %v4_v0  ;;  %34 = vst [vmem:[%s95_s1 + $0x28] sm:$0xff] %v4_v0 }
   0x5   :  { %35 = vst [vmem:[%s95_s1 + $0x30] sm:$0xff] %v4_v0  ;;  %36 = vst [vmem:[%s95_s1 + $0x38] sm:$0xff] %v4_v0 }
   0x6   :  { %37 = vst [vmem:[%s95_s1 + $0x40] sm:$0xff] %v4_v0  ;;  %38 = vst [vmem:[%s95_s1 + $0x48] sm:$0xff] %v4_v0 }
   0x7   :  { %39 = vst [vmem:[%s95_s1 + $0x50] sm:$0xff] %v4_v0  ;;  %40 = vst [vmem:[%s95_s1 + $0x58] sm:$0xff] %v4_v0 }
   0x8   :  { %41 = vst [vmem:[%s95_s1 + $0x60] sm:$0xff] %v4_v0 }

// kernel: tile.9
= control target key start
LH: loop header
LB: loop body
LE: loop exit
PB: predicated region body
PF: predicated region fallthrough
CT: control target
= control target key end

     0   :  { %vm4_vm0 = vcmask 1047556   ;;  %s297_s14 = smov 96   ;;  %s298_s15 = smov 112   ;;  %vm13_vm1 = vcmask 1044484   ;;  %vm6_vm2 = vcmask 130048   ;;  %vm28_vm3 = vcmask 1048448   ;;  %s453_s0 = inlined_call_operand.vmem [shape: f32[100,16], index: 0, kind: input, shape index: {}]   ;;  %s454_s1 = inlined_call_operand.vmem [shape: f32[1,1600], index: 1, kind: output, shape index: {}]  }
   0x1   :  { %v257_v0 = vld [vmem:[%s453_s0 + $0x6] ss:$8 sm:$0xf]   ;;  %v254_v2 = vld [vmem:[%s453_s0 + $0x7] ss:$8 sm:$0xf]  }
   0x2   :  { %v258_v1 = vld [vmem:[%s453_s0 + $0x6] ss:$8 sm:$0xf0]   ;;  %v255_v4 = vld [vmem:[%s453_s0 + $0x7] ss:$8 sm:$0xf0]  }
   0x3   :  { %v43_v3 = vsel %vm4_vm0, %v258_v1, %v257_v0  ;;  %v25_v5 = vsel %vm4_vm0, %v255_v4, %v254_v2  ;;  %v259_v6 = vld [vmem:[%s453_s0 + $0x46] ss:$8 sm:$0xf]   ;;  %v256_v7 = vld [vmem:[%s453_s0 + $0x47] ss:$8 sm:$0xf]  }
   0x4   :  { %44 = vrot.lane.b32.xlu1 %v43_v3, %s297_s14  ;;  %26 = vrot.lane.b32.xlu0 %v25_v5, %s298_s15  ;;  %v260_v8 = vld [vmem:[%s453_s0 + $0x5] ss:$8 sm:$0xf]   ;;  %v263_v12 = vld [vmem:[%s453_s0 + $0x4] ss:$8 sm:$0xf]  }
   0x5   :  { %v261_v9 = vld [vmem:[%s453_s0 + $0x5] ss:$8 sm:$0xf0]   ;;  %v264_v13 = vld [vmem:[%s453_s0 + $0x4] ss:$8 sm:$0xf0]  }
   0x6   :  { %v262_v10 = vld [vmem:[%s453_s0 + $0x45] ss:$8 sm:$0xf]   ;;  %v61_v11 = vsel %vm4_vm0, %v261_v9, %v260_v8  ;;  %s299_s30 = smov 80   ;;  %v79_v18 = vsel %vm4_vm0, %v264_v13, %v263_v12  ;;  %v269_v19 = vld [vmem:[%s453_s0 + $0x5f] sm:$0x10]  }
   0x7   :  { %v265_v14 = vld [vmem:[%s453_s0 + $0x44] ss:$8 sm:$0xf]   ;;  %v268_v15 = vld [vmem:[%s453_s0 + $0x43] ss:$8 sm:$0xf]  }
   0x8   :  { %51 = vrot.lane.b32.xlu1 %v259_v6, %s297_s14  ;;  %33 = vrot.lane.b32.xlu0 %v256_v7, %s298_s15  ;;  %v266_v16 = vld [vmem:[%s453_s0 + $0x3] ss:$8 sm:$0xf]   ;;  %v2_v20 = vld [vmem:[%s453_s0] ss:$8 sm:$0xf]   ;;  %v108_v25 = vsel %vm13_vm1, %v269_v19, %v268_v15 }
   0x9   :  { %v267_v17 = vld [vmem:[%s453_s0 + $0x3] ss:$8 sm:$0xf0]   ;;  %v3_v21 = vld [vmem:[%s453_s0] ss:$8 sm:$0xf0]  }
   0xa   :  { %v252_v22 = vld [vmem:[%s453_s0 + $0x40] ss:$8 sm:$0xf]   ;;  %s300_s18 = smov 64   ;;  %v5_v23 = vsel %vm4_vm0, %v3_v21, %v2_v20  ;;  %v97_v27 = vsel %vm4_vm0, %v267_v17, %v266_v16  ;;  %v273_v29 = vld [vmem:[%s453_s0 + $0x5e] sm:$0x10]  }
   0xb   :  { %v253_v24 = vld [vmem:[%s453_s0 + $0x5c] sm:$0x10]   ;;  %7 = vst.msk [vmem:[#allocation0] ss:$8 sm:$0xf] %vm6_vm2, %v5_v23   ;;  %s301_s29 = smov 48  }
   0xc   :  { %69 = vrot.lane.b32.xlu1 %v262_v10, %s299_s30  ;;  %62 = vrot.lane.b32.xlu0 %v61_v11, %s299_s30  ;;  %8 = vst.msk [vmem:[#allocation0] ss:$8 sm:$0xf0] %vm6_vm2, %v5_v23   ;;  %v14_v26 = vsel %vm13_vm1, %v253_v24, %v252_v22  ;;  %v272_v28 = vld [vmem:[%s453_s0 + $0x42] ss:$8 sm:$0xf]  }
   0xd   :  { %17 = vst.msk [vmem:[#allocation0 + $0x40] ss:$8 sm:$0xf] %vm6_vm2, %v14_v26   ;;  %19 = vst.msk [vmem:[#allocation0 + $0x5c] sm:$0x10] %vm6_vm2, %v14_v26   ;;  %v132_v32 = vsel %vm13_vm1, %v273_v29, %v272_v28  ;;  %s303_s9 = smov 16  }
   0xe   :  { %v270_v30 = vld [vmem:[%s453_s0 + $0x2] ss:$8 sm:$0xf]   ;;  %v276_v34 = vld [vmem:[%s453_s0 + $0x41] ss:$8 sm:$0xf]  }
   0xf   :  { %v271_v31 = vld [vmem:[%s453_s0 + $0x2] ss:$8 sm:$0xf0]   ;;  %v277_v35 = vld [vmem:[%s453_s0 + $0x5d] sm:$0x10]   ;;  %vm46_vm4 = vcmask 917248  }
  0x10   :  { %87 = vrot.lane.b32.xlu1 %v265_v14, %s300_s18  ;;  %80 = vrot.lane.b32.xlu0 %v79_v18, %s300_s18  ;;  %v121_v33 = vsel %vm4_vm0, %v271_v31, %v270_v30  ;;  %v274_v36 = vld [vmem:[%s453_s0 + $0x1] ss:$8 sm:$0xf]   ;;  %v156_v38 = vsel %vm13_vm1, %v277_v35, %v276_v34  ;;  %vm64_vm5 = vcmask 786048   ;;  %vm82_vm6 = vcmask 654848  }
  0x11   :  { %v275_v37 = vld [vmem:[%s453_s0 + $0x1] ss:$8 sm:$0xf0]   ;;  %s302_s0 = smov 32   ;;  %vm100_vm7 = vcmask 523648   ;;  %vm124_vm8 = vcmask 392448  }
  0x12   :  { %v145_v39 = vsel %vm4_vm0, %v275_v37, %v274_v36  ;;  %vm148_vm9 = vcmask 261248  }
  0x14   :  { %109 = vrot.lane.b32.xlu1 %v108_v25, %s301_s29  ;;  %98 = vrot.lane.b32.xlu0 %v97_v27, %s301_s29 }
  0x18   :  { %133 = vrot.lane.b32.xlu1 %v132_v32, %s302_s0  ;;  %122 = vrot.lane.b32.xlu0 %v121_v33, %s302_s0 }
  0x1c   :  { %157 = vrot.lane.b32.xlu1 %v156_v38, %s303_s9  ;;  %146 = vrot.lane.b32.xlu0 %v145_v39, %s303_s9 }
  0x76   :  { %v45_v40 = vpop.permute.xlu1 %44   ;;  %v27_v41 = vpop.permute.xlu0 %26  }
  0x77   :  { %29 = vst.msk [vmem:[#allocation0] ss:$8 sm:$0xf] %vm28_vm3, %v27_v41   ;;  %30 = vst.msk [vmem:[#allocation0] ss:$8 sm:$0xf0] %vm28_vm3, %v27_v41  }
  0x78   :  { %47 = vst.msk [vmem:[#allocation0] ss:$8 sm:$0xf] %vm46_vm4, %v45_v40   ;;  %48 = vst.msk [vmem:[#allocation0] ss:$8 sm:$0xf0] %vm46_vm4, %v45_v40  }
  0x7a   :  { %v52_v42 = vpop.permute.xlu1 %51   ;;  %v34_v43 = vpop.permute.xlu0 %33  }
  0x7b   :  { %37 = vst.msk [vmem:[#allocation0 + $0x40] ss:$8 sm:$0xf] %vm28_vm3, %v34_v43  }
  0x7c   :  { %55 = vst.msk [vmem:[#allocation0 + $0x40] ss:$8 sm:$0xf] %vm46_vm4, %v52_v42  }
  0x7e   :  { %v70_v44 = vpop.permute.xlu1 %69   ;;  %v63_v45 = vpop.permute.xlu0 %62  }
  0x7f   :  { %73 = vst.msk [vmem:[#allocation0 + $0x40] ss:$8 sm:$0xf] %vm64_vm5, %v70_v44   ;;  %65 = vst.msk [vmem:[#allocation0] ss:$8 sm:$0xf] %vm64_vm5, %v63_v45  }
  0x80   :  { %66 = vst.msk [vmem:[#allocation0] ss:$8 sm:$0xf0] %vm64_vm5, %v63_v45  }
  0x82   :  { %v88_v46 = vpop.permute.xlu1 %87   ;;  %v81_v47 = vpop.permute.xlu0 %80  }
  0x83   :  { %91 = vst.msk [vmem:[#allocation0 + $0x40] ss:$8 sm:$0xf] %vm82_vm6, %v88_v46   ;;  %83 = vst.msk [vmem:[#allocation0] ss:$8 sm:$0xf] %vm82_vm6, %v81_v47  }
  0x84   :  { %84 = vst.msk [vmem:[#allocation0] ss:$8 sm:$0xf0] %vm82_vm6, %v81_v47  }
  0x86   :  { %v110_v48 = vpop.permute.xlu1 %109   ;;  %v99_v49 = vpop.permute.xlu0 %98  }
  0x87   :  { %113 = vst.msk [vmem:[#allocation0 + $0x40] ss:$8 sm:$0xf] %vm100_vm7, %v110_v48   ;;  %115 = vst.msk [vmem:[#allocation0 + $0x5c] sm:$0x10] %vm100_vm7, %v110_v48  }
  0x88   :  { %101 = vst.msk [vmem:[#allocation0] ss:$8 sm:$0xf] %vm100_vm7, %v99_v49   ;;  %102 = vst.msk [vmem:[#allocation0] ss:$8 sm:$0xf0] %vm100_vm7, %v99_v49  }
  0x8a   :  { %v134_v50 = vpop.permute.xlu1 %133   ;;  %v123_v51 = vpop.permute.xlu0 %122  }
  0x8b   :  { %137 = vst.msk [vmem:[#allocation0 + $0x40] ss:$8 sm:$0xf] %vm124_vm8, %v134_v50   ;;  %139 = vst.msk [vmem:[#allocation0 + $0x5c] sm:$0x10] %vm124_vm8, %v134_v50  }
  0x8c   :  { %125 = vst.msk [vmem:[#allocation0] ss:$8 sm:$0xf] %vm124_vm8, %v123_v51   ;;  %126 = vst.msk [vmem:[#allocation0] ss:$8 sm:$0xf0] %vm124_vm8, %v123_v51  }
  0x8e   :  { %v158_v52 = vpop.permute.xlu1 %157   ;;  %v147_v53 = vpop.permute.xlu0 %146  }
  0x8f   :  { %161 = vst.msk [vmem:[#allocation0 + $0x40] ss:$8 sm:$0xf] %vm148_vm9, %v158_v52   ;;  %163 = vst.msk [vmem:[#allocation0 + $0x5c] sm:$0x10] %vm148_vm9, %v158_v52  }
  0x90   :  { %149 = vst.msk [vmem:[#allocation0] ss:$8 sm:$0xf] %vm148_vm9, %v147_v53   ;;  %150 = vst.msk [vmem:[#allocation0] ss:$8 sm:$0xf0] %vm148_vm9, %v147_v53  }
  0x96   :  { %v212_v54 = vld [vmem:[#allocation0 + $0x40] sm:$0x1]  ;;  %v218_v55 = vld [vmem:[#allocation0 + $0x48] sm:$0x1]  ;;  %v224_v56 = vld [vmem:[#allocation0 + $0x50] sm:$0x1] }
  0x97   :  { %285 = vst [vmem:[%s454_s1 + $0x8] sm:$0x1] %v212_v54  ;;  %286 = vst [vmem:[%s454_s1 + $0x9] sm:$0x1] %v218_v55  ;;  %v230_v57 = vld [vmem:[#allocation0 + $0x58] sm:$0x1] }
  0x98   :  { %287 = vst [vmem:[%s454_s1 + $0xa] sm:$0x1] %v224_v56  ;;  %v236_v58 = vld [vmem:[#allocation0 + $0x60] sm:$0x1]  ;;  %288 = vst [vmem:[%s454_s1 + $0xb] sm:$0x1] %v230_v57 }
  0x99   :  { %v167_v59 = vld [vmem:[#allocation0] sm:$0x1]  ;;  %289 = vst [vmem:[%s454_s1 + $0xc] sm:$0x1] %v236_v58  ;;  %v171_v60 = vld [vmem:[#allocation0 + $0x8] sm:$0x1] }
  0x9a   :  { %169 = vst [vmem:[%s454_s1] sm:$0x1] %v167_v59  ;;  %v176_v61 = vld [vmem:[#allocation0 + $0x10] sm:$0x1]  ;;  %v182_v62 = vld [vmem:[#allocation0 + $0x18] sm:$0x1] }
  0x9b   :  { %278 = vst [vmem:[%s454_s1 + $0x1] sm:$0x1] %v171_v60  ;;  %279 = vst [vmem:[%s454_s1 + $0x2] sm:$0x1] %v176_v61  ;;  %v188_v63 = vld [vmem:[#allocation0 + $0x20] sm:$0x1] }
  0x9c   :  { %280 = vst [vmem:[%s454_s1 + $0x3] sm:$0x1] %v182_v62  ;;  %v194_v0 = vld [vmem:[#allocation0 + $0x28] sm:$0x1]  ;;  %v200_v1 = vld [vmem:[#allocation0 + $0x30] sm:$0x1] }
  0x9d   :  { %281 = vst [vmem:[%s454_s1 + $0x4] sm:$0x1] %v188_v63  ;;  %282 = vst [vmem:[%s454_s1 + $0x5] sm:$0x1] %v194_v0  ;;  %v206_v2 = vld [vmem:[#allocation0 + $0x38] sm:$0x1] }
  0x9e   :  { %283 = vst [vmem:[%s454_s1 + $0x6] sm:$0x1] %v200_v1  ;;  %284 = vst [vmem:[%s454_s1 + $0x7] sm:$0x1] %v206_v2 }

// kernel: modded_lenet5_forward.1
= control target key start
LH: loop header
LB: loop body
LE: loop exit
PB: predicated region body
PF: predicated region fallthrough
CT: control target
= control target key end

     0   :  { %17 = vsyncpa [#allocation3], 0  ;;  %s22341_s0 = inlined_call_operand.vmem [shape: f32[8,2352], index: 0, kind: input, shape index: {}]   ;;  %s22342_s1 = inlined_call_operand.vmem [shape: f32[3,6], index: 1, kind: input, shape index: {}]   ;;  %s22343_s2 = inlined_call_operand.vmem [shape: f32[6], index: 2, kind: input, shape index: {}]   ;;  %s22344_s3 = inlined_call_operand.vmem [shape: f32[755,196], index: 3, kind: input, shape index: {}]   ;;  %s22345_s4 = inlined_call_operand.vmem [shape: f32[1176,1600], index: 4, kind: input, shape index: {}]   ;;  %s22346_s5 = inlined_call_operand.vmem [shape: f32[1,1600], index: 5, kind: input, shape index: {}]   ;;  %s22347_s6 = inlined_call_operand.vmem [shape: f32[1424,120], index: 6, kind: input, shape index: {}]   ;;  %s22348_s7 = inlined_call_operand.vmem [shape: f32[1,120], index: 7, kind: input, shape index: {}]   ;;  %s22349_s8 = inlined_call_operand.vmem [shape: f32[120,84], index: 8, kind: input, shape index: {}]   ;;  %s22350_s9 = inlined_call_operand.vmem [shape: f32[1,84], index: 9, kind: input, shape index: {}]   ;;  %s22351_s10 = inlined_call_operand.vmem [shape: f32[84,128], index: 10, kind: input, shape index: {}]   ;;  %s22352_s11 = inlined_call_operand.vmem [shape: f32[1,128], index: 11, kind: input, shape index: {}]   ;;  %s22353_s12 = inlined_call_operand.vmem [shape: f32[8,128], index: 12, kind: output, shape index: {}]  }
   0x1   :  { %s27_s23 = sshll.u32 %s22342_s1, 4  ;;  %s28_s23 = int_to_ptr.vmem [resolvable:$true] %s27_s23 }
   0x2   :  { %18 = vsyncpa [#allocation5], 0  ;;  %s37_s26 = sshll.u32 %s22343_s2, 4  ;;  %s12376_s27 = scalar_lea.vmem %s28_s23, 64  ;;  %s38_s26 = int_to_ptr.vmem [resolvable:$true] %s37_s26 }
   0x3   :  { %p12377_p0 = scmp.ne.s32.totalorder %s28_s23, %s12376_s27  ;;  %p12381_p1 = scmp.lt.s32.totalorder %s28_s23, %s28_s23 }
   0x4   :  { %p12382_p2 = scmp.lt.s32.totalorder %s12376_s27, %s12376_s27 }
   0x6   :  { %p12383_p3 = por %p12382_p2, %p12381_p1 }
   0x8   :  { %p12384_p4 = pnand %p12383_p3, %p12377_p0 }
   0xa   :  { %12387 = shalt.err (!%p12384_p4)
}
   0xb   :  { %s12404_s28 = smov [#allocation2]   ;;  %s12388_s29 = scalar_lea.vmem %s38_s26, 16 }
   0xc   :  { %30 = dma.vmem_to_smem %s28_s23, 64, %s12404_s28, [#allocation3]  }
   0xd   :  { %p12389_p5 = scmp.ne.s32.totalorder %s38_s26, %s12388_s29  ;;  %p12393_p6 = scmp.lt.s32.totalorder %s38_s26, %s38_s26 }
   0xe   :  { %p12394_p7 = scmp.lt.s32.totalorder %s12388_s29, %s12388_s29 }
  0x10   :  { %p12395_p8 = por %p12394_p7, %p12393_p6 }
  0x12   :  { %p12396_p9 = pnand %p12395_p8, %p12389_p5 }
  0x14   :  { %12399 = shalt.err (!%p12396_p9)
}
  0x15   :  { %s12405_s1 = smov [#allocation4]  }
  0x16   :  { %40 = dma.vmem_to_smem %s38_s26, 16, %s12405_s1, [#allocation5]  }
  0x17   :  { %12400 = dma.done.wait [#allocation3], 64  }
  0x18   :  { %12401 = vsyncadd [#allocation3], 4294967232 }
  0x19   :  { %12402 = dma.done.wait [#allocation5], 16  }
  0x1a   :  { %12403 = vsyncadd [#allocation5], 4294967280 }
  0x1b   :  { %65 = sfence }
  0x1c   :  { %s8317_s2 = sld [smem:[#allocation2 + $0x80]]  ;;  %v12492_v0 = vld [vmem:[%s22341_s0 + $0x48] sm:$0xff]  ;;  %v12497_v1 = vld [vmem:[%s22341_s0 + $0x38] sm:$0xff]  ;;  %v12504_v3 = vld [vmem:[%s22341_s0 + $0x50] sm:$0xff]  ;;  %s12406_s21 = smov 112   ;;  %vm323_vm0 = vcmask 916480  }
  0x1d   :  { %s8318_s30 = sld [smem:[#allocation2 + $0x100]]  ;;  %v12509_v4 = vld [vmem:[%s22341_s0 + $0x40] sm:$0xff]  ;;  %v12524_v9 = vld [vmem:[%s22341_s0 + $0x68] sm:$0xff]  ;;  %v12531_v11 = vld [vmem:[%s22341_s0 + $0x30] sm:$0xff]  ;;  %s8324_s26 = sld [smem:[#allocation2 + $0x81]]  ;;  %vm374_vm1 = vcmask 785408  }
  0x1e   :  { %v12542_v14 = vld [vmem:[%s22341_s0 + $0x78] sm:$0xff]  ;;  %v12547_v15 = vld [vmem:[%s22341_s0 + $0x70] sm:$0xff]  ;;  %v12558_v19 = vld [vmem:[%s22341_s0 + $0x80] sm:$0xff]  ;;  %s8325_s14 = sld [smem:[#allocation2 + $0x101]]  ;;  %s275_s15 = sld [smem:[#allocation2]]  ;;  %vm423_vm2 = vcmask 1039360  }
  0x1f   :  { %v12572_v24 = vld [vmem:[%s22341_s0 + $0x60] sm:$0xff]  ;;  %s284_s18 = sld [smem:[#allocation4]]  ;;  %v12615_v39 = vld [vmem:[%s22341_s0 + $0x58] sm:$0xff]  ;;  %v12626_v42 = vld [vmem:[%s22341_s0 + $0x28] sm:$0xff]  ;;  %s8322_s17 = sld [smem:[#allocation2 + $0x1]]  ;;  %vm465_vm3 = vcmask 818176  }
  0x20   :  { %v12586_v29 = vld [vmem:[%s22341_s0 + $0x20] sm:$0xff]  ;;  %v12633_v44 = vld [vmem:[%s22341_s0 + $0x88] sm:$0xff]  ;;  %v12638_v45 = vld [vmem:[%s22341_s0 + $0x90] sm:$0xff]  ;;  %s8323_s20 = sld [smem:[#allocation4 + $0x1]]  ;;  %s12408_s22 = smov 127   ;;  %vm484_vm4 = vcmask 941056  }
  0x21   :  { %v12663_v55 = vld [vmem:[%s22341_s0 + $0x8] sm:$0xff]  ;;  %v12668_v56 = vld [vmem:[%s22341_s0 + $0x10] sm:$0xff]  ;;  %s12409_s24 = smov 100   ;;  %s8338_s16 = sld [smem:[#allocation2 + $0x83]]  ;;  %vm488_vm5 = vcmask 1042432   ;;  %vm2819_vm6 = vcmask 556032  }
  0x22   :  { %v12499_v2 = vstv %s8317_s2  ;;  %s12407_s2 = smov 96   ;;  %s13336_s27 = sld [smem:[#allocation2 + $0x2]]  ;;  %vm2830_vm7 = vcmask 64512   ;;  %vm2840_vm8 = vcmask 621568   ;;  %vm2851_vm9 = vcmask 130048  }
  0x23   :  { %v298_v5 = vmul.f32 %v12499_v2, %v12492_v0  ;;  %v296_v6 = vmul.f32 %v12499_v2, %v12497_v1  ;;  %v299_v7 = vmul.f32 %v12499_v2, %v12504_v3  ;;  %v297_v8 = vmul.f32 %v12499_v2, %v12509_v4  ;;  %s8345_s25 = sld [smem:[#allocation2 + $0x84]]  ;;  %s8352_s19 = sld [smem:[#allocation2 + $0x85]] }
  0x24   :  { %v12526_v10 = vstv %s8318_s30  ;;  %v295_v13 = vmul.f32 %v12499_v2, %v12531_v11  ;;  %v727_v18 = vstv %s8324_s26  ;;  %v12579_v27 = vstv %s8325_s14  ;;  %s8331_s14 = sld [smem:[#allocation2 + $0x82]]  ;;  %s8346_s30 = sld [smem:[#allocation2 + $0x104]] }
  0x25   :  { %315 = vrot.lane.b32.xlu1 %v298_v5, %s12406_s21  ;;  %311 = vrot.lane.b32.xlu0 %v296_v6, %s12406_s21  ;;  %v347_v12 = vmul.f32 %v12526_v10, %v12524_v9  ;;  %v349_v16 = vmul.f32 %v12526_v10, %v12542_v14  ;;  %v348_v17 = vmul.f32 %v12526_v10, %v12547_v15  ;;  %v12581_v28 = vstv %s275_s15  ;;  %s8332_s15 = sld [smem:[#allocation2 + $0x102]]  ;;  %s8343_s13 = sld [smem:[#allocation2 + $0x4]] }
  0x26   :  { %v729_v20 = vmul.f32 %v727_v18, %v12497_v1  ;;  %v350_v21 = vmul.f32 %v12526_v10, %v12558_v19  ;;  %v731_v22 = vmul.f32 %v727_v18, %v12492_v0  ;;  %v730_v23 = vmul.f32 %v727_v18, %v12509_v4  ;;  %s8351_s26 = sld [smem:[#allocation4 + $0x5]] }
  0x27   :  { %v346_v25 = vmul.f32 %v12526_v10, %v12572_v24  ;;  %v732_v26 = vmul.f32 %v727_v18, %v12504_v3  ;;  %v779_v30 = vmul.f32 %v12579_v27, %v12524_v9  ;;  %v728_v31 = vmul.f32 %v727_v18, %v12531_v11 }
  0x28   :  { %v281_v32 = vmul.f32 %v12581_v28, %v12586_v29  ;;  %v12595_v33 = vstv %s284_s18  ;;  %v781_v35 = vmul.f32 %v12579_v27, %v12542_v14  ;;  %v780_v36 = vmul.f32 %v12579_v27, %v12547_v15  ;;  %s12413_s18 = smov 16  }
  0x29   :  { %317 = vrot.lane.b32.xlu1 %v299_v7, %s12406_s21  ;;  %313 = vrot.lane.b32.xlu0 %v297_v8, %s12406_s21  ;;  %v778_v37 = vmul.f32 %v12579_v27, %v12572_v24  ;;  %v782_v38 = vmul.f32 %v12579_v27, %v12558_v19  ;;  %v300_v40 = vmul.f32 %v12499_v2, %v12615_v39  ;;  %v12683_v7 = vld [vmem:[%s22341_s0 + $0x18] sm:$0xff]  ;;  %vm2861_vm10 = vcmask 687104  }
  0x2a   :  { %v12598_v34 = vadd.f32 %v12595_v33, %v281_v32  ;;  %v301_v41 = vmul.f32 %v12499_v2, %v12572_v24  ;;  %v283_v43 = vmul.f32 %v12581_v28, %v12531_v11  ;;  %v282_v46 = vmul.f32 %v12581_v28, %v12626_v42 }
  0x2b   :  { %v351_v49 = vmul.f32 %v12526_v10, %v12633_v44  ;;  %v352_v50 = vmul.f32 %v12526_v10, %v12638_v45  ;;  %v733_v51 = vmul.f32 %v727_v18, %v12615_v39  ;;  %v734_v52 = vmul.f32 %v727_v18, %v12572_v24 }
  0x2c   :  { %v12643_v47 = vadd.f32 %v12595_v33, %v283_v43  ;;  %v12646_v48 = vadd.f32 %v12595_v33, %v282_v46  ;;  %v278_v59 = vmul.f32 %v12581_v28, %v12663_v55  ;;  %v279_v60 = vmul.f32 %v12581_v28, %v12668_v56 }
  0x2d   :  { %362 = vrot.lane.b32.xlu1 %v347_v12, %s12407_s2  ;;  %309 = vrot.lane.b32.xlu0 %v295_v13, %s12406_s21  ;;  %vm4850_vm11 = vcmask 195584   ;;  %vm12417_vm12 = vmmov 0   ;;  %vm8125_vm13 = vcmask 982016   ;;  %vm8221_vm14 = vcmask 1043456  }
  0x2e   :  { %v287_v61 = vadd.f32 %v12595_v33, %v278_v59  ;;  %v288_v62 = vadd.f32 %v12595_v33, %v279_v60 }
  0x31   :  { %366 = vrot.lane.b32.xlu1 %v349_v16, %s12407_s2  ;;  %364 = vrot.lane.b32.xlu0 %v348_v17, %s12407_s2  ;;  %v12688_v16 = vld [vmem:[%s22341_s0] sm:$0xff] }
  0x35   :  { %744 = vrot.lane.b32.xlu1 %v729_v20, %s12406_s21  ;;  %368 = vrot.lane.b32.xlu0 %v350_v21, %s12407_s2  ;;  %v280_v20 = vmul.f32 %v12581_v28, %v12683_v7 }
  0x37   :  { %v289_v32 = vadd.f32 %v12595_v33, %v280_v20 }
  0x39   :  { %748 = vrot.lane.b32.xlu1 %v731_v22, %s12406_s21  ;;  %746 = vrot.lane.b32.xlu0 %v730_v23, %s12406_s21  ;;  %v277_v23 = vmul.f32 %v12581_v28, %v12688_v16 }
  0x3b   :  { %v286_v28 = vadd.f32 %v12595_v33, %v277_v23  ;;  %v12722_v33 = vstv %s8323_s20 }
  0x3d   :  { %360 = vrot.lane.b32.xlu1 %v346_v25, %s12407_s2  ;;  %750 = vrot.lane.b32.xlu0 %v732_v26, %s12406_s21 }
  0x41   :  { %794 = vrot.lane.b32.xlu1 %v779_v30, %s12407_s2  ;;  %742 = vrot.lane.b32.xlu0 %v728_v31, %s12406_s21 }
  0x45   :  { %798 = vrot.lane.b32.xlu1 %v781_v35, %s12407_s2  ;;  %796 = vrot.lane.b32.xlu0 %v780_v36, %s12407_s2 }
  0x49   :  { %792 = vrot.lane.b32.xlu1 %v778_v37, %s12407_s2  ;;  %800 = vrot.lane.b32.xlu0 %v782_v38, %s12407_s2  ;;  %v12712_v38 = vstv %s8322_s17  ;;  %s8339_s17 = sld [smem:[#allocation2 + $0x103]] }
  0x4d   :  { %319 = vrot.lane.b32.xlu0 %v300_v40, %s12406_s21  ;;  %321 = vrot.lane.b32.xlu1 %v301_v41, %s12406_s21 }
  0x51   :  { %370 = vrot.lane.b32.xlu0 %v351_v49, %s12407_s2  ;;  %372 = vrot.lane.b32.xlu1 %v352_v50, %s12407_s2  ;;  %v711_v49 = vmul.f32 %v12712_v38, %v12663_v55 }
  0x53   :  { %v720_v60 = vadd.f32 %v12722_v33, %v711_v49 }
  0x55   :  { %752 = vrot.lane.b32.xlu0 %v733_v51, %s12406_s21  ;;  %754 = vrot.lane.b32.xlu1 %v734_v52, %s12406_s21  ;;  %v712_v52 = vmul.f32 %v12712_v38, %v12668_v56 }
  0x97   :  { %v316_v53 = vpop.permute.xlu1 %315  ;;  %v312_v54 = vpop.permute.xlu0 %311 }
  0x9b   :  { %v12670_v57 = vpop.permute.xlu1 %317  ;;  %v314_v58 = vpop.permute.xlu0 %313 }
  0x9c   :  { %v325_v5 = vsel %vm323_vm0, %v312_v54, %v314_v58  ;;  %v326_v6 = vsel %vm323_vm0, %v314_v58, %v316_v53  ;;  %v327_v36 = vsel %vm323_vm0, %v316_v53, %v12670_v57 }
  0x9d   :  { %v338_v8 = vadd.f32 %v325_v5, %v287_v61  ;;  %v339_v10 = vadd.f32 %v326_v6, %v288_v62  ;;  %v340_v46 = vadd.f32 %v327_v36, %v289_v32  ;;  %v713_v61 = vmul.f32 %v12712_v38, %v12683_v7 }
  0x9f   :  { %v363_v63 = vpop.permute.xlu1 %362  ;;  %v310_v2 = vpop.permute.xlu0 %309  ;;  %v722_v20 = vadd.f32 %v12722_v33, %v713_v61 }
  0xa0   :  { %v324_v41 = vsel %vm323_vm0, %v310_v2, %v312_v54  ;;  %v721_v2 = vadd.f32 %v12722_v33, %v712_v52 }
  0xa1   :  { %v337_v50 = vadd.f32 %v324_v41, %v286_v28 }
  0xa3   :  { %v367_v12 = vpop.permute.xlu1 %366  ;;  %v365_v13 = vpop.permute.xlu0 %364 }
  0xa4   :  { %v376_v17 = vsel %vm374_vm1, %v363_v63, %v365_v13  ;;  %v377_v18 = vsel %vm374_vm1, %v365_v13, %v367_v12 }
  0xa5   :  { %v12694_v21 = vadd.f32 %v376_v17, %v338_v8  ;;  %v12696_v22 = vadd.f32 %v377_v18, %v339_v10  ;;  %v710_v10 = vmul.f32 %v12712_v38, %v12688_v16 }
  0xa7   :  { %v22361_v25 = vmax.f32 %v12694_v21, 0.0  ;;  %v22360_v26 = vmax.f32 %v12696_v22, 0.0  ;;  %v745_v30 = vpop.permute.xlu1 %744  ;;  %v12702_v31 = vpop.permute.xlu0 %368  ;;  %v719_v23 = vadd.f32 %v12722_v33, %v710_v10 }
  0xa8   :  { %v378_v43 = vsel %vm374_vm1, %v367_v12, %v12702_v31 }
  0xa9   :  { %v12128_v35 = vpack.i.bf16 %v22360_v26, %v22361_v25  ;;  %v12720_v51 = vadd.f32 %v378_v43, %v340_v46 }
  0xab   :  { %v749_v37 = vpop.permute.xlu1 %748  ;;  %v747_v40 = vpop.permute.xlu0 %746  ;;  %12129 = vrot.lane.b32.xlu0 %v12128_v35, %s12408_s22  ;;  %v22355_v62 = vmax.f32 %v12720_v51, 0.0 }
  0xac   :  { %v758_v12 = vsel %vm323_vm0, %v747_v40, %v749_v37 }
  0xad   :  { %v771_v18 = vadd.f32 %v758_v12, %v721_v2 }
  0xaf   :  { %v361_v53 = vpop.permute.xlu1 %360  ;;  %v12726_v58 = vpop.permute.xlu0 %750 }
  0xb0   :  { %v375_v54 = vsel %vm374_vm1, %v361_v53, %v363_v63  ;;  %v757_v63 = vsel %vm323_vm0, %v745_v30, %v747_v40  ;;  %v759_v36 = vsel %vm323_vm0, %v749_v37, %v12726_v58 }
  0xb1   :  { %v12729_v59 = vadd.f32 %v375_v54, %v337_v50  ;;  %v770_v17 = vadd.f32 %v757_v63, %v720_v60  ;;  %v772_v49 = vadd.f32 %v759_v36, %v722_v20  ;;  %v89_v36 = vld [vmem:[%s22344_s3 + $0x20] sm:$0xff] }
  0xb3   :  { %v22356_v5 = vmax.f32 %v12729_v59, 0.0  ;;  %v795_v6 = vpop.permute.xlu1 %794  ;;  %v743_v8 = vpop.permute.xlu0 %742 }
  0xb4   :  { %v756_v28 = vsel %vm323_vm0, %v743_v8, %v745_v30 }
  0xb5   :  { %v12133_v13 = vpack.i.bf16 %v22356_v5, %v22355_v62  ;;  %v769_v50 = vadd.f32 %v756_v28, %v719_v23  ;;  %v92_v23 = vld [vmem:[%s22344_s3 + $0x38] sm:$0xff]  ;;  %v91_v28 = vld [vmem:[%s22344_s3 + $0x30] sm:$0xff]  ;;  %v122_v62 = vld [vmem:[%s22344_s3 + $0x128] sm:$0xff] }
  0xb6   :  { %v123_v5 = vld [vmem:[%s22344_s3 + $0x130] sm:$0xff] }
  0xb7   :  { %v799_v32 = vpop.permute.xlu1 %798  ;;  %v797_v35 = vpop.permute.xlu0 %796  ;;  %12134 = vrot.lane.b32.xlu1 %v12133_v13, %s12408_s22  ;;  %v784_v13 = vmul.f32 %v12579_v27, %v12638_v45  ;;  %v90_v45 = vld [vmem:[%s22344_s3 + $0x28] sm:$0xff] }
  0xb8   :  { %v807_v40 = vsel %vm374_vm1, %v795_v6, %v797_v35  ;;  %v808_v41 = vsel %vm374_vm1, %v797_v35, %v799_v32  ;;  %v12808_v35 = vpack.c.bf16 %v92_v23, %v90_v45  ;;  %v101_v23 = vld [vmem:[%s22344_s3 + $0x80] sm:$0xff] }
  0xb9   :  { %v12753_v43 = vadd.f32 %v807_v40, %v770_v17  ;;  %v12755_v46 = vadd.f32 %v808_v41, %v771_v18  ;;  %v86_v17 = vld [vmem:[%s22344_s3 + $0x8] sm:$0xff]  ;;  %v85_v18 = vld [vmem:[%s22344_s3] sm:$0xff]  ;;  %v96_v41 = vld [vmem:[%s22344_s3 + $0x58] sm:$0xff] }
  0xba   :  { %22670 = vst [vmem:[#allocation10_spill] sm:$0xff] %v12808_v35  ;;  %v94_v40 = vld [vmem:[%s22344_s3 + $0x48] sm:$0xff] }
  0xbb   :  { %v22357_v52 = vmax.f32 %v12753_v43, 0.0  ;;  %v22358_v53 = vmax.f32 %v12755_v46, 0.0  ;;  %v793_v54 = vpop.permute.xlu1 %792  ;;  %v12759_v60 = vpop.permute.xlu0 %800 }
  0xbc   :  { %v806_v37 = vsel %vm374_vm1, %v793_v54, %v795_v6  ;;  %v809_v30 = vsel %vm374_vm1, %v799_v32, %v12759_v60  ;;  %v783_v6 = vmul.f32 %v12579_v27, %v12633_v44  ;;  %v88_v44 = vld [vmem:[%s22344_s3 + $0x18] sm:$0xff]  ;;  %v87_v27 = vld [vmem:[%s22344_s3 + $0x10] sm:$0xff]  ;;  %v93_v54 = vld [vmem:[%s22344_s3 + $0x40] sm:$0xff] }
  0xbd   :  { %v12764_v61 = vadd.f32 %v806_v37, %v769_v50  ;;  %v12766_v2 = vadd.f32 %v809_v30, %v772_v49  ;;  %v12138_v8 = vpack.i.bf16 %v22358_v53, %v22357_v52  ;;  %v12795_v20 = vpack.c.bf16 %v88_v44, %v86_v17  ;;  %v95_v37 = vld [vmem:[%s22344_s3 + $0x50] sm:$0xff]  ;;  %v98_v30 = vld [vmem:[%s22344_s3 + $0x68] sm:$0xff] }
  0xbe   :  { %v12806_v32 = vpack.c.bf16 %v87_v27, %v85_v18  ;;  %v12826_v49 = vpack.c.bf16 %v91_v28, %v89_v36  ;;  %v12830_v50 = vpack.c.bf16 %v96_v41, %v94_v40  ;;  %v99_v17 = vld [vmem:[%s22344_s3 + $0x70] sm:$0xff]  ;;  %v102_v44 = vld [vmem:[%s22344_s3 + $0x88] sm:$0xff]  ;;  %v104_v18 = vld [vmem:[%s22344_s3 + $0x98] sm:$0xff] }
  0xbf   :  { %v22359_v10 = vmax.f32 %v12764_v61, 0.0  ;;  %v22354_v63 = vmax.f32 %v12766_v2, 0.0  ;;  %12139 = vrot.lane.b32.xlu0 %v12138_v8, %s12408_s22  ;;  %22668 = vst [vmem:[#allocation8_spill] sm:$0xff] %v12795_v20  ;;  %8773 = vmatprep.subr.bf16.mxu0 %v12795_v20  ;;  %v100_v8 = vld [vmem:[%s22344_s3 + $0x78] sm:$0xff]  ;;  %v12870_v45 = vpack.c.bf16 %v104_v18, %v102_v44  ;;  %v103_v36 = vld [vmem:[%s22344_s3 + $0x90] sm:$0xff]  ;;  %v106_v28 = vld [vmem:[%s22344_s3 + $0xa8] sm:$0xff] }
  0xc0   :  { %22669 = vst [vmem:[#allocation9_spill] sm:$0xff] %v12806_v32  ;;  %8961 = vmatprep.subr.bf16.mxu1 %v12795_v20  ;;  %8775 = vmatpush1.bf16.msra.mxu0 %v12806_v32  ;;  %22671 = vst [vmem:[#allocation11_spill] sm:$0xff] %v12826_v49  ;;  %v108_v40 = vld [vmem:[%s22344_s3 + $0xb8] sm:$0xff]  ;;  %v12886_v41 = vpack.c.bf16 %v103_v36, %v101_v23  ;;  %v109_v18 = vld [vmem:[%s22344_s3 + $0xc0] sm:$0xff] }
  0xc1   :  { %v12143_v12 = vpack.i.bf16 %v22359_v10, %v22354_v63  ;;  %8963 = vmatpush1.bf16.msra.mxu1 %v12806_v32  ;;  %8777 = vmatprep.subr.bf16.mxu0 %v12808_v35  ;;  %22672 = vst [vmem:[#allocation12_spill] sm:$0xff] %v12830_v50  ;;  %22676 = vst [vmem:[#allocation16_spill] sm:$0xff] %v12870_v45  ;;  %v111_v23 = vld [vmem:[%s22344_s3 + $0xd0] sm:$0xff]  ;;  %v114_v36 = vld [vmem:[%s22344_s3 + $0xe8] sm:$0xff]  ;;  %v12998_v10 = vpop.permute.xlu0 %319 }
  0xc2   :  { %8965 = vmatprep.subr.bf16.mxu1 %v12808_v35  ;;  %22677 = vst [vmem:[#allocation17_spill] sm:$0xff] %v12886_v41  ;;  %v119_v63 = vld [vmem:[%s22344_s3 + $0x110] sm:$0xff]  ;;  %v126_v52 = vld [vmem:[%s22344_s3 + $0x148] sm:$0xff] }
  0xc3   :  { %802 = vrot.lane.b32.xlu0 %v783_v6, %s12407_s2  ;;  %12144 = vrot.lane.b32.xlu1 %v12143_v12, %s12408_s22  ;;  %v12846_v6 = vpack.c.bf16 %v95_v37, %v93_v54  ;;  %v12850_v12 = vpack.c.bf16 %v100_v8, %v98_v30  ;;  %v12890_v54 = vpack.c.bf16 %v108_v40, %v106_v28  ;;  %v105_v37 = vld [vmem:[%s22344_s3 + $0xa0] sm:$0xff]  ;;  %v107_v30 = vld [vmem:[%s22344_s3 + $0xb0] sm:$0xff] }
  0xc4   :  { %8779 = vmatpush1.bf16.msra.mxu0 %v12826_v49  ;;  %v110_v8 = vld [vmem:[%s22344_s3 + $0xc8] sm:$0xff]  ;;  %v116_v28 = vld [vmem:[%s22344_s3 + $0xf8] sm:$0xff]  ;;  %v12926_v40 = vpack.c.bf16 %v111_v23, %v109_v18  ;;  %v127_v53 = vld [vmem:[%s22344_s3 + $0x150] sm:$0xff] }
  0xc5   :  { %8967 = vmatpush1.bf16.msra.mxu1 %v12826_v49  ;;  %22673 = vst [vmem:[#allocation13_spill] sm:$0xff] %v12846_v6  ;;  %8781 = vmatprep.subr.bf16.mxu0 %v12830_v50  ;;  %22674 = vst [vmem:[#allocation14_spill] sm:$0xff] %v12850_v12  ;;  %v120_v18 = vld [vmem:[%s22344_s3 + $0x118] sm:$0xff] }
  0xc6   :  { %8969 = vmatprep.subr.bf16.mxu1 %v12830_v50  ;;  %22678 = vst [vmem:[#allocation18_spill] sm:$0xff] %v12890_v54  ;;  %22681 = vst [vmem:[#allocation21_spill] sm:$0xff] %v12926_v40 }
  0xc7   :  { %804 = vrot.lane.b32.xlu1 %v784_v13, %s12407_s2  ;;  %v97_v13 = vld [vmem:[%s22344_s3 + $0x60] sm:$0xff] }
  0xc8   :  { %8783 = vmatpush1.bf16.msra.mxu0 %v12846_v6  ;;  %v12866_v27 = vpack.c.bf16 %v99_v17, %v97_v13  ;;  %v112_v13 = vld [vmem:[%s22344_s3 + $0xd8] sm:$0xff]  ;;  %v12906_v17 = vpack.c.bf16 %v107_v30, %v105_v37  ;;  %v12930_v37 = vpack.c.bf16 %v116_v28, %v114_v36  ;;  %v113_v30 = vld [vmem:[%s22344_s3 + $0xe0] sm:$0xff] }
  0xc9   :  { %8971 = vmatpush1.bf16.msra.mxu1 %v12846_v6  ;;  %8785 = vmatprep.subr.bf16.mxu0 %v12850_v12  ;;  %v12910_v44 = vpack.c.bf16 %v112_v13, %v110_v8  ;;  %v115_v8 = vld [vmem:[%s22344_s3 + $0xf0] sm:$0xff]  ;;  %v118_v13 = vld [vmem:[%s22344_s3 + $0x108] sm:$0xff]  ;;  %v117_v28 = vld [vmem:[%s22344_s3 + $0x100] sm:$0xff] }
  0xca   :  { %22675 = vst [vmem:[#allocation15_spill] sm:$0xff] %v12866_v27  ;;  %8973 = vmatprep.subr.bf16.mxu1 %v12850_v12  ;;  %22679 = vst [vmem:[#allocation19_spill] sm:$0xff] %v12906_v17  ;;  %v12946_v23 = vpack.c.bf16 %v115_v8, %v113_v30  ;;  %v12950_v36 = vpack.c.bf16 %v120_v18, %v118_v13  ;;  %v124_v30 = vld [vmem:[%s22344_s3 + $0x138] sm:$0xff]  ;;  %v12966_v8 = vpack.c.bf16 %v119_v63, %v117_v28  ;;  %v121_v18 = vld [vmem:[%s22344_s3 + $0x120] sm:$0xff] }
  0xcb   :  { %22680 = vst [vmem:[#allocation20_spill] sm:$0xff] %v12910_v44  ;;  %22682 = vst [vmem:[#allocation22_spill] sm:$0xff] %v12930_v37  ;;  %v12970_v13 = vpack.c.bf16 %v124_v30, %v122_v62  ;;  %v128_v63 = vld [vmem:[%s22344_s3 + $0x158] sm:$0xff]  ;;  %v12986_v62 = vpack.c.bf16 %v123_v5, %v121_v18  ;;  %v125_v30 = vld [vmem:[%s22344_s3 + $0x140] sm:$0xff]  ;;  %v13008_v18 = vpop.permute.xlu0 %370 }
  0xcc   :  { %8787 = vmatpush1.bf16.msra.mxu0 %v12866_v27  ;;  %22683 = vst [vmem:[#allocation23_spill] sm:$0xff] %v12946_v23  ;;  %22684 = vst [vmem:[#allocation24_spill] sm:$0xff] %v12950_v36  ;;  %v12990_v28 = vpack.c.bf16 %v128_v63, %v126_v52  ;;  %v13002_v5 = vpack.c.bf16 %v127_v53, %v125_v30  ;;  %v13006_v52 = vpop.permute.xlu1 %321  ;;  %v130_v53 = vld [vmem:[%s22344_s3 + $0x168] sm:$0xff]  ;;  %v132_v30 = vld [vmem:[%s22344_s3 + $0x178] sm:$0xff] }
  0xcd   :  { %8975 = vmatpush1.bf16.msra.mxu1 %v12866_v27  ;;  %8789 = vmatprep.subr.bf16.mxu0 %v12870_v45  ;;  %22685 = vst [vmem:[#allocation25_spill] sm:$0xff] %v12966_v8  ;;  %22686 = vst [vmem:[#allocation26_spill] sm:$0xff] %v12970_v13 }
  0xce   :  { %8977 = vmatprep.subr.bf16.mxu1 %v12870_v45  ;;  %22687 = vst [vmem:[#allocation27_spill] sm:$0xff] %v12986_v62  ;;  %22688 = vst [vmem:[#allocation28_spill] sm:$0xff] %v12990_v28 }
  0xcf   :  { %22689 = vst [vmem:[#allocation29_spill] sm:$0xff] %v13002_v5  ;;  %v13014_v26 = vpop.permute.xlu0 %752 }
  0xd0   :  { %8791 = vmatpush1.bf16.msra.mxu0 %v12886_v41  ;;  %v13012_v63 = vpop.permute.xlu1 %372 }
  0xd1   :  { %8979 = vmatpush1.bf16.msra.mxu1 %v12886_v41  ;;  %8793 = vmatprep.subr.bf16.mxu0 %v12890_v54 }
  0xd2   :  { %8981 = vmatprep.subr.bf16.mxu1 %v12890_v54 }
  0xd4   :  { %8795 = vmatpush1.bf16.msra.mxu0 %v12906_v17 }
  0xd5   :  { %8983 = vmatpush1.bf16.msra.mxu1 %v12906_v17  ;;  %8797 = vmatprep.subr.bf16.mxu0 %v12910_v44 }
  0xd6   :  { %8985 = vmatprep.subr.bf16.mxu1 %v12910_v44  ;;  %v139_v44 = vld [vmem:[%s22344_s3 + $0x1b0] sm:$0xff] }
  0xd8   :  { %8799 = vmatpush1.bf16.msra.mxu0 %v12926_v40 }
  0xd9   :  { %8987 = vmatpush1.bf16.msra.mxu1 %v12926_v40  ;;  %8801 = vmatprep.subr.bf16.mxu0 %v12930_v37 }
  0xda   :  { %8989 = vmatprep.subr.bf16.mxu1 %v12930_v37  ;;  %v138_v37 = vld [vmem:[%s22344_s3 + $0x1a8] sm:$0xff] }
  0xdc   :  { %8803 = vmatpush1.bf16.msra.mxu0 %v12946_v23 }
  0xdd   :  { %8991 = vmatpush1.bf16.msra.mxu1 %v12946_v23  ;;  %8805 = vmatprep.subr.bf16.mxu0 %v12950_v36  ;;  %v136_v23 = vld [vmem:[%s22344_s3 + $0x198] sm:$0xff] }
  0xde   :  { %8993 = vmatprep.subr.bf16.mxu1 %v12950_v36  ;;  %v134_v36 = vld [vmem:[%s22344_s3 + $0x188] sm:$0xff] }
  0xe0   :  { %8807 = vmatpush1.bf16.msra.mxu0 %v12966_v8 }
  0xe1   :  { %8995 = vmatpush1.bf16.msra.mxu1 %v12966_v8  ;;  %8809 = vmatprep.subr.bf16.mxu0 %v12970_v13 }
  0xe2   :  { %8997 = vmatprep.subr.bf16.mxu1 %v12970_v13  ;;  %v131_v13 = vld [vmem:[%s22344_s3 + $0x170] sm:$0xff] }
  0xe4   :  { %8811 = vmatpush1.bf16.msra.mxu0 %v12986_v62 }
  0xe5   :  { %8999 = vmatpush1.bf16.msra.mxu1 %v12986_v62  ;;  %8813 = vmatprep.subr.bf16.mxu0 %v12990_v28  ;;  %v13026_v62 = vpack.c.bf16 %v132_v30, %v130_v53  ;;  %v13044_v53 = vpack.c.bf16 %v136_v23, %v134_v36  ;;  %v135_v23 = vld [vmem:[%s22344_s3 + $0x190] sm:$0xff] }
  0xe6   :  { %9001 = vmatprep.subr.bf16.mxu1 %v12990_v28  ;;  %v13024_v28 = vpop.permute.xlu1 %754 }
  0xe7   :  { %22690 = vst [vmem:[#allocation30_spill] sm:$0xff] %v13026_v62  ;;  %22692 = vst [vmem:[#allocation32_spill] sm:$0xff] %v13044_v53 }
  0xe8   :  { %8815 = vmatpush1.bf16.msra.mxu0 %v13002_v5 }
  0xe9   :  { %9003 = vmatpush1.bf16.msra.mxu1 %v13002_v5  ;;  %v129_v5 = vld [vmem:[%s22344_s3 + $0x160] sm:$0xff]  ;;  %8817 = vmatprep.subr.bf16.mxu0 %v13026_v62 }
  0xea   :  { %v13034_v8 = vpack.c.bf16 %v131_v13, %v129_v5  ;;  %9005 = vmatprep.subr.bf16.mxu1 %v13026_v62  ;;  %v133_v13 = vld [vmem:[%s22344_s3 + $0x180] sm:$0xff] }
  0xeb   :  { %v13058_v36 = vpack.c.bf16 %v135_v23, %v133_v13  ;;  %v137_v62 = vld [vmem:[%s22344_s3 + $0x1a0] sm:$0xff] }
  0xec   :  { %22691 = vst [vmem:[#allocation31_spill] sm:$0xff] %v13034_v8  ;;  %8819 = vmatpush1.bf16.msra.mxu0 %v13034_v8  ;;  %v13082_v17 = vpack.c.bf16 %v139_v44, %v137_v62  ;;  %v142_v44 = vld [vmem:[%s22344_s3 + $0x1c8] sm:$0xff] }
  0xed   :  { %9007 = vmatpush1.bf16.msra.mxu1 %v13034_v8  ;;  %8821 = vmatprep.subr.bf16.mxu0 %v13044_v53  ;;  %22693 = vst [vmem:[#allocation33_spill] sm:$0xff] %v13058_v36  ;;  %v140_v8 = vld [vmem:[%s22344_s3 + $0x1b8] sm:$0xff] }
  0xee   :  { %9009 = vmatprep.subr.bf16.mxu1 %v13044_v53  ;;  %v13077_v23 = vpack.c.bf16 %v140_v8, %v138_v37  ;;  %22696 = vst [vmem:[#allocation35_spill] sm:$0xff] %v13082_v17  ;;  %v22697_v37 = vmax.f32 %v12694_v21, 0.0 }
  0xf0   :  { %8823 = vmatpush1.bf16.msra.mxu0 %v13058_v36  ;;  %22695 = vst [vmem:[#allocation34_spill] sm:$0xff] %v13077_v23 }
  0xf1   :  { %9011 = vmatpush1.bf16.msra.mxu1 %v13058_v36  ;;  %8825 = vmatprep.subr.bf16.mxu0 %v13077_v23  ;;  %v22698_v36 = vmax.f32 %v12696_v22, 0.0  ;;  %v141_v22 = vld [vmem:[%s22344_s3 + $0x1c0] sm:$0xff] }
  0xf2   :  { %9013 = vmatprep.subr.bf16.mxu1 %v13077_v23 }
  0xf4   :  { %8827 = vmatpush1.bf16.msra.mxu0 %v13082_v17 }
  0xf5   :  { %9015 = vmatpush1.bf16.msra.mxu1 %v13082_v17 }
 0x11d   :  { %v13022_v25 = vpop.permute.xlu0 %12129 }
 0x11e   :  { %v12132_v30 = vunpack.i.h.bf16 %v13022_v25  ;;  %v22694_v53 = vunpack.i.l.bf16 %v13022_v25 }
 0x120   :  { %v425_v13 = vsel %vm423_vm2, %v22694_v53, %v12132_v30  ;;  %v714_v53 = vmul.f32 %v12712_v38, %v12586_v29  ;;  %v144_v29 = vld [vmem:[%s22344_s3 + $0x1d8] sm:$0xff] }
 0x121   :  { %v13093_v8 = vmax.f32 %v22697_v37, %v425_v13  ;;  %v13109_v62 = vpack.c.bf16 %v144_v29, %v142_v44  ;;  %v379_v44 = vsel %vm374_vm1, %v12702_v31, %v13008_v18  ;;  %v760_v29 = vsel %vm323_vm0, %v12726_v58, %v13014_v26 }
 0x122   :  { %v723_v13 = vadd.f32 %v12722_v33, %v714_v53  ;;  %v148_v53 = vld [vmem:[%s22344_s3 + $0x1f8] sm:$0xff]  ;;  %v715_v31 = vmul.f32 %v12712_v38, %v12626_v42 }
 0x123   :  { %22699 = vst [vmem:[#allocation36_spill] sm:$0xff] %v13109_v62  ;;  %8829 = vmatprep.subr.bf16.mxu0 %v13109_v62  ;;  %9017 = vmatprep.subr.bf16.mxu1 %v13109_v62 }
 0x129   :  { %v13060_v5 = vpop.permute.xlu1 %12134 }
 0x12a   :  { %v22396_v40 = vunpack.i.l.bf16 %v13060_v5  ;;  %v12137_v17 = vunpack.i.h.bf16 %v13060_v5 }
 0x12c   :  { %v426_v54 = vsel %vm423_vm2, %v12132_v30, %v22396_v40  ;;  %v328_v30 = vsel %vm323_vm0, %v12670_v57, %v12998_v10  ;;  %v146_v57 = vld [vmem:[%s22344_s3 + $0x1e8] sm:$0xff]  ;;  %v329_v40 = vsel %vm323_vm0, %v12998_v10, %v13006_v52 }
 0x12d   :  { %v13097_v41 = vmax.f32 %v22698_v36, %v426_v54  ;;  %v143_v54 = vld [vmem:[%s22344_s3 + $0x1d0] sm:$0xff]  ;;  %v13143_v58 = vpack.c.bf16 %v148_v53, %v146_v57  ;;  %v773_v57 = vadd.f32 %v760_v29, %v723_v13  ;;  %v342_v13 = vadd.f32 %v329_v40, %v12646_v48 }
 0x12e   :  { %v13120_v36 = vpack.c.bf16 %v143_v54, %v141_v22  ;;  %v145_v22 = vld [vmem:[%s22344_s3 + $0x1e0] sm:$0xff]  ;;  %v147_v54 = vld [vmem:[%s22344_s3 + $0x1f0] sm:$0xff] }
 0x12f   :  { %v12153_v21 = vpack.i.bf16 %v13097_v41, %v13093_v8  ;;  %22701 = vst [vmem:[#allocation38_spill] sm:$0xff] %v13143_v58  ;;  %v13154_v62 = vpack.c.bf16 %v147_v54, %v145_v22 }
 0x130   :  { %22700 = vst [vmem:[#allocation37_spill] sm:$0xff] %v13120_v36  ;;  %8831 = vmatpush1.bf16.msra.mxu0 %v13120_v36  ;;  %9019 = vmatpush1.bf16.msra.mxu1 %v13120_v36 }
 0x131   :  { %v12140_v37 = vpop.permute.xlu0 %12139  ;;  %12154 = vrot.lane.b32.xlu0 %v12153_v21, %s12409_s24  ;;  %v341_v21 = vadd.f32 %v328_v30, %v12598_v34  ;;  %22702 = vst [vmem:[#allocation39_spill] sm:$0xff] %v13154_v62  ;;  %8833 = vmatprep.subr.bf16.mxu0 %v13143_v58 }
 0x132   :  { %v12142_v34 = vunpack.i.h.bf16 %v12140_v37  ;;  %v12141_v30 = vunpack.i.l.bf16 %v12140_v37  ;;  %9021 = vmatprep.subr.bf16.mxu1 %v13143_v58 }
 0x133   :  { %v13156_v42 = vadd.f32 %v379_v44, %v341_v21  ;;  %v724_v44 = vadd.f32 %v12722_v33, %v715_v31  ;;  %v380_v21 = vsel %vm374_vm1, %v13008_v18, %v13012_v63  ;;  %v22703_v31 = vmax.f32 %v12764_v61, 0.0 }
 0x134   :  { %8835 = vmatpush1.bf16.msra.mxu0 %v13154_v62  ;;  %9023 = vmatpush1.bf16.msra.mxu1 %v13154_v62  ;;  %v855_v54 = vsel %vm423_vm2, %v12141_v30, %v12142_v34  ;;  %v22704_v62 = vmax.f32 %v12755_v46, 0.0  ;;  %v22706_v46 = vmax.f32 %v12753_v43, 0.0 }
 0x135   :  { %v803_v53 = vpop.permute.xlu0 %802  ;;  %v13158_v36 = vpop.permute.xlu1 %12144  ;;  %v399_v48 = vmax.f32 %v13156_v42, 0.0 }
 0x136   :  { %v810_v23 = vsel %vm374_vm1, %v12759_v60, %v803_v53  ;;  %v12147_v10 = vunpack.i.h.bf16 %v13158_v36  ;;  %v22407_v37 = vunpack.i.l.bf16 %v13158_v36  ;;  %v22713_v42 = vunpack.i.l.bf16 %v13158_v36  ;;  %v155_v36 = vld [vmem:[%s22344_s3 + $0x230] sm:$0xff] }
 0x137   :  { %v13170_v29 = vadd.f32 %v810_v23, %v773_v57 }
 0x138   :  { %v854_v60 = vsel %vm423_vm2, %v12147_v10, %v12141_v30  ;;  %v856_v22 = vsel %vm423_vm2, %v12142_v34, %v22407_v37  ;;  %v761_v10 = vsel %vm323_vm0, %v13014_v26, %v13024_v28  ;;  %v22705_v37 = vunpack.i.l.bf16 %v13022_v25 }
 0x139   :  { %v830_v40 = vmax.f32 %v13170_v29, 0.0  ;;  %v805_v23 = vpop.permute.xlu1 %804  ;;  %v13185_v57 = vmax.f32 %v22703_v31, %v854_v60  ;;  %v13189_v18 = vmax.f32 %v22704_v62, %v856_v22  ;;  %v13205_v62 = vmax.f32 %v22706_v46, %v855_v54 }
 0x13a   :  { %v424_v34 = vsel %vm423_vm2, %v12137_v17, %v22705_v37  ;;  %v13207_v60 = vadd.f32 %v380_v21, %v342_v13  ;;  %v811_v26 = vsel %vm374_vm1, %v803_v53, %v805_v23  ;;  %v774_v22 = vadd.f32 %v761_v10, %v724_v44 }
 0x13b   :  { %v12148_v30 = vpack.i.bf16 %v830_v40, %v399_v48  ;;  %v12163_v61 = vpack.i.bf16 %v13185_v57, %v13189_v18  ;;  %v22707_v25 = vmax.f32 %v12729_v59, 0.0  ;;  %v13216_v37 = vstv %s8331_s14  ;;  %s8344_s14 = sld [smem:[#allocation4 + $0x4]] }
 0x13c   :  { %v22411_v54 = vmax.f32 %v13207_v60, 0.0  ;;  %v13221_v13 = vadd.f32 %v811_v26, %v774_v22  ;;  %v1151_v59 = vmul.f32 %v13216_v37, %v12509_v4  ;;  %v1150_v44 = vmul.f32 %v13216_v37, %v12497_v1 }
 0x13d   :  { %12149 = vrot.lane.b32.xlu1 %v12148_v30, %s12408_s22  ;;  %12164 = vrot.lane.b32.xlu0 %v12163_v61, %s12409_s24  ;;  %v13214_v17 = vmax.f32 %v22707_v25, %v424_v34  ;;  %v1153_v21 = vmul.f32 %v13216_v37, %v12504_v3  ;;  %v343_v31 = vadd.f32 %v13006_v52, %v12643_v47  ;;  %v13246_v30 = vstv %s8332_s15  ;;  %s13370_s15 = sld [smem:[#allocation4 + $0x2]] }
 0x13e   :  { %v22409_v53 = vmax.f32 %v13221_v13, 0.0  ;;  %v1152_v10 = vmul.f32 %v13216_v37, %v12492_v0  ;;  %v1149_v34 = vmul.f32 %v13216_v37, %v12531_v11  ;;  %v1200_v47 = vmul.f32 %v13246_v30, %v12524_v9 }
 0x13f   :  { %v12158_v43 = vpack.i.bf16 %v13205_v62, %v13214_v17  ;;  %v13249_v61 = vadd.f32 %v13012_v63, %v343_v31  ;;  %v716_v46 = vmul.f32 %v12712_v38, %v12531_v11  ;;  %v1201_v63 = vmul.f32 %v13246_v30, %v12547_v15 }
 0x140   :  { %v1202_v26 = vmul.f32 %v13246_v30, %v12542_v14  ;;  %v13266_v22 = vstv %s8338_s16  ;;  %v1203_v38 = vmul.f32 %v13246_v30, %v12558_v19 }
 0x141   :  { %12159 = vrot.lane.b32.xlu1 %v12158_v43, %s12409_s24  ;;  %419 = vrot.lane.b32.xlu0 %v22411_v54, %s12408_s22  ;;  %v401_v52 = vmax.f32 %v13249_v61, 0.0  ;;  %v725_v25 = vadd.f32 %v12722_v33, %v716_v46  ;;  %v1571_v43 = vmul.f32 %v13266_v22, %v12497_v1  ;;  %v1573_v33 = vmul.f32 %v13266_v22, %v12492_v0 }
 0x142   :  { %v1574_v1 = vmul.f32 %v13266_v22, %v12504_v3  ;;  %v1199_v0 = vmul.f32 %v13246_v30, %v12572_v24 }
 0x145   :  { %850 = vrot.lane.b32.xlu1 %v22409_v53, %s12408_s22  ;;  %1167 = vrot.lane.b32.xlu0 %v1151_v59, %s12406_s21  ;;  %v775_v59 = vadd.f32 %v13024_v28, %v725_v25 }
 0x149   :  { %1165 = vrot.lane.b32.xlu1 %v1150_v44, %s12406_s21  ;;  %1171 = vrot.lane.b32.xlu0 %v1153_v21, %s12406_s21  ;;  %v1572_v44 = vmul.f32 %v13266_v22, %v12509_v4  ;;  %v13282_v21 = vadd.f32 %v805_v23, %v775_v59  ;;  %v1570_v4 = vmul.f32 %v13266_v22, %v12531_v11  ;;  %v13297_v23 = vstv %s8339_s17  ;;  %v150_v11 = vld [vmem:[%s22344_s3 + $0x208] sm:$0xff]  ;;  %s13509_s17 = sld [smem:[#allocation2 + $0x3]] }
 0x14a   :  { %v1621_v3 = vmul.f32 %v13297_v23, %v12524_v9  ;;  %v1622_v31 = vmul.f32 %v13297_v23, %v12547_v15  ;;  %v152_v9 = vld [vmem:[%s22344_s3 + $0x218] sm:$0xff] }
 0x14b   :  { %v22412_v28 = vmax.f32 %v13282_v21, 0.0 }
 0x14d   :  { %1169 = vrot.lane.b32.xlu1 %v1152_v10, %s12406_s21  ;;  %1163 = vrot.lane.b32.xlu0 %v1149_v34, %s12406_s21  ;;  %v1623_v10 = vmul.f32 %v13297_v23, %v12542_v14  ;;  %v13316_v34 = vpack.c.bf16 %v152_v9, %v150_v11 }
 0x14f   :  { %22708 = vst [vmem:[#allocation40_spill] sm:$0xff] %v13316_v34  ;;  %8837 = vmatprep.subr.bf16.mxu0 %v13316_v34  ;;  %9025 = vmatprep.subr.bf16.mxu1 %v13316_v34 }
 0x151   :  { %421 = vrot.lane.b32.xlu1 %v401_v52, %s12408_s22  ;;  %1215 = vrot.lane.b32.xlu0 %v1200_v47, %s12407_s2 }
 0x155   :  { %1217 = vrot.lane.b32.xlu1 %v1201_v63, %s12407_s2  ;;  %1219 = vrot.lane.b32.xlu0 %v1202_v26, %s12407_s2 }
 0x159   :  { %1221 = vrot.lane.b32.xlu1 %v1203_v38, %s12407_s2  ;;  %1586 = vrot.lane.b32.xlu0 %v1571_v43, %s12406_s21  ;;  %v149_v43 = vld [vmem:[%s22344_s3 + $0x200] sm:$0xff] }
 0x15d   :  { %1588 = vrot.lane.b32.xlu1 %v1572_v44, %s12406_s21  ;;  %1590 = vrot.lane.b32.xlu0 %v1573_v33, %s12406_s21  ;;  %v22709_v44 = vunpack.i.l.bf16 %v13060_v5 }
 0x161   :  { %1592 = vrot.lane.b32.xlu1 %v1574_v1, %s12406_s21  ;;  %852 = vrot.lane.b32.xlu0 %v22412_v28, %s12408_s22  ;;  %v154_v1 = vld [vmem:[%s22344_s3 + $0x228] sm:$0xff] }
 0x165   :  { %1213 = vrot.lane.b32.xlu1 %v1199_v0, %s12407_s2  ;;  %1584 = vrot.lane.b32.xlu0 %v1570_v4, %s12406_s21  ;;  %v156_v0 = vld [vmem:[%s22344_s3 + $0x238] sm:$0xff] }
 0x169   :  { %1636 = vrot.lane.b32.xlu1 %v1621_v3, %s12407_s2  ;;  %1638 = vrot.lane.b32.xlu0 %v1622_v31, %s12407_s2 }
 0x16d   :  { %1640 = vrot.lane.b32.xlu1 %v1623_v10, %s12407_s2 }
 0x1a3   :  { %v13320_v15 = vpop.permute.xlu0 %12154 }
 0x1a4   :  { %v22408_v14 = vunpack.i.h.bf16 %v13320_v15  ;;  %v12156_v47 = vunpack.i.l.bf16 %v13320_v15 }
 0x1a6   :  { %v467_v46 = vsel %vm465_vm3, %v12156_v47, %v22408_v14  ;;  %v13363_v14 = vpack.c.bf16 %v156_v0, %v154_v1  ;;  %v153_v0 = vld [vmem:[%s22344_s3 + $0x220] sm:$0xff] }
 0x1a7   :  { %v479_v63 = vmax.f32 %v13093_v8, %v467_v46  ;;  %v151_v8 = vld [vmem:[%s22344_s3 + $0x210] sm:$0xff] }
 0x1a8   :  { %22712 = vst [vmem:[#allocation42_spill] sm:$0xff] %v13363_v14 }
 0x1a9   :  { %559 = vmatprep.mubr.f32.mxu0 %v479_v63  ;;  %v22710_v63 = vmax.f32 %v12720_v51, 0.0 }
 0x1af   :  { %v12150_v26 = vpop.permute.xlu1 %12149  ;;  %v13328_v25 = vpop.permute.xlu0 %12164 }
 0x1b0   :  { %v12151_v38 = vunpack.i.l.bf16 %v12150_v26  ;;  %v12152_v59 = vunpack.i.h.bf16 %v12150_v26  ;;  %v12167_v4 = vunpack.i.h.bf16 %v13328_v25  ;;  %v22410_v31 = vunpack.i.l.bf16 %v13328_v25 }
 0x1b2   :  { %v427_v33 = vsel %vm423_vm2, %v22709_v44, %v12151_v38  ;;  %v13361_v44 = vpack.c.bf16 %v151_v8, %v149_v43  ;;  %v857_v51 = vsel %vm423_vm2, %v22713_v42, %v12152_v59  ;;  %v162_v42 = vld [vmem:[%s22344_s3 + $0x268] sm:$0xff] }
 0x1b3   :  { %v12160_v3 = vpop.permute.xlu1 %12159  ;;  %v13348_v5 = vpop.permute.xlu0 %419  ;;  %v13359_v26 = vmax.f32 %v22710_v63, %v427_v33 }
 0x1b4   :  { %v12162_v10 = vunpack.i.h.bf16 %v12160_v3  ;;  %v12161_v11 = vunpack.i.l.bf16 %v12160_v3  ;;  %v428_v9 = vsel %vm423_vm2, %v12151_v38, %v13348_v5  ;;  %22711 = vst [vmem:[#allocation41_spill] sm:$0xff] %v13361_v44 }
 0x1b5   :  { %v13355_v46 = vmax.f32 %v399_v48, %v428_v9  ;;  %v13411_v9 = vpack.c.bf16 %v155_v36, %v153_v0 }
 0x1b6   :  { %v466_v53 = vsel %vm465_vm3, %v12161_v11, %v12156_v47  ;;  %v896_v3 = vsel %vm465_vm3, %v12162_v10, %v22410_v31  ;;  %v895_v38 = vsel %vm465_vm3, %v12167_v4, %v12162_v10  ;;  %v158_v10 = vld [vmem:[%s22344_s3 + $0x248] sm:$0xff]  ;;  %v13408_v11 = vstv %s13336_s27  ;;  %s13540_s27 = sld [smem:[#allocation4 + $0x3]] }
 0x1b7   :  { %v13375_v48 = vpop.permute.xlu1 %850  ;;  %v1168_v43 = vpop.permute.xlu0 %1167  ;;  %v12168_v33 = vpack.i.bf16 %v13355_v46, %v13359_v26  ;;  %v478_v47 = vmax.f32 %v13214_v17, %v466_v53  ;;  %v908_v8 = vmax.f32 %v13205_v62, %v896_v3  ;;  %v907_v1 = vmax.f32 %v13185_v57, %v895_v38  ;;  %v160_v62 = vld [vmem:[%s22344_s3 + $0x258] sm:$0xff]  ;;  %22715 = vst [vmem:[#allocation43_spill] sm:$0xff] %v13411_v9  ;;  %v159_v3 = vld [vmem:[%s22344_s3 + $0x250] sm:$0xff] }
 0x1b8   :  { %v858_v4 = vsel %vm423_vm2, %v12152_v59, %v13375_v48  ;;  %v22714_v17 = vmax.f32 %v12766_v2, 0.0  ;;  %v1624_v59 = vmul.f32 %v13297_v23, %v12558_v19  ;;  %v13420_v63 = vpack.c.bf16 %v160_v62, %v158_v10  ;;  %v157_v19 = vld [vmem:[%s22344_s3 + $0x240] sm:$0xff]  ;;  %v168_v10 = vld [vmem:[%s22344_s3 + $0x298] sm:$0xff] }
 0x1b9   :  { %v13398_v57 = vmax.f32 %v830_v40, %v858_v4  ;;  %12169 = vrot.lane.b32.xlu0 %v12168_v33, %s12409_s24  ;;  %560 = vmatmul.mubr.f32.vlgmr.msra.gmra.mrb[0].mxu0 %v478_v47  ;;  %v1620_v38 = vmul.f32 %v13297_v23, %v12572_v24  ;;  %v1132_v33 = vmul.f32 %v13408_v11, %v12663_v55  ;;  %v166_v4 = vld [vmem:[%s22344_s3 + $0x288] sm:$0xff] }
 0x1ba   :  { %v13403_v53 = vmax.f32 %v22714_v17, %v857_v51  ;;  %980 = vmatprep.mubr.f32.mxu1 %v908_v8  ;;  %8839 = vmatpush1.bf16.msra.mxu0 %v13361_v44  ;;  %22716 = vst [vmem:[#allocation44_spill] sm:$0xff] %v13420_v63  ;;  %v164_v51 = vld [vmem:[%s22344_s3 + $0x278] sm:$0xff]  ;;  %v1133_v24 = vmul.f32 %v13408_v11, %v12668_v56  ;;  %v13446_v8 = vstv %s13370_s15  ;;  %v163_v56 = vld [vmem:[%s22344_s3 + $0x270] sm:$0xff] }
 0x1bb   :  { %981 = vmatmul.mubr.f32.vlgmr.msra.gmra.mrb[0].mxu1 %v907_v1  ;;  %v13413_v29 = vpop.permute.xlu1 %1165  ;;  %v13415_v40 = vpop.permute.xlu0 %1171  ;;  %8841 = vmatprep.subr.bf16.mxu0 %v13363_v14  ;;  %v1154_v47 = vmul.f32 %v13216_v37, %v12615_v39  ;;  %v13450_v1 = vpack.c.bf16 %v159_v3, %v157_v19  ;;  %v13457_v36 = vpack.c.bf16 %v164_v51, %v162_v42  ;;  %v161_v39 = vld [vmem:[%s22344_s3 + $0x260] sm:$0xff] }
 0x1bc   :  { %v12173_v2 = vpack.i.bf16 %v13398_v57, %v13403_v53  ;;  %9027 = vmatpush1.bf16.msra.mxu1 %v13361_v44  ;;  %v1141_v62 = vadd.f32 %v13446_v8, %v1132_v33  ;;  %v1142_v17 = vadd.f32 %v13446_v8, %v1133_v24  ;;  %v13482_v19 = vpack.c.bf16 %v163_v56, %v161_v39  ;;  %v165_v51 = vld [vmem:[%s22344_s3 + $0x280] sm:$0xff]  ;;  %v170_v24 = vld [vmem:[%s22344_s3 + $0x2a8] sm:$0xff] }
 0x1bd   :  { %1642 = vrot.lane.b32.xlu0 %v1624_v59, %s12407_s2  ;;  %9029 = vmatprep.subr.bf16.mxu1 %v13363_v14  ;;  %22717 = vst [vmem:[#allocation45_spill] sm:$0xff] %v13450_v1  ;;  %22718 = vst [vmem:[#allocation46_spill] sm:$0xff] %v13457_v36  ;;  %v1178_v59 = vsel %vm323_vm0, %v13413_v29, %v1168_v43 }
 0x1be   :  { %12174 = vrot.lane.b32.xlu1 %v12173_v2, %s12409_s24  ;;  %8843 = vmatpush1.bf16.msra.mxu0 %v13411_v9  ;;  %22719 = vst [vmem:[#allocation47_spill] sm:$0xff] %v13482_v19  ;;  %v1191_v39 = vadd.f32 %v1178_v59, %v1141_v62  ;;  %v169_v62 = vld [vmem:[%s22344_s3 + $0x2a0] sm:$0xff] }
 0x1bf   :  { %v13452_v0 = vpop.permute.xlu1 %1169  ;;  %v13454_v55 = vpop.permute.xlu0 %1163  ;;  %8845 = vmatprep.subr.bf16.mxu0 %v13420_v63 }
 0x1c0   :  { %9031 = vmatpush1.bf16.msra.mxu1 %v13411_v9  ;;  %v1179_v2 = vsel %vm323_vm0, %v1168_v43, %v13452_v0  ;;  %v167_v43 = vld [vmem:[%s22344_s3 + $0x290] sm:$0xff]  ;;  %v13624_v9 = vstv %s13540_s27 }
 0x1c1   :  { %1173 = vrot.lane.b32.xlu0 %v1154_v47, %s12406_s21  ;;  %9033 = vmatprep.subr.bf16.mxu1 %v13420_v63  ;;  %v172_v47 = vld [vmem:[%s22344_s3 + $0x2b8] sm:$0xff]  ;;  %v1192_v56 = vadd.f32 %v1179_v2, %v1142_v17  ;;  %v13512_v61 = vpack.c.bf16 %v167_v43, %v165_v51  ;;  %v171_v17 = vld [vmem:[%s22344_s3 + $0x2b0] sm:$0xff]  ;;  %v174_v51 = vld [vmem:[%s22344_s3 + $0x2c8] sm:$0xff] }
 0x1c2   :  { %1634 = vrot.lane.b32.xlu1 %v1620_v38, %s12407_s2  ;;  %8847 = vmatpush1.bf16.msra.mxu0 %v13450_v1  ;;  %v13489_v38 = vpack.c.bf16 %v168_v10, %v166_v4  ;;  %v13515_v10 = vpack.c.bf16 %v172_v47, %v170_v24  ;;  %v176_v43 = vld [vmem:[%s22344_s3 + $0x2d8] sm:$0xff] }
 0x1c3   :  { %v13484_v3 = vpop.permute.xlu1 %421  ;;  %v13486_v42 = vpop.permute.xlu0 %1215  ;;  %8849 = vmatprep.subr.bf16.mxu0 %v13457_v36  ;;  %22721 = vst [vmem:[#allocation49_spill] sm:$0xff] %v13512_v61 }
 0x1c4   :  { %22720 = vst [vmem:[#allocation48_spill] sm:$0xff] %v13489_v38  ;;  %v443_v33 = vmax.f32 %v401_v52, %v13484_v3  ;;  %9035 = vmatpush1.bf16.msra.mxu1 %v13450_v1  ;;  %22722 = vst [vmem:[#allocation50_spill] sm:$0xff] %v13515_v10 }
 0x1c5   :  { %9037 = vmatprep.subr.bf16.mxu1 %v13457_v36  ;;  %v12343_v36 = vld [vmem:[%s22341_s0 + $0x8] sm:$0xff] }
 0x1c6   :  { %463 = vrot.lane.b32.xlu1 %v443_v33, %s12409_s24  ;;  %8851 = vmatpush1.bf16.msra.mxu0 %v13482_v19  ;;  %v1134_v33 = vmul.f32 %v13408_v11, %v12683_v7 }
 0x1c7   :  { %v1218_v52 = vpop.permute.xlu1 %1217  ;;  %v1220_v4 = vpop.permute.xlu0 %1219  ;;  %8853 = vmatprep.subr.bf16.mxu0 %v13489_v38 }
 0x1c8   :  { %v1228_v59 = vsel %vm374_vm1, %v13486_v42, %v1218_v52  ;;  %v1229_v2 = vsel %vm374_vm1, %v1218_v52, %v1220_v4  ;;  %9039 = vmatpush1.bf16.msra.mxu1 %v13482_v19  ;;  %v13543_v52 = vpack.c.bf16 %v171_v17, %v169_v62  ;;  %v175_v62 = vld [vmem:[%s22344_s3 + $0x2d0] sm:$0xff]  ;;  %v178_v17 = vld [vmem:[%s22344_s3 + $0x2e8] sm:$0xff] }
 0x1c9   :  { %v13535_v24 = vadd.f32 %v1228_v59, %v1191_v39  ;;  %v13537_v47 = vadd.f32 %v1229_v2, %v1192_v56  ;;  %9041 = vmatprep.subr.bf16.mxu1 %v13489_v38  ;;  %v13552_v39 = vpack.c.bf16 %v176_v43, %v174_v51  ;;  %v173_v56 = vld [vmem:[%s22344_s3 + $0x2c0] sm:$0xff]  ;;  %v180_v59 = vld [vmem:[%s22344_s3 + $0x2f8] sm:$0xff]  ;;  %v1143_v2 = vadd.f32 %v13446_v8, %v1134_v33 }
 0x1ca   :  { %8855 = vmatpush1.bf16.msra.mxu0 %v13512_v61  ;;  %22723 = vst [vmem:[#allocation51_spill] sm:$0xff] %v13543_v52  ;;  %v1131_v51 = vmul.f32 %v13408_v11, %v12688_v16  ;;  %v13579_v38 = vstv %s13509_s17  ;;  %v13582_v19 = vpack.c.bf16 %v175_v62, %v173_v56  ;;  %v177_v56 = vld [vmem:[%s22344_s3 + $0x2e0] sm:$0xff]  ;;  %v179_v62 = vld [vmem:[%s22344_s3 + $0x2f0] sm:$0xff] }
 0x1cb   :  { %v22420_v31 = vmax.f32 %v13535_v24, 0.0  ;;  %v22419_v54 = vmax.f32 %v13537_v47, 0.0  ;;  %v13547_v28 = vpop.permute.xlu1 %1221  ;;  %v13549_v7 = vpop.permute.xlu0 %1586  ;;  %8857 = vmatprep.subr.bf16.mxu0 %v13515_v10  ;;  %22724 = vst [vmem:[#allocation52_spill] sm:$0xff] %v13552_v39  ;;  %v1553_v1 = vmul.f32 %v12343_v36, %v13579_v38 }
 0x1cc   :  { %9043 = vmatpush1.bf16.msra.mxu1 %v13512_v61  ;;  %v1180_v61 = vsel %vm323_vm0, %v13452_v0, %v13415_v40  ;;  %22725 = vst [vmem:[#allocation53_spill] sm:$0xff] %v13582_v19  ;;  %v1230_v63 = vsel %vm374_vm1, %v1220_v4, %v13547_v28  ;;  %v181_v4 = vld [vmem:[%s22344_s3 + $0x300] sm:$0xff] }
 0x1cd   :  { %v12178_v43 = vpack.i.bf16 %v22419_v54, %v22420_v31  ;;  %9045 = vmatprep.subr.bf16.mxu1 %v13515_v10  ;;  %v13592_v54 = vld [vmem:[%s22341_s0 + $0x88] sm:$0xff]  ;;  %v13597_v31 = vpack.c.bf16 %v180_v59, %v178_v17  ;;  %v184_v10 = vld [vmem:[%s22344_s3 + $0x318] sm:$0xff]  ;;  %v1193_v17 = vadd.f32 %v1180_v61, %v1143_v2  ;;  %v1140_v59 = vadd.f32 %v13446_v8, %v1131_v51 }
 0x1ce   :  { %8859 = vmatpush1.bf16.msra.mxu0 %v13543_v52  ;;  %v1204_v0 = vmul.f32 %v13592_v54, %v13246_v30  ;;  %v13627_v61 = vpack.c.bf16 %v179_v62, %v177_v56  ;;  %v12344_v51 = vld [vmem:[%s22341_s0 + $0x58] sm:$0xff]  ;;  %v22729_v56 = vmax.f32 %v13282_v21, 0.0  ;;  %v1562_v14 = vadd.f32 %v13624_v9, %v1553_v1  ;;  %v12345_v21 = vld [vmem:[%s22341_s0 + $0x10] sm:$0xff] }
 0x1cf   :  { %v13584_v33 = vpop.permute.xlu1 %1588  ;;  %12179 = vrot.lane.b32.xlu0 %v12178_v43, %s12408_s22  ;;  %v13587_v16 = vpop.permute.xlu0 %1590  ;;  %8861 = vmatprep.subr.bf16.mxu0 %v13552_v39  ;;  %22726 = vst [vmem:[#allocation54_spill] sm:$0xff] %v13597_v31  ;;  %v182_v43 = vld [vmem:[%s22344_s3 + $0x308] sm:$0xff] }
 0x1d0   :  { %9047 = vmatpush1.bf16.msra.mxu1 %v13543_v52  ;;  %v1177_v52 = vsel %vm323_vm0, %v13454_v55, %v13413_v29  ;;  %22727 = vst [vmem:[#allocation55_spill] sm:$0xff] %v13627_v61  ;;  %v1575_v29 = vmul.f32 %v12344_v51, %v13266_v22  ;;  %v13639_v55 = vpack.c.bf16 %v184_v10, %v182_v43  ;;  %v186_v51 = vld [vmem:[%s22344_s3 + $0x328] sm:$0xff]  ;;  %v188_v10 = vld [vmem:[%s22344_s3 + $0x338] sm:$0xff] }
 0x1d1   :  { %9049 = vmatprep.subr.bf16.mxu1 %v13552_v39  ;;  %v1190_v43 = vadd.f32 %v1177_v52, %v1140_v59  ;;  %v13657_v39 = vadd.f32 %v1230_v63, %v1193_v17  ;;  %v13672_v63 = vld [vmem:[%s22341_s0 + $0x60] sm:$0xff] }
 0x1d2   :  { %8863 = vmatpush1.bf16.msra.mxu0 %v13582_v19  ;;  %22728 = vst [vmem:[#allocation56_spill] sm:$0xff] %v13639_v55  ;;  %v1155_v1 = vmul.f32 %v13672_v63, %v13216_v37  ;;  %v187_v37 = vld [vmem:[%s22344_s3 + $0x330] sm:$0xff] }
 0x1d3   :  { %v13629_v2 = vpop.permute.xlu1 %1592  ;;  %1223 = vrot.lane.b32.xlu0 %v1204_v0, %s12407_s2  ;;  %v13632_v36 = vpop.permute.xlu0 %852  ;;  %8865 = vmatprep.subr.bf16.mxu0 %v13597_v31  ;;  %v183_v0 = vld [vmem:[%s22344_s3 + $0x310] sm:$0xff]  ;;  %22730 = vst [vmem:[#allocation57_spill] sm:$0xff] %v13657_v39 }
 0x1d4   :  { %v873_v62 = vmax.f32 %v22729_v56, %v13632_v36  ;;  %9051 = vmatpush1.bf16.msra.mxu1 %v13582_v19  ;;  %v1554_v56 = vmul.f32 %v12345_v21, %v13579_v38  ;;  %v1599_v19 = vsel %vm323_vm0, %v13549_v7, %v13584_v33  ;;  %v13677_v52 = vpack.c.bf16 %v183_v0, %v181_v4  ;;  %v185_v21 = vld [vmem:[%s22344_s3 + $0x320] sm:$0xff]  ;;  %v192_v0 = vld [vmem:[%s22344_s3 + $0x358] sm:$0xff] }
 0x1d5   :  { %9053 = vmatprep.subr.bf16.mxu1 %v13597_v31 }
 0x1d6   :  { %893 = vrot.lane.b32.xlu1 %v873_v62, %s12409_s24  ;;  %8867 = vmatpush1.bf16.msra.mxu0 %v13627_v61  ;;  %22731 = vst [vmem:[#allocation58_spill] sm:$0xff] %v13677_v52  ;;  %v13683_v62 = vpack.c.bf16 %v188_v10, %v186_v51  ;;  %v1612_v10 = vadd.f32 %v1599_v19, %v1562_v14 }
 0x1d7   :  { %v1214_v17 = vpop.permute.xlu1 %1213  ;;  %1594 = vrot.lane.b32.xlu0 %v1575_v29, %s12406_s21  ;;  %v13680_v59 = vpop.permute.xlu0 %1584  ;;  %8869 = vmatprep.subr.bf16.mxu0 %v13639_v55  ;;  %v190_v29 = vld [vmem:[%s22344_s3 + $0x348] sm:$0xff]  ;;  %v1563_v31 = vadd.f32 %v13624_v9, %v1554_v56 }
 0x1d8   :  { %v1227_v4 = vsel %vm374_vm1, %v1214_v17, %v13486_v42  ;;  %9055 = vmatpush1.bf16.msra.mxu1 %v13627_v61  ;;  %v1600_v42 = vsel %vm323_vm0, %v13584_v33, %v13587_v16  ;;  %v13710_v17 = vpack.c.bf16 %v187_v37, %v185_v21  ;;  %v13716_v19 = vpack.c.bf16 %v192_v0, %v190_v29  ;;  %v191_v33 = vld [vmem:[%s22344_s3 + $0x350] sm:$0xff]  ;;  %v196_v21 = vld [vmem:[%s22344_s3 + $0x378] sm:$0xff] }
 0x1d9   :  { %v13702_v44 = vadd.f32 %v1227_v4, %v1190_v43  ;;  %9057 = vmatprep.subr.bf16.mxu1 %v13639_v55  ;;  %v189_v43 = vld [vmem:[%s22344_s3 + $0x340] sm:$0xff]  ;;  %v1613_v37 = vadd.f32 %v1600_v42, %v1563_v31  ;;  %v22732_v4 = vmax.f32 %v13657_v39, 0.0  ;;  %v13750_v31 = vld [vmem:[%s22341_s0 + $0x90] sm:$0xff] }
 0x1da   :  { %1175 = vrot.lane.b32.xlu1 %v1155_v1, %s12406_s21  ;;  %8871 = vmatpush1.bf16.msra.mxu0 %v13677_v52  ;;  %v194_v1 = vld [vmem:[%s22344_s3 + $0x368] sm:$0xff] }
 0x1db   :  { %v22449_v61 = vmax.f32 %v13702_v44, 0.0  ;;  %v13713_v51 = vpop.permute.xlu1 %1636  ;;  %v1639_v14 = vpop.permute.xlu0 %1638  ;;  %8873 = vmatprep.subr.bf16.mxu0 %v13683_v62  ;;  %v13754_v42 = vpack.c.bf16 %v196_v21, %v194_v1 }
 0x1dc   :  { %v1649_v56 = vsel %vm374_vm1, %v13713_v51, %v1639_v14  ;;  %9059 = vmatpush1.bf16.msra.mxu1 %v13677_v52  ;;  %v13741_v52 = vpack.c.bf16 %v191_v33, %v189_v43  ;;  %v193_v43 = vld [vmem:[%s22344_s3 + $0x360] sm:$0xff]  ;;  %v195_v33 = vld [vmem:[%s22344_s3 + $0x370] sm:$0xff] }
 0x1dd   :  { %v12183_v29 = vpack.i.bf16 %v22449_v61, %v22732_v4  ;;  %v13737_v0 = vadd.f32 %v1649_v56, %v1612_v10  ;;  %9061 = vmatprep.subr.bf16.mxu1 %v13683_v62  ;;  %v1205_v10 = vmul.f32 %v13750_v31, %v13246_v30  ;;  %22733 = vst [vmem:[#allocation59_spill] sm:$0xff] %v13754_v42  ;;  %v198_v4 = vld [vmem:[%s22344_s3 + $0x388] sm:$0xff]  ;;  %v200_v30 = vld [vmem:[%s22344_s3 + $0x398] sm:$0xff] }
 0x1de   :  { %8875 = vmatpush1.bf16.msra.mxu0 %v13710_v17  ;;  %v13781_v61 = vpack.c.bf16 %v200_v30, %v198_v4  ;;  %v429_v30 = vsel %vm423_vm2, %v13348_v5, %v13484_v3  ;;  %v206_v5 = vld [vmem:[%s22344_s3 + $0x3c8] sm:$0xff]  ;;  %v208_v3 = vld [vmem:[%s22344_s3 + $0x3d8] sm:$0xff] }
 0x1df   :  { %v13743_v55 = vpop.permute.xlu1 %1640  ;;  %12184 = vrot.lane.b32.xlu1 %v12183_v29, %s12408_s22  ;;  %8877 = vmatprep.subr.bf16.mxu0 %v13716_v19  ;;  %v22452_v21 = vmax.f32 %v13737_v0, 0.0  ;;  %v13776_v29 = vpack.c.bf16 %v195_v33, %v193_v43  ;;  %v202_v43 = vld [vmem:[%s22344_s3 + $0x3a8] sm:$0xff]  ;;  %v1576_v33 = vmul.f32 %v13672_v63, %v13266_v22 }
 0x1e0   :  { %v1650_v56 = vsel %vm374_vm1, %v1639_v14, %v13743_v55  ;;  %9063 = vmatpush1.bf16.msra.mxu1 %v13710_v17  ;;  %22735 = vst [vmem:[#allocation61_spill] sm:$0xff] %v13781_v61 }
 0x1e1   :  { %v13771_v1 = vadd.f32 %v1650_v56, %v1613_v37  ;;  %9065 = vmatprep.subr.bf16.mxu1 %v13716_v19  ;;  %22734 = vst [vmem:[#allocation60_spill] sm:$0xff] %v13776_v29  ;;  %v197_v37 = vld [vmem:[%s22344_s3 + $0x380] sm:$0xff]  ;;  %v199_v56 = vld [vmem:[%s22344_s3 + $0x390] sm:$0xff] }
 0x1e2   :  { %8879 = vmatpush1.bf16.msra.mxu0 %v13741_v52  ;;  %v13807_v39 = vpack.c.bf16 %v199_v56, %v197_v37  ;;  %v22738_v37 = vmax.f32 %v13207_v60, 0.0  ;;  %v205_v60 = vld [vmem:[%s22344_s3 + $0x3c0] sm:$0xff] }
 0x1e3   :  { %v22451_v14 = vmax.f32 %v13771_v1, 0.0  ;;  %1225 = vrot.lane.b32.xlu1 %v1205_v10, %s12407_s2  ;;  %8881 = vmatprep.subr.bf16.mxu0 %v13754_v42  ;;  %v204_v10 = vld [vmem:[%s22344_s3 + $0x3b8] sm:$0xff] }
 0x1e4   :  { %9067 = vmatpush1.bf16.msra.mxu1 %v13741_v52  ;;  %22736 = vst [vmem:[#allocation62_spill] sm:$0xff] %v13807_v39  ;;  %v13811_v22 = vpack.c.bf16 %v204_v10, %v202_v43  ;;  %v13829_v56 = vmax.f32 %v22738_v37, %v429_v30  ;;  %v859_v43 = vsel %vm423_vm2, %v13375_v48, %v13632_v36  ;;  %v210_v48 = vld [vmem:[%s22344_s3 + $0x3e8] sm:$0xff]  ;;  %v212_v36 = vld [vmem:[%s22344_s3 + $0x3f8] sm:$0xff]  ;;  %v211_v37 = vld [vmem:[%s22344_s3 + $0x3f0] sm:$0xff] }
 0x1e5   :  { %v12188_v4 = vpack.i.bf16 %v22451_v14, %v22452_v21  ;;  %9069 = vmatprep.subr.bf16.mxu1 %v13754_v42  ;;  %v201_v14 = vld [vmem:[%s22344_s3 + $0x3a0] sm:$0xff]  ;;  %v203_v21 = vld [vmem:[%s22344_s3 + $0x3b0] sm:$0xff] }
 0x1e6   :  { %8883 = vmatpush1.bf16.msra.mxu0 %v13776_v29  ;;  %22737 = vst [vmem:[#allocation63_spill] sm:$0xff] %v13811_v22  ;;  %v13836_v10 = vpack.c.bf16 %v203_v21, %v201_v14  ;;  %v22741_v21 = vmax.f32 %v13221_v13, 0.0  ;;  %v209_v13 = vld [vmem:[%s22344_s3 + $0x3e0] sm:$0xff] }
 0x1e7   :  { %12189 = vrot.lane.b32.xlu0 %v12188_v4, %s12408_s22  ;;  %8885 = vmatprep.subr.bf16.mxu0 %v13781_v61  ;;  %v207_v4 = vld [vmem:[%s22344_s3 + $0x3d0] sm:$0xff] }
 0x1e8   :  { %9071 = vmatpush1.bf16.msra.mxu1 %v13776_v29  ;;  %1596 = vrot.lane.b32.xlu1 %v1576_v33, %s12406_s21  ;;  %22739 = vst [vmem:[#allocation64_spill] sm:$0xff] %v13836_v10  ;;  %v13841_v33 = vpack.c.bf16 %v208_v3, %v206_v5  ;;  %v13858_v14 = vmax.f32 %v22741_v21, %v859_v43  ;;  %v214_v43 = vld [vmem:[%s22344_s3 + $0x408] sm:$0xff]  ;;  %v13908_v21 = vld [vmem:[%s22341_s0] sm:$0xff] }
 0x1e9   :  { %9073 = vmatprep.subr.bf16.mxu1 %v13781_v61  ;;  %v13862_v30 = vpack.c.bf16 %v207_v4, %v205_v60  ;;  %v1625_v5 = vmul.f32 %v13592_v54, %v13297_v23  ;;  %v13869_v3 = vpack.c.bf16 %v212_v36, %v210_v48  ;;  %v216_v54 = vld [vmem:[%s22344_s3 + $0x418] sm:$0xff]  ;;  %v13886_v60 = vpack.c.bf16 %v211_v37, %v209_v13  ;;  %v213_v37 = vld [vmem:[%s22344_s3 + $0x400] sm:$0xff] }
 0x1ea   :  { %8887 = vmatpush1.bf16.msra.mxu0 %v13807_v39  ;;  %22740 = vst [vmem:[#allocation65_spill] sm:$0xff] %v13841_v33  ;;  %v13890_v4 = vpack.c.bf16 %v216_v54, %v214_v43  ;;  %v13901_v48 = vld [vmem:[%s22341_s0 + $0x18] sm:$0xff]  ;;  %22747 = vst [vmem:[#allocation71_spill] sm:$0xff] %v13908_v21  ;;  %v1601_v43 = vsel %vm323_vm0, %v13587_v16, %v13629_v2 }
 0x1eb   :  { %461 = vrot.lane.b32.xlu0 %v13829_v56, %s12409_s24  ;;  %8889 = vmatprep.subr.bf16.mxu0 %v13811_v22  ;;  %22742 = vst [vmem:[#allocation66_spill] sm:$0xff] %v13862_v30  ;;  %22743 = vst [vmem:[#allocation67_spill] sm:$0xff] %v13869_v3  ;;  %v1555_v36 = vmul.f32 %v13901_v48, %v13579_v38 }
 0x1ec   :  { %9075 = vmatpush1.bf16.msra.mxu1 %v13807_v39  ;;  %22744 = vst [vmem:[#allocation68_spill] sm:$0xff] %v13886_v60  ;;  %22745 = vst [vmem:[#allocation69_spill] sm:$0xff] %v13890_v4 }
 0x1ed   :  { %9077 = vmatprep.subr.bf16.mxu1 %v13811_v22  ;;  %22746 = vst [vmem:[#allocation70_spill] sm:$0xff] %v13901_v48  ;;  %v215_v48 = vld [vmem:[%s22344_s3 + $0x410] sm:$0xff] }
 0x1ee   :  { %8891 = vmatpush1.bf16.msra.mxu0 %v13836_v10  ;;  %v13945_v42 = vpack.c.bf16 %v215_v48, %v213_v37  ;;  %v224_v48 = vld [vmem:[%s22344_s3 + $0x458] sm:$0xff] }
 0x1ef   :  { %891 = vrot.lane.b32.xlu0 %v13858_v14, %s12409_s24  ;;  %8893 = vmatprep.subr.bf16.mxu0 %v13841_v33 }
 0x1f0   :  { %9079 = vmatpush1.bf16.msra.mxu1 %v13836_v10  ;;  %22750 = vst [vmem:[#allocation72_spill] sm:$0xff] %v13945_v42 }
 0x1f1   :  { %9081 = vmatprep.subr.bf16.mxu1 %v13841_v33 }
 0x1f2   :  { %8895 = vmatpush1.bf16.msra.mxu0 %v13862_v30 }
 0x1f3   :  { %1644 = vrot.lane.b32.xlu0 %v1625_v5, %s12407_s2  ;;  %8897 = vmatprep.subr.bf16.mxu0 %v13869_v3  ;;  %v1552_v5 = vmul.f32 %v13908_v21, %v13579_v38  ;;  %v220_v21 = vld [vmem:[%s22344_s3 + $0x438] sm:$0xff] }
 0x1f4   :  { %9083 = vmatpush1.bf16.msra.mxu1 %v13862_v30  ;;  %v22748_v30 = vunpack.i.h.bf16 %v13320_v15  ;;  %v217_v15 = vld [vmem:[%s22344_s3 + $0x420] sm:$0xff] }
 0x1f5   :  { %9085 = vmatprep.subr.bf16.mxu1 %v13869_v3  ;;  %v1561_v3 = vadd.f32 %v13624_v9, %v1552_v5 }
 0x1f6   :  { %8899 = vmatpush1.bf16.msra.mxu0 %v13886_v60 }
 0x1f7   :  { %8901 = vmatprep.subr.bf16.mxu0 %v13890_v4 }
 0x1f8   :  { %9087 = vmatpush1.bf16.msra.mxu1 %v13886_v60  ;;  %v1564_v60 = vadd.f32 %v13624_v9, %v1555_v36 }
 0x1f9   :  { %9089 = vmatprep.subr.bf16.mxu1 %v13890_v4  ;;  %v218_v4 = vld [vmem:[%s22344_s3 + $0x428] sm:$0xff] }
 0x1fa   :  { %v13947_v16 = vpack.c.bf16 %v220_v21, %v218_v4  ;;  %v222_v4 = vld [vmem:[%s22344_s3 + $0x448] sm:$0xff] }
 0x1fc   :  { %22751 = vst [vmem:[#allocation73_spill] sm:$0xff] %v13947_v16 }
 0x22b   :  { %v13912_v13 = vpop.permute.xlu0 %12169 }
 0x22c   :  { %v12171_v54 = vunpack.i.l.bf16 %v13912_v13  ;;  %v22749_v10 = vunpack.i.h.bf16 %v13912_v13 }
 0x22e   :  { %v468_v33 = vsel %vm465_vm3, %v22748_v30, %v12171_v54  ;;  %v469_v22 = vsel %vm465_vm3, %v12171_v54, %v22749_v10  ;;  %v219_v10 = vld [vmem:[%s22344_s3 + $0x430] sm:$0xff]  ;;  %v1598_v30 = vsel %vm323_vm0, %v13680_v59, %v13549_v7  ;;  %v22752_v7 = vunpack.i.l.bf16 %v13328_v25 }
 0x22f   :  { %v13941_v61 = vpop.permute.xlu0 %1642  ;;  %v481_v36 = vmax.f32 %v13359_v26, %v469_v22  ;;  %v480_v29 = vmax.f32 %v13097_v41, %v468_v33  ;;  %v1614_v33 = vadd.f32 %v1601_v43, %v1564_v60  ;;  %v1611_v60 = vadd.f32 %v1598_v30, %v1561_v3  ;;  %v221_v3 = vld [vmem:[%s22344_s3 + $0x440] sm:$0xff] }
 0x230   :  { %v13939_v39 = vpop.permute.xlu1 %12174  ;;  %v1651_v22 = vsel %vm374_vm1, %v13743_v55, %v13941_v61  ;;  %v13975_v55 = vpack.c.bf16 %v219_v10, %v217_v15 }
 0x231   :  { %v22479_v26 = vunpack.i.h.bf16 %v13939_v39  ;;  %v12176_v41 = vunpack.i.l.bf16 %v13939_v39  ;;  %630 = vmatprep.mubr.f32.mxu0 %v481_v36  ;;  %v13977_v5 = vadd.f32 %v1651_v22, %v1614_v33  ;;  %v223_v36 = vld [vmem:[%s22344_s3 + $0x450] sm:$0xff]  ;;  %v225_v22 = vld [vmem:[%s22344_s3 + $0x460] sm:$0xff] }
 0x232   :  { %631 = vmatmul.mubr.f32.vlgmr.msra.gmra.mrb[0].mxu0 %v480_v29  ;;  %22753 = vst [vmem:[#allocation74_spill] sm:$0xff] %v13975_v55  ;;  %v13985_v29 = vpack.c.bf16 %v224_v48, %v222_v4  ;;  %v14005_v30 = vpack.c.bf16 %v223_v36, %v221_v3  ;;  %v227_v33 = vld [vmem:[%s22344_s3 + $0x470] sm:$0xff]  ;;  %v230_v48 = vld [vmem:[%s22344_s3 + $0x488] sm:$0xff]  ;;  %v233_v3 = vld [vmem:[%s22344_s3 + $0x4a0] sm:$0xff] }
 0x233   :  { %v897_v59 = vsel %vm465_vm3, %v22752_v7, %v12176_v41  ;;  %v898_v21 = vsel %vm465_vm3, %v12176_v41, %v22479_v26  ;;  %8903 = vmatpush1.bf16.msra.mxu0 %v13945_v42  ;;  %v232_v7 = vld [vmem:[%s22344_s3 + $0x498] sm:$0xff]  ;;  %v235_v36 = vld [vmem:[%s22344_s3 + $0x4b0] sm:$0xff] }
 0x234   :  { %v1635_v37 = vpop.permute.xlu1 %1634  ;;  %v910_v43 = vmax.f32 %v13403_v53, %v898_v21  ;;  %v909_v54 = vmax.f32 %v13189_v18, %v897_v59  ;;  %8905 = vmatprep.subr.bf16.mxu0 %v13947_v16  ;;  %22754 = vst [vmem:[#allocation75_spill] sm:$0xff] %v13985_v29  ;;  %v226_v18 = vld [vmem:[%s22344_s3 + $0x468] sm:$0xff]  ;;  %v228_v53 = vld [vmem:[%s22344_s3 + $0x478] sm:$0xff]  ;;  %22755 = vst [vmem:[#allocation76_spill] sm:$0xff] %v14005_v30  ;;  %v14029_v59 = vpack.c.bf16 %v227_v33, %v225_v22 }
 0x235   :  { %v1648_v25 = vsel %vm374_vm1, %v1635_v37, %v13713_v51  ;;  %v22477_v51 = vmax.f32 %v13977_v5, 0.0  ;;  %v14009_v41 = vpack.c.bf16 %v228_v53, %v226_v18  ;;  %v1626_v21 = vmul.f32 %v13750_v31, %v13297_v23  ;;  %v229_v37 = vld [vmem:[%s22344_s3 + $0x480] sm:$0xff]  ;;  %v236_v23 = vld [vmem:[%s22344_s3 + $0x4b8] sm:$0xff]  ;;  %v238_v18 = vld [vmem:[%s22344_s3 + $0x4c8] sm:$0xff] }
 0x236   :  { %v13993_v15 = vadd.f32 %v1648_v25, %v1611_v60  ;;  %1051 = vmatprep.mubr.f32.mxu1 %v910_v43  ;;  %22757 = vst [vmem:[#allocation78_spill] sm:$0xff] %v14029_v59  ;;  %v14035_v60 = vpack.c.bf16 %v232_v7, %v230_v48  ;;  %v231_v43 = vld [vmem:[%s22344_s3 + $0x490] sm:$0xff]  ;;  %v240_v53 = vld [vmem:[%s22344_s3 + $0x4d8] sm:$0xff]  ;;  %v14073_v22 = vpack.c.bf16 %v235_v36, %v233_v3  ;;  %v237_v48 = vld [vmem:[%s22344_s3 + $0x4c0] sm:$0xff] }
 0x237   :  { %1052 = vmatmul.mubr.f32.vlgmr.msra.gmra.mrb[0].mxu1 %v909_v54  ;;  %8907 = vmatpush1.bf16.msra.mxu0 %v13975_v55  ;;  %22756 = vst [vmem:[#allocation77_spill] sm:$0xff] %v14009_v41  ;;  %v234_v54 = vld [vmem:[%s22344_s3 + $0x4a8] sm:$0xff]  ;;  %v14052_v31 = vpack.c.bf16 %v231_v43, %v229_v37  ;;  %v239_v7 = vld [vmem:[%s22344_s3 + $0x4d0] sm:$0xff]  ;;  %v244_v43 = vld [vmem:[%s22344_s3 + $0x4f8] sm:$0xff] }
 0x238   :  { %v22478_v10 = vmax.f32 %v13993_v15, 0.0  ;;  %9091 = vmatpush1.bf16.msra.mxu1 %v13945_v42  ;;  %8909 = vmatprep.subr.bf16.mxu0 %v13985_v29  ;;  %22758 = vst [vmem:[#allocation79_spill] sm:$0xff] %v14035_v60  ;;  %v14056_v25 = vpack.c.bf16 %v236_v23, %v234_v54  ;;  %22761 = vst [vmem:[#allocation82_spill] sm:$0xff] %v14073_v22  ;;  %v14075_v33 = vpop.permute.xlu1 %463  ;;  %v242_v37 = vld [vmem:[%s22344_s3 + $0x4e8] sm:$0xff]  ;;  %v14097_v54 = vpack.c.bf16 %v239_v7, %v237_v48  ;;  %v241_v36 = vld [vmem:[%s22344_s3 + $0x4e0] sm:$0xff] }
 0x239   :  { %9093 = vmatprep.subr.bf16.mxu1 %v13947_v16  ;;  %22759 = vst [vmem:[#allocation80_spill] sm:$0xff] %v14052_v31  ;;  %v14103_v3 = vpack.c.bf16 %v244_v43, %v242_v37  ;;  %v246_v48 = vld [vmem:[%s22344_s3 + $0x508] sm:$0xff]  ;;  %v248_v7 = vld [vmem:[%s22344_s3 + $0x518] sm:$0xff] }
 0x23a   :  { %v12193_v4 = vpack.i.bf16 %v22478_v10, %v22477_v51  ;;  %22760 = vst [vmem:[#allocation81_spill] sm:$0xff] %v14056_v25  ;;  %22763 = vst [vmem:[#allocation84_spill] sm:$0xff] %v14097_v54  ;;  %v14124_v37 = vld [vmem:[%s22341_s0 + $0x28] sm:$0xff]  ;;  %v14134_v26 = vpack.c.bf16 %v248_v7, %v246_v48  ;;  %v251_v48 = vld [vmem:[%s22344_s3 + $0x530] sm:$0xff] }
 0x23b   :  { %8911 = vmatpush1.bf16.msra.mxu0 %v14005_v30  ;;  %22764 = vst [vmem:[#allocation85_spill] sm:$0xff] %v14103_v3  ;;  %v1136_v43 = vmul.f32 %v14124_v37, %v13408_v11 }
 0x23c   :  { %9095 = vmatpush1.bf16.msra.mxu1 %v13975_v55  ;;  %12194 = vrot.lane.b32.xlu1 %v12193_v4, %s12408_s22  ;;  %v14079_v4 = vpack.c.bf16 %v240_v53, %v238_v18  ;;  %v243_v18 = vld [vmem:[%s22344_s3 + $0x4f0] sm:$0xff]  ;;  %22766 = vst [vmem:[#allocation87_spill] sm:$0xff] %v14134_v26 }
 0x23d   :  { %8913 = vmatprep.subr.bf16.mxu0 %v14009_v41  ;;  %9097 = vmatprep.subr.bf16.mxu1 %v13985_v29  ;;  %v14128_v51 = vpack.c.bf16 %v243_v18, %v241_v36  ;;  %v250_v36 = vld [vmem:[%s22344_s3 + $0x528] sm:$0xff]  ;;  %v252_v18 = vld [vmem:[%s22344_s3 + $0x538] sm:$0xff] }
 0x23e   :  { %22762 = vst [vmem:[#allocation83_spill] sm:$0xff] %v14079_v4 }
 0x23f   :  { %8915 = vmatpush1.bf16.msra.mxu0 %v14029_v59  ;;  %22765 = vst [vmem:[#allocation86_spill] sm:$0xff] %v14128_v51 }
 0x240   :  { %9099 = vmatpush1.bf16.msra.mxu1 %v14005_v30  ;;  %1646 = vrot.lane.b32.xlu1 %v1626_v21, %s12407_s2  ;;  %v14087_v21 = vpop.permute.xlu0 %1173 }
 0x241   :  { %8917 = vmatprep.subr.bf16.mxu0 %v14035_v60  ;;  %9101 = vmatprep.subr.bf16.mxu1 %v14009_v41  ;;  %v14162_v41 = vpack.c.bf16 %v252_v18, %v250_v36 }
 0x243   :  { %8919 = vmatpush1.bf16.msra.mxu0 %v14052_v31  ;;  %22768 = vst [vmem:[#allocation89_spill] sm:$0xff] %v14162_v41 }
 0x244   :  { %9103 = vmatpush1.bf16.msra.mxu1 %v14029_v59  ;;  %8921 = vmatprep.subr.bf16.mxu0 %v14056_v25  ;;  %v14111_v53 = vpop.permute.xlu0 %12179 }
 0x245   :  { %9105 = vmatprep.subr.bf16.mxu1 %v14035_v60  ;;  %v22769_v18 = vunpack.i.l.bf16 %v14111_v53 }
 0x247   :  { %8923 = vmatpush1.bf16.msra.mxu0 %v14073_v22 }
 0x248   :  { %9107 = vmatpush1.bf16.msra.mxu1 %v14052_v31  ;;  %v14099_v23 = vpop.permute.xlu1 %893  ;;  %8925 = vmatprep.subr.bf16.mxu0 %v14079_v4  ;;  %v14150_v7 = vpop.permute.xlu0 %1223  ;;  %v1145_v31 = vadd.f32 %v13446_v8, %v1136_v43  ;;  %v249_v43 = vld [vmem:[%s22344_s3 + $0x520] sm:$0xff] }
 0x249   :  { %9109 = vmatprep.subr.bf16.mxu1 %v14056_v25  ;;  %v247_v25 = vld [vmem:[%s22344_s3 + $0x510] sm:$0xff]  ;;  %v14184_v29 = vpack.c.bf16 %v251_v48, %v249_v43  ;;  %v22772_v43 = vmax.f32 %v13535_v24, 0.0 }
 0x24b   :  { %8927 = vmatpush1.bf16.msra.mxu0 %v14097_v54  ;;  %22770 = vst [vmem:[#allocation90_spill] sm:$0xff] %v14184_v29 }
 0x24c   :  { %9111 = vmatpush1.bf16.msra.mxu1 %v14073_v22  ;;  %v14130_v10 = vpop.permute.xlu1 %1175  ;;  %8929 = vmatprep.subr.bf16.mxu0 %v14103_v3  ;;  %v245_v22 = vld [vmem:[%s22344_s3 + $0x500] sm:$0xff]  ;;  %v14199_v48 = vpop.permute.xlu0 %1594 }
 0x24d   :  { %9113 = vmatprep.subr.bf16.mxu1 %v14079_v4  ;;  %v12182_v4 = vunpack.i.h.bf16 %v14111_v53  ;;  %v14155_v60 = vpack.c.bf16 %v247_v25, %v245_v22  ;;  %v1182_v59 = vsel %vm323_vm0, %v14087_v21, %v14130_v10  ;;  %v254_v22 = vld [vmem:[%s22344_s3 + $0x548] sm:$0xff] }
 0x24e   :  { %v1195_v30 = vadd.f32 %v1182_v59, %v1145_v31  ;;  %v253_v59 = vld [vmem:[%s22344_s3 + $0x540] sm:$0xff]  ;;  %v255_v31 = vld [vmem:[%s22344_s3 + $0x550] sm:$0xff] }
 0x24f   :  { %8931 = vmatpush1.bf16.msra.mxu0 %v14128_v51  ;;  %22767 = vst [vmem:[#allocation88_spill] sm:$0xff] %v14155_v60 }
 0x250   :  { %9115 = vmatpush1.bf16.msra.mxu1 %v14097_v54  ;;  %8933 = vmatprep.subr.bf16.mxu0 %v14134_v26  ;;  %v1276_v54 = vsel %vm423_vm2, %v22769_v18, %v12182_v4 }
 0x251   :  { %9117 = vmatprep.subr.bf16.mxu1 %v14103_v3  ;;  %v14170_v25 = vpop.permute.xlu1 %12184  ;;  %v256_v3 = vld [vmem:[%s22344_s3 + $0x558] sm:$0xff]  ;;  %v14203_v18 = vmax.f32 %v22772_v43, %v1276_v54 }
 0x252   :  { %v22506_v36 = vunpack.i.l.bf16 %v14170_v25  ;;  %v14191_v16 = vpack.c.bf16 %v256_v3, %v254_v22  ;;  %v258_v3 = vld [vmem:[%s22344_s3 + $0x568] sm:$0xff]  ;;  %v260_v22 = vld [vmem:[%s22344_s3 + $0x578] sm:$0xff] }
 0x253   :  { %8935 = vmatpush1.bf16.msra.mxu0 %v14155_v60  ;;  %v14230_v43 = vpack.c.bf16 %v260_v22, %v258_v3 }
 0x254   :  { %9119 = vmatpush1.bf16.msra.mxu1 %v14128_v51  ;;  %v1277_v55 = vsel %vm423_vm2, %v12182_v4, %v22506_v36  ;;  %8937 = vmatprep.subr.bf16.mxu0 %v14162_v41  ;;  %22771 = vst [vmem:[#allocation91_spill] sm:$0xff] %v14191_v16  ;;  %v22773_v4 = vmax.f32 %v13537_v47, 0.0 }
 0x255   :  { %9121 = vmatprep.subr.bf16.mxu1 %v14134_v26  ;;  %v14215_v26 = vpop.permute.xlu1 %1225  ;;  %22776 = vst [vmem:[#allocation94_spill] sm:$0xff] %v14230_v43 }
 0x256   :  { %v14207_v36 = vmax.f32 %v22773_v4, %v1277_v55  ;;  %v1232_v24 = vsel %vm374_vm1, %v14150_v7, %v14215_v26  ;;  %v14224_v55 = vpack.c.bf16 %v255_v31, %v253_v59  ;;  %v257_v4 = vld [vmem:[%s22344_s3 + $0x560] sm:$0xff]  ;;  %v264_v59 = vld [vmem:[%s22344_s3 + $0x598] sm:$0xff] }
 0x257   :  { %8939 = vmatpush1.bf16.msra.mxu0 %v14184_v29  ;;  %v14226_v54 = vadd.f32 %v1232_v24, %v1195_v30  ;;  %v262_v30 = vld [vmem:[%s22344_s3 + $0x588] sm:$0xff]  ;;  %v12351_v31 = vld [vmem:[%s22341_s0 + $0x20] sm:$0xff] }
 0x258   :  { %22774 = vst [vmem:[#allocation92_spill] sm:$0xff] %v14207_v36  ;;  %9123 = vmatpush1.bf16.msra.mxu1 %v14155_v60  ;;  %v12203_v47 = vpack.i.bf16 %v14207_v36, %v14203_v18  ;;  %22775 = vst [vmem:[#allocation93_spill] sm:$0xff] %v14224_v55  ;;  %8941 = vmatprep.subr.bf16.mxu0 %v14191_v16  ;;  %v259_v60 = vld [vmem:[%s22344_s3 + $0x570] sm:$0xff]  ;;  %v1135_v3 = vmul.f32 %v12351_v31, %v13408_v11 }
 0x259   :  { %9125 = vmatprep.subr.bf16.mxu1 %v14162_v41  ;;  %v14238_v51 = vpop.permute.xlu0 %12189  ;;  %v14253_v22 = vpack.c.bf16 %v259_v60, %v257_v4  ;;  %v14257_v24 = vpack.c.bf16 %v264_v59, %v262_v30  ;;  %v263_v41 = vld [vmem:[%s22344_s3 + $0x590] sm:$0xff]  ;;  %v1556_v42 = vmul.f32 %v12351_v31, %v13579_v38  ;;  %v266_v60 = vld [vmem:[%s22344_s3 + $0x5a8] sm:$0xff]  ;;  %v268_v4 = vld [vmem:[%s22344_s3 + $0x5b8] sm:$0xff] }
 0x25a   :  { %12204 = vrot.lane.b32.xlu0 %v12203_v47, %s12409_s24  ;;  %v261_v47 = vld [vmem:[%s22344_s3 + $0x580] sm:$0xff]  ;;  %v1144_v59 = vadd.f32 %v13446_v8, %v1135_v3  ;;  %v267_v3 = vld [vmem:[%s22344_s3 + $0x5b0] sm:$0xff] }
 0x25b   :  { %8943 = vmatpush1.bf16.msra.mxu0 %v14224_v55  ;;  %22777 = vst [vmem:[#allocation95_spill] sm:$0xff] %v14253_v22  ;;  %22778 = vst [vmem:[#allocation96_spill] sm:$0xff] %v14257_v24  ;;  %v14278_v31 = vpack.c.bf16 %v263_v41, %v261_v47  ;;  %v1565_v41 = vadd.f32 %v13624_v9, %v1556_v42 }
 0x25c   :  { %9127 = vmatpush1.bf16.msra.mxu1 %v14184_v29  ;;  %8945 = vmatprep.subr.bf16.mxu0 %v14230_v43  ;;  %v1181_v29 = vsel %vm323_vm0, %v13415_v40, %v14087_v21  ;;  %v270_v40 = vld [vmem:[%s22344_s3 + $0x5c8] sm:$0xff]  ;;  %v272_v21 = vld [vmem:[%s22344_s3 + $0x5d8] sm:$0xff] }
 0x25d   :  { %9129 = vmatprep.subr.bf16.mxu1 %v14191_v16  ;;  %v462_v36 = vpop.permute.xlu0 %461  ;;  %22779 = vst [vmem:[#allocation97_spill] sm:$0xff] %v14278_v31 }
 0x25e   :  { %v471_v30 = vsel %vm465_vm3, %v462_v36, %v14075_v33  ;;  %v14285_v33 = vpack.c.bf16 %v268_v4, %v266_v60  ;;  %v1231_v60 = vsel %vm374_vm1, %v13547_v28, %v14150_v7  ;;  %v1602_v4 = vsel %vm323_vm0, %v13629_v2, %v14199_v48 }
 0x25f   :  { %v483_v16 = vmax.f32 %v13829_v56, %v471_v30  ;;  %8947 = vmatpush1.bf16.msra.mxu0 %v14253_v22  ;;  %v265_v56 = vld [vmem:[%s22344_s3 + $0x5a0] sm:$0xff]  ;;  %v22529_v28 = vunpack.i.l.bf16 %v14238_v51  ;;  %v14318_v2 = vpack.c.bf16 %v272_v21, %v270_v40  ;;  %v1615_v7 = vadd.f32 %v1602_v4, %v1565_v41  ;;  %v274_v4 = vld [vmem:[%s22344_s3 + $0x5e8] sm:$0x7] }
 0x260   :  { %9131 = vmatpush1.bf16.msra.mxu1 %v14224_v55  ;;  %8949 = vmatprep.subr.bf16.mxu0 %v14257_v24  ;;  %22780 = vst [vmem:[#allocation98_spill] sm:$0xff] %v14285_v33  ;;  %v22528_v55 = vunpack.i.h.bf16 %v14238_v51 }
 0x261   :  { %9133 = vmatprep.subr.bf16.mxu1 %v14230_v43  ;;  %v892_v47 = vpop.permute.xlu0 %891  ;;  %8321 = vmatprep.mubr.msk.f32.mxu0 %vm484_vm4, %v483_v16  ;;  %v1194_v16 = vadd.f32 %v1181_v29, %v1144_v59  ;;  %v14312_v43 = vpack.c.bf16 %v267_v3, %v265_v56  ;;  %22782 = vst [vmem:[#allocation100_spill] sm:$0xff] %v14318_v2  ;;  %v271_v29 = vld [vmem:[%s22344_s3 + $0x5d0] sm:$0xff]  ;;  %v12187_v56 = vunpack.i.h.bf16 %v14170_v25 }
 0x262   :  { %v900_v42 = vsel %vm465_vm3, %v892_v47, %v14099_v23  ;;  %v1697_v41 = vsel %vm423_vm2, %v22529_v28, %v22528_v55  ;;  %v22808_v55 = vld [vmem:[#allocation36_spill] sm:$0xff]  ;;  %v1557_v28 = vmul.f32 %v14124_v37, %v13579_v38 }
 0x263   :  { %v912_v30 = vmax.f32 %v13858_v14, %v900_v42  ;;  %8951 = vmatpush1.bf16.msra.mxu0 %v14278_v31  ;;  %22781 = vst [vmem:[#allocation99_spill] sm:$0xff] %v14312_v43  ;;  %v269_v14 = vld [vmem:[%s22344_s3 + $0x5c0] sm:$0xff]  ;;  %v14326_v23 = vadd.f32 %v1231_v60, %v1194_v16  ;;  %v22784_v42 = vunpack.i.l.bf16 %v14111_v53  ;;  %v22787_v53 = vmax.f32 %v13702_v44, 0.0  ;;  %v22789_v44 = vld [vmem:[#allocation17_spill] sm:$0xff] }
 0x264   :  { %9135 = vmatpush1.bf16.msra.mxu1 %v14253_v22  ;;  %8953 = vmatprep.subr.bf16.mxu0 %v14285_v33  ;;  %v14339_v21 = vpack.c.bf16 %v271_v29, %v269_v14  ;;  %v22848_v22 = vmax.f32 %v13977_v5, 0.0 }
 0x265   :  { %9137 = vmatprep.subr.bf16.mxu1 %v14257_v24  ;;  %v14328_v59 = vpop.permute.xlu0 %1644  ;;  %8328 = vmatprep.mubr.msk.f32.mxu1 %vm484_vm4, %v912_v30  ;;  %v1275_v16 = vsel %vm423_vm2, %v12187_v56, %v22784_v42  ;;  %v22785_v30 = vunpack.i.h.bf16 %v13912_v13  ;;  %v273_v13 = vld [vmem:[%s22344_s3 + $0x5e0] sm:$0x7]  ;;  %v22853_v5 = vmax.f32 %v14326_v23, 0.0 }
 0x266   :  { %v1652_v3 = vsel %vm374_vm1, %v13941_v61, %v14328_v59  ;;  %22783 = vst [vmem:[#allocation101_spill] sm:$0xff] %v14339_v21  ;;  %v22526_v61 = vmax.f32 %v14326_v23, 0.0 }
 0x267   :  { %v14335_v40 = vadd.f32 %v1652_v3, %v1615_v7  ;;  %8955 = vmatpush1.bf16.msra.mxu0 %v14312_v43  ;;  %v470_v14 = vsel %vm465_vm3, %v22785_v30, %v462_v36  ;;  %v22786_v7 = vmax.f32 %v13737_v0, 0.0  ;;  %v14377_v36 = vmax.f32 %v22787_v53, %v1275_v16  ;;  %v22794_v16 = vld [vmem:[#allocation22_spill] sm:$0xff]  ;;  %v22795_v30 = vld [vmem:[#allocation23_spill] sm:$0xff]  ;;  %v22800_v53 = vld [vmem:[#allocation28_spill] sm:$0xff] }
 0x268   :  { %9139 = vmatpush1.bf16.msra.mxu1 %v14278_v31  ;;  %8957 = vmatprep.subr.bf16.mxu0 %v14318_v2  ;;  %v482_v56 = vmax.f32 %v13355_v46, %v470_v14  ;;  %v22788_v0 = vunpack.i.h.bf16 %v13939_v39  ;;  %v22791_v39 = vld [vmem:[#allocation19_spill] sm:$0xff]  ;;  %v22796_v14 = vld [vmem:[#allocation24_spill] sm:$0xff] }
 0x269   :  { %9141 = vmatprep.subr.bf16.mxu1 %v14285_v33  ;;  %v22527_v60 = vmax.f32 %v14335_v40, 0.0  ;;  %v14367_v3 = vmax.f32 %v22786_v7, %v1697_v41  ;;  %v22798_v7 = vld [vmem:[#allocation26_spill] sm:$0xff] }
 0x26a   :  { %v899_v41 = vsel %vm465_vm3, %v22788_v0, %v892_v47  ;;  %v22792_v47 = vld [vmem:[#allocation20_spill] sm:$0xff]  ;;  %v22802_v0 = vld [vmem:[#allocation30_spill] sm:$0xff] }
 0x26b   :  { %8959 = vmatpush1.bf16.msra.mxu0 %v14339_v21  ;;  %v12198_v29 = vpack.i.bf16 %v22527_v60, %v22526_v61  ;;  %v12208_v42 = vpack.i.bf16 %v14367_v3, %v14377_v36  ;;  %v911_v46 = vmax.f32 %v13398_v57, %v899_v41  ;;  %v22790_v57 = vld [vmem:[#allocation18_spill] sm:$0xff]  ;;  %v22803_v41 = vld [vmem:[#allocation31_spill] sm:$0xff] }
 0x26c   :  { %9143 = vmatpush1.bf16.msra.mxu1 %v14312_v43  ;;  %8319 = vmatprep.subr.msk.mxu0 %vm488_vm5, %v274_v4  ;;  %v22806_v61 = vld [vmem:[#allocation34_spill] sm:$0xff]  ;;  %v22807_v60 = vld [vmem:[#allocation35_spill] sm:$0xff]  ;;  %v22847_v43 = vunpack.i.l.bf16 %v14170_v25  ;;  %v22849_v25 = vmax.f32 %v14335_v40, 0.0 }
 0x26d   :  { %9145 = vmatprep.subr.bf16.mxu1 %v14318_v2  ;;  %12199 = vrot.lane.b32.xlu1 %v12198_v29, %s12408_s22  ;;  %v22797_v29 = vld [vmem:[#allocation25_spill] sm:$0xff] }
 0x26f   :  { %8320 = vmatpush1.msk.msra.mxu0 %vm488_vm5, %v273_v13 }
 0x270   :  { %9147 = vmatpush1.bf16.msra.mxu1 %v14339_v21  ;;  %702 = vmatmul.mubr.f32.vlgmr.msra.gmra.mrb[0].mxu0 %v482_v56  ;;  %v22801_v56 = vld [vmem:[#allocation29_spill] sm:$0xff] }
 0x271   :  { %8326 = vmatprep.subr.msk.mxu1 %vm488_vm5, %v274_v4  ;;  %12209 = vrot.lane.b32.xlu1 %v12208_v42, %s12409_s24  ;;  %v22793_v4 = vld [vmem:[#allocation21_spill] sm:$0xff]  ;;  %v22804_v42 = vld [vmem:[#allocation32_spill] sm:$0xff] }
 0x272   :  { %9149 = vmatprep.subr.bf16.mxu0 %v12795_v20 }
 0x273   :  { %9151 = vmatpush1.bf16.msra.mxu0 %v12806_v32 }
 0x274   :  { %8327 = vmatpush1.msk.msra.mxu1 %vm488_vm5, %v273_v13  ;;  %9153 = vmatprep.subr.bf16.mxu0 %v12808_v35  ;;  %v22799_v13 = vld [vmem:[#allocation27_spill] sm:$0xff] }
 0x275   :  { %1123 = vmatmul.mubr.f32.vlgmr.msra.gmra.mrb[0].mxu1 %v911_v46  ;;  %9337 = vmatprep.subr.bf16.mxu1 %v12795_v20  ;;  %v22805_v46 = vld [vmem:[#allocation33_spill] sm:$0xff] }
 0x276   :  { %9339 = vmatpush1.bf16.msra.mxu1 %v12806_v32 }
 0x277   :  { %9155 = vmatpush1.bf16.msra.mxu0 %v12826_v49  ;;  %9341 = vmatprep.subr.bf16.mxu1 %v12808_v35 }
 0x278   :  { %9157 = vmatprep.subr.bf16.mxu0 %v12830_v50 }
 0x27a   :  { %9343 = vmatpush1.bf16.msra.mxu1 %v12826_v49  ;;  %v22846_v49 = vld [vmem:[#allocation69_spill] sm:$0xff] }
 0x27b   :  { %9159 = vmatpush1.bf16.msra.mxu0 %v12846_v6  ;;  %9345 = vmatprep.subr.bf16.mxu1 %v12830_v50 }
 0x27c   :  { %9161 = vmatprep.subr.bf16.mxu0 %v12850_v12 }
 0x27e   :  { %9347 = vmatpush1.bf16.msra.mxu1 %v12846_v6  ;;  %v22845_v6 = vld [vmem:[#allocation68_spill] sm:$0xff] }
 0x27f   :  { %9163 = vmatpush1.bf16.msra.mxu0 %v12866_v27  ;;  %9349 = vmatprep.subr.bf16.mxu1 %v12850_v12  ;;  %v22844_v12 = vld [vmem:[#allocation67_spill] sm:$0xff] }
 0x280   :  { %9165 = vmatprep.subr.bf16.mxu0 %v12870_v45 }
 0x282   :  { %9351 = vmatpush1.bf16.msra.mxu1 %v12866_v27  ;;  %v22843_v27 = vld [vmem:[#allocation66_spill] sm:$0xff] }
 0x283   :  { %9167 = vmatpush1.bf16.msra.mxu0 %v22789_v44  ;;  %9353 = vmatprep.subr.bf16.mxu1 %v12870_v45  ;;  %v22842_v45 = vld [vmem:[#allocation65_spill] sm:$0xff] }
 0x284   :  { %9169 = vmatprep.subr.bf16.mxu0 %v22790_v57 }
 0x286   :  { %9355 = vmatpush1.bf16.msra.mxu1 %v22789_v44  ;;  %v22841_v44 = vld [vmem:[#allocation64_spill] sm:$0xff] }
 0x287   :  { %9171 = vmatpush1.bf16.msra.mxu0 %v22791_v39  ;;  %9357 = vmatprep.subr.bf16.mxu1 %v22790_v57  ;;  %v22840_v57 = vld [vmem:[#allocation63_spill] sm:$0xff] }
 0x288   :  { %9173 = vmatprep.subr.bf16.mxu0 %v22792_v47 }
 0x28a   :  { %9359 = vmatpush1.bf16.msra.mxu1 %v22791_v39  ;;  %v22839_v39 = vld [vmem:[#allocation62_spill] sm:$0xff] }
 0x28b   :  { %9175 = vmatpush1.bf16.msra.mxu0 %v22793_v4  ;;  %9361 = vmatprep.subr.bf16.mxu1 %v22792_v47 }
 0x28c   :  { %9177 = vmatprep.subr.bf16.mxu0 %v22794_v16 }
 0x28e   :  { %9363 = vmatpush1.bf16.msra.mxu1 %v22793_v4 }
 0x28f   :  { %9179 = vmatpush1.bf16.msra.mxu0 %v22795_v30  ;;  %9365 = vmatprep.subr.bf16.mxu1 %v22794_v16 }
 0x290   :  { %9181 = vmatprep.subr.bf16.mxu0 %v22796_v14 }
 0x292   :  { %9367 = vmatpush1.bf16.msra.mxu1 %v22795_v30 }
 0x293   :  { %9183 = vmatpush1.bf16.msra.mxu0 %v22797_v29  ;;  %9369 = vmatprep.subr.bf16.mxu1 %v22796_v14 }
 0x294   :  { %9185 = vmatprep.subr.bf16.mxu0 %v22798_v7 }
 0x296   :  { %9371 = vmatpush1.bf16.msra.mxu1 %v22797_v29 }
 0x297   :  { %9187 = vmatpush1.bf16.msra.mxu0 %v22799_v13  ;;  %9373 = vmatprep.subr.bf16.mxu1 %v22798_v7 }
 0x298   :  { %9189 = vmatprep.subr.bf16.mxu0 %v22800_v53 }
 0x29a   :  { %9375 = vmatpush1.bf16.msra.mxu1 %v22799_v13 }
 0x29b   :  { %9191 = vmatpush1.bf16.msra.mxu0 %v22801_v56  ;;  %9377 = vmatprep.subr.bf16.mxu1 %v22800_v53 }
 0x29c   :  { %9193 = vmatprep.subr.bf16.mxu0 %v22802_v0 }
 0x29e   :  { %9379 = vmatpush1.bf16.msra.mxu1 %v22801_v56  ;;  %v22812_v56 = vunpack.i.h.bf16 %v14238_v51 }
 0x29f   :  { %9195 = vmatpush1.bf16.msra.mxu0 %v22803_v41  ;;  %9381 = vmatprep.subr.bf16.mxu1 %v22802_v0  ;;  %v22809_v0 = vld [vmem:[#allocation37_spill] sm:$0xff] }
 0x2a0   :  { %9197 = vmatprep.subr.bf16.mxu0 %v22804_v42 }
 0x2a2   :  { %9383 = vmatpush1.bf16.msra.mxu1 %v22803_v41  ;;  %v14450_v41 = vpop.permute.xlu1 %1596 }
 0x2a3   :  { %9199 = vmatpush1.bf16.msra.mxu0 %v22805_v46  ;;  %9385 = vmatprep.subr.bf16.mxu1 %v22804_v42  ;;  %v22810_v42 = vld [vmem:[#allocation39_spill] sm:$0xff]  ;;  %v1603_v37 = vsel %vm323_vm0, %v14199_v48, %v14450_v41  ;;  %v14479_v48 = vld [vmem:[%s22341_s0 + $0x30] sm:$0xff] }
 0x2a4   :  { %9201 = vmatprep.subr.bf16.mxu0 %v22806_v61  ;;  %22813 = vst [vmem:[#allocation102_spill] sm:$0xff] %v14479_v48  ;;  %v1137_v53 = vmul.f32 %v14479_v48, %v13408_v11 }
 0x2a6   :  { %9387 = vmatpush1.bf16.msra.mxu1 %v22805_v46 }
 0x2a7   :  { %9203 = vmatpush1.bf16.msra.mxu0 %v22807_v60  ;;  %9389 = vmatprep.subr.bf16.mxu1 %v22806_v61  ;;  %v1566_v61 = vadd.f32 %v13624_v9, %v1557_v28 }
 0x2a8   :  { %9205 = vmatprep.subr.bf16.mxu0 %v22808_v55 }
 0x2a9   :  { %v1616_v13 = vadd.f32 %v1603_v37, %v1566_v61  ;;  %v14501_v61 = vstv %s8345_s25  ;;  %s8350_s25 = sld [smem:[#allocation2 + $0x5]] }
 0x2aa   :  { %9391 = vmatpush1.bf16.msra.mxu1 %v22807_v60 }
 0x2ab   :  { %9207 = vmatpush1.bf16.msra.mxu0 %v22809_v0  ;;  %9393 = vmatprep.subr.bf16.mxu1 %v22808_v55 }
 0x2ac   :  { %9209 = vmatprep.subr.bf16.mxu0 %v13143_v58 }
 0x2ae   :  { %9395 = vmatpush1.bf16.msra.mxu1 %v22809_v0  ;;  %v14457_v46 = vpop.permute.xlu1 %12194  ;;  %v22811_v0 = vunpack.i.l.bf16 %v14238_v51  ;;  %v22815_v51 = vmax.f32 %v13771_v1, 0.0  ;;  %v12353_v1 = vld [vmem:[%s22341_s0 + $0x38] sm:$0xff] }
 0x2af   :  { %9211 = vmatpush1.bf16.msra.mxu0 %v22810_v42  ;;  %9397 = vmatprep.subr.bf16.mxu1 %v13143_v58  ;;  %v12197_v60 = vunpack.i.h.bf16 %v14457_v46  ;;  %v22544_v55 = vunpack.i.l.bf16 %v14457_v46 }
 0x2b0   :  { %9213 = vmatprep.subr.bf16.mxu0 %v13316_v34 }
 0x2b1   :  { %v1696_v28 = vsel %vm423_vm2, %v12197_v60, %v22811_v0  ;;  %v1698_v58 = vsel %vm423_vm2, %v22812_v56, %v22544_v55  ;;  %v22814_v60 = vmax.f32 %v13993_v15, 0.0  ;;  %v1146_v15 = vadd.f32 %v13446_v8, %v1137_v53  ;;  %v12354_v8 = vld [vmem:[%s22341_s0 + $0x40] sm:$0xff]  ;;  %v12355_v53 = vld [vmem:[%s22341_s0 + $0x48] sm:$0xff] }
 0x2b2   :  { %9399 = vmatpush1.bf16.msra.mxu1 %v22810_v42  ;;  %v14483_v7 = vpop.permute.xlu1 %1646  ;;  %v14491_v56 = vmax.f32 %v22815_v51, %v1698_v58  ;;  %v22547_v58 = vmax.f32 %v14226_v54, 0.0 }
 0x2b3   :  { %v14487_v0 = vmax.f32 %v22814_v60, %v1696_v28  ;;  %9401 = vmatprep.subr.bf16.mxu1 %v13316_v34  ;;  %v1653_v55 = vsel %vm374_vm1, %v14328_v59, %v14483_v7  ;;  %v1196_v59 = vadd.f32 %v14130_v10, %v1146_v15  ;;  %v1994_v28 = vmul.f32 %v12355_v53, %v14501_v61  ;;  %v12356_v60 = vld [vmem:[%s22341_s0 + $0x50] sm:$0xff] }
 0x2b4   :  { %22816 = vst [vmem:[#allocation103_spill] sm:$0xff] %v14491_v56  ;;  %v14497_v42 = vadd.f32 %v1653_v55, %v1616_v13  ;;  %v1992_v55 = vmul.f32 %v12353_v1, %v14501_v61  ;;  %v1993_v13 = vmul.f32 %v12354_v8, %v14501_v61  ;;  %v1995_v51 = vmul.f32 %v12356_v60, %v14501_v61 }
 0x2b5   :  { %v12213_v11 = vpack.i.bf16 %v14487_v0, %v14491_v56  ;;  %v14528_v10 = vadd.f32 %v14215_v26, %v1196_v59  ;;  %v1991_v26 = vmul.f32 %v14479_v48, %v14501_v61 }
 0x2b6   :  { %v22546_v37 = vmax.f32 %v14497_v42, 0.0 }
 0x2b7   :  { %12214 = vrot.lane.b32.xlu0 %v12213_v11, %s12409_s24  ;;  %v14536_v11 = vstv %s8346_s30  ;;  %v22548_v15 = vmax.f32 %v14528_v10, 0.0  ;;  %s8353_s30 = sld [smem:[#allocation2 + $0x105]] }
 0x2b8   :  { %1692 = vrot.lane.b32.xlu1 %v22546_v37, %s12408_s22 }
 0x2bb   :  { %1271 = vrot.lane.b32.xlu0 %v22547_v58, %s12408_s22  ;;  %v14562_v58 = vstv %s8352_s19 }
 0x2bc   :  { %2007 = vrot.lane.b32.xlu1 %v1992_v55, %s12406_s21  ;;  %v12357_v55 = vld [vmem:[%s22341_s0 + $0x70] sm:$0xff]  ;;  %v2414_v30 = vmul.f32 %v12354_v8, %v14562_v58  ;;  %v2416_v47 = vmul.f32 %v12356_v60, %v14562_v58 }
 0x2bd   :  { %v2043_v59 = vmul.f32 %v12357_v55, %v14536_v11 }
 0x2bf   :  { %2009 = vrot.lane.b32.xlu0 %v1993_v13, %s12406_s21  ;;  %v12358_v13 = vld [vmem:[%s22341_s0 + $0x68] sm:$0xff] }
 0x2c0   :  { %2011 = vrot.lane.b32.xlu1 %v1994_v28, %s12406_s21  ;;  %v2042_v28 = vmul.f32 %v12358_v13, %v14536_v11 }
 0x2c3   :  { %2013 = vrot.lane.b32.xlu0 %v1995_v51, %s12406_s21  ;;  %v14558_v51 = vld [vmem:[%s22341_s0 + $0x80] sm:$0xff] }
 0x2c4   :  { %1273 = vrot.lane.b32.xlu1 %v22548_v15, %s12408_s22  ;;  %v2045_v37 = vmul.f32 %v14558_v51, %v14536_v11  ;;  %v12360_v15 = vld [vmem:[%s22341_s0 + $0x78] sm:$0xff] }
 0x2c7   :  { %2005 = vrot.lane.b32.xlu0 %v1991_v26, %s12406_s21  ;;  %v1558_v26 = vmul.f32 %v14479_v48, %v13579_v38 }
 0x2c8   :  { %2059 = vrot.lane.b32.xlu1 %v2043_v59, %s12407_s2  ;;  %v2044_v59 = vmul.f32 %v12360_v15, %v14536_v11 }
 0x2c9   :  { %v1567_v38 = vadd.f32 %v13624_v9, %v1558_v26  ;;  %v2415_v9 = vmul.f32 %v12355_v53, %v14562_v58  ;;  %v22818_v53 = vunpack.i.l.bf16 %v14457_v46  ;;  %v22823_v46 = vld [vmem:[#allocation45_spill] sm:$0xff] }
 0x2cb   :  { %2057 = vrot.lane.b32.xlu0 %v2042_v28, %s12407_s2  ;;  %v2413_v28 = vmul.f32 %v12353_v1, %v14562_v58  ;;  %v2041_v1 = vmul.f32 %v13672_v63, %v14536_v11 }
 0x2cc   :  { %v14571_v34 = vpop.permute.xlu0 %12204  ;;  %2063 = vrot.lane.b32.xlu1 %v2045_v37, %s12407_s2  ;;  %v1617_v37 = vadd.f32 %v14450_v41, %v1567_v38  ;;  %v22819_v38 = vld [vmem:[#allocation41_spill] sm:$0xff] }
 0x2cd   :  { %22817 = vst [vmem:[#allocation104_spill] sm:$0xff] %v14571_v34  ;;  %v22557_v29 = vunpack.i.h.bf16 %v14571_v34  ;;  %v12206_v14 = vunpack.i.l.bf16 %v14571_v34 }
 0x2ce   :  { %v14590_v8 = vadd.f32 %v14483_v7, %v1617_v37  ;;  %v22822_v37 = vld [vmem:[#allocation44_spill] sm:$0xff] }
 0x2cf   :  { %2061 = vrot.lane.b32.xlu0 %v2044_v59, %s12407_s2  ;;  %v1317_v16 = vsel %vm465_vm3, %v12206_v14, %v22557_v29  ;;  %v22836_v29 = vld [vmem:[#allocation59_spill] sm:$0xff] }
 0x2d0   :  { %v1329_v4 = vmax.f32 %v14203_v18, %v1317_v16  ;;  %2430 = vrot.lane.b32.xlu1 %v2414_v30, %s12406_s21  ;;  %v14595_v18 = vstv %s8353_s30 }
 0x2d1   :  { %v2463_v16 = vmul.f32 %v12358_v13, %v14595_v18  ;;  %v2465_v63 = vmul.f32 %v12360_v15, %v14595_v18  ;;  %v2464_v30 = vmul.f32 %v12357_v55, %v14595_v18  ;;  %v22820_v55 = vld [vmem:[#allocation42_spill] sm:$0xff] }
 0x2d2   :  { %1401 = vmatprep.mubr.f32.mxu0 %v1329_v4  ;;  %v22558_v4 = vmax.f32 %v14590_v8, 0.0 }
 0x2d3   :  { %2428 = vrot.lane.b32.xlu0 %v2413_v28, %s12406_s21  ;;  %v22821_v28 = vld [vmem:[#allocation43_spill] sm:$0xff] }
 0x2d4   :  { %2434 = vrot.lane.b32.xlu1 %v2416_v47, %s12406_s21  ;;  %v2412_v47 = vmul.f32 %v14479_v48, %v14562_v58  ;;  %v22838_v48 = vld [vmem:[#allocation61_spill] sm:$0xff] }
 0x2d7   :  { %2432 = vrot.lane.b32.xlu0 %v2415_v9, %s12406_s21  ;;  %v22824_v9 = vld [vmem:[#allocation46_spill] sm:$0xff] }
 0x2d8   :  { %2055 = vrot.lane.b32.xlu1 %v2041_v1, %s12407_s2  ;;  %v22825_v1 = vld [vmem:[#allocation47_spill] sm:$0xff] }
 0x2db   :  { %1694 = vrot.lane.b32.xlu0 %v22558_v4, %s12408_s22  ;;  %v22837_v4 = vld [vmem:[#allocation60_spill] sm:$0xff] }
 0x2dc   :  { %2478 = vrot.lane.b32.xlu1 %v2463_v16, %s12407_s2  ;;  %v22826_v16 = vld [vmem:[#allocation48_spill] sm:$0xff] }
 0x2df   :  { %2426 = vrot.lane.b32.xlu0 %v2412_v47, %s12406_s21  ;;  %v12200_v7 = vpop.permute.xlu1 %12199  ;;  %v22829_v47 = vld [vmem:[#allocation51_spill] sm:$0xff] }
 0x2e0   :  { %v12202_v41 = vunpack.i.h.bf16 %v12200_v7  ;;  %2482 = vrot.lane.b32.xlu1 %v2465_v63, %s12407_s2  ;;  %v22830_v63 = vld [vmem:[#allocation52_spill] sm:$0xff]  ;;  %v12201_v50 = vunpack.i.l.bf16 %v12200_v7 }
 0x2e2   :  { %v1699_v60 = vsel %vm423_vm2, %v22818_v53, %v12202_v41  ;;  %v22832_v53 = vld [vmem:[#allocation54_spill] sm:$0xff]  ;;  %v1278_v33 = vsel %vm423_vm2, %v22847_v43, %v12201_v50 }
 0x2e3   :  { %2480 = vrot.lane.b32.xlu0 %v2464_v30, %s12407_s2  ;;  %v12210_v13 = vpop.permute.xlu1 %12209  ;;  %v22831_v30 = vld [vmem:[#allocation53_spill] sm:$0xff]  ;;  %v14667_v34 = vmax.f32 %v22848_v22, %v1699_v60  ;;  %v14690_v60 = vstv %s8343_s13 }
 0x2e4   :  { %v12211_v26 = vunpack.i.l.bf16 %v12210_v13  ;;  %v12212_v32 = vunpack.i.h.bf16 %v12210_v13 }
 0x2e6   :  { %v1316_v59 = vsel %vm465_vm3, %v12211_v26, %v12206_v14  ;;  %v22827_v14 = vld [vmem:[#allocation49_spill] sm:$0xff]  ;;  %v22833_v26 = vld [vmem:[#allocation55_spill] sm:$0xff] }
 0x2e7   :  { %v1328_v15 = vmax.f32 %v14377_v36, %v1316_v59  ;;  %v22828_v36 = vld [vmem:[#allocation50_spill] sm:$0xff]  ;;  %v22834_v59 = vld [vmem:[#allocation56_spill] sm:$0xff] }
 0x2e9   :  { %1402 = vmatmul.mubr.f32.vlgmr.msra.gmra.mrb[2].mxu0 %v1328_v15  ;;  %v22835_v15 = vld [vmem:[#allocation58_spill] sm:$0xff] }
 0x2ea   :  { %9215 = vmatpush1.bf16.msra.mxu0 %v22819_v38 }
 0x2eb   :  { %9217 = vmatprep.subr.bf16.mxu0 %v22820_v55 }
 0x2ee   :  { %9219 = vmatpush1.bf16.msra.mxu0 %v22821_v28 }
 0x2ef   :  { %9221 = vmatprep.subr.bf16.mxu0 %v22822_v37 }
 0x2f2   :  { %9223 = vmatpush1.bf16.msra.mxu0 %v22823_v46 }
 0x2f3   :  { %9225 = vmatprep.subr.bf16.mxu0 %v22824_v9 }
 0x2f6   :  { %9227 = vmatpush1.bf16.msra.mxu0 %v22825_v1 }
 0x2f7   :  { %9229 = vmatprep.subr.bf16.mxu0 %v22826_v16 }
 0x2fa   :  { %9231 = vmatpush1.bf16.msra.mxu0 %v22827_v14 }
 0x2fb   :  { %9233 = vmatprep.subr.bf16.mxu0 %v22828_v36 }
 0x2fe   :  { %9235 = vmatpush1.bf16.msra.mxu0 %v22829_v47 }
 0x2ff   :  { %9237 = vmatprep.subr.bf16.mxu0 %v22830_v63 }
 0x302   :  { %9239 = vmatpush1.bf16.msra.mxu0 %v22831_v30 }
 0x303   :  { %9241 = vmatprep.subr.bf16.mxu0 %v22832_v53 }
 0x306   :  { %9243 = vmatpush1.bf16.msra.mxu0 %v22833_v26 }
 0x307   :  { %9245 = vmatprep.subr.bf16.mxu0 %v22834_v59 }
 0x30a   :  { %9247 = vmatpush1.bf16.msra.mxu0 %v22835_v15 }
 0x30b   :  { %9249 = vmatprep.subr.bf16.mxu0 %v13683_v62 }
 0x30e   :  { %9251 = vmatpush1.bf16.msra.mxu0 %v13710_v17 }
 0x30f   :  { %9253 = vmatprep.subr.bf16.mxu0 %v13716_v19 }
 0x312   :  { %9255 = vmatpush1.bf16.msra.mxu0 %v13741_v52 }
 0x313   :  { %9257 = vmatprep.subr.bf16.mxu0 %v22836_v29 }
 0x316   :  { %9259 = vmatpush1.bf16.msra.mxu0 %v22837_v4 }
 0x317   :  { %9261 = vmatprep.subr.bf16.mxu0 %v22838_v48 }
 0x31a   :  { %9263 = vmatpush1.bf16.msra.mxu0 %v22839_v39 }
 0x31b   :  { %9265 = vmatprep.subr.bf16.mxu0 %v22840_v57 }
 0x31e   :  { %9267 = vmatpush1.bf16.msra.mxu0 %v22841_v44 }
 0x31f   :  { %9269 = vmatprep.subr.bf16.mxu0 %v22842_v45 }
 0x322   :  { %9271 = vmatpush1.bf16.msra.mxu0 %v22843_v27 }
 0x323   :  { %9273 = vmatprep.subr.bf16.mxu0 %v22844_v12 }
 0x326   :  { %9275 = vmatpush1.bf16.msra.mxu0 %v22845_v6 }
 0x327   :  { %9277 = vmatprep.subr.bf16.mxu0 %v22846_v49 }
 0x329   :  { %v14649_v35 = vpop.permute.xlu0 %12214 }
 0x32a   :  { %v12217_v20 = vunpack.i.h.bf16 %v14649_v35  ;;  %v22597_v21 = vunpack.i.l.bf16 %v14649_v35  ;;  %v14653_v2 = vpop.permute.xlu1 %1692 }
 0x32b   :  { %v1700_v7 = vsel %vm423_vm2, %v12202_v41, %v14653_v2 }
 0x32c   :  { %v1737_v31 = vsel %vm465_vm3, %v12217_v20, %v12212_v32  ;;  %v1738_v24 = vsel %vm465_vm3, %v12212_v32, %v22597_v21  ;;  %v14671_v56 = vmax.f32 %v22849_v25, %v1700_v7  ;;  %v22851_v21 = vld [vmem:[#allocation57_spill] sm:$0xff]  ;;  %v14714_v25 = vstv %s8344_s14 }
 0x32d   :  { %v1749_v13 = vmax.f32 %v14487_v0, %v1737_v31  ;;  %v14673_v43 = vpop.permute.xlu0 %1271  ;;  %v1750_v20 = vmax.f32 %v14367_v3, %v1738_v24  ;;  %v22852_v31 = vmax.f32 %v22851_v21, 0.0  ;;  %v14707_v21 = vld [vmem:[%s22341_s0 + $0x8] sm:$0xff] }
 0x32e   :  { %22850 = vst [vmem:[#allocation52_spill] sm:$0xff] %v14671_v56  ;;  %v1279_v41 = vsel %vm423_vm2, %v12201_v50, %v14673_v43  ;;  %v12223_v32 = vpack.i.bf16 %v14671_v56, %v14667_v34  ;;  %v14688_v40 = vpop.permute.xlu1 %2007  ;;  %v1974_v3 = vmul.f32 %v14707_v21, %v14690_v60 }
 0x32f   :  { %v14682_v0 = vmax.f32 %v22852_v31, %v1278_v33  ;;  %v14686_v22 = vmax.f32 %v22853_v5, %v1279_v41  ;;  %1822 = vmatprep.mubr.f32.mxu1 %v1750_v20  ;;  %v14698_v33 = vld [vmem:[%s22341_s0 + $0x60] sm:$0xff]  ;;  %v14732_v5 = vld [vmem:[%s22341_s0 + $0x58] sm:$0xff] }
 0x330   :  { %1823 = vmatmul.mubr.f32.vlgmr.msra.gmra.mrb[2].mxu1 %v1749_v13  ;;  %12224 = vrot.lane.b32.xlu1 %v12223_v32, %s12409_s24  ;;  %v2462_v23 = vmul.f32 %v14698_v33, %v14595_v18  ;;  %v2466_v13 = vmul.f32 %v14558_v51, %v14595_v18  ;;  %v1983_v41 = vadd.f32 %v14714_v25, %v1974_v3  ;;  %v12363_v32 = vld [vmem:[%s22341_s0 + $0x10] sm:$0xff]  ;;  %v22855_v3 = vmax.f32 %v14528_v10, 0.0 }
 0x331   :  { %22854 = vst [vmem:[#allocation53_spill] sm:$0xff] %v14686_v22  ;;  %v12218_v50 = vpack.i.bf16 %v14686_v22, %v14682_v0  ;;  %v2010_v24 = vpop.permute.xlu0 %2009  ;;  %9403 = vmatpush1.bf16.msra.mxu1 %v22819_v38  ;;  %v1975_v31 = vmul.f32 %v12363_v32, %v14690_v60 }
 0x332   :  { %9405 = vmatprep.subr.bf16.mxu1 %v22820_v55  ;;  %v2012_v7 = vpop.permute.xlu1 %2011 }
 0x333   :  { %12219 = vrot.lane.b32.xlu0 %v12218_v50, %s12409_s24  ;;  %v1996_v50 = vmul.f32 %v14732_v5, %v14501_v61  ;;  %v1984_v55 = vadd.f32 %v14714_v25, %v1975_v31  ;;  %v2021_v22 = vsel %vm323_vm0, %v2010_v24, %v2012_v7 }
 0x334   :  { %2476 = vrot.lane.b32.xlu1 %v2462_v23, %s12407_s2  ;;  %v2020_v23 = vsel %vm323_vm0, %v14688_v40, %v2010_v24 }
 0x335   :  { %v14716_v20 = vpop.permute.xlu0 %2013  ;;  %9407 = vmatpush1.bf16.msra.mxu1 %v22821_v28 }
 0x336   :  { %9409 = vmatprep.subr.bf16.mxu1 %v22822_v37  ;;  %v14727_v51 = vpop.permute.xlu1 %1273 }
 0x337   :  { %2484 = vrot.lane.b32.xlu0 %v2466_v13, %s12407_s2  ;;  %v1294_v37 = vmax.f32 %v22855_v3, %v14727_v51  ;;  %v2033_v13 = vadd.f32 %v2020_v23, %v1983_v41  ;;  %v2034_v3 = vadd.f32 %v2021_v22, %v1984_v55  ;;  %v22856_v41 = vld [vmem:[#allocation70_spill] sm:$0xff] }
 0x338   :  { %v1976_v31 = vmul.f32 %v22856_v41, %v14690_v60  ;;  %v2022_v41 = vsel %vm323_vm0, %v2012_v7, %v14716_v20 }
 0x339   :  { %v2006_v28 = vpop.permute.xlu0 %2005  ;;  %9411 = vmatpush1.bf16.msra.mxu1 %v22823_v46  ;;  %1314 = vrot.lane.b32.xlu1 %v1294_v37, %s12409_s24 }
 0x33a   :  { %9413 = vmatprep.subr.bf16.mxu1 %v22824_v9  ;;  %v2060_v38 = vpop.permute.xlu1 %2059 }
 0x33b   :  { %2015 = vrot.lane.b32.xlu0 %v1996_v50, %s12406_s21  ;;  %v22857_v50 = vld [vmem:[#allocation71_spill] sm:$0xff] }
 0x33c   :  { %v1973_v23 = vmul.f32 %v22857_v50, %v14690_v60 }
 0x33d   :  { %v2058_v56 = vpop.permute.xlu0 %2057  ;;  %9415 = vmatpush1.bf16.msra.mxu1 %v22825_v1 }
 0x33e   :  { %v2070_v10 = vsel %vm374_vm1, %v2058_v56, %v2060_v38  ;;  %9417 = vmatprep.subr.bf16.mxu1 %v22826_v16  ;;  %v14752_v37 = vpop.permute.xlu1 %2063  ;;  %v1982_v50 = vadd.f32 %v14714_v25, %v1973_v23  ;;  %v14783_v23 = vstv %s8350_s25  ;;  %s12414_s25 = smov 84  }
 0x33f   :  { %v14750_v46 = vadd.f32 %v2070_v10, %v2033_v13  ;;  %v1985_v10 = vadd.f32 %v14714_v25, %v1976_v31 }
 0x341   :  { %v2062_v24 = vpop.permute.xlu0 %2061  ;;  %9419 = vmatpush1.bf16.msra.mxu1 %v22827_v14  ;;  %v22613_v55 = vmax.f32 %v14750_v46, 0.0  ;;  %v2035_v31 = vadd.f32 %v2022_v41, %v1985_v10  ;;  %v2396_v41 = vmul.f32 %v12363_v32, %v14783_v23 }
 0x342   :  { %v2071_v1 = vsel %vm374_vm1, %v2060_v38, %v2062_v24  ;;  %9421 = vmatprep.subr.bf16.mxu1 %v22828_v36  ;;  %v2431_v13 = vpop.permute.xlu1 %2430 }
 0x343   :  { %v14762_v22 = vadd.f32 %v2071_v1, %v2034_v3  ;;  %v14765_v16 = vpop.f32.mrb[0].mxu0  ;;  %v2019_v1 = vsel %vm323_vm0, %v2006_v28, %v14688_v40  ;;  %v14797_v40 = vld [vmem:[%s22341_s0 + $0x88] sm:$0xff] }
 0x344   :  { %22858 = vst [vmem:[#allocation54_spill] sm:$0xff] %v14765_v16  ;;  %v14771_v9 = vpop.f32.mrb[1].mxu0  ;;  %v2046_v10 = vmul.f32 %v14797_v40, %v14536_v11 }
 0x345   :  { %v22612_v14 = vmax.f32 %v14762_v22, 0.0  ;;  %v2429_v38 = vpop.permute.xlu0 %2428  ;;  %22859 = vst [vmem:[#allocation55_spill] sm:$0xff] %v14771_v9  ;;  %9423 = vmatpush1.bf16.msra.mxu1 %v22829_v47  ;;  %v2032_v9 = vadd.f32 %v2019_v1, %v1982_v50  ;;  %v2072_v47 = vsel %vm374_vm1, %v2062_v24, %v14752_v37  ;;  %v2395_v24 = vmul.f32 %v14707_v21, %v14783_v23 }
 0x346   :  { %9425 = vmatprep.subr.bf16.mxu1 %v22830_v63  ;;  %v14781_v7 = vpop.permute.xlu1 %2434  ;;  %v14806_v1 = vadd.f32 %v2072_v47, %v2035_v31  ;;  %v22863_v21 = vmax.f32 %v14590_v8, 0.0 }
 0x347   :  { %v12228_v3 = vpack.i.bf16 %v22612_v14, %v22613_v55 }
 0x348   :  { %v14785_v16 = vpop.f32.mrb[0].mxu1  ;;  %22862 = vst [vmem:[#allocation59_spill] sm:$0xff] %v14806_v1 }
 0x349   :  { %22860 = vst [vmem:[#allocation56_spill] sm:$0xff] %v14785_v16  ;;  %v14789_v36 = vpop.permute.xlu0 %2432  ;;  %12229 = vrot.lane.b32.xlu0 %v12228_v3, %s12408_s22  ;;  %v14792_v28 = vpop.f32.mrb[1].mxu1  ;;  %9427 = vmatpush1.bf16.msra.mxu1 %v22831_v30  ;;  %v14808_v3 = vstv %s8351_s26  ;;  %v2417_v16 = vmul.f32 %v14732_v5, %v14562_v58  ;;  %v2441_v5 = vsel %vm323_vm0, %v2429_v38, %v2431_v13 }
 0x34a   :  { %22861 = vst [vmem:[#allocation58_spill] sm:$0xff] %v14792_v28  ;;  %9429 = vmatprep.subr.bf16.mxu1 %v22832_v53  ;;  %v2056_v50 = vpop.permute.xlu1 %2055  ;;  %v2404_v47 = vadd.f32 %v14808_v3, %v2395_v24  ;;  %v2405_v31 = vadd.f32 %v14808_v3, %v2396_v41 }
 0x34b   :  { %v2069_v14 = vsel %vm374_vm1, %v2056_v50, %v2058_v56 }
 0x34c   :  { %v14812_v28 = vadd.f32 %v2069_v14, %v2032_v9  ;;  %v1997_v9 = vmul.f32 %v14698_v33, %v14501_v61  ;;  %v22614_v14 = vmax.f32 %v14806_v1, 0.0  ;;  %v2454_v61 = vadd.f32 %v2441_v5, %v2404_v47 }
 0x34d   :  { %v1695_v55 = vpop.permute.xlu0 %1694  ;;  %2065 = vrot.lane.b32.xlu0 %v2046_v10, %s12407_s2  ;;  %9431 = vmatpush1.bf16.msra.mxu1 %v22833_v26  ;;  %v2442_v10 = vsel %vm323_vm0, %v2431_v13, %v14789_v36 }
 0x34e   :  { %v1715_v32 = vmax.f32 %v22863_v21, %v1695_v55  ;;  %9433 = vmatprep.subr.bf16.mxu1 %v22834_v59  ;;  %v14822_v56 = vpop.permute.xlu1 %2478  ;;  %v22617_v8 = vmax.f32 %v14812_v28, 0.0  ;;  %v2455_v41 = vadd.f32 %v2442_v10, %v2405_v31 }
 0x350   :  { %1735 = vrot.lane.b32.xlu1 %v1715_v32, %s12409_s24  ;;  %v12233_v13 = vpack.i.bf16 %v22617_v8, %v22614_v14 }
 0x351   :  { %v2427_v50 = vpop.permute.xlu0 %2426  ;;  %2436 = vrot.lane.b32.xlu0 %v2417_v16, %s12406_s21  ;;  %9435 = vmatpush1.bf16.msra.mxu1 %v22835_v15 }
 0x352   :  { %v2440_v24 = vsel %vm323_vm0, %v2427_v50, %v2429_v38  ;;  %9437 = vmatprep.subr.bf16.mxu1 %v13683_v62  ;;  %v14836_v21 = vpop.permute.xlu1 %2482 }
 0x354   :  { %2017 = vrot.lane.b32.xlu1 %v1997_v9, %s12406_s21  ;;  %v14857_v9 = vld [vmem:[%s22341_s0 + $0x90] sm:$0xff] }
 0x355   :  { %v2481_v32 = vpop.permute.xlu0 %2480  ;;  %9439 = vmatpush1.bf16.msra.mxu1 %v13710_v17  ;;  %v2047_v5 = vmul.f32 %v14857_v9, %v14536_v11  ;;  %v2418_v11 = vmul.f32 %v14698_v33, %v14562_v58  ;;  %v22865_v58 = vmax.f32 %v14497_v42, 0.0  ;;  %v12368_v33 = vld [vmem:[%s22341_s0 + $0x18] sm:$0xff] }
 0x356   :  { %v2491_v16 = vsel %vm374_vm1, %v14822_v56, %v2481_v32  ;;  %v2492_v38 = vsel %vm374_vm1, %v2481_v32, %v14836_v21  ;;  %9441 = vmatprep.subr.bf16.mxu1 %v13716_v19 }
 0x357   :  { %v14849_v47 = vadd.f32 %v2491_v16, %v2454_v61  ;;  %v14851_v31 = vadd.f32 %v2492_v38, %v2455_v41  ;;  %v1280_v41 = vsel %vm423_vm2, %v14673_v43, %v14727_v51  ;;  %v1701_v16 = vsel %vm423_vm2, %v14653_v2, %v1695_v55  ;;  %v12367_v2 = vld [vmem:[%s22341_s0] sm:$0xff] }
 0x358   :  { %12234 = vrot.lane.b32.xlu1 %v12233_v13, %s12408_s22  ;;  %v22864_v13 = vmax.f32 %v14226_v54, 0.0  ;;  %v14891_v43 = vmax.f32 %v22865_v58, %v1701_v16  ;;  %v2467_v54 = vmul.f32 %v14797_v40, %v14595_v18  ;;  %v2394_v42 = vmul.f32 %v12367_v2, %v14783_v23 }
 0x359   :  { %v22616_v10 = vmax.f32 %v14849_v47, 0.0  ;;  %v22615_v50 = vmax.f32 %v14851_v31, 0.0  ;;  %9443 = vmatpush1.bf16.msra.mxu1 %v13741_v52  ;;  %v2397_v51 = vmul.f32 %v12368_v33, %v14783_v23  ;;  %v22867_v33 = vld [vmem:[#allocation103_spill] sm:$0xff] }
 0x35a   :  { %9445 = vmatprep.subr.bf16.mxu1 %v22836_v29  ;;  %v14880_v32 = vmax.f32 %v22864_v13, %v1280_v41  ;;  %v2403_v55 = vadd.f32 %v14808_v3, %v2394_v42  ;;  %v2443_v41 = vsel %vm323_vm0, %v14789_v36, %v14781_v7  ;;  %v22866_v13 = vunpack.i.l.bf16 %v14649_v35 }
 0x35b   :  { %v12238_v61 = vpack.i.bf16 %v22615_v50, %v22616_v10  ;;  %v22868_v50 = vld [vmem:[#allocation104_spill] sm:$0xff] }
 0x35c   :  { %2067 = vrot.lane.b32.xlu1 %v2047_v5, %s12407_s2  ;;  %v2453_v42 = vadd.f32 %v2440_v24, %v2403_v55  ;;  %v22869_v10 = vunpack.i.h.bf16 %v22868_v50  ;;  %v22873_v50 = vld [vmem:[#allocation73_spill] sm:$0xff] }
 0x35d   :  { %12239 = vrot.lane.b32.xlu0 %v12238_v61, %s12408_s22  ;;  %9447 = vmatpush1.bf16.msra.mxu1 %v22837_v4  ;;  %v2406_v61 = vadd.f32 %v14808_v3, %v2397_v51 }
 0x35e   :  { %9449 = vmatprep.subr.bf16.mxu1 %v22838_v48 }
 0x35f   :  { %v2456_v1 = vadd.f32 %v2443_v41, %v2406_v61  ;;  %v22876_v41 = vld [vmem:[#allocation76_spill] sm:$0xff] }
 0x360   :  { %2438 = vrot.lane.b32.xlu1 %v2418_v11, %s12406_s21 }
 0x361   :  { %1312 = vrot.lane.b32.xlu0 %v14880_v32, %s12409_s24  ;;  %9451 = vmatpush1.bf16.msra.mxu1 %v22839_v39 }
 0x362   :  { %9453 = vmatprep.subr.bf16.mxu1 %v22840_v57 }
 0x365   :  { %1733 = vrot.lane.b32.xlu0 %v14891_v43, %s12409_s24  ;;  %9455 = vmatpush1.bf16.msra.mxu1 %v22841_v44 }
 0x366   :  { %9457 = vmatprep.subr.bf16.mxu1 %v22842_v45 }
 0x369   :  { %2486 = vrot.lane.b32.xlu0 %v2467_v54, %s12407_s2  ;;  %9459 = vmatpush1.bf16.msra.mxu1 %v22843_v27 }
 0x36a   :  { %9461 = vmatprep.subr.bf16.mxu1 %v22844_v12 }
 0x36d   :  { %9463 = vmatpush1.bf16.msra.mxu1 %v22845_v6 }
 0x36e   :  { %9465 = vmatprep.subr.bf16.mxu1 %v22846_v49  ;;  %v22870_v49 = vld [vmem:[#allocation92_spill] sm:$0xff] }
 0x3a2   :  { %v14913_v40 = vpop.permute.xlu1 %12224 }
 0x3a3   :  { %v22623_v38 = vunpack.i.h.bf16 %v14913_v40  ;;  %v12226_v5 = vunpack.i.l.bf16 %v14913_v40 }
 0x3a5   :  { %v14921_v11 = vpop.permute.xlu0 %12219  ;;  %v1739_v16 = vsel %vm465_vm3, %v22866_v13, %v12226_v5  ;;  %v1740_v2 = vsel %vm465_vm3, %v12226_v5, %v22623_v38 }
 0x3a6   :  { %v22622_v58 = vunpack.i.h.bf16 %v14921_v11  ;;  %v12221_v54 = vunpack.i.l.bf16 %v14921_v11  ;;  %v1751_v51 = vmax.f32 %v22867_v33, %v1739_v16  ;;  %v2477_v14 = vpop.permute.xlu1 %2476  ;;  %v1752_v36 = vmax.f32 %v14667_v34, %v1740_v2  ;;  %v22877_v16 = vld [vmem:[#allocation77_spill] sm:$0xff]  ;;  %v22879_v2 = vld [vmem:[#allocation79_spill] sm:$0xff] }
 0x3a7   :  { %v2490_v13 = vsel %vm374_vm1, %v2477_v14, %v14822_v56  ;;  %v22872_v14 = vld [vmem:[#allocation72_spill] sm:$0xff] }
 0x3a8   :  { %v1318_v35 = vsel %vm465_vm3, %v22869_v10, %v12221_v54  ;;  %v1319_v8 = vsel %vm465_vm3, %v12221_v54, %v22622_v58  ;;  %v14942_v24 = vadd.f32 %v2490_v13, %v2453_v42  ;;  %1893 = vmatprep.mubr.f32.mxu1 %v1752_v36  ;;  %v22878_v54 = vld [vmem:[#allocation78_spill] sm:$0xff]  ;;  %v22881_v42 = vld [vmem:[#allocation81_spill] sm:$0xff] }
 0x3a9   :  { %v1330_v5 = vmax.f32 %v22870_v49, %v1318_v35  ;;  %v14944_v55 = vpop.permute.xlu0 %2484  ;;  %v1331_v34 = vmax.f32 %v14682_v0, %v1319_v8  ;;  %1894 = vmatmul.mubr.f32.vlgmr.msra.gmra.mrb[2].mxu1 %v1751_v51  ;;  %v22875_v8 = vld [vmem:[#allocation75_spill] sm:$0xff]  ;;  %v22882_v36 = vld [vmem:[#allocation82_spill] sm:$0xff] }
 0x3aa   :  { %v2493_v10 = vsel %vm374_vm1, %v14836_v21, %v14944_v55  ;;  %9467 = vmatpush1.bf16.msra.mxu1 %v22872_v14  ;;  %v22621_v49 = vmax.f32 %v14942_v24, 0.0  ;;  %v2468_v21 = vmul.f32 %v14857_v9, %v14595_v18  ;;  %v22880_v9 = vld [vmem:[#allocation80_spill] sm:$0xff]  ;;  %v22883_v35 = vld [vmem:[#allocation83_spill] sm:$0xff] }
 0x3ab   :  { %v14950_v56 = vadd.f32 %v2493_v10, %v2456_v1  ;;  %1472 = vmatprep.mubr.f32.mxu0 %v1331_v34  ;;  %9469 = vmatprep.subr.bf16.mxu1 %v22873_v50  ;;  %v22874_v1 = vld [vmem:[#allocation74_spill] sm:$0xff]  ;;  %v1315_v33 = vpop.permute.xlu1 %1314  ;;  %v22885_v34 = vld [vmem:[#allocation85_spill] sm:$0xff]  ;;  %v14995_v10 = vld [vmem:[%s22341_s0 + $0x28] sm:$0xff] }
 0x3ac   :  { %1473 = vmatmul.mubr.f32.vlgmr.msra.gmra.mrb[2].mxu0 %v1330_v5  ;;  %v22884_v5 = vld [vmem:[#allocation84_spill] sm:$0xff] }
 0x3ad   :  { %22871 = vst [vmem:[#allocation60_spill] sm:$0xff] %v14950_v56  ;;  %v22620_v61 = vmax.f32 %v14950_v56, 0.0  ;;  %9279 = vmatpush1.bf16.msra.mxu0 %v22872_v14  ;;  %v14978_v18 = vpop.permute.xlu0 %2015 }
 0x3ae   :  { %9281 = vmatprep.subr.bf16.mxu0 %v22873_v50  ;;  %9471 = vmatpush1.bf16.msra.mxu1 %v22874_v1 }
 0x3af   :  { %v12243_v0 = vpack.i.bf16 %v22621_v49, %v22620_v61  ;;  %9473 = vmatprep.subr.bf16.mxu1 %v22875_v8 }
 0x3b1   :  { %9283 = vmatpush1.bf16.msra.mxu0 %v22874_v1  ;;  %12244 = vrot.lane.b32.xlu1 %v12243_v0, %s12408_s22  ;;  %v1978_v0 = vmul.f32 %v14995_v10, %v14690_v60 }
 0x3b2   :  { %9285 = vmatprep.subr.bf16.mxu0 %v22875_v8  ;;  %9475 = vmatpush1.bf16.msra.mxu1 %v22876_v41  ;;  %v22891_v8 = vmax.f32 %v14762_v22, 0.0  ;;  %v22894_v22 = vld [vmem:[#allocation91_spill] sm:$0xff] }
 0x3b3   :  { %9477 = vmatprep.subr.bf16.mxu1 %v22877_v16 }
 0x3b5   :  { %9287 = vmatpush1.bf16.msra.mxu0 %v22876_v41  ;;  %2488 = vrot.lane.b32.xlu1 %v2468_v21, %s12407_s2 }
 0x3b6   :  { %9289 = vmatprep.subr.bf16.mxu0 %v22877_v16  ;;  %9479 = vmatpush1.bf16.msra.mxu1 %v22878_v54 }
 0x3b7   :  { %9481 = vmatprep.subr.bf16.mxu1 %v22879_v2 }
 0x3b9   :  { %9291 = vmatpush1.bf16.msra.mxu0 %v22878_v54  ;;  %v22888_v54 = vld [vmem:[#allocation88_spill] sm:$0xff] }
 0x3ba   :  { %9293 = vmatprep.subr.bf16.mxu0 %v22879_v2  ;;  %9483 = vmatpush1.bf16.msra.mxu1 %v22880_v9 }
 0x3bb   :  { %9485 = vmatprep.subr.bf16.mxu1 %v22881_v42  ;;  %v12230_v51 = vpop.permute.xlu0 %12229 }
 0x3bc   :  { %v12232_v49 = vunpack.i.h.bf16 %v12230_v51  ;;  %v12231_v58 = vunpack.i.l.bf16 %v12230_v51 }
 0x3bd   :  { %9295 = vmatpush1.bf16.msra.mxu0 %v22880_v9 }
 0x3be   :  { %9297 = vmatprep.subr.bf16.mxu0 %v22881_v42  ;;  %9487 = vmatpush1.bf16.msra.mxu1 %v22882_v36  ;;  %v22887_v42 = vld [vmem:[#allocation87_spill] sm:$0xff] }
 0x3bf   :  { %9489 = vmatprep.subr.bf16.mxu1 %v22883_v35  ;;  %v2066_v21 = vpop.permute.xlu0 %2065 }
 0x3c1   :  { %9299 = vmatpush1.bf16.msra.mxu0 %v22882_v36  ;;  %v1987_v36 = vadd.f32 %v14714_v25, %v1978_v0  ;;  %v22889_v0 = vld [vmem:[#allocation89_spill] sm:$0xff] }
 0x3c2   :  { %v14987_v13 = vpop.permute.xlu1 %1735  ;;  %9301 = vmatprep.subr.bf16.mxu0 %v22883_v35  ;;  %9491 = vmatpush1.bf16.msra.mxu1 %v22884_v5  ;;  %v22886_v35 = vld [vmem:[#allocation86_spill] sm:$0xff] }
 0x3c3   :  { %9493 = vmatprep.subr.bf16.mxu1 %v22885_v34 }
 0x3c5   :  { %9303 = vmatpush1.bf16.msra.mxu0 %v22884_v5  ;;  %v15014_v5 = vpop.permute.xlu0 %2436 }
 0x3c6   :  { %v15000_v61 = vpop.permute.xlu1 %2017  ;;  %9305 = vmatprep.subr.bf16.mxu0 %v22885_v34  ;;  %9495 = vmatpush1.bf16.msra.mxu1 %v22886_v35  ;;  %v2118_v34 = vsel %vm423_vm2, %v12231_v58, %v12232_v49 }
 0x3c7   :  { %v2024_v38 = vsel %vm323_vm0, %v14978_v18, %v15000_v61  ;;  %9497 = vmatprep.subr.bf16.mxu1 %v22887_v42 }
 0x3c8   :  { %v2037_v16 = vadd.f32 %v2024_v38, %v1987_v36  ;;  %v22893_v36 = vld [vmem:[#allocation90_spill] sm:$0xff] }
 0x3c9   :  { %9307 = vmatpush1.bf16.msra.mxu0 %v22886_v35 }
 0x3ca   :  { %v15010_v9 = vpop.permute.xlu1 %12234  ;;  %9309 = vmatprep.subr.bf16.mxu0 %v22887_v42  ;;  %9499 = vmatpush1.bf16.msra.mxu1 %v22888_v54  ;;  %v22890_v42 = vmax.f32 %v14750_v46, 0.0 }
 0x3cb   :  { %v12237_v51 = vunpack.i.h.bf16 %v15010_v9  ;;  %v22640_v2 = vunpack.i.l.bf16 %v15010_v9  ;;  %9501 = vmatprep.subr.bf16.mxu1 %v22889_v0 }
 0x3cc   :  { %v15026_v41 = vmax.f32 %v22890_v42, %v2118_v34 }
 0x3cd   :  { %v2119_v35 = vsel %vm423_vm2, %v12232_v49, %v22640_v2  ;;  %9311 = vmatpush1.bf16.msra.mxu0 %v22888_v54  ;;  %v2117_v38 = vsel %vm423_vm2, %v12237_v51, %v12231_v58  ;;  %v12370_v58 = vld [vmem:[%s22341_s0 + $0x20] sm:$0xff] }
 0x3ce   :  { %v15030_v1 = vmax.f32 %v22891_v8, %v2119_v35  ;;  %9313 = vmatprep.subr.bf16.mxu0 %v22889_v0  ;;  %v15033_v50 = vpop.permute.xlu1 %2067  ;;  %9503 = vmatpush1.bf16.msra.mxu1 %v22893_v36  ;;  %v1977_v34 = vmul.f32 %v12370_v58, %v14690_v60  ;;  %v22896_v0 = vmax.f32 %v14849_v47, 0.0  ;;  %v2023_v47 = vsel %vm323_vm0, %v14716_v20, %v14978_v18  ;;  %v22900_v20 = vld [vmem:[#allocation96_spill] sm:$0xff] }
 0x3cf   :  { %v15037_v14 = vpop.permute.xlu0 %12239  ;;  %v2074_v49 = vsel %vm374_vm1, %v2066_v21, %v15033_v50  ;;  %9505 = vmatprep.subr.bf16.mxu1 %v22894_v22 }
 0x3d0   :  { %22892 = vst [vmem:[#allocation61_spill] sm:$0xff] %v15030_v1  ;;  %v22646_v46 = vunpack.i.h.bf16 %v15037_v14  ;;  %v22647_v42 = vunpack.i.l.bf16 %v15037_v14  ;;  %v12248_v8 = vpack.i.bf16 %v15030_v1, %v15026_v41  ;;  %v15046_v35 = vadd.f32 %v2074_v49, %v2037_v16 }
 0x3d1   :  { %9315 = vmatpush1.bf16.msra.mxu0 %v22893_v36  ;;  %v2398_v16 = vmul.f32 %v12370_v58, %v14783_v23  ;;  %v22895_v49 = vmax.f32 %v14812_v28, 0.0  ;;  %v22897_v36 = vld [vmem:[#allocation93_spill] sm:$0xff] }
 0x3d2   :  { %v2539_v51 = vsel %vm423_vm2, %v22647_v42, %v22646_v46  ;;  %12249 = vrot.lane.b32.xlu0 %v12248_v8, %s12409_s24  ;;  %9317 = vmatprep.subr.bf16.mxu0 %v22894_v22  ;;  %v22898_v46 = vld [vmem:[#allocation94_spill] sm:$0xff]  ;;  %v1986_v8 = vadd.f32 %v14714_v25, %v1977_v34 }
 0x3d3   :  { %v15063_v2 = vmax.f32 %v22895_v49, %v2117_v38  ;;  %v15067_v54 = vmax.f32 %v22896_v0, %v2539_v51  ;;  %9507 = vmatpush1.bf16.msra.mxu1 %v22897_v36  ;;  %v1313_v1 = vpop.permute.xlu0 %1312  ;;  %v2407_v0 = vadd.f32 %v14808_v3, %v2398_v16 }
 0x3d4   :  { %v1321_v56 = vsel %vm465_vm3, %v1313_v1, %v1315_v33  ;;  %9509 = vmatprep.subr.bf16.mxu1 %v22898_v46  ;;  %v22899_v33 = vld [vmem:[#allocation95_spill] sm:$0xff]  ;;  %v2036_v18 = vadd.f32 %v2023_v47, %v1986_v8  ;;  %v22905_v47 = vunpack.i.h.bf16 %v14913_v40  ;;  %v22909_v40 = vld [vmem:[#allocation52_spill] sm:$0xff] }
 0x3d5   :  { %v1333_v42 = vmax.f32 %v14880_v32, %v1321_v56  ;;  %9319 = vmatpush1.bf16.msra.mxu0 %v22897_v36  ;;  %v12253_v28 = vpack.i.bf16 %v15067_v54, %v15063_v2  ;;  %v2073_v32 = vsel %vm374_vm1, %v14752_v37, %v2066_v21  ;;  %v2444_v56 = vsel %vm323_vm0, %v14781_v7, %v15014_v5  ;;  %v22901_v21 = vld [vmem:[#allocation97_spill] sm:$0xff]  ;;  %v22903_v8 = vld [vmem:[#allocation99_spill] sm:$0xff] }
 0x3d6   :  { %9321 = vmatprep.subr.bf16.mxu0 %v22898_v46  ;;  %v15096_v51 = vadd.f32 %v2073_v32, %v2036_v18  ;;  %v2457_v37 = vadd.f32 %v2444_v56, %v2407_v0  ;;  %v22906_v32 = vld [vmem:[#allocation101_spill] sm:$0xff]  ;;  %v15128_v56 = vld [vmem:[%s22344_s3 + $0x5e8] sm:$0x7] }
 0x3d7   :  { %9511 = vmatpush1.bf16.msra.mxu1 %v22899_v33  ;;  %v1734_v38 = vpop.permute.xlu0 %1733  ;;  %12254 = vrot.lane.b32.xlu1 %v12253_v28, %s12409_s24  ;;  %v22904_v28 = vld [vmem:[#allocation100_spill] sm:$0xff]  ;;  %22907 = vst [vmem:[#allocation62_spill] sm:$0xff] %v15128_v56 }
 0x3d8   :  { %v1742_v58 = vsel %vm465_vm3, %v1734_v38, %v14987_v13  ;;  %8335 = vmatprep.mubr.msk.f32.mxu0 %vm484_vm4, %v1333_v42  ;;  %9513 = vmatprep.subr.bf16.mxu1 %v22900_v20  ;;  %v22902_v42 = vld [vmem:[#allocation98_spill] sm:$0xff]  ;;  %v22649_v16 = vmax.f32 %v15096_v51, 0.0  ;;  %v1741_v0 = vsel %vm465_vm3, %v22905_v47, %v1734_v38  ;;  %v22915_v47 = vld [vmem:[#allocation11_spill] sm:$0xff] }
 0x3d9   :  { %v1754_v34 = vmax.f32 %v14891_v43, %v1742_v58  ;;  %9323 = vmatpush1.bf16.msra.mxu0 %v22899_v33  ;;  %v22908_v58 = vunpack.i.h.bf16 %v14921_v11  ;;  %v1753_v38 = vmax.f32 %v22909_v40, %v1741_v0  ;;  %v22912_v11 = vld [vmem:[#allocation8_spill] sm:$0xff]  ;;  %v22919_v40 = vld [vmem:[#allocation15_spill] sm:$0xff] }
 0x3da   :  { %9325 = vmatprep.subr.bf16.mxu0 %v22900_v20  ;;  %v22916_v0 = vld [vmem:[#allocation12_spill] sm:$0xff] }
 0x3db   :  { %9515 = vmatpush1.bf16.msra.mxu1 %v22901_v21  ;;  %v15099_v7 = vpop.permute.xlu0 %2486  ;;  %8342 = vmatprep.mubr.msk.f32.mxu1 %vm484_vm4, %v1754_v34  ;;  %v1320_v18 = vsel %vm465_vm3, %v22908_v58, %v1313_v1  ;;  %v15142_v34 = vld [vmem:[%s22344_s3 + $0x5e0] sm:$0x7]  ;;  %v22913_v1 = vld [vmem:[#allocation9_spill] sm:$0xff] }
 0x3dc   :  { %v2494_v13 = vsel %vm374_vm1, %v14944_v55, %v15099_v7  ;;  %9517 = vmatprep.subr.bf16.mxu1 %v22902_v42  ;;  %22910 = vst [vmem:[#allocation63_spill] sm:$0xff] %v15142_v34  ;;  %v22917_v58 = vld [vmem:[#allocation13_spill] sm:$0xff] }
 0x3dd   :  { %v15106_v43 = vadd.f32 %v2494_v13, %v2457_v37  ;;  %9327 = vmatpush1.bf16.msra.mxu0 %v22901_v21  ;;  %v22911_v37 = vld [vmem:[#allocation53_spill] sm:$0xff] }
 0x3de   :  { %9329 = vmatprep.subr.bf16.mxu0 %v22902_v42  ;;  %v1332_v13 = vmax.f32 %v22911_v37, %v1320_v18  ;;  %v22918_v18 = vld [vmem:[#allocation14_spill] sm:$0xff]  ;;  %v22921_v37 = vld [vmem:[#allocation17_spill] sm:$0xff] }
 0x3df   :  { %v22648_v49 = vmax.f32 %v15106_v43, 0.0  ;;  %9519 = vmatpush1.bf16.msra.mxu1 %v22903_v8 }
 0x3e0   :  { %9521 = vmatprep.subr.bf16.mxu1 %v22904_v28 }
 0x3e1   :  { %v12263_v55 = vpack.i.bf16 %v22648_v49, %v22649_v16  ;;  %9331 = vmatpush1.bf16.msra.mxu0 %v22903_v8  ;;  %v22947_v49 = vld [vmem:[#allocation40_spill] sm:$0xff]  ;;  %v22948_v16 = vmax.f32 %v14942_v24, 0.0 }
 0x3e2   :  { %9333 = vmatprep.subr.bf16.mxu0 %v22904_v28 }
 0x3e3   :  { %9523 = vmatpush1.bf16.msra.mxu1 %v22906_v32  ;;  %12264 = vrot.lane.b32.xlu1 %v12263_v55, %s12408_s22  ;;  %v22914_v55 = vld [vmem:[#allocation10_spill] sm:$0xff] }
 0x3e4   :  { %8340 = vmatprep.subr.msk.mxu1 %vm488_vm5, %v15128_v56 }
 0x3e5   :  { %9335 = vmatpush1.bf16.msra.mxu0 %v22906_v32 }
 0x3e6   :  { %8333 = vmatprep.subr.msk.mxu0 %vm488_vm5, %v15128_v56  ;;  %v22962_v56 = vunpack.i.l.bf16 %v15010_v9 }
 0x3e7   :  { %8341 = vmatpush1.msk.msra.mxu1 %vm488_vm5, %v15142_v34 }
 0x3e8   :  { %1965 = vmatmul.mubr.f32.vlgmr.msra.gmra.mrb[2].mxu1 %v1753_v38  ;;  %9713 = vmatprep.subr.bf16.mxu1 %v22912_v11  ;;  %v22920_v38 = vld [vmem:[#allocation16_spill] sm:$0xff] }
 0x3e9   :  { %8334 = vmatpush1.msk.msra.mxu0 %vm488_vm5, %v15142_v34  ;;  %9715 = vmatpush1.bf16.msra.mxu1 %v22913_v1 }
 0x3ea   :  { %1544 = vmatmul.mubr.f32.vlgmr.msra.gmra.mrb[2].mxu0 %v1332_v13  ;;  %9525 = vmatprep.subr.bf16.mxu0 %v22912_v11  ;;  %v22922_v13 = vld [vmem:[#allocation18_spill] sm:$0xff]  ;;  %v22923_v11 = vld [vmem:[#allocation19_spill] sm:$0xff] }
 0x3eb   :  { %9527 = vmatpush1.bf16.msra.mxu0 %v22913_v1  ;;  %9717 = vmatprep.subr.bf16.mxu1 %v22914_v55  ;;  %v22924_v1 = vld [vmem:[#allocation20_spill] sm:$0xff] }
 0x3ec   :  { %9529 = vmatprep.subr.bf16.mxu0 %v22914_v55  ;;  %v22925_v55 = vld [vmem:[#allocation21_spill] sm:$0xff] }
 0x3ed   :  { %9719 = vmatpush1.bf16.msra.mxu1 %v22915_v47 }
 0x3ee   :  { %9721 = vmatprep.subr.bf16.mxu1 %v22916_v0 }
 0x3ef   :  { %9531 = vmatpush1.bf16.msra.mxu0 %v22915_v47  ;;  %v22926_v47 = vld [vmem:[#allocation22_spill] sm:$0xff] }
 0x3f0   :  { %9533 = vmatprep.subr.bf16.mxu0 %v22916_v0  ;;  %v22927_v0 = vld [vmem:[#allocation23_spill] sm:$0xff] }
 0x3f1   :  { %9723 = vmatpush1.bf16.msra.mxu1 %v22917_v58 }
 0x3f2   :  { %9725 = vmatprep.subr.bf16.mxu1 %v22918_v18 }
 0x3f3   :  { %9535 = vmatpush1.bf16.msra.mxu0 %v22917_v58  ;;  %v22928_v58 = vld [vmem:[#allocation24_spill] sm:$0xff] }
 0x3f4   :  { %9537 = vmatprep.subr.bf16.mxu0 %v22918_v18  ;;  %v22929_v18 = vld [vmem:[#allocation25_spill] sm:$0xff] }
 0x3f5   :  { %9727 = vmatpush1.bf16.msra.mxu1 %v22919_v40 }
 0x3f6   :  { %9729 = vmatprep.subr.bf16.mxu1 %v22920_v38 }
 0x3f7   :  { %9539 = vmatpush1.bf16.msra.mxu0 %v22919_v40  ;;  %v22930_v40 = vld [vmem:[#allocation26_spill] sm:$0xff] }
 0x3f8   :  { %9541 = vmatprep.subr.bf16.mxu0 %v22920_v38  ;;  %v22931_v38 = vld [vmem:[#allocation27_spill] sm:$0xff] }
 0x3f9   :  { %9731 = vmatpush1.bf16.msra.mxu1 %v22921_v37 }
 0x3fa   :  { %9733 = vmatprep.subr.bf16.mxu1 %v22922_v13 }
 0x3fb   :  { %9543 = vmatpush1.bf16.msra.mxu0 %v22921_v37  ;;  %v22932_v37 = vld [vmem:[#allocation28_spill] sm:$0xff] }
 0x3fc   :  { %9545 = vmatprep.subr.bf16.mxu0 %v22922_v13  ;;  %v22933_v13 = vld [vmem:[#allocation29_spill] sm:$0xff] }
 0x3fd   :  { %9735 = vmatpush1.bf16.msra.mxu1 %v22923_v11 }
 0x3fe   :  { %9737 = vmatprep.subr.bf16.mxu1 %v22924_v1 }
 0x3ff   :  { %9547 = vmatpush1.bf16.msra.mxu0 %v22923_v11  ;;  %v22934_v11 = vld [vmem:[#allocation30_spill] sm:$0xff] }
 0x400   :  { %9549 = vmatprep.subr.bf16.mxu0 %v22924_v1  ;;  %v22935_v1 = vld [vmem:[#allocation31_spill] sm:$0xff] }
 0x401   :  { %9739 = vmatpush1.bf16.msra.mxu1 %v22925_v55 }
 0x402   :  { %9741 = vmatprep.subr.bf16.mxu1 %v22926_v47 }
 0x403   :  { %9551 = vmatpush1.bf16.msra.mxu0 %v22925_v55  ;;  %v22936_v55 = vld [vmem:[#allocation32_spill] sm:$0xff] }
 0x404   :  { %9553 = vmatprep.subr.bf16.mxu0 %v22926_v47  ;;  %v22937_v47 = vld [vmem:[#allocation33_spill] sm:$0xff] }
 0x405   :  { %9743 = vmatpush1.bf16.msra.mxu1 %v22927_v0 }
 0x406   :  { %9745 = vmatprep.subr.bf16.mxu1 %v22928_v58 }
 0x407   :  { %9555 = vmatpush1.bf16.msra.mxu0 %v22927_v0  ;;  %v22938_v0 = vld [vmem:[#allocation34_spill] sm:$0xff] }
 0x408   :  { %9557 = vmatprep.subr.bf16.mxu0 %v22928_v58  ;;  %v22939_v58 = vld [vmem:[#allocation35_spill] sm:$0xff] }
 0x409   :  { %9747 = vmatpush1.bf16.msra.mxu1 %v22929_v18 }
 0x40a   :  { %9749 = vmatprep.subr.bf16.mxu1 %v22930_v40 }
 0x40b   :  { %9559 = vmatpush1.bf16.msra.mxu0 %v22929_v18  ;;  %v22940_v18 = vld [vmem:[#allocation36_spill] sm:$0xff] }
 0x40c   :  { %9561 = vmatprep.subr.bf16.mxu0 %v22930_v40  ;;  %v2399_v40 = vmul.f32 %v14995_v10, %v14783_v23 }
 0x40d   :  { %9751 = vmatpush1.bf16.msra.mxu1 %v22931_v38 }
 0x40e   :  { %9753 = vmatprep.subr.bf16.mxu1 %v22932_v37 }
 0x40f   :  { %9563 = vmatpush1.bf16.msra.mxu0 %v22931_v38  ;;  %v2439_v38 = vpop.permute.xlu1 %2438 }
 0x410   :  { %9565 = vmatprep.subr.bf16.mxu0 %v22932_v37  ;;  %v22941_v37 = vld [vmem:[#allocation102_spill] sm:$0xff]  ;;  %v2445_v10 = vsel %vm323_vm0, %v15014_v5, %v2439_v38 }
 0x411   :  { %9755 = vmatpush1.bf16.msra.mxu1 %v22933_v13 }
 0x412   :  { %9757 = vmatprep.subr.bf16.mxu1 %v22934_v11 }
 0x413   :  { %9567 = vmatpush1.bf16.msra.mxu0 %v22933_v13  ;;  %v1979_v13 = vmul.f32 %v22941_v37, %v14690_v60  ;;  %v22945_v37 = vunpack.i.l.bf16 %v15037_v14 }
 0x414   :  { %9569 = vmatprep.subr.bf16.mxu0 %v22934_v11  ;;  %v22942_v11 = vld [vmem:[#allocation37_spill] sm:$0xff] }
 0x415   :  { %9759 = vmatpush1.bf16.msra.mxu1 %v22935_v1  ;;  %v1988_v60 = vadd.f32 %v14714_v25, %v1979_v13 }
 0x416   :  { %9761 = vmatprep.subr.bf16.mxu1 %v22936_v55 }
 0x417   :  { %9571 = vmatpush1.bf16.msra.mxu0 %v22935_v1  ;;  %v22943_v1 = vld [vmem:[#allocation38_spill] sm:$0xff] }
 0x418   :  { %9573 = vmatprep.subr.bf16.mxu0 %v22936_v55  ;;  %v2408_v55 = vadd.f32 %v14808_v3, %v2399_v40 }
 0x419   :  { %9763 = vmatpush1.bf16.msra.mxu1 %v22937_v47 }
 0x41a   :  { %9765 = vmatprep.subr.bf16.mxu1 %v22938_v0  ;;  %v2458_v13 = vadd.f32 %v2445_v10, %v2408_v55 }
 0x41b   :  { %9575 = vmatpush1.bf16.msra.mxu0 %v22937_v47 }
 0x41c   :  { %9577 = vmatprep.subr.bf16.mxu0 %v22938_v0 }
 0x41d   :  { %9767 = vmatpush1.bf16.msra.mxu1 %v22939_v58 }
 0x41e   :  { %9769 = vmatprep.subr.bf16.mxu1 %v22940_v18 }
 0x41f   :  { %9579 = vmatpush1.bf16.msra.mxu0 %v22939_v58 }
 0x420   :  { %9581 = vmatprep.subr.bf16.mxu0 %v22940_v18  ;;  %v22944_v18 = vld [vmem:[#allocation39_spill] sm:$0xff] }
 0x421   :  { %9771 = vmatpush1.bf16.msra.mxu1 %v22942_v11 }
 0x422   :  { %9773 = vmatprep.subr.bf16.mxu1 %v22943_v1 }
 0x423   :  { %v15214_v47 = vpop.permute.xlu1 %12244  ;;  %9583 = vmatpush1.bf16.msra.mxu0 %v22942_v11  ;;  %v22946_v11 = vunpack.i.h.bf16 %v15037_v14 }
 0x424   :  { %v12247_v0 = vunpack.i.h.bf16 %v15214_v47  ;;  %v22652_v58 = vunpack.i.l.bf16 %v15214_v47  ;;  %9585 = vmatprep.subr.bf16.mxu0 %v22943_v1  ;;  %v12373_v1 = vld [vmem:[%s22341_s0 + $0x30] sm:$0xff]  ;;  %s12410_s0 = smov 68  }
 0x425   :  { %9775 = vmatpush1.bf16.msra.mxu1 %v22944_v18  ;;  %v2400_v25 = vmul.f32 %v12373_v1, %v14783_v23 }
 0x426   :  { %v2538_v40 = vsel %vm423_vm2, %v12247_v0, %v22945_v37  ;;  %v2540_v5 = vsel %vm423_vm2, %v22946_v11, %v22652_v58  ;;  %9777 = vmatprep.subr.bf16.mxu1 %v22947_v49  ;;  %v22949_v0 = vmax.f32 %v14851_v31, 0.0  ;;  %v2038_v58 = vadd.f32 %v15000_v61, %v1988_v60 }
 0x427   :  { %v15239_v34 = vmax.f32 %v22948_v16, %v2538_v40  ;;  %v2489_v14 = vpop.permute.xlu1 %2488  ;;  %9587 = vmatpush1.bf16.msra.mxu0 %v22944_v18  ;;  %v2409_v16 = vadd.f32 %v14808_v3, %v2400_v25 }
 0x428   :  { %v15243_v37 = vmax.f32 %v22949_v0, %v2540_v5  ;;  %v2495_v11 = vsel %vm374_vm1, %v15099_v7, %v2489_v14  ;;  %9589 = vmatprep.subr.bf16.mxu0 %v22947_v49  ;;  %v15258_v55 = vadd.f32 %v15033_v50, %v2038_v58  ;;  %v22657_v7 = vmax.f32 %v15046_v35, 0.0  ;;  %v22951_v0 = vld [vmem:[#allocation42_spill] sm:$0xff] }
 0x429   :  { %v15250_v23 = vadd.f32 %v2495_v11, %v2458_v13  ;;  %v2459_v61 = vadd.f32 %v2439_v38, %v2409_v16  ;;  %v22950_v13 = vld [vmem:[#allocation41_spill] sm:$0xff]  ;;  %v22953_v11 = vld [vmem:[#allocation44_spill] sm:$0xff]  ;;  %v22955_v16 = vld [vmem:[#allocation46_spill] sm:$0xff] }
 0x42a   :  { %v12258_v24 = vpack.i.bf16 %v15239_v34, %v15243_v37  ;;  %v22655_v3 = vmax.f32 %v15258_v55, 0.0 }
 0x42b   :  { %v22656_v31 = vmax.f32 %v15250_v23, 0.0  ;;  %v15268_v49 = vadd.f32 %v2489_v14, %v2459_v61  ;;  %v22952_v14 = vld [vmem:[#allocation43_spill] sm:$0xff]  ;;  %v22957_v61 = vld [vmem:[#allocation48_spill] sm:$0xff] }
 0x42c   :  { %12259 = vrot.lane.b32.xlu0 %v12258_v24, %s12409_s24  ;;  %v22954_v24 = vld [vmem:[#allocation45_spill] sm:$0xff] }
 0x42d   :  { %2534 = vrot.lane.b32.xlu1 %v22656_v31, %s12408_s22  ;;  %v22654_v50 = vmax.f32 %v15268_v49, 0.0 }
 0x430   :  { %2113 = vrot.lane.b32.xlu0 %v22657_v7, %s12408_s22 }
 0x434   :  { %2115 = vrot.lane.b32.xlu0 %v22655_v3, %s12408_s22 }
 0x438   :  { %2536 = vrot.lane.b32.xlu0 %v22654_v50, %s12408_s22  ;;  %s12411_s22 = smov 8  }
 0x444   :  { %v15277_v10 = vpop.permute.xlu0 %12249 }
 0x445   :  { %v22653_v38 = vunpack.i.h.bf16 %v15277_v10  ;;  %v12251_v58 = vunpack.i.l.bf16 %v15277_v10 }
 0x447   :  { %v2159_v60 = vsel %vm465_vm3, %v12251_v58, %v22653_v38 }
 0x448   :  { %v2171_v18 = vmax.f32 %v15026_v41, %v2159_v60  ;;  %v22956_v41 = vld [vmem:[#allocation47_spill] sm:$0xff] }
 0x449   :  { %v12255_v40 = vpop.permute.xlu1 %12254  ;;  %v22960_v60 = vld [vmem:[#allocation51_spill] sm:$0xff] }
 0x44a   :  { %v12256_v5 = vunpack.i.l.bf16 %v12255_v40  ;;  %2243 = vmatprep.mubr.f32.mxu0 %v2171_v18  ;;  %v22961_v18 = vld [vmem:[#allocation69_spill] sm:$0xff]  ;;  %v12257_v38 = vunpack.i.h.bf16 %v12255_v40 }
 0x44c   :  { %v2158_v1 = vsel %vm465_vm3, %v12256_v5, %v12251_v58  ;;  %v22958_v58 = vld [vmem:[#allocation49_spill] sm:$0xff] }
 0x44d   :  { %v2170_v25 = vmax.f32 %v15063_v2, %v2158_v1  ;;  %v22959_v2 = vld [vmem:[#allocation50_spill] sm:$0xff] }
 0x44f   :  { %2244 = vmatmul.mubr.f32.vlgmr.msra.gmra.mrb[4].mxu0 %v2170_v25 }
 0x450   :  { %9591 = vmatpush1.bf16.msra.mxu0 %v22950_v13 }
 0x451   :  { %9593 = vmatprep.subr.bf16.mxu0 %v22951_v0 }
 0x454   :  { %9595 = vmatpush1.bf16.msra.mxu0 %v22952_v14 }
 0x455   :  { %9597 = vmatprep.subr.bf16.mxu0 %v22953_v11  ;;  %v12265_v5 = vpop.permute.xlu1 %12264 }
 0x456   :  { %v12266_v1 = vunpack.i.l.bf16 %v12265_v5  ;;  %v12267_v7 = vunpack.i.h.bf16 %v12265_v5  ;;  %v22963_v5 = vld [vmem:[#allocation59_spill] sm:$0xff] }
 0x457   :  { %v22964_v46 = vmax.f32 %v22963_v5, 0.0 }
 0x458   :  { %9599 = vmatpush1.bf16.msra.mxu0 %v22954_v24  ;;  %v2120_v32 = vsel %vm423_vm2, %v22962_v56, %v12266_v1  ;;  %v22965_v56 = vmax.f32 %v15096_v51, 0.0 }
 0x459   :  { %9601 = vmatprep.subr.bf16.mxu0 %v22955_v16  ;;  %v15336_v9 = vmax.f32 %v22964_v46, %v2120_v32 }
 0x45c   :  { %9603 = vmatpush1.bf16.msra.mxu0 %v22956_v41 }
 0x45d   :  { %9605 = vmatprep.subr.bf16.mxu0 %v22957_v61 }
 0x460   :  { %9607 = vmatpush1.bf16.msra.mxu0 %v22958_v58 }
 0x461   :  { %9609 = vmatprep.subr.bf16.mxu0 %v22959_v2 }
 0x464   :  { %9611 = vmatpush1.bf16.msra.mxu0 %v22960_v60 }
 0x465   :  { %9613 = vmatprep.subr.bf16.mxu0 %v22830_v63 }
 0x468   :  { %9615 = vmatpush1.bf16.msra.mxu0 %v22831_v30 }
 0x469   :  { %9617 = vmatprep.subr.bf16.mxu0 %v22832_v53 }
 0x46c   :  { %9619 = vmatpush1.bf16.msra.mxu0 %v22833_v26 }
 0x46d   :  { %9621 = vmatprep.subr.bf16.mxu0 %v22834_v59 }
 0x470   :  { %9623 = vmatpush1.bf16.msra.mxu0 %v22835_v15 }
 0x471   :  { %9625 = vmatprep.subr.bf16.mxu0 %v13683_v62 }
 0x474   :  { %9627 = vmatpush1.bf16.msra.mxu0 %v13710_v17 }
 0x475   :  { %9629 = vmatprep.subr.bf16.mxu0 %v13716_v19 }
 0x478   :  { %9631 = vmatpush1.bf16.msra.mxu0 %v13741_v52 }
 0x479   :  { %9633 = vmatprep.subr.bf16.mxu0 %v22836_v29 }
 0x47c   :  { %9635 = vmatpush1.bf16.msra.mxu0 %v22837_v4 }
 0x47d   :  { %9637 = vmatprep.subr.bf16.mxu0 %v22838_v48 }
 0x480   :  { %9639 = vmatpush1.bf16.msra.mxu0 %v22839_v39 }
 0x481   :  { %9641 = vmatprep.subr.bf16.mxu0 %v22840_v57 }
 0x484   :  { %9643 = vmatpush1.bf16.msra.mxu0 %v22841_v44 }
 0x485   :  { %9645 = vmatprep.subr.bf16.mxu0 %v22842_v45 }
 0x488   :  { %9647 = vmatpush1.bf16.msra.mxu0 %v22843_v27 }
 0x489   :  { %9649 = vmatprep.subr.bf16.mxu0 %v22844_v12 }
 0x48c   :  { %9651 = vmatpush1.bf16.msra.mxu0 %v22845_v6 }
 0x48d   :  { %9653 = vmatprep.subr.bf16.mxu0 %v22961_v18 }
 0x49e   :  { %v15319_v25 = vpop.permute.xlu0 %12259 }
 0x49f   :  { %v12262_v50 = vunpack.i.h.bf16 %v15319_v25  ;;  %v12261_v3 = vunpack.i.l.bf16 %v15319_v25  ;;  %v2535_v31 = vpop.permute.xlu1 %2534 }
 0x4a0   :  { %v2542_v20 = vsel %vm423_vm2, %v12267_v7, %v2535_v31 }
 0x4a1   :  { %v2579_v28 = vsel %vm465_vm3, %v12262_v50, %v12257_v38  ;;  %v2580_v8 = vsel %vm465_vm3, %v12257_v38, %v12261_v3  ;;  %v22966_v38 = vunpack.i.l.bf16 %v15214_v47 }
 0x4a2   :  { %v2591_v42 = vmax.f32 %v15239_v34, %v2579_v28  ;;  %v2114_v21 = vpop.permute.xlu0 %2113  ;;  %v2592_v40 = vmax.f32 %v15067_v54, %v2580_v8  ;;  %v22967_v54 = vmax.f32 %v15106_v43, 0.0 }
 0x4a3   :  { %v2121_v33 = vsel %vm423_vm2, %v12266_v1, %v2114_v21  ;;  %v2541_v28 = vsel %vm423_vm2, %v22966_v38, %v12267_v7  ;;  %v22971_v7 = vmax.f32 %v15250_v23, 0.0  ;;  %v22974_v23 = vld [vmem:[#allocation56_spill] sm:$0xff]  ;;  %v22984_v38 = vld [vmem:[#allocation78_spill] sm:$0xff] }
 0x4a4   :  { %v15340_v50 = vmax.f32 %v22965_v56, %v2121_v33  ;;  %2664 = vmatprep.mubr.f32.mxu1 %v2592_v40  ;;  %v15347_v8 = vmax.f32 %v22967_v54, %v2542_v20  ;;  %v22968_v33 = vld [vmem:[#allocation60_spill] sm:$0xff]  ;;  %v22983_v56 = vld [vmem:[#allocation77_spill] sm:$0xff] }
 0x4a5   :  { %2665 = vmatmul.mubr.f32.vlgmr.msra.gmra.mrb[4].mxu1 %v2591_v42  ;;  %v22969_v51 = vmax.f32 %v22968_v33, 0.0  ;;  %v22970_v42 = vmax.f32 %v15046_v35, 0.0  ;;  %v22982_v40 = vld [vmem:[#allocation76_spill] sm:$0xff]  ;;  %v22987_v33 = vld [vmem:[#allocation81_spill] sm:$0xff] }
 0x4a6   :  { %v12268_v34 = vpack.i.bf16 %v15340_v50, %v15336_v9  ;;  %v2116_v1 = vpop.permute.xlu0 %2115  ;;  %9779 = vmatpush1.bf16.msra.mxu1 %v22950_v13  ;;  %v22972_v13 = vmax.f32 %v15258_v55, 0.0  ;;  %v22975_v55 = vld [vmem:[#allocation58_spill] sm:$0xff] }
 0x4a7   :  { %v2122_v46 = vsel %vm423_vm2, %v2114_v21, %v2116_v1  ;;  %9781 = vmatprep.subr.bf16.mxu1 %v22951_v0  ;;  %v15356_v32 = vmax.f32 %v22969_v51, %v2541_v28  ;;  %v22985_v28 = vld [vmem:[#allocation79_spill] sm:$0xff] }
 0x4a8   :  { %v15360_v47 = vmax.f32 %v22970_v42, %v2122_v46  ;;  %12269 = vrot.lane.b32.xlu1 %v12268_v34, %s12409_s24  ;;  %v2136_v0 = vmax.f32 %v22972_v13, %v2116_v1  ;;  %v22986_v34 = vld [vmem:[#allocation80_spill] sm:$0xff]  ;;  %v22988_v42 = vld [vmem:[#allocation82_spill] sm:$0xff] }
 0x4a9   :  { %v12273_v20 = vpack.i.bf16 %v15347_v8, %v15356_v32  ;;  %v22994_v13 = vld [vmem:[#allocation88_spill] sm:$0xff] }
 0x4aa   :  { %2154 = vrot.lane.b32.xlu0 %v15360_v47, %s12409_s24  ;;  %v2537_v43 = vpop.permute.xlu0 %2536  ;;  %9783 = vmatpush1.bf16.msra.mxu1 %v22952_v14 }
 0x4ab   :  { %v2543_v21 = vsel %vm423_vm2, %v2535_v31, %v2537_v43  ;;  %9785 = vmatprep.subr.bf16.mxu1 %v22953_v11  ;;  %v22973_v31 = vmax.f32 %v15268_v49, 0.0 }
 0x4ac   :  { %v15372_v35 = vmax.f32 %v22971_v7, %v2543_v21  ;;  %12274 = vrot.lane.b32.xlu1 %v12273_v20, %s12409_s24  ;;  %v22991_v21 = vld [vmem:[#allocation85_spill] sm:$0xff]  ;;  %v22992_v7 = vld [vmem:[#allocation86_spill] sm:$0xff] }
 0x4ad   :  { %v2557_v14 = vmax.f32 %v22973_v31, %v2537_v43  ;;  %v22990_v43 = vld [vmem:[#allocation84_spill] sm:$0xff]  ;;  %v22996_v31 = vld [vmem:[#allocation90_spill] sm:$0xff] }
 0x4ae   :  { %2575 = vrot.lane.b32.xlu0 %v15372_v35, %s12409_s24  ;;  %9787 = vmatpush1.bf16.msra.mxu1 %v22954_v24 }
 0x4af   :  { %9789 = vmatprep.subr.bf16.mxu1 %v22955_v16 }
 0x4b0   :  { %2156 = vrot.lane.b32.xlu1 %v2136_v0, %s12409_s24  ;;  %v22995_v0 = vld [vmem:[#allocation89_spill] sm:$0xff] }
 0x4b2   :  { %2815 = vrot.lane.b32.xlu0 %v22974_v23, %s12410_s0  ;;  %9791 = vmatpush1.bf16.msra.mxu1 %v22956_v41  ;;  %v22998_v23 = vld [vmem:[#allocation95_spill] sm:$0xff] }
 0x4b3   :  { %9793 = vmatprep.subr.bf16.mxu1 %v22957_v61 }
 0x4b4   :  { %2577 = vrot.lane.b32.xlu1 %v2557_v14, %s12409_s24  ;;  %s12412_s24 = smov 76   ;;  %v22997_v14 = vld [vmem:[#allocation94_spill] sm:$0xff] }
 0x4b6   :  { %9795 = vmatpush1.bf16.msra.mxu1 %v22958_v58  ;;  %v22980_v58 = vld [vmem:[#allocation74_spill] sm:$0xff] }
 0x4b7   :  { %9797 = vmatprep.subr.bf16.mxu1 %v22959_v2 }
 0x4b8   :  { %2817 = vrot.lane.b32.xlu1 %v22975_v55, %s12410_s0  ;;  %v22999_v55 = vld [vmem:[#allocation96_spill] sm:$0xff] }
 0x4ba   :  { %9799 = vmatpush1.bf16.msra.mxu1 %v22960_v60  ;;  %v22981_v60 = vld [vmem:[#allocation75_spill] sm:$0xff] }
 0x4bb   :  { %9801 = vmatprep.subr.bf16.mxu1 %v22830_v63  ;;  %v1966_v49 = vpop.f32.mrb[2].mxu1 }
 0x4bc   :  { %v1968_v11 = vpop.f32.mrb[3].mxu1 }
 0x4bd   :  { %v12278_v24 = vpack.i.bf16 %v1968_v11, %v1966_v49  ;;  %v1545_v16 = vpop.f32.mrb[2].mxu0  ;;  %v23000_v49 = vld [vmem:[#allocation97_spill] sm:$0xff]  ;;  %v23001_v11 = vld [vmem:[#allocation98_spill] sm:$0xff] }
 0x4be   :  { %9803 = vmatpush1.bf16.msra.mxu1 %v22831_v30  ;;  %2826 = vrot.lane.b32.xlu0 %v1545_v16, %s12411_s22  ;;  %v1547_v41 = vpop.f32.mrb[3].mxu0  ;;  %v2884_v16 = vld [vmem:[%s22345_s4 + $0x70] sm:$0xff] }
 0x4bf   :  { %9805 = vmatprep.subr.bf16.mxu1 %v22832_v53  ;;  %2828 = vrot.lane.b32.xlu1 %v1547_v41, %s12411_s22  ;;  %v22978_v53 = vld [vmem:[#allocation72_spill] sm:$0xff]  ;;  %v2870_v41 = vld [vmem:[%s22345_s4] sm:$0xff] }
 0x4c2   :  { %9807 = vmatpush1.bf16.msra.mxu1 %v22833_v26  ;;  %12279 = vrot.lane.b32.xlu0 %v12278_v24, %s12412_s24  ;;  %v23002_v24 = vld [vmem:[#allocation99_spill] sm:$0xff] }
 0x4c3   :  { %9809 = vmatprep.subr.bf16.mxu1 %v22834_v59 }
 0x4c6   :  { %9811 = vmatpush1.bf16.msra.mxu1 %v22835_v15 }
 0x4c7   :  { %9813 = vmatprep.subr.bf16.mxu1 %v13683_v62 }
 0x4ca   :  { %9815 = vmatpush1.bf16.msra.mxu1 %v13710_v17 }
 0x4cb   :  { %9817 = vmatprep.subr.bf16.mxu1 %v13716_v19  ;;  %v22976_v19 = vunpack.i.h.bf16 %v15277_v10  ;;  %v22979_v10 = vld [vmem:[#allocation73_spill] sm:$0xff] }
 0x4ce   :  { %9819 = vmatpush1.bf16.msra.mxu1 %v13741_v52 }
 0x4cf   :  { %9821 = vmatprep.subr.bf16.mxu1 %v22836_v29 }
 0x4d2   :  { %9823 = vmatpush1.bf16.msra.mxu1 %v22837_v4 }
 0x4d3   :  { %9825 = vmatprep.subr.bf16.mxu1 %v22838_v48 }
 0x4d6   :  { %9827 = vmatpush1.bf16.msra.mxu1 %v22839_v39 }
 0x4d7   :  { %9829 = vmatprep.subr.bf16.mxu1 %v22840_v57 }
 0x4da   :  { %9831 = vmatpush1.bf16.msra.mxu1 %v22841_v44 }
 0x4db   :  { %9833 = vmatprep.subr.bf16.mxu1 %v22842_v45  ;;  %v22977_v45 = vld [vmem:[#allocation61_spill] sm:$0xff] }
 0x4de   :  { %9835 = vmatpush1.bf16.msra.mxu1 %v22843_v27 }
 0x4df   :  { %9837 = vmatprep.subr.bf16.mxu1 %v22844_v12 }
 0x4e2   :  { %9839 = vmatpush1.bf16.msra.mxu1 %v22845_v6 }
 0x4e3   :  { %9841 = vmatprep.subr.bf16.mxu1 %v22961_v18 }
 0x51a   :  { %v15413_v52 = vpop.permute.xlu1 %12269 }
 0x51b   :  { %v12272_v62 = vunpack.i.h.bf16 %v15413_v52  ;;  %v12271_v17 = vunpack.i.l.bf16 %v15413_v52 }
 0x51c   :  { %v15424_v57 = vpop.permute.xlu0 %2154 }
 0x51d   :  { %v2160_v44 = vsel %vm465_vm3, %v22976_v19, %v12271_v17  ;;  %v2161_v27 = vsel %vm465_vm3, %v12271_v17, %v12272_v62  ;;  %v2883_v17 = vld [vmem:[%s22345_s4 + $0x68] sm:$0xff]  ;;  %v2162_v19 = vsel %vm465_vm3, %v12272_v62, %v15424_v57  ;;  %v2873_v62 = vld [vmem:[%s22345_s4 + $0x18] sm:$0xff] }
 0x51e   :  { %v2172_v12 = vmax.f32 %v22977_v45, %v2160_v44  ;;  %v15426_v6 = vpop.permute.xlu1 %12274  ;;  %v2173_v39 = vmax.f32 %v15336_v9, %v2161_v27  ;;  %v23004_v44 = vld [vmem:[#allocation101_spill] sm:$0xff]  ;;  %v2897_v27 = vld [vmem:[%s22345_s4 + $0xd8] sm:$0xff]  ;;  %v2910_v45 = vld [vmem:[%s22345_s4 + $0x140] sm:$0xff] }
 0x51f   :  { %v12277_v29 = vunpack.i.h.bf16 %v15426_v6  ;;  %v12276_v48 = vunpack.i.l.bf16 %v15426_v6 }
 0x520   :  { %2314 = vmatprep.mubr.f32.mxu0 %v2173_v39  ;;  %v15443_v61 = vpop.permute.xlu0 %2575  ;;  %v9902_v39 = vpack.c.bf16 %v2883_v17, %v2870_v41  ;;  %v2963_v41 = vld [vmem:[%s22345_s4 + $0x2e8] sm:$0xff]  ;;  %v3001_v17 = vld [vmem:[%s22345_s4 + $0x418] sm:$0xff] }
 0x521   :  { %v2581_v4 = vsel %vm465_vm3, %v12261_v3, %v12276_v48  ;;  %2315 = vmatmul.mubr.f32.vlgmr.msra.gmra.mrb[4].mxu0 %v2172_v12  ;;  %v2582_v63 = vsel %vm465_vm3, %v12276_v48, %v12277_v29  ;;  %v23005_v12 = vld [vmem:[#allocation62_spill] sm:$0xff]  ;;  %v2896_v48 = vld [vmem:[%s22345_s4 + $0xd0] sm:$0xff] }
 0x522   :  { %v2593_v30 = vmax.f32 %v15243_v37, %v2581_v4  ;;  %9655 = vmatpush1.bf16.msra.mxu0 %v22978_v53  ;;  %v2157_v26 = vpop.permute.xlu1 %2156  ;;  %v2594_v59 = vmax.f32 %v15356_v32, %v2582_v63  ;;  %v2174_v4 = vmax.f32 %v15340_v50, %v2162_v19  ;;  %v9904_v63 = vpack.c.bf16 %v2910_v45, %v2897_v27  ;;  %v2923_v50 = vld [vmem:[%s22345_s4 + $0x1a8] sm:$0xff]  ;;  %v3014_v19 = vld [vmem:[%s22345_s4 + $0x480] sm:$0xff] }
 0x523   :  { %v2163_v15 = vsel %vm465_vm3, %v15424_v57, %v2157_v26  ;;  %9657 = vmatprep.subr.bf16.mxu0 %v22979_v10  ;;  %v2886_v57 = vld [vmem:[%s22345_s4 + $0x80] sm:$0xff]  ;;  %v2885_v26 = vld [vmem:[%s22345_s4 + $0x78] sm:$0xff] }
 0x524   :  { %v2175_v3 = vmax.f32 %v15360_v47, %v2163_v15  ;;  %2735 = vmatprep.mubr.f32.mxu1 %v2594_v59  ;;  %v15454_v25 = vpop.permute.xlu0 %2815  ;;  %v22989_v47 = vld [vmem:[#allocation83_spill] sm:$0xff]  ;;  %v2583_v59 = vsel %vm465_vm3, %v12277_v29, %v15443_v61  ;;  %v10192_v6 = vpack.c.bf16 %v2886_v57, %v2873_v62  ;;  %v2899_v29 = vld [vmem:[%s22345_s4 + $0xe8] sm:$0xff]  ;;  %v9920_v62 = vpack.c.bf16 %v3014_v19, %v3001_v17  ;;  %v3080_v19 = vld [vmem:[%s22345_s4 + $0x690] sm:$0xff] }
 0x525   :  { %2736 = vmatmul.mubr.f32.vlgmr.msra.gmra.mrb[4].mxu1 %v2593_v30  ;;  %v2909_v30 = vld [vmem:[%s22345_s4 + $0x138] sm:$0xff]  ;;  %v23006_v15 = vld [vmem:[#allocation63_spill] sm:$0xff] }
 0x526   :  { %9659 = vmatpush1.bf16.msra.mxu0 %v22980_v58  ;;  %9843 = vmatpush1.bf16.msra.mxu1 %v22978_v53  ;;  %v2578_v37 = vpop.permute.xlu1 %2577  ;;  %v2872_v53 = vld [vmem:[%s22345_s4 + $0x10] sm:$0xff]  ;;  %v2990_v27 = vld [vmem:[%s22345_s4 + $0x3c0] sm:$0xff] }
 0x527   :  { %v2584_v2 = vsel %vm465_vm3, %v15443_v61, %v2578_v37  ;;  %8349 = vmatprep.mubr.msk.f32.mxu0 %vm484_vm4, %v2175_v3  ;;  %9661 = vmatprep.subr.bf16.mxu0 %v22981_v60  ;;  %v23007_v3 = vld [vmem:[#allocation55_spill] sm:$0xff]  ;;  %v2912_v61 = vld [vmem:[%s22345_s4 + $0x150] sm:$0xff]  ;;  %v9906_v37 = vpack.c.bf16 %v2909_v30, %v2896_v48 }
 0x528   :  { %v2596_v18 = vmax.f32 %v15372_v35, %v2584_v2  ;;  %9845 = vmatprep.subr.bf16.mxu1 %v22979_v10  ;;  %v22993_v35 = vld [vmem:[#allocation87_spill] sm:$0xff]  ;;  %v2936_v10 = vld [vmem:[%s22345_s4 + $0x210] sm:$0xff]  ;;  %v10194_v2 = vpack.c.bf16 %v2885_v26, %v2872_v53  ;;  %v3003_v53 = vld [vmem:[%s22345_s4 + $0x428] sm:$0xff] }
 0x529   :  { %v2976_v48 = vld [vmem:[%s22345_s4 + $0x350] sm:$0xff] }
 0x52a   :  { %9663 = vmatpush1.bf16.msra.mxu0 %v22982_v40  ;;  %9847 = vmatpush1.bf16.msra.mxu1 %v22980_v58  ;;  %v15458_v5 = vpop.permute.xlu1 %2817  ;;  %v15586_v58 = vsel %vm2819_vm6, %v23007_v3, %v15454_v25  ;;  %v3040_v30 = vld [vmem:[%s22345_s4 + $0x550] sm:$0xff] }
 0x52b   :  { %8356 = vmatprep.mubr.msk.f32.mxu1 %vm484_vm4, %v2596_v18  ;;  %v15464_v9 = vsel %vm2819_vm6, %v15454_v25, %v15458_v5  ;;  %9665 = vmatprep.subr.bf16.mxu0 %v22983_v56  ;;  %v2935_v18 = vld [vmem:[%s22345_s4 + $0x208] sm:$0xff]  ;;  %v2595_v25 = vmax.f32 %v15347_v8, %v2583_v59  ;;  %v10196_v8 = vpack.c.bf16 %v2912_v61, %v2899_v29  ;;  %v3016_v26 = vld [vmem:[%s22345_s4 + $0x490] sm:$0xff]  ;;  %v3002_v29 = vld [vmem:[%s22345_s4 + $0x420] sm:$0xff] }
 0x52c   :  { %9849 = vmatprep.subr.bf16.mxu1 %v22981_v60  ;;  %v2922_v60 = vld [vmem:[%s22345_s4 + $0x1a0] sm:$0xff]  ;;  %v3015_v61 = vld [vmem:[%s22345_s4 + $0x488] sm:$0xff] }
 0x52e   :  { %9667 = vmatpush1.bf16.msra.mxu0 %v22984_v38  ;;  %9851 = vmatpush1.bf16.msra.mxu1 %v22982_v40  ;;  %v9908_v40 = vpack.c.bf16 %v2936_v10, %v2923_v50  ;;  %v3026_v50 = vld [vmem:[%s22345_s4 + $0x4e0] sm:$0xff]  ;;  %v3039_v10 = vld [vmem:[%s22345_s4 + $0x548] sm:$0xff] }
 0x52f   :  { %9669 = vmatprep.subr.bf16.mxu0 %v22985_v28  ;;  %9853 = vmatprep.subr.bf16.mxu1 %v22983_v56  ;;  %v2898_v56 = vld [vmem:[%s22345_s4 + $0xe0] sm:$0xff] }
 0x530   :  { %v15472_v54 = vpop.permute.xlu0 %2826 }
 0x531   :  { %v2829_v1 = vpop.permute.xlu1 %2828 }
 0x532   :  { %9671 = vmatpush1.bf16.msra.mxu0 %v22986_v34  ;;  %9855 = vmatpush1.bf16.msra.mxu1 %v22984_v38  ;;  %v2831_v46 = vsel %vm2830_vm7, %v15472_v54, %v2829_v1  ;;  %v2911_v38 = vld [vmem:[%s22345_s4 + $0x148] sm:$0xff]  ;;  %v2925_v1 = vld [vmem:[%s22345_s4 + $0x1b8] sm:$0xff] }
 0x533   :  { %9673 = vmatprep.subr.bf16.mxu0 %v22987_v33  ;;  %9857 = vmatprep.subr.bf16.mxu1 %v22985_v28  ;;  %v2949_v28 = vld [vmem:[%s22345_s4 + $0x278] sm:$0xff] }
 0x534   :  { %v15480_v51 = vpop.permute.xlu0 %12279 }
 0x535   :  { %v12281_v32 = vunpack.i.l.bf16 %v15480_v51 }
 0x536   :  { %9675 = vmatpush1.bf16.msra.mxu0 %v22988_v42  ;;  %9859 = vmatpush1.bf16.msra.mxu1 %v22986_v34  ;;  %v2962_v34 = vld [vmem:[%s22345_s4 + $0x2e0] sm:$0xff] }
 0x537   :  { %9677 = vmatprep.subr.bf16.mxu0 %v22989_v47  ;;  %9861 = vmatprep.subr.bf16.mxu1 %v22987_v33  ;;  %v15490_v20 = vsel %vm2840_vm8, %v2831_v46, %v12281_v32  ;;  %v2938_v46 = vld [vmem:[%s22345_s4 + $0x220] sm:$0xff]  ;;  %v9910_v33 = vpack.c.bf16 %v2935_v18, %v2922_v60  ;;  %v3029_v60 = vld [vmem:[%s22345_s4 + $0x4f8] sm:$0xff] }
 0x538   :  { %v3042_v18 = vld [vmem:[%s22345_s4 + $0x560] sm:$0xff] }
 0x53a   :  { %9679 = vmatpush1.bf16.msra.mxu0 %v22990_v43  ;;  %9863 = vmatpush1.bf16.msra.mxu1 %v22988_v42  ;;  %v10198_v42 = vpack.c.bf16 %v2911_v38, %v2898_v56  ;;  %v3052_v56 = vld [vmem:[%s22345_s4 + $0x5b0] sm:$0xff]  ;;  %v3065_v38 = vld [vmem:[%s22345_s4 + $0x618] sm:$0xff] }
 0x53b   :  { %9681 = vmatprep.subr.bf16.mxu0 %v22991_v21  ;;  %9865 = vmatprep.subr.bf16.mxu1 %v22989_v47  ;;  %v2948_v47 = vld [vmem:[%s22345_s4 + $0x270] sm:$0xff] }
 0x53e   :  { %9683 = vmatpush1.bf16.msra.mxu0 %v22992_v7  ;;  %9867 = vmatpush1.bf16.msra.mxu1 %v22990_v43  ;;  %v2961_v43 = vld [vmem:[%s22345_s4 + $0x2d8] sm:$0xff] }
 0x53f   :  { %9685 = vmatprep.subr.bf16.mxu0 %v22993_v35  ;;  %9869 = vmatprep.subr.bf16.mxu1 %v22991_v21  ;;  %v9912_v21 = vpack.c.bf16 %v2962_v34, %v2949_v28  ;;  %v3028_v34 = vld [vmem:[%s22345_s4 + $0x4f0] sm:$0xff] }
 0x542   :  { %9687 = vmatpush1.bf16.msra.mxu0 %v22994_v13  ;;  %9871 = vmatpush1.bf16.msra.mxu1 %v22992_v7  ;;  %v10200_v7 = vpack.c.bf16 %v2938_v46, %v2925_v1  ;;  %v3041_v1 = vld [vmem:[%s22345_s4 + $0x558] sm:$0xff]  ;;  %v3079_v46 = vld [vmem:[%s22345_s4 + $0x688] sm:$0xff] }
 0x543   :  { %9689 = vmatprep.subr.bf16.mxu0 %v22995_v0  ;;  %9873 = vmatprep.subr.bf16.mxu1 %v22993_v35  ;;  %v2924_v35 = vld [vmem:[%s22345_s4 + $0x1b0] sm:$0xff] }
 0x546   :  { %9691 = vmatpush1.bf16.msra.mxu0 %v22996_v31  ;;  %9875 = vmatpush1.bf16.msra.mxu1 %v22994_v13  ;;  %v2937_v13 = vld [vmem:[%s22345_s4 + $0x218] sm:$0xff] }
 0x547   :  { %9693 = vmatprep.subr.bf16.mxu0 %v22894_v22  ;;  %9877 = vmatprep.subr.bf16.mxu1 %v22995_v0  ;;  %v2975_v0 = vld [vmem:[%s22345_s4 + $0x348] sm:$0xff] }
 0x54a   :  { %9695 = vmatpush1.bf16.msra.mxu0 %v22897_v36  ;;  %9879 = vmatpush1.bf16.msra.mxu1 %v22996_v31  ;;  %v2988_v31 = vld [vmem:[%s22345_s4 + $0x3b0] sm:$0xff] }
 0x54b   :  { %9697 = vmatprep.subr.bf16.mxu0 %v22997_v14  ;;  %9881 = vmatprep.subr.bf16.mxu1 %v22894_v22  ;;  %v23003_v22 = vld [vmem:[#allocation100_spill] sm:$0xff] }
 0x54e   :  { %9699 = vmatpush1.bf16.msra.mxu0 %v22998_v23  ;;  %9883 = vmatpush1.bf16.msra.mxu1 %v22897_v36  ;;  %v2871_v36 = vld [vmem:[%s22345_s4 + $0x8] sm:$0xff] }
 0x54f   :  { %9701 = vmatprep.subr.bf16.mxu0 %v22999_v55  ;;  %9885 = vmatprep.subr.bf16.mxu1 %v22997_v14  ;;  %v9900_v52 = vpack.c.bf16 %v2884_v16, %v2871_v36  ;;  %v2951_v14 = vld [vmem:[%s22345_s4 + $0x288] sm:$0xff]  ;;  %v2950_v16 = vld [vmem:[%s22345_s4 + $0x280] sm:$0xff] }
 0x552   :  { %9703 = vmatpush1.bf16.msra.mxu0 %v23000_v49  ;;  %9887 = vmatpush1.bf16.msra.mxu1 %v22998_v23  ;;  %v2964_v23 = vld [vmem:[%s22345_s4 + $0x2f0] sm:$0xff] }
 0x553   :  { %9705 = vmatprep.subr.bf16.mxu0 %v23001_v11  ;;  %9889 = vmatprep.subr.bf16.mxu1 %v22999_v55  ;;  %v9914_v55 = vpack.c.bf16 %v2961_v43, %v2948_v47  ;;  %v10204_v36 = vpack.c.bf16 %v2964_v23, %v2951_v14  ;;  %v3068_v47 = vld [vmem:[%s22345_s4 + $0x630] sm:$0xff]  ;;  %v9930_v43 = vpack.c.bf16 %v3065_v38, %v3052_v56  ;;  %v3067_v14 = vld [vmem:[%s22345_s4 + $0x628] sm:$0xff]  ;;  %v3105_v23 = vld [vmem:[%s22345_s4 + $0x758] sm:$0xff] }
 0x554   :  { %v3172_v56 = vld [vmem:[%s22345_s4 + $0x970] sm:$0xff] }
 0x556   :  { %9707 = vmatpush1.bf16.msra.mxu0 %v23002_v24  ;;  %9891 = vmatpush1.bf16.msra.mxu1 %v23000_v49  ;;  %v10202_v49 = vpack.c.bf16 %v2937_v13, %v2924_v35  ;;  %v3091_v35 = vld [vmem:[%s22345_s4 + $0x6e8] sm:$0xff] }
 0x557   :  { %9709 = vmatprep.subr.bf16.mxu0 %v23003_v22  ;;  %9893 = vmatprep.subr.bf16.mxu1 %v23001_v11  ;;  %v2974_v11 = vld [vmem:[%s22345_s4 + $0x340] sm:$0xff] }
 0x55a   :  { %9711 = vmatpush1.bf16.msra.mxu0 %v23004_v44  ;;  %9895 = vmatpush1.bf16.msra.mxu1 %v23002_v24  ;;  %v2987_v24 = vld [vmem:[%s22345_s4 + $0x3a8] sm:$0xff] }
 0x55b   :  { %8347 = vmatprep.subr.msk.mxu0 %vm488_vm5, %v23005_v12  ;;  %9897 = vmatprep.subr.bf16.mxu1 %v23003_v22  ;;  %v9916_v22 = vpack.c.bf16 %v2988_v31, %v2975_v0  ;;  %v9918_v45 = vpack.c.bf16 %v2987_v24, %v2974_v11  ;;  %v3054_v31 = vld [vmem:[%s22345_s4 + $0x5c0] sm:$0xff] }
 0x55c   :  { %v3094_v11 = vld [vmem:[%s22345_s4 + $0x700] sm:$0xff] }
 0x55e   :  { %8348 = vmatpush1.msk.msra.mxu0 %vm488_vm5, %v23006_v15  ;;  %9899 = vmatpush1.bf16.msra.mxu1 %v23004_v44  ;;  %v2977_v44 = vld [vmem:[%s22345_s4 + $0x358] sm:$0xff] }
 0x55f   :  { %2386 = vmatmul.mubr.f32.vlgmr.msra.gmra.mrb[4].mxu0 %v2174_v4  ;;  %9901 = vmatprep.subr.bf16.mxu0 %v9900_v52  ;;  %v3000_v52 = vld [vmem:[%s22345_s4 + $0x410] sm:$0xff]  ;;  %v10208_v57 = vpack.c.bf16 %v2990_v27, %v2977_v44  ;;  %v2989_v4 = vld [vmem:[%s22345_s4 + $0x3b8] sm:$0xff]  ;;  %v3131_v27 = vld [vmem:[%s22345_s4 + $0x828] sm:$0xff] }
 0x560   :  { %9903 = vmatpush1.bf16.msra.mxu0 %v9902_v39  ;;  %4917 = vmatprep.mubr.f32.mxu0 %v15586_v58  ;;  %v3013_v39 = vld [vmem:[%s22345_s4 + $0x478] sm:$0xff] }
 0x561   :  { %8354 = vmatprep.subr.msk.mxu1 %vm488_vm5, %v23005_v12  ;;  %9905 = vmatprep.subr.bf16.mxu0 %v9904_v63  ;;  %v10206_v12 = vpack.c.bf16 %v2963_v41, %v2950_v16  ;;  %v3027_v63 = vld [vmem:[%s22345_s4 + $0x4e8] sm:$0xff]  ;;  %v9922_v59 = vpack.c.bf16 %v3013_v39, %v3000_v52  ;;  %v3117_v16 = vld [vmem:[%s22345_s4 + $0x7b8] sm:$0xff]  ;;  %v3120_v52 = vld [vmem:[%s22345_s4 + $0x7d0] sm:$0xff] }
 0x562   :  { %8355 = vmatpush1.msk.msra.mxu1 %vm488_vm5, %v23006_v15  ;;  %v10210_v15 = vpack.c.bf16 %v2989_v4, %v2976_v48  ;;  %v9924_v3 = vpack.c.bf16 %v3040_v30, %v3027_v63  ;;  %v3093_v44 = vld [vmem:[%s22345_s4 + $0x6f8] sm:$0xff]  ;;  %v3143_v48 = vld [vmem:[%s22345_s4 + $0x888] sm:$0xff]  ;;  %v3106_v30 = vld [vmem:[%s22345_s4 + $0x760] sm:$0xff] }
 0x563   :  { %2807 = vmatmul.mubr.f32.vlgmr.msra.gmra.mrb[4].mxu1 %v2595_v25  ;;  %10193 = vmatprep.subr.bf16.mxu1 %v10192_v6  ;;  %v10212_v6 = vpack.c.bf16 %v3016_v26, %v3003_v53  ;;  %v9926_v25 = vpack.c.bf16 %v3039_v10, %v3026_v50  ;;  %v3119_v53 = vld [vmem:[%s22345_s4 + $0x7c8] sm:$0xff]  ;;  %v3157_v26 = vld [vmem:[%s22345_s4 + $0x8f8] sm:$0xff]  ;;  %v3146_v50 = vld [vmem:[%s22345_s4 + $0x8a0] sm:$0xff] }
 0x564   :  { %9907 = vmatpush1.bf16.msra.mxu0 %v9906_v37  ;;  %10195 = vmatpush1.bf16.msra.mxu1 %v10194_v2  ;;  %v3053_v37 = vld [vmem:[%s22345_s4 + $0x5b8] sm:$0xff]  ;;  %v3066_v2 = vld [vmem:[%s22345_s4 + $0x620] sm:$0xff] }
 0x565   :  { %5272 = vmatprep.mubr.f32.mxu1 %v15586_v58  ;;  %9909 = vmatprep.subr.bf16.mxu0 %v9908_v40  ;;  %v10214_v40 = vpack.c.bf16 %v3015_v61, %v3002_v29  ;;  %v9928_v28 = vpack.c.bf16 %v3066_v2, %v3053_v37  ;;  %v3169_v29 = vld [vmem:[%s22345_s4 + $0x958] sm:$0xff]  ;;  %v3132_v2 = vld [vmem:[%s22345_s4 + $0x830] sm:$0xff] }
 0x566   :  { %10197 = vmatprep.subr.bf16.mxu1 %v10196_v8  ;;  %v10216_v8 = vpack.c.bf16 %v3042_v18, %v3029_v60  ;;  %v3145_v60 = vld [vmem:[%s22345_s4 + $0x898] sm:$0xff]  ;;  %v3183_v18 = vld [vmem:[%s22345_s4 + $0x9c8] sm:$0xff] }
 0x568   :  { %9911 = vmatpush1.bf16.msra.mxu0 %v9910_v33  ;;  %10199 = vmatpush1.bf16.msra.mxu1 %v10198_v42  ;;  %v3092_v33 = vld [vmem:[%s22345_s4 + $0x6f0] sm:$0xff]  ;;  %v3055_v42 = vld [vmem:[%s22345_s4 + $0x5c8] sm:$0xff] }
 0x569   :  { %9913 = vmatprep.subr.bf16.mxu0 %v9912_v21  ;;  %10201 = vmatprep.subr.bf16.mxu1 %v10200_v7  ;;  %v10218_v21 = vpack.c.bf16 %v3041_v1, %v3028_v34  ;;  %v3078_v7 = vld [vmem:[%s22345_s4 + $0x680] sm:$0xff]  ;;  %v9932_v13 = vpack.c.bf16 %v3092_v33, %v3079_v46  ;;  %v10220_v0 = vpack.c.bf16 %v3068_v47, %v3055_v42  ;;  %v3195_v34 = vld [vmem:[%s22345_s4 + $0xa28] sm:$0xff]  ;;  %v3209_v47 = vld [vmem:[%s22345_s4 + $0xa98] sm:$0xff] }
 0x56a   :  { %v9934_v24 = vpack.c.bf16 %v3091_v35, %v3078_v7  ;;  %v3158_v33 = vld [vmem:[%s22345_s4 + $0x900] sm:$0xff]  ;;  %v3171_v42 = vld [vmem:[%s22345_s4 + $0x968] sm:$0xff] }
 0x56b   :  { %v3198_v7 = vld [vmem:[%s22345_s4 + $0xa40] sm:$0xff] }
 0x56c   :  { %9915 = vmatpush1.bf16.msra.mxu0 %v9914_v55  ;;  %10203 = vmatpush1.bf16.msra.mxu1 %v10202_v49  ;;  %v3118_v55 = vld [vmem:[%s22345_s4 + $0x7c0] sm:$0xff]  ;;  %v3081_v49 = vld [vmem:[%s22345_s4 + $0x698] sm:$0xff] }
 0x56d   :  { %9917 = vmatprep.subr.bf16.mxu0 %v9916_v22  ;;  %10205 = vmatprep.subr.bf16.mxu1 %v10204_v36  ;;  %v10222_v22 = vpack.c.bf16 %v3067_v14, %v3054_v31  ;;  %v3104_v36 = vld [vmem:[%s22345_s4 + $0x750] sm:$0xff]  ;;  %v9936_v41 = vpack.c.bf16 %v3118_v55, %v3105_v23  ;;  %v10224_v17 = vpack.c.bf16 %v3094_v11, %v3081_v49  ;;  %v3221_v31 = vld [vmem:[%s22345_s4 + $0xaf8] sm:$0xff]  ;;  %v3235_v11 = vld [vmem:[%s22345_s4 + $0xb68] sm:$0xff] }
 0x56e   :  { %v9938_v39 = vpack.c.bf16 %v3117_v16, %v3104_v36  ;;  %v3184_v55 = vld [vmem:[%s22345_s4 + $0x9d0] sm:$0xff]  ;;  %v3197_v49 = vld [vmem:[%s22345_s4 + $0xa38] sm:$0xff] }
 0x56f   :  { %v3224_v36 = vld [vmem:[%s22345_s4 + $0xb10] sm:$0xff] }
 0x570   :  { %9919 = vmatpush1.bf16.msra.mxu0 %v9918_v45  ;;  %10207 = vmatpush1.bf16.msra.mxu1 %v10206_v12  ;;  %v3144_v45 = vld [vmem:[%s22345_s4 + $0x890] sm:$0xff]  ;;  %v3107_v12 = vld [vmem:[%s22345_s4 + $0x768] sm:$0xff] }
 0x571   :  { %9921 = vmatprep.subr.bf16.mxu0 %v9920_v62  ;;  %10209 = vmatprep.subr.bf16.mxu1 %v10208_v57  ;;  %v10226_v62 = vpack.c.bf16 %v3093_v44, %v3080_v19  ;;  %v3130_v57 = vld [vmem:[%s22345_s4 + $0x820] sm:$0xff]  ;;  %v9940_v4 = vpack.c.bf16 %v3144_v45, %v3131_v27  ;;  %v10228_v63 = vpack.c.bf16 %v3120_v52, %v3107_v12  ;;  %v3247_v19 = vld [vmem:[%s22345_s4 + $0xbc8] sm:$0xff]  ;;  %v3261_v52 = vld [vmem:[%s22345_s4 + $0xc38] sm:$0xff] }
 0x572   :  { %v9942_v10 = vpack.c.bf16 %v3143_v48, %v3130_v57  ;;  %v3210_v45 = vld [vmem:[%s22345_s4 + $0xaa0] sm:$0xff]  ;;  %v3223_v12 = vld [vmem:[%s22345_s4 + $0xb08] sm:$0xff] }
 0x573   :  { %v3250_v57 = vld [vmem:[%s22345_s4 + $0xbe0] sm:$0xff] }
 0x574   :  { %9923 = vmatpush1.bf16.msra.mxu0 %v9922_v59  ;;  %10211 = vmatpush1.bf16.msra.mxu1 %v10210_v15  ;;  %v3170_v59 = vld [vmem:[%s22345_s4 + $0x960] sm:$0xff]  ;;  %v3133_v15 = vld [vmem:[%s22345_s4 + $0x838] sm:$0xff] }
 0x575   :  { %9925 = vmatprep.subr.bf16.mxu0 %v9924_v3  ;;  %10213 = vmatprep.subr.bf16.mxu1 %v10212_v6  ;;  %v10230_v3 = vpack.c.bf16 %v3119_v53, %v3106_v30  ;;  %v3156_v6 = vld [vmem:[%s22345_s4 + $0x8f0] sm:$0xff]  ;;  %v9944_v61 = vpack.c.bf16 %v3170_v59, %v3157_v26  ;;  %v10232_v37 = vpack.c.bf16 %v3146_v50, %v3133_v15  ;;  %v3273_v30 = vld [vmem:[%s22345_s4 + $0xc98] sm:$0xff]  ;;  %v3287_v50 = vld [vmem:[%s22345_s4 + $0xd08] sm:$0xff] }
 0x576   :  { %v9946_v38 = vpack.c.bf16 %v3169_v29, %v3156_v6  ;;  %v3236_v59 = vld [vmem:[%s22345_s4 + $0xb70] sm:$0xff]  ;;  %v3249_v15 = vld [vmem:[%s22345_s4 + $0xbd8] sm:$0xff] }
 0x577   :  { %v3276_v6 = vld [vmem:[%s22345_s4 + $0xcb0] sm:$0xff] }
 0x578   :  { %9927 = vmatpush1.bf16.msra.mxu0 %v9926_v25  ;;  %10215 = vmatpush1.bf16.msra.mxu1 %v10214_v40  ;;  %v3196_v25 = vld [vmem:[%s22345_s4 + $0xa30] sm:$0xff]  ;;  %v3159_v40 = vld [vmem:[%s22345_s4 + $0x908] sm:$0xff] }
 0x579   :  { %9929 = vmatprep.subr.bf16.mxu0 %v9928_v28  ;;  %10217 = vmatprep.subr.bf16.mxu1 %v10216_v8  ;;  %v10234_v28 = vpack.c.bf16 %v3145_v60, %v3132_v2  ;;  %v3182_v8 = vld [vmem:[%s22345_s4 + $0x9c0] sm:$0xff]  ;;  %v9948_v1 = vpack.c.bf16 %v3196_v25, %v3183_v18  ;;  %v10236_v46 = vpack.c.bf16 %v3172_v56, %v3159_v40  ;;  %v3299_v18 = vld [vmem:[%s22345_s4 + $0xd68] sm:$0xff]  ;;  %v3313_v56 = vld [vmem:[%s22345_s4 + $0xdd8] sm:$0xff] }
 0x57a   :  { %v9950_v35 = vpack.c.bf16 %v3195_v34, %v3182_v8  ;;  %v3286_v60 = vld [vmem:[%s22345_s4 + $0xd00] sm:$0xff]  ;;  %v3275_v40 = vld [vmem:[%s22345_s4 + $0xca8] sm:$0xff] }
 0x57b   :  { %v3262_v25 = vld [vmem:[%s22345_s4 + $0xc40] sm:$0xff]  ;;  %v9966_v34 = vpack.c.bf16 %v3299_v18, %v3286_v60 }
 0x57c   :  { %9931 = vmatpush1.bf16.msra.mxu0 %v9930_v43  ;;  %10219 = vmatpush1.bf16.msra.mxu1 %v10218_v21  ;;  %v3222_v43 = vld [vmem:[%s22345_s4 + $0xb00] sm:$0xff]  ;;  %v3185_v21 = vld [vmem:[%s22345_s4 + $0x9d8] sm:$0xff] }
 0x57d   :  { %9933 = vmatprep.subr.bf16.mxu0 %v9932_v13  ;;  %10221 = vmatprep.subr.bf16.mxu1 %v10220_v0  ;;  %v10238_v13 = vpack.c.bf16 %v3171_v42, %v3158_v33  ;;  %v3208_v0 = vld [vmem:[%s22345_s4 + $0xa90] sm:$0xff]  ;;  %v9952_v14 = vpack.c.bf16 %v3222_v43, %v3209_v47  ;;  %v10240_v23 = vpack.c.bf16 %v3198_v7, %v3185_v21  ;;  %v3302_v8 = vld [vmem:[%s22345_s4 + $0xd80] sm:$0xff]  ;;  %v3325_v42 = vld [vmem:[%s22345_s4 + $0xe38] sm:$0xff] }
 0x57e   :  { %v9954_v16 = vpack.c.bf16 %v3221_v31, %v3208_v0  ;;  %v3312_v33 = vld [vmem:[%s22345_s4 + $0xdd0] sm:$0xff]  ;;  %v3301_v21 = vld [vmem:[%s22345_s4 + $0xd78] sm:$0xff]  ;;  %v3339_v7 = vld [vmem:[%s22345_s4 + $0xea8] sm:$0xff] }
 0x57f   :  { %v3288_v43 = vld [vmem:[%s22345_s4 + $0xd10] sm:$0xff]  ;;  %v3315_v31 = vld [vmem:[%s22345_s4 + $0xde8] sm:$0xff] }
 0x580   :  { %9935 = vmatpush1.bf16.msra.mxu0 %v9934_v24  ;;  %10223 = vmatpush1.bf16.msra.mxu1 %v10222_v22  ;;  %v3248_v24 = vld [vmem:[%s22345_s4 + $0xbd0] sm:$0xff]  ;;  %v3211_v22 = vld [vmem:[%s22345_s4 + $0xaa8] sm:$0xff] }
 0x581   :  { %9937 = vmatprep.subr.bf16.mxu0 %v9936_v41  ;;  %10225 = vmatprep.subr.bf16.mxu1 %v10224_v17  ;;  %v10242_v41 = vpack.c.bf16 %v3197_v49, %v3184_v55  ;;  %v3234_v17 = vld [vmem:[%s22345_s4 + $0xb60] sm:$0xff]  ;;  %v9956_v44 = vpack.c.bf16 %v3248_v24, %v3235_v11  ;;  %v10244_v27 = vpack.c.bf16 %v3224_v36, %v3211_v22  ;;  %v3352_v0 = vld [vmem:[%s22345_s4 + $0xf10] sm:$0xff]  ;;  %v3351_v55 = vld [vmem:[%s22345_s4 + $0xf08] sm:$0xff] }
 0x582   :  { %v9958_v48 = vpack.c.bf16 %v3247_v19, %v3234_v17  ;;  %v3314_v49 = vld [vmem:[%s22345_s4 + $0xde0] sm:$0xff]  ;;  %v9972_v11 = vpack.c.bf16 %v3352_v0, %v3339_v7  ;;  %v3327_v22 = vld [vmem:[%s22345_s4 + $0xe48] sm:$0xff]  ;;  %v3365_v36 = vld [vmem:[%s22345_s4 + $0xf78] sm:$0xff] }
 0x583   :  { %v3354_v17 = vld [vmem:[%s22345_s4 + $0xf20] sm:$0xff] }
 0x584   :  { %9939 = vmatpush1.bf16.msra.mxu0 %v9938_v39  ;;  %10227 = vmatpush1.bf16.msra.mxu1 %v10226_v62  ;;  %v3274_v39 = vld [vmem:[%s22345_s4 + $0xca0] sm:$0xff]  ;;  %v3237_v62 = vld [vmem:[%s22345_s4 + $0xb78] sm:$0xff] }
 0x585   :  { %9941 = vmatprep.subr.bf16.mxu0 %v9940_v4  ;;  %10229 = vmatprep.subr.bf16.mxu1 %v10228_v63  ;;  %v10246_v4 = vpack.c.bf16 %v3223_v12, %v3210_v45  ;;  %v3260_v63 = vld [vmem:[%s22345_s4 + $0xc30] sm:$0xff]  ;;  %v9960_v53 = vpack.c.bf16 %v3274_v39, %v3261_v52  ;;  %v10248_v26 = vpack.c.bf16 %v3250_v57, %v3237_v62  ;;  %v3377_v12 = vld [vmem:[%s22345_s4 + $0xfd8] sm:$0xff]  ;;  %v3391_v57 = vld [vmem:[%s22345_s4 + $0x1048] sm:$0xff] }
 0x586   :  { %v9962_v29 = vpack.c.bf16 %v3273_v30, %v3260_v63  ;;  %v3364_v45 = vld [vmem:[%s22345_s4 + $0xf70] sm:$0xff]  ;;  %v3353_v62 = vld [vmem:[%s22345_s4 + $0xf18] sm:$0xff]  ;;  %v3418_v7 = vld [vmem:[%s22345_s4 + $0x1120] sm:$0xff] }
 0x587   :  { %v3340_v52 = vld [vmem:[%s22345_s4 + $0xeb0] sm:$0xff]  ;;  %v9978_v30 = vpack.c.bf16 %v3377_v12, %v3364_v45 }
 0x588   :  { %9943 = vmatpush1.bf16.msra.mxu0 %v9942_v10  ;;  %10231 = vmatpush1.bf16.msra.mxu1 %v10230_v3  ;;  %v3300_v10 = vld [vmem:[%s22345_s4 + $0xd70] sm:$0xff]  ;;  %v3263_v3 = vld [vmem:[%s22345_s4 + $0xc48] sm:$0xff] }
 0x589   :  { %9945 = vmatprep.subr.bf16.mxu0 %v9944_v61  ;;  %10233 = vmatprep.subr.bf16.mxu1 %v10232_v37  ;;  %v10250_v61 = vpack.c.bf16 %v3249_v15, %v3236_v59  ;;  %v9964_v37 = vpack.c.bf16 %v3300_v10, %v3287_v50  ;;  %v10252_v2 = vpack.c.bf16 %v3276_v6, %v3263_v3  ;;  %v3380_v63 = vld [vmem:[%s22345_s4 + $0xff0] sm:$0xff]  ;;  %v3390_v59 = vld [vmem:[%s22345_s4 + $0x1040] sm:$0xff]  ;;  %v3403_v15 = vld [vmem:[%s22345_s4 + $0x10a8] sm:$0xff] }
 0x58a   :  { %v3366_v50 = vld [vmem:[%s22345_s4 + $0xf80] sm:$0xff]  ;;  %v3379_v3 = vld [vmem:[%s22345_s4 + $0xfe8] sm:$0xff]  ;;  %v3417_v6 = vld [vmem:[%s22345_s4 + $0x1118] sm:$0xff] }
 0x58b   :  { %v10270_v60 = vpack.c.bf16 %v3379_v3, %v3366_v50  ;;  %v3533_v3 = vld [vmem:[%s22345_s4 + $0x14b8] sm:$0xff] }
 0x58c   :  { %9947 = vmatpush1.bf16.msra.mxu0 %v9946_v38  ;;  %10235 = vmatpush1.bf16.msra.mxu1 %v10234_v28  ;;  %v3326_v38 = vld [vmem:[%s22345_s4 + $0xe40] sm:$0xff]  ;;  %v3289_v28 = vld [vmem:[%s22345_s4 + $0xd18] sm:$0xff] }
 0x58d   :  { %9949 = vmatprep.subr.bf16.mxu0 %v9948_v1  ;;  %10237 = vmatprep.subr.bf16.mxu1 %v10236_v46  ;;  %v10254_v1 = vpack.c.bf16 %v3275_v40, %v3262_v25  ;;  %v9968_v46 = vpack.c.bf16 %v3326_v38, %v3313_v56  ;;  %v10256_v47 = vpack.c.bf16 %v3302_v8, %v3289_v28  ;;  %v3416_v25 = vld [vmem:[%s22345_s4 + $0x1110] sm:$0xff]  ;;  %v3429_v40 = vld [vmem:[%s22345_s4 + $0x1178] sm:$0xff]  ;;  %v3443_v8 = vld [vmem:[%s22345_s4 + $0x11e8] sm:$0xff] }
 0x58e   :  { %v3392_v56 = vld [vmem:[%s22345_s4 + $0x1050] sm:$0xff]  ;;  %v3405_v28 = vld [vmem:[%s22345_s4 + $0x10b8] sm:$0xff] }
 0x590   :  { %9951 = vmatpush1.bf16.msra.mxu0 %v9950_v35  ;;  %10239 = vmatpush1.bf16.msra.mxu1 %v10238_v13  ;;  %v15979_v35 = vsel %vm2830_vm7, %v15458_v5, %v15472_v54  ;;  %v23008_v13 = vld [vmem:[#allocation54_spill] sm:$0xff]  ;;  %v10258_v5 = vpack.c.bf16 %v3301_v21, %v3288_v43  ;;  %v3338_v54 = vld [vmem:[%s22345_s4 + $0xea0] sm:$0xff]  ;;  %v3455_v21 = vld [vmem:[%s22345_s4 + $0x1248] sm:$0xff] }
 0x591   :  { %9953 = vmatprep.subr.bf16.mxu0 %v9952_v14  ;;  %10241 = vmatprep.subr.bf16.mxu1 %v10240_v23  ;;  %v3328_v14 = vld [vmem:[%s22345_s4 + $0xe50] sm:$0xff]  ;;  %v9970_v23 = vpack.c.bf16 %v3325_v42, %v3312_v33  ;;  %v9974_v19 = vpack.c.bf16 %v3351_v55, %v3338_v54  ;;  %v9986_v33 = vpack.c.bf16 %v3429_v40, %v3416_v25  ;;  %v3442_v43 = vld [vmem:[%s22345_s4 + $0x11e0] sm:$0xff] }
 0x592   :  { %v10260_v24 = vpack.c.bf16 %v3328_v14, %v3315_v31  ;;  %v10274_v42 = vpack.c.bf16 %v3405_v28, %v3392_v56  ;;  %v3431_v31 = vld [vmem:[%s22345_s4 + $0x1188] sm:$0xff]  ;;  %v3469_v14 = vld [vmem:[%s22345_s4 + $0x12b8] sm:$0xff]  ;;  %v3458_v54 = vld [vmem:[%s22345_s4 + $0x1260] sm:$0xff]  ;;  %v9990_v55 = vpack.c.bf16 %v3455_v21, %v3442_v43 }
 0x593   :  { %v3559_v28 = vld [vmem:[%s22345_s4 + $0x1588] sm:$0xff] }
 0x594   :  { %9955 = vmatpush1.bf16.msra.mxu0 %v9954_v16  ;;  %10243 = vmatpush1.bf16.msra.mxu1 %v10242_v41  ;;  %v3378_v16 = vld [vmem:[%s22345_s4 + $0xfe0] sm:$0xff]  ;;  %v3341_v41 = vld [vmem:[%s22345_s4 + $0xeb8] sm:$0xff] }
 0x595   :  { %9957 = vmatprep.subr.bf16.mxu0 %v9956_v44  ;;  %10245 = vmatprep.subr.bf16.mxu1 %v10244_v27  ;;  %v10262_v44 = vpack.c.bf16 %v3327_v22, %v3314_v49  ;;  %v9976_v27 = vpack.c.bf16 %v3378_v16, %v3365_v36  ;;  %v10264_v39 = vpack.c.bf16 %v3354_v17, %v3341_v41  ;;  %v3481_v22 = vld [vmem:[%s22345_s4 + $0x1318] sm:$0xff]  ;;  %v3444_v36 = vld [vmem:[%s22345_s4 + $0x11f0] sm:$0xff]  ;;  %v3495_v17 = vld [vmem:[%s22345_s4 + $0x1388] sm:$0xff] }
 0x596   :  { %v10278_v49 = vpack.c.bf16 %v3431_v31, %v3418_v7  ;;  %v3457_v41 = vld [vmem:[%s22345_s4 + $0x1258] sm:$0xff] }
 0x597   :  { %v10282_v12 = vpack.c.bf16 %v3457_v41, %v3444_v36  ;;  %v3585_v31 = vld [vmem:[%s22345_s4 + $0x1658] sm:$0xff]  ;;  %v3611_v41 = vld [vmem:[%s22345_s4 + $0x1728] sm:$0xff] }
 0x598   :  { %9959 = vmatpush1.bf16.msra.mxu0 %v9958_v48  ;;  %10247 = vmatpush1.bf16.msra.mxu1 %v10246_v4  ;;  %v3404_v48 = vld [vmem:[%s22345_s4 + $0x10b0] sm:$0xff]  ;;  %v3367_v4 = vld [vmem:[%s22345_s4 + $0xf88] sm:$0xff] }
 0x599   :  { %9961 = vmatprep.subr.bf16.mxu0 %v9960_v53  ;;  %10249 = vmatprep.subr.bf16.mxu1 %v10248_v26  ;;  %v10266_v53 = vpack.c.bf16 %v3353_v62, %v3340_v52  ;;  %v9980_v26 = vpack.c.bf16 %v3404_v48, %v3391_v57  ;;  %v10268_v10 = vpack.c.bf16 %v3380_v63, %v3367_v4  ;;  %v3507_v62 = vld [vmem:[%s22345_s4 + $0x13e8] sm:$0xff]  ;;  %v3470_v57 = vld [vmem:[%s22345_s4 + $0x12c0] sm:$0xff]  ;;  %v3521_v63 = vld [vmem:[%s22345_s4 + $0x1458] sm:$0xff] }
 0x59a   :  { %v3483_v4 = vld [vmem:[%s22345_s4 + $0x1328] sm:$0xff] }
 0x59c   :  { %9963 = vmatpush1.bf16.msra.mxu0 %v9962_v29  ;;  %10251 = vmatpush1.bf16.msra.mxu1 %v10250_v61  ;;  %v3430_v29 = vld [vmem:[%s22345_s4 + $0x1180] sm:$0xff]  ;;  %v3393_v61 = vld [vmem:[%s22345_s4 + $0x1058] sm:$0xff] }
 0x59d   :  { %9965 = vmatprep.subr.bf16.mxu0 %v9964_v37  ;;  %10253 = vmatprep.subr.bf16.mxu1 %v10252_v2  ;;  %v3406_v37 = vld [vmem:[%s22345_s4 + $0x10c0] sm:$0xff]  ;;  %v9982_v2 = vpack.c.bf16 %v3403_v15, %v3390_v59  ;;  %v9984_v18 = vpack.c.bf16 %v3430_v29, %v3417_v6  ;;  %v10286_v15 = vpack.c.bf16 %v3483_v4, %v3470_v57  ;;  %v3496_v6 = vld [vmem:[%s22345_s4 + $0x1390] sm:$0xff]  ;;  %v3637_v4 = vld [vmem:[%s22345_s4 + $0x17f8] sm:$0xff] }
 0x59e   :  { %v10272_v38 = vpack.c.bf16 %v3406_v37, %v3393_v61  ;;  %v3509_v61 = vld [vmem:[%s22345_s4 + $0x13f8] sm:$0xff]  ;;  %v3547_v37 = vld [vmem:[%s22345_s4 + $0x1528] sm:$0xff] }
 0x59f   :  { %4918 = vmatmul.mubr.f32.vlgmr.msra.gmra.mrb[6].mxu0 %v23008_v13  ;;  %v10290_v40 = vpack.c.bf16 %v3509_v61, %v3496_v6  ;;  %v3663_v61 = vld [vmem:[%s22345_s4 + $0x18c8] sm:$0xff] }
 0x5a0   :  { %9967 = vmatpush1.bf16.msra.mxu0 %v9966_v34  ;;  %4988 = vmatprep.mubr.f32.mxu0 %v15979_v35  ;;  %v3456_v34 = vld [vmem:[%s22345_s4 + $0x1250] sm:$0xff] }
 0x5a1   :  { %10255 = vmatpush1.bf16.msra.mxu1 %v10254_v1  ;;  %9969 = vmatprep.subr.bf16.mxu0 %v9968_v46  ;;  %v3419_v1 = vld [vmem:[%s22345_s4 + $0x1128] sm:$0xff]  ;;  %v3432_v46 = vld [vmem:[%s22345_s4 + $0x1190] sm:$0xff] }
 0x5a2   :  { %10257 = vmatprep.subr.bf16.mxu1 %v10256_v47  ;;  %v9988_v47 = vpack.c.bf16 %v3456_v34, %v3443_v8  ;;  %v10276_v0 = vpack.c.bf16 %v3432_v46, %v3419_v1  ;;  %v3522_v8 = vld [vmem:[%s22345_s4 + $0x1460] sm:$0xff]  ;;  %v3535_v1 = vld [vmem:[%s22345_s4 + $0x14c8] sm:$0xff]  ;;  %v3573_v46 = vld [vmem:[%s22345_s4 + $0x15f8] sm:$0xff] }
 0x5a3   :  { %v10294_v21 = vpack.c.bf16 %v3535_v1, %v3522_v8  ;;  %v3689_v1 = vld [vmem:[%s22345_s4 + $0x1998] sm:$0xff] }
 0x5a4   :  { %5273 = vmatmul.mubr.f32.vlgmr.msra.gmra.mrb[6].mxu1 %v23008_v13  ;;  %9971 = vmatpush1.bf16.msra.mxu0 %v9970_v23  ;;  %v3482_v23 = vld [vmem:[%s22345_s4 + $0x1320] sm:$0xff] }
 0x5a5   :  { %10259 = vmatpush1.bf16.msra.mxu1 %v10258_v5  ;;  %5343 = vmatprep.mubr.f32.mxu1 %v15979_v35  ;;  %v3445_v5 = vld [vmem:[%s22345_s4 + $0x11f8] sm:$0xff] }
 0x5a6   :  { %9973 = vmatprep.subr.bf16.mxu0 %v9972_v11  ;;  %10261 = vmatprep.subr.bf16.mxu1 %v10260_v24  ;;  %v9992_v11 = vpack.c.bf16 %v3482_v23, %v3469_v14  ;;  %v3468_v24 = vld [vmem:[%s22345_s4 + $0x12b0] sm:$0xff]  ;;  %v10280_v16 = vpack.c.bf16 %v3458_v54, %v3445_v5  ;;  %v3561_v5 = vld [vmem:[%s22345_s4 + $0x1598] sm:$0xff]  ;;  %v3599_v54 = vld [vmem:[%s22345_s4 + $0x16c8] sm:$0xff] }
 0x5a7   :  { %v9994_v45 = vpack.c.bf16 %v3481_v22, %v3468_v24  ;;  %v3548_v14 = vld [vmem:[%s22345_s4 + $0x1530] sm:$0xff] }
 0x5a8   :  { %9975 = vmatpush1.bf16.msra.mxu0 %v9974_v19  ;;  %v3508_v19 = vld [vmem:[%s22345_s4 + $0x13f0] sm:$0xff]  ;;  %v10298_v22 = vpack.c.bf16 %v3561_v5, %v3548_v14  ;;  %v3715_v5 = vld [vmem:[%s22345_s4 + $0x1a68] sm:$0xff] }
 0x5a9   :  { %10263 = vmatpush1.bf16.msra.mxu1 %v10262_v44  ;;  %9977 = vmatprep.subr.bf16.mxu0 %v9976_v27  ;;  %v3471_v44 = vld [vmem:[%s22345_s4 + $0x12c8] sm:$0xff]  ;;  %v3484_v27 = vld [vmem:[%s22345_s4 + $0x1330] sm:$0xff]  ;;  %v9996_v52 = vpack.c.bf16 %v3508_v19, %v3495_v17  ;;  %v3574_v17 = vld [vmem:[%s22345_s4 + $0x1600] sm:$0xff] }
 0x5aa   :  { %10265 = vmatprep.subr.bf16.mxu1 %v10264_v39  ;;  %v3494_v39 = vld [vmem:[%s22345_s4 + $0x1380] sm:$0xff]  ;;  %v10284_v48 = vpack.c.bf16 %v3484_v27, %v3471_v44  ;;  %v3587_v44 = vld [vmem:[%s22345_s4 + $0x1668] sm:$0xff]  ;;  %v3625_v27 = vld [vmem:[%s22345_s4 + $0x1798] sm:$0xff] }
 0x5ab   :  { %v9998_v59 = vpack.c.bf16 %v3507_v62, %v3494_v39  ;;  %v10302_v62 = vpack.c.bf16 %v3587_v44, %v3574_v17  ;;  %v3728_v44 = vld [vmem:[%s22345_s4 + $0x1ad0] sm:$0xff] }
 0x5ac   :  { %9979 = vmatpush1.bf16.msra.mxu0 %v9978_v30  ;;  %v3534_v30 = vld [vmem:[%s22345_s4 + $0x14c0] sm:$0xff] }
 0x5ad   :  { %10267 = vmatpush1.bf16.msra.mxu1 %v10266_v53  ;;  %9981 = vmatprep.subr.bf16.mxu0 %v9980_v26  ;;  %v3497_v53 = vld [vmem:[%s22345_s4 + $0x1398] sm:$0xff]  ;;  %v3510_v26 = vld [vmem:[%s22345_s4 + $0x1400] sm:$0xff]  ;;  %v10000_v50 = vpack.c.bf16 %v3534_v30, %v3521_v63  ;;  %v3600_v63 = vld [vmem:[%s22345_s4 + $0x16d0] sm:$0xff] }
 0x5ae   :  { %10269 = vmatprep.subr.bf16.mxu1 %v10268_v10  ;;  %v3520_v10 = vld [vmem:[%s22345_s4 + $0x1450] sm:$0xff]  ;;  %v10288_v29 = vpack.c.bf16 %v3510_v26, %v3497_v53  ;;  %v3613_v53 = vld [vmem:[%s22345_s4 + $0x1738] sm:$0xff]  ;;  %v3651_v26 = vld [vmem:[%s22345_s4 + $0x1868] sm:$0xff] }
 0x5af   :  { %v10002_v25 = vpack.c.bf16 %v3533_v3, %v3520_v10  ;;  %v10306_v3 = vpack.c.bf16 %v3613_v53, %v3600_v63  ;;  %v3767_v53 = vld [vmem:[%s22345_s4 + $0x1c08] sm:$0xff] }
 0x5b0   :  { %9983 = vmatpush1.bf16.msra.mxu0 %v9982_v2  ;;  %v3560_v2 = vld [vmem:[%s22345_s4 + $0x1590] sm:$0xff] }
 0x5b1   :  { %10271 = vmatpush1.bf16.msra.mxu1 %v10270_v60  ;;  %9985 = vmatprep.subr.bf16.mxu0 %v9984_v18  ;;  %v3523_v60 = vld [vmem:[%s22345_s4 + $0x1468] sm:$0xff]  ;;  %v3536_v18 = vld [vmem:[%s22345_s4 + $0x14d0] sm:$0xff]  ;;  %v10004_v56 = vpack.c.bf16 %v3560_v2, %v3547_v37  ;;  %v3626_v37 = vld [vmem:[%s22345_s4 + $0x17a0] sm:$0xff] }
 0x5b2   :  { %10273 = vmatprep.subr.bf16.mxu1 %v10272_v38  ;;  %v3546_v38 = vld [vmem:[%s22345_s4 + $0x1520] sm:$0xff]  ;;  %v10292_v34 = vpack.c.bf16 %v3536_v18, %v3523_v60  ;;  %v3639_v60 = vld [vmem:[%s22345_s4 + $0x1808] sm:$0xff]  ;;  %v3677_v18 = vld [vmem:[%s22345_s4 + $0x1938] sm:$0xff] }
 0x5b3   :  { %v10006_v43 = vpack.c.bf16 %v3559_v28, %v3546_v38  ;;  %v10310_v28 = vpack.c.bf16 %v3639_v60, %v3626_v37  ;;  %v3780_v60 = vld [vmem:[%s22345_s4 + $0x1c70] sm:$0xff] }
 0x5b4   :  { %9987 = vmatpush1.bf16.msra.mxu0 %v9986_v33  ;;  %v3586_v33 = vld [vmem:[%s22345_s4 + $0x1660] sm:$0xff] }
 0x5b5   :  { %10275 = vmatpush1.bf16.msra.mxu1 %v10274_v42  ;;  %9989 = vmatprep.subr.bf16.mxu0 %v9988_v47  ;;  %v3549_v42 = vld [vmem:[%s22345_s4 + $0x1538] sm:$0xff]  ;;  %v3562_v47 = vld [vmem:[%s22345_s4 + $0x15a0] sm:$0xff]  ;;  %v10008_v7 = vpack.c.bf16 %v3586_v33, %v3573_v46  ;;  %v3652_v46 = vld [vmem:[%s22345_s4 + $0x1870] sm:$0xff] }
 0x5b6   :  { %10277 = vmatprep.subr.bf16.mxu1 %v10276_v0  ;;  %v3572_v0 = vld [vmem:[%s22345_s4 + $0x15f0] sm:$0xff]  ;;  %v10296_v23 = vpack.c.bf16 %v3562_v47, %v3549_v42  ;;  %v3665_v42 = vld [vmem:[%s22345_s4 + $0x18d8] sm:$0xff]  ;;  %v3703_v47 = vld [vmem:[%s22345_s4 + $0x1a08] sm:$0xff] }
 0x5b7   :  { %v10010_v24 = vpack.c.bf16 %v3585_v31, %v3572_v0  ;;  %v10314_v31 = vpack.c.bf16 %v3665_v42, %v3652_v46  ;;  %v3806_v42 = vld [vmem:[%s22345_s4 + $0x1d40] sm:$0xff] }
 0x5b8   :  { %9991 = vmatpush1.bf16.msra.mxu0 %v9990_v55  ;;  %v3612_v55 = vld [vmem:[%s22345_s4 + $0x1730] sm:$0xff] }
 0x5b9   :  { %10279 = vmatpush1.bf16.msra.mxu1 %v10278_v49  ;;  %9993 = vmatprep.subr.bf16.mxu0 %v9992_v11  ;;  %v3575_v49 = vld [vmem:[%s22345_s4 + $0x1608] sm:$0xff]  ;;  %v3588_v11 = vld [vmem:[%s22345_s4 + $0x1670] sm:$0xff]  ;;  %v10012_v36 = vpack.c.bf16 %v3612_v55, %v3599_v54  ;;  %v3678_v54 = vld [vmem:[%s22345_s4 + $0x1940] sm:$0xff] }
 0x5ba   :  { %10281 = vmatprep.subr.bf16.mxu1 %v10280_v16  ;;  %v3598_v16 = vld [vmem:[%s22345_s4 + $0x16c0] sm:$0xff]  ;;  %v10300_v19 = vpack.c.bf16 %v3588_v11, %v3575_v49  ;;  %v3691_v49 = vld [vmem:[%s22345_s4 + $0x19a8] sm:$0xff]  ;;  %v3729_v11 = vld [vmem:[%s22345_s4 + $0x1ad8] sm:$0xff] }
 0x5bb   :  { %v10014_v39 = vpack.c.bf16 %v3611_v41, %v3598_v16  ;;  %v3718_v16 = vld [vmem:[%s22345_s4 + $0x1a80] sm:$0xff]  ;;  %v10318_v17 = vpack.c.bf16 %v3691_v49, %v3678_v54  ;;  %v3832_v49 = vld [vmem:[%s22345_s4 + $0x1e10] sm:$0xff] }
 0x5bc   :  { %9995 = vmatpush1.bf16.msra.mxu0 %v9994_v45  ;;  %v3638_v45 = vld [vmem:[%s22345_s4 + $0x1800] sm:$0xff] }
 0x5bd   :  { %10283 = vmatpush1.bf16.msra.mxu1 %v10282_v12  ;;  %9997 = vmatprep.subr.bf16.mxu0 %v9996_v52  ;;  %v3601_v12 = vld [vmem:[%s22345_s4 + $0x16d8] sm:$0xff]  ;;  %v3614_v52 = vld [vmem:[%s22345_s4 + $0x1740] sm:$0xff]  ;;  %v10016_v57 = vpack.c.bf16 %v3638_v45, %v3625_v27 }
 0x5be   :  { %10285 = vmatprep.subr.bf16.mxu1 %v10284_v48  ;;  %v3624_v48 = vld [vmem:[%s22345_s4 + $0x1790] sm:$0xff]  ;;  %v10304_v30 = vpack.c.bf16 %v3614_v52, %v3601_v12  ;;  %v3741_v27 = vld [vmem:[%s22345_s4 + $0x1b38] sm:$0xff] }
 0x5bf   :  { %v10018_v10 = vpack.c.bf16 %v3637_v4, %v3624_v48  ;;  %v3704_v12 = vld [vmem:[%s22345_s4 + $0x1a10] sm:$0xff]  ;;  %v3717_v52 = vld [vmem:[%s22345_s4 + $0x1a78] sm:$0xff]  ;;  %v3731_v48 = vld [vmem:[%s22345_s4 + $0x1ae8] sm:$0xff]  ;;  %v10034_v63 = vpack.c.bf16 %v3741_v27, %v3728_v44 }
 0x5c0   :  { %9999 = vmatpush1.bf16.msra.mxu0 %v9998_v59  ;;  %v3664_v59 = vld [vmem:[%s22345_s4 + $0x18d0] sm:$0xff] }
 0x5c1   :  { %10287 = vmatpush1.bf16.msra.mxu1 %v10286_v15  ;;  %10001 = vmatprep.subr.bf16.mxu0 %v10000_v50  ;;  %v3627_v15 = vld [vmem:[%s22345_s4 + $0x17a8] sm:$0xff]  ;;  %v3640_v50 = vld [vmem:[%s22345_s4 + $0x1810] sm:$0xff]  ;;  %v10020_v6 = vpack.c.bf16 %v3664_v59, %v3651_v26  ;;  %v3730_v26 = vld [vmem:[%s22345_s4 + $0x1ae0] sm:$0xff] }
 0x5c2   :  { %10289 = vmatprep.subr.bf16.mxu1 %v10288_v29  ;;  %v3650_v29 = vld [vmem:[%s22345_s4 + $0x1860] sm:$0xff]  ;;  %v10308_v2 = vpack.c.bf16 %v3640_v50, %v3627_v15  ;;  %v3744_v4 = vld [vmem:[%s22345_s4 + $0x1b50] sm:$0xff]  ;;  %v3743_v50 = vld [vmem:[%s22345_s4 + $0x1b48] sm:$0xff] }
 0x5c3   :  { %v10022_v38 = vpack.c.bf16 %v3663_v61, %v3650_v29  ;;  %v10324_v15 = vpack.c.bf16 %v3744_v4, %v3731_v48  ;;  %v3770_v29 = vld [vmem:[%s22345_s4 + $0x1c20] sm:$0xff]  ;;  %v10326_v37 = vpack.c.bf16 %v3743_v50, %v3730_v26  ;;  %v3848_v44 = vld [vmem:[%s22345_s4 + $0x1e90] sm:$0xff]  ;;  %v3847_v4 = vld [vmem:[%s22345_s4 + $0x1e88] sm:$0xff] }
 0x5c4   :  { %10003 = vmatpush1.bf16.msra.mxu0 %v10002_v25  ;;  %v3690_v25 = vld [vmem:[%s22345_s4 + $0x19a0] sm:$0xff]  ;;  %v3884_v50 = vld [vmem:[%s22345_s4 + $0x1fb0] sm:$0xff] }
 0x5c5   :  { %10291 = vmatpush1.bf16.msra.mxu1 %v10290_v40  ;;  %10005 = vmatprep.subr.bf16.mxu0 %v10004_v56  ;;  %v3653_v40 = vld [vmem:[%s22345_s4 + $0x1878] sm:$0xff]  ;;  %v3666_v56 = vld [vmem:[%s22345_s4 + $0x18e0] sm:$0xff]  ;;  %v10024_v8 = vpack.c.bf16 %v3690_v25, %v3677_v18  ;;  %v3756_v25 = vld [vmem:[%s22345_s4 + $0x1bb0] sm:$0xff] }
 0x5c6   :  { %10293 = vmatprep.subr.bf16.mxu1 %v10292_v34  ;;  %v3676_v34 = vld [vmem:[%s22345_s4 + $0x1930] sm:$0xff]  ;;  %v10312_v33 = vpack.c.bf16 %v3666_v56, %v3653_v40  ;;  %v3793_v18 = vld [vmem:[%s22345_s4 + $0x1cd8] sm:$0xff] }
 0x5c7   :  { %v10026_v0 = vpack.c.bf16 %v3689_v1, %v3676_v34  ;;  %v3769_v56 = vld [vmem:[%s22345_s4 + $0x1c18] sm:$0xff]  ;;  %v3796_v34 = vld [vmem:[%s22345_s4 + $0x1cf0] sm:$0xff]  ;;  %v10042_v1 = vpack.c.bf16 %v3793_v18, %v3780_v60 }
 0x5c8   :  { %10007 = vmatpush1.bf16.msra.mxu0 %v10006_v43  ;;  %v3716_v43 = vld [vmem:[%s22345_s4 + $0x1a70] sm:$0xff]  ;;  %v10330_v46 = vpack.c.bf16 %v3769_v56, %v3756_v25  ;;  %v3910_v56 = vld [vmem:[%s22345_s4 + $0x2080] sm:$0xff] }
 0x5c9   :  { %10295 = vmatpush1.bf16.msra.mxu1 %v10294_v21  ;;  %10009 = vmatprep.subr.bf16.mxu0 %v10008_v7  ;;  %v3679_v21 = vld [vmem:[%s22345_s4 + $0x1948] sm:$0xff]  ;;  %v3692_v7 = vld [vmem:[%s22345_s4 + $0x19b0] sm:$0xff]  ;;  %v10028_v14 = vpack.c.bf16 %v3716_v43, %v3703_v47  ;;  %v3782_v43 = vld [vmem:[%s22345_s4 + $0x1c80] sm:$0xff] }
 0x5ca   :  { %10297 = vmatprep.subr.bf16.mxu1 %v10296_v23  ;;  %v3702_v23 = vld [vmem:[%s22345_s4 + $0x1a00] sm:$0xff]  ;;  %v10316_v55 = vpack.c.bf16 %v3692_v7, %v3679_v21  ;;  %v3819_v47 = vld [vmem:[%s22345_s4 + $0x1da8] sm:$0xff]  ;;  %v3900_v60 = vld [vmem:[%s22345_s4 + $0x2030] sm:$0xff] }
 0x5cb   :  { %v10030_v41 = vpack.c.bf16 %v3715_v5, %v3702_v23  ;;  %v3795_v7 = vld [vmem:[%s22345_s4 + $0x1ce8] sm:$0xff]  ;;  %v3822_v23 = vld [vmem:[%s22345_s4 + $0x1dc0] sm:$0xff]  ;;  %v10046_v5 = vpack.c.bf16 %v3819_v47, %v3806_v42 }
 0x5cc   :  { %10011 = vmatpush1.bf16.msra.mxu0 %v10010_v24  ;;  %v3742_v24 = vld [vmem:[%s22345_s4 + $0x1b40] sm:$0xff]  ;;  %v10334_v54 = vpack.c.bf16 %v3795_v7, %v3782_v43  ;;  %v3936_v7 = vld [vmem:[%s22345_s4 + $0x2150] sm:$0xff] }
 0x5cd   :  { %10299 = vmatpush1.bf16.msra.mxu1 %v10298_v22  ;;  %10013 = vmatprep.subr.bf16.mxu0 %v10012_v36  ;;  %v12282_v22 = vunpack.i.h.bf16 %v15480_v51  ;;  %v3705_v36 = vld [vmem:[%s22345_s4 + $0x1a18] sm:$0xff]  ;;  %v3926_v42 = vld [vmem:[%s22345_s4 + $0x2100] sm:$0xff] }
 0x5ce   :  { %10301 = vmatprep.subr.bf16.mxu1 %v10300_v19  ;;  %v10032_v19 = vpack.c.bf16 %v3742_v24, %v3729_v11  ;;  %v10320_v45 = vpack.c.bf16 %v3718_v16, %v3705_v36  ;;  %v3845_v11 = vld [vmem:[%s22345_s4 + $0x1e78] sm:$0xff]  ;;  %v3808_v24 = vld [vmem:[%s22345_s4 + $0x1d50] sm:$0xff]  ;;  %v4602_v51 = vld [vmem:[%s22345_s4 + $0x3620] sm:$0xff] }
 0x5cf   :  { %v3821_v16 = vld [vmem:[%s22345_s4 + $0x1db8] sm:$0xff]  ;;  %v10050_v27 = vpack.c.bf16 %v3845_v11, %v3832_v49  ;;  %v3952_v49 = vld [vmem:[%s22345_s4 + $0x21d0] sm:$0xff] }
 0x5d0   :  { %10015 = vmatpush1.bf16.msra.mxu0 %v10014_v39  ;;  %v3755_v39 = vld [vmem:[%s22345_s4 + $0x1ba8] sm:$0xff] }
 0x5d1   :  { %10303 = vmatpush1.bf16.msra.mxu1 %v10302_v62  ;;  %10017 = vmatprep.subr.bf16.mxu0 %v10016_v57  ;;  %v16375_v62 = vsel %vm2840_vm8, %v12281_v32, %v12282_v22  ;;  %v3768_v57 = vld [vmem:[%s22345_s4 + $0x1c10] sm:$0xff]  ;;  %v10322_v32 = vpack.c.bf16 %v3717_v52, %v3704_v12  ;;  %v3858_v52 = vld [vmem:[%s22345_s4 + $0x1ee0] sm:$0xff] }
 0x5d2   :  { %10305 = vmatprep.subr.bf16.mxu1 %v10304_v30  ;;  %v3754_v30 = vld [vmem:[%s22345_s4 + $0x1ba0] sm:$0xff]  ;;  %v10036_v59 = vpack.c.bf16 %v3768_v57, %v3755_v39  ;;  %v3871_v39 = vld [vmem:[%s22345_s4 + $0x1f48] sm:$0xff] }
 0x5d3   :  { %v10038_v61 = vpack.c.bf16 %v3767_v53, %v3754_v30  ;;  %v3834_v57 = vld [vmem:[%s22345_s4 + $0x1e20] sm:$0xff]  ;;  %v3861_v30 = vld [vmem:[%s22345_s4 + $0x1ef8] sm:$0xff]  ;;  %v10054_v26 = vpack.c.bf16 %v3871_v39, %v3858_v52 }
 0x5d4   :  { %10019 = vmatpush1.bf16.msra.mxu0 %v10018_v10  ;;  %v3781_v10 = vld [vmem:[%s22345_s4 + $0x1c78] sm:$0xff]  ;;  %v3874_v53 = vld [vmem:[%s22345_s4 + $0x1f60] sm:$0xff] }
 0x5d5   :  { %10307 = vmatpush1.bf16.msra.mxu1 %v10306_v3  ;;  %10021 = vmatprep.subr.bf16.mxu0 %v10020_v6  ;;  %v3794_v3 = vld [vmem:[%s22345_s4 + $0x1ce0] sm:$0xff]  ;;  %v3757_v6 = vld [vmem:[%s22345_s4 + $0x1bb8] sm:$0xff] }
 0x5d6   :  { %10309 = vmatprep.subr.bf16.mxu1 %v10308_v2  ;;  %v10040_v2 = vpack.c.bf16 %v3794_v3, %v3781_v10  ;;  %v10328_v40 = vpack.c.bf16 %v3770_v29, %v3757_v6  ;;  %v3897_v10 = vld [vmem:[%s22345_s4 + $0x2018] sm:$0xff]  ;;  %v3860_v3 = vld [vmem:[%s22345_s4 + $0x1ef0] sm:$0xff]  ;;  %v10344_v6 = vpack.c.bf16 %v3874_v53, %v3861_v30  ;;  %v3978_v52 = vld [vmem:[%s22345_s4 + $0x22a0] sm:$0xff] }
 0x5d7   :  { %v3873_v29 = vld [vmem:[%s22345_s4 + $0x1f58] sm:$0xff]  ;;  %v10058_v18 = vpack.c.bf16 %v3897_v10, %v3884_v50  ;;  %v4004_v50 = vld [vmem:[%s22345_s4 + $0x2370] sm:$0xff] }
 0x5d8   :  { %10023 = vmatpush1.bf16.msra.mxu0 %v10022_v38  ;;  %v3807_v38 = vld [vmem:[%s22345_s4 + $0x1d48] sm:$0xff]  ;;  %v10346_v25 = vpack.c.bf16 %v3873_v29, %v3860_v3  ;;  %v3977_v53 = vld [vmem:[%s22345_s4 + $0x2298] sm:$0xff]  ;;  %v4014_v29 = vld [vmem:[%s22345_s4 + $0x23c0] sm:$0xff] }
 0x5d9   :  { %10311 = vmatpush1.bf16.msra.mxu1 %v10310_v28  ;;  %10025 = vmatprep.subr.bf16.mxu0 %v10024_v8  ;;  %v3820_v28 = vld [vmem:[%s22345_s4 + $0x1db0] sm:$0xff]  ;;  %v3783_v8 = vld [vmem:[%s22345_s4 + $0x1c88] sm:$0xff] }
 0x5da   :  { %10313 = vmatprep.subr.bf16.mxu1 %v10312_v33  ;;  %v10044_v33 = vpack.c.bf16 %v3820_v28, %v3807_v38  ;;  %v10332_v21 = vpack.c.bf16 %v3796_v34, %v3783_v8  ;;  %v3923_v38 = vld [vmem:[%s22345_s4 + $0x20e8] sm:$0xff]  ;;  %v3886_v28 = vld [vmem:[%s22345_s4 + $0x1fc0] sm:$0xff] }
 0x5db   :  { %v3899_v34 = vld [vmem:[%s22345_s4 + $0x2028] sm:$0xff]  ;;  %v10062_v47 = vpack.c.bf16 %v3923_v38, %v3910_v56  ;;  %v4030_v56 = vld [vmem:[%s22345_s4 + $0x2440] sm:$0xff] }
 0x5dc   :  { %10027 = vmatpush1.bf16.msra.mxu0 %v10026_v0  ;;  %v3833_v0 = vld [vmem:[%s22345_s4 + $0x1e18] sm:$0xff]  ;;  %v10350_v43 = vpack.c.bf16 %v3899_v34, %v3886_v28  ;;  %v4040_v34 = vld [vmem:[%s22345_s4 + $0x2490] sm:$0xff] }
 0x5dd   :  { %10315 = vmatpush1.bf16.msra.mxu1 %v10314_v31  ;;  %10029 = vmatprep.subr.bf16.mxu0 %v10028_v14  ;;  %v3846_v31 = vld [vmem:[%s22345_s4 + $0x1e80] sm:$0xff]  ;;  %v3809_v14 = vld [vmem:[%s22345_s4 + $0x1d58] sm:$0xff] }
 0x5de   :  { %10317 = vmatprep.subr.bf16.mxu1 %v10316_v55  ;;  %v10048_v55 = vpack.c.bf16 %v3846_v31, %v3833_v0  ;;  %v10336_v36 = vpack.c.bf16 %v3822_v23, %v3809_v14  ;;  %v3949_v0 = vld [vmem:[%s22345_s4 + $0x21b8] sm:$0xff]  ;;  %v3912_v31 = vld [vmem:[%s22345_s4 + $0x2090] sm:$0xff] }
 0x5df   :  { %4989 = vmatmul.mubr.f32.vlgmr.msra.gmra.mrb[6].mxu0 %v15464_v9  ;;  %v3925_v23 = vld [vmem:[%s22345_s4 + $0x20f8] sm:$0xff]  ;;  %v10066_v11 = vpack.c.bf16 %v3949_v0, %v3936_v7  ;;  %v4056_v7 = vld [vmem:[%s22345_s4 + $0x2510] sm:$0xff] }
 0x5e0   :  { %10031 = vmatpush1.bf16.msra.mxu0 %v10030_v41  ;;  %5059 = vmatprep.mubr.f32.mxu0 %v16375_v62  ;;  %v3859_v41 = vld [vmem:[%s22345_s4 + $0x1ee8] sm:$0xff] }
 0x5e1   :  { %10319 = vmatpush1.bf16.msra.mxu1 %v10318_v17  ;;  %10033 = vmatprep.subr.bf16.mxu0 %v10032_v19  ;;  %v3872_v17 = vld [vmem:[%s22345_s4 + $0x1f50] sm:$0xff]  ;;  %v3835_v19 = vld [vmem:[%s22345_s4 + $0x1e28] sm:$0xff] }
 0x5e2   :  { %10321 = vmatprep.subr.bf16.mxu1 %v10320_v45  ;;  %v10338_v45 = vpack.c.bf16 %v3821_v16, %v3808_v24  ;;  %v10052_v12 = vpack.c.bf16 %v3872_v17, %v3859_v41  ;;  %v10340_v48 = vpack.c.bf16 %v3848_v44, %v3835_v19  ;;  %v10354_v24 = vpack.c.bf16 %v3925_v23, %v3912_v31  ;;  %v3962_v16 = vld [vmem:[%s22345_s4 + $0x2220] sm:$0xff]  ;;  %v3975_v41 = vld [vmem:[%s22345_s4 + $0x2288] sm:$0xff] }
 0x5e3   :  { %v3938_v17 = vld [vmem:[%s22345_s4 + $0x2160] sm:$0xff]  ;;  %v3951_v44 = vld [vmem:[%s22345_s4 + $0x21c8] sm:$0xff]  ;;  %v10070_v39 = vpack.c.bf16 %v3975_v41, %v3962_v16 }
 0x5e4   :  { %5344 = vmatmul.mubr.f32.vlgmr.msra.gmra.mrb[6].mxu1 %v15464_v9  ;;  %10035 = vmatpush1.bf16.msra.mxu0 %v10034_v63  ;;  %v3885_v63 = vld [vmem:[%s22345_s4 + $0x1fb8] sm:$0xff]  ;;  %v4066_v23 = vld [vmem:[%s22345_s4 + $0x2560] sm:$0xff] }
 0x5e5   :  { %10323 = vmatpush1.bf16.msra.mxu1 %v10322_v32  ;;  %5414 = vmatprep.mubr.f32.mxu1 %v16375_v62  ;;  %v3898_v32 = vld [vmem:[%s22345_s4 + $0x2020] sm:$0xff] }
 0x5e6   :  { %10037 = vmatprep.subr.bf16.mxu0 %v10036_v59  ;;  %10325 = vmatprep.subr.bf16.mxu1 %v10324_v15  ;;  %v10342_v59 = vpack.c.bf16 %v3847_v4, %v3834_v57  ;;  %v10056_v15 = vpack.c.bf16 %v3898_v32, %v3885_v63  ;;  %v10358_v57 = vpack.c.bf16 %v3951_v44, %v3938_v17  ;;  %v3988_v4 = vld [vmem:[%s22345_s4 + $0x22f0] sm:$0xff]  ;;  %v4001_v63 = vld [vmem:[%s22345_s4 + $0x2358] sm:$0xff]  ;;  %v4082_v16 = vld [vmem:[%s22345_s4 + $0x25e0] sm:$0xff] }
 0x5e7   :  { %v3964_v32 = vld [vmem:[%s22345_s4 + $0x2230] sm:$0xff]  ;;  %v10074_v10 = vpack.c.bf16 %v4001_v63, %v3988_v4 }
 0x5e8   :  { %10039 = vmatpush1.bf16.msra.mxu0 %v10038_v61  ;;  %v3911_v61 = vld [vmem:[%s22345_s4 + $0x2088] sm:$0xff]  ;;  %v10362_v3 = vpack.c.bf16 %v3977_v53, %v3964_v32  ;;  %v4092_v44 = vld [vmem:[%s22345_s4 + $0x2630] sm:$0xff] }
 0x5e9   :  { %10327 = vmatpush1.bf16.msra.mxu1 %v10326_v37  ;;  %10041 = vmatprep.subr.bf16.mxu0 %v10040_v2  ;;  %v3924_v37 = vld [vmem:[%s22345_s4 + $0x20f0] sm:$0xff]  ;;  %v3887_v2 = vld [vmem:[%s22345_s4 + $0x1fc8] sm:$0xff] }
 0x5ea   :  { %10329 = vmatprep.subr.bf16.mxu1 %v10328_v40  ;;  %v10060_v40 = vpack.c.bf16 %v3924_v37, %v3911_v61  ;;  %v10348_v8 = vpack.c.bf16 %v3900_v60, %v3887_v2  ;;  %v4027_v61 = vld [vmem:[%s22345_s4 + $0x2428] sm:$0xff]  ;;  %v3990_v37 = vld [vmem:[%s22345_s4 + $0x2300] sm:$0xff]  ;;  %v4108_v4 = vld [vmem:[%s22345_s4 + $0x26b0] sm:$0xff] }
 0x5eb   :  { %v4003_v60 = vld [vmem:[%s22345_s4 + $0x2368] sm:$0xff]  ;;  %v10078_v38 = vpack.c.bf16 %v4027_v61, %v4014_v29  ;;  %v4134_v29 = vld [vmem:[%s22345_s4 + $0x2780] sm:$0xff] }
 0x5ec   :  { %10043 = vmatpush1.bf16.msra.mxu0 %v10042_v1  ;;  %v3937_v1 = vld [vmem:[%s22345_s4 + $0x2158] sm:$0xff]  ;;  %v10366_v28 = vpack.c.bf16 %v4003_v60, %v3990_v37 }
 0x5ed   :  { %10331 = vmatpush1.bf16.msra.mxu1 %v10330_v46  ;;  %10045 = vmatprep.subr.bf16.mxu0 %v10044_v33  ;;  %v3950_v46 = vld [vmem:[%s22345_s4 + $0x21c0] sm:$0xff]  ;;  %v3913_v33 = vld [vmem:[%s22345_s4 + $0x2098] sm:$0xff] }
 0x5ee   :  { %10333 = vmatprep.subr.bf16.mxu1 %v10332_v21  ;;  %v10064_v21 = vpack.c.bf16 %v3950_v46, %v3937_v1  ;;  %v10352_v14 = vpack.c.bf16 %v3926_v42, %v3913_v33  ;;  %v4053_v1 = vld [vmem:[%s22345_s4 + $0x24f8] sm:$0xff]  ;;  %v4016_v46 = vld [vmem:[%s22345_s4 + $0x23d0] sm:$0xff] }
 0x5ef   :  { %v4029_v42 = vld [vmem:[%s22345_s4 + $0x2438] sm:$0xff]  ;;  %v10082_v0 = vpack.c.bf16 %v4053_v1, %v4040_v34  ;;  %v4160_v34 = vld [vmem:[%s22345_s4 + $0x2850] sm:$0xff] }
 0x5f0   :  { %10047 = vmatpush1.bf16.msra.mxu0 %v10046_v5  ;;  %v3963_v5 = vld [vmem:[%s22345_s4 + $0x2228] sm:$0xff]  ;;  %v10370_v31 = vpack.c.bf16 %v4029_v42, %v4016_v46 }
 0x5f1   :  { %10335 = vmatpush1.bf16.msra.mxu1 %v10334_v54  ;;  %10049 = vmatprep.subr.bf16.mxu0 %v10048_v55  ;;  %v3976_v54 = vld [vmem:[%s22345_s4 + $0x2290] sm:$0xff]  ;;  %v3939_v55 = vld [vmem:[%s22345_s4 + $0x2168] sm:$0xff] }
 0x5f2   :  { %10337 = vmatprep.subr.bf16.mxu1 %v10336_v36  ;;  %v10068_v36 = vpack.c.bf16 %v3976_v54, %v3963_v5  ;;  %v10356_v19 = vpack.c.bf16 %v3952_v49, %v3939_v55  ;;  %v4079_v5 = vld [vmem:[%s22345_s4 + $0x25c8] sm:$0xff]  ;;  %v4042_v54 = vld [vmem:[%s22345_s4 + $0x24a0] sm:$0xff] }
 0x5f3   :  { %v4055_v49 = vld [vmem:[%s22345_s4 + $0x2508] sm:$0xff]  ;;  %v10086_v41 = vpack.c.bf16 %v4079_v5, %v4066_v23  ;;  %v4186_v23 = vld [vmem:[%s22345_s4 + $0x2920] sm:$0xff] }
 0x5f4   :  { %10051 = vmatpush1.bf16.msra.mxu0 %v10050_v27  ;;  %v3989_v27 = vld [vmem:[%s22345_s4 + $0x22f8] sm:$0xff]  ;;  %v10374_v17 = vpack.c.bf16 %v4055_v49, %v4042_v54 }
 0x5f5   :  { %10339 = vmatpush1.bf16.msra.mxu1 %v10338_v45  ;;  %10053 = vmatprep.subr.bf16.mxu0 %v10052_v12  ;;  %v4002_v45 = vld [vmem:[%s22345_s4 + $0x2360] sm:$0xff]  ;;  %v3965_v12 = vld [vmem:[%s22345_s4 + $0x2238] sm:$0xff] }
 0x5f6   :  { %10341 = vmatprep.subr.bf16.mxu1 %v10340_v48  ;;  %v10072_v48 = vpack.c.bf16 %v4002_v45, %v3989_v27  ;;  %v10360_v30 = vpack.c.bf16 %v3978_v52, %v3965_v12  ;;  %v4105_v27 = vld [vmem:[%s22345_s4 + $0x2698] sm:$0xff]  ;;  %v4068_v45 = vld [vmem:[%s22345_s4 + $0x2570] sm:$0xff] }
 0x5f7   :  { %v4081_v52 = vld [vmem:[%s22345_s4 + $0x25d8] sm:$0xff]  ;;  %v10090_v63 = vpack.c.bf16 %v4105_v27, %v4092_v44  ;;  %v4212_v44 = vld [vmem:[%s22345_s4 + $0x29f0] sm:$0xff] }
 0x5f8   :  { %10055 = vmatpush1.bf16.msra.mxu0 %v10054_v26  ;;  %v4015_v26 = vld [vmem:[%s22345_s4 + $0x23c8] sm:$0xff]  ;;  %v10378_v32 = vpack.c.bf16 %v4081_v52, %v4068_v45 }
 0x5f9   :  { %10343 = vmatpush1.bf16.msra.mxu1 %v10342_v59  ;;  %10057 = vmatprep.subr.bf16.mxu0 %v10056_v15  ;;  %v4028_v59 = vld [vmem:[%s22345_s4 + $0x2430] sm:$0xff]  ;;  %v3991_v15 = vld [vmem:[%s22345_s4 + $0x2308] sm:$0xff] }
 0x5fa   :  { %10345 = vmatprep.subr.bf16.mxu1 %v10344_v6  ;;  %v10076_v6 = vpack.c.bf16 %v4028_v59, %v4015_v26  ;;  %v10364_v2 = vpack.c.bf16 %v4004_v50, %v3991_v15  ;;  %v4118_v26 = vld [vmem:[%s22345_s4 + $0x2700] sm:$0xff]  ;;  %v4131_v59 = vld [vmem:[%s22345_s4 + $0x2768] sm:$0xff] }
 0x5fb   :  { %v4107_v50 = vld [vmem:[%s22345_s4 + $0x26a8] sm:$0xff]  ;;  %v10094_v61 = vpack.c.bf16 %v4131_v59, %v4118_v26 }
 0x5fc   :  { %10059 = vmatpush1.bf16.msra.mxu0 %v10058_v18  ;;  %v4041_v18 = vld [vmem:[%s22345_s4 + $0x2498] sm:$0xff] }
 0x5fd   :  { %10347 = vmatpush1.bf16.msra.mxu1 %v10346_v25  ;;  %10061 = vmatprep.subr.bf16.mxu0 %v10060_v40  ;;  %v4054_v25 = vld [vmem:[%s22345_s4 + $0x2500] sm:$0xff]  ;;  %v4017_v40 = vld [vmem:[%s22345_s4 + $0x23d8] sm:$0xff] }
 0x5fe   :  { %10349 = vmatprep.subr.bf16.mxu1 %v10348_v8  ;;  %v10080_v8 = vpack.c.bf16 %v4054_v25, %v4041_v18  ;;  %v10368_v33 = vpack.c.bf16 %v4030_v56, %v4017_v40  ;;  %v4144_v18 = vld [vmem:[%s22345_s4 + $0x27d0] sm:$0xff]  ;;  %v4157_v25 = vld [vmem:[%s22345_s4 + $0x2838] sm:$0xff] }
 0x5ff   :  { %v4133_v56 = vld [vmem:[%s22345_s4 + $0x2778] sm:$0xff]  ;;  %v10098_v1 = vpack.c.bf16 %v4157_v25, %v4144_v18 }
 0x600   :  { %10063 = vmatpush1.bf16.msra.mxu0 %v10062_v47  ;;  %v4067_v47 = vld [vmem:[%s22345_s4 + $0x2568] sm:$0xff] }
 0x601   :  { %10351 = vmatpush1.bf16.msra.mxu1 %v10350_v43  ;;  %10065 = vmatprep.subr.bf16.mxu0 %v10064_v21  ;;  %v4080_v43 = vld [vmem:[%s22345_s4 + $0x25d0] sm:$0xff]  ;;  %v4043_v21 = vld [vmem:[%s22345_s4 + $0x24a8] sm:$0xff] }
 0x602   :  { %10353 = vmatprep.subr.bf16.mxu1 %v10352_v14  ;;  %v10084_v14 = vpack.c.bf16 %v4080_v43, %v4067_v47  ;;  %v10372_v55 = vpack.c.bf16 %v4056_v7, %v4043_v21  ;;  %v4170_v47 = vld [vmem:[%s22345_s4 + $0x28a0] sm:$0xff]  ;;  %v4183_v43 = vld [vmem:[%s22345_s4 + $0x2908] sm:$0xff] }
 0x603   :  { %v4159_v7 = vld [vmem:[%s22345_s4 + $0x2848] sm:$0xff]  ;;  %v10102_v5 = vpack.c.bf16 %v4183_v43, %v4170_v47  ;;  %v4277_v47 = vld [vmem:[%s22345_s4 + $0x2bf8] sm:$0xff]  ;;  %v4290_v43 = vld [vmem:[%s22345_s4 + $0x2c60] sm:$0xff] }
 0x604   :  { %10067 = vmatpush1.bf16.msra.mxu0 %v10066_v11  ;;  %v4093_v11 = vld [vmem:[%s22345_s4 + $0x2638] sm:$0xff] }
 0x605   :  { %10355 = vmatpush1.bf16.msra.mxu1 %v10354_v24  ;;  %10069 = vmatprep.subr.bf16.mxu0 %v10068_v36  ;;  %v4106_v24 = vld [vmem:[%s22345_s4 + $0x26a0] sm:$0xff]  ;;  %v4069_v36 = vld [vmem:[%s22345_s4 + $0x2578] sm:$0xff] }
 0x606   :  { %10357 = vmatprep.subr.bf16.mxu1 %v10356_v19  ;;  %v10088_v19 = vpack.c.bf16 %v4106_v24, %v4093_v11  ;;  %v10376_v12 = vpack.c.bf16 %v4082_v16, %v4069_v36  ;;  %v4196_v11 = vld [vmem:[%s22345_s4 + $0x2970] sm:$0xff]  ;;  %v4209_v24 = vld [vmem:[%s22345_s4 + $0x29d8] sm:$0xff] }
 0x607   :  { %v4185_v16 = vld [vmem:[%s22345_s4 + $0x2918] sm:$0xff]  ;;  %v10106_v27 = vpack.c.bf16 %v4209_v24, %v4196_v11  ;;  %v4327_v11 = vld [vmem:[%s22345_s4 + $0x2d88] sm:$0xff]  ;;  %v4340_v24 = vld [vmem:[%s22345_s4 + $0x2df0] sm:$0xff] }
 0x608   :  { %10071 = vmatpush1.bf16.msra.mxu0 %v10070_v39  ;;  %v4119_v39 = vld [vmem:[%s22345_s4 + $0x2708] sm:$0xff] }
 0x609   :  { %10359 = vmatpush1.bf16.msra.mxu1 %v10358_v57  ;;  %10073 = vmatprep.subr.bf16.mxu0 %v10072_v48  ;;  %v4132_v57 = vld [vmem:[%s22345_s4 + $0x2770] sm:$0xff]  ;;  %v4095_v48 = vld [vmem:[%s22345_s4 + $0x2648] sm:$0xff] }
 0x60a   :  { %10361 = vmatprep.subr.bf16.mxu1 %v10360_v30  ;;  %v4094_v30 = vld [vmem:[%s22345_s4 + $0x2640] sm:$0xff]  ;;  %v10092_v53 = vpack.c.bf16 %v4132_v57, %v4119_v39  ;;  %v10380_v15 = vpack.c.bf16 %v4108_v4, %v4095_v48  ;;  %v4235_v57 = vld [vmem:[%s22345_s4 + $0x2aa8] sm:$0xff] }
 0x60b   :  { %v10382_v37 = vpack.c.bf16 %v4107_v50, %v4094_v30  ;;  %v4222_v39 = vld [vmem:[%s22345_s4 + $0x2a40] sm:$0xff]  ;;  %v4211_v4 = vld [vmem:[%s22345_s4 + $0x29e8] sm:$0xff]  ;;  %v4225_v30 = vld [vmem:[%s22345_s4 + $0x2a58] sm:$0xff] }
 0x60c   :  { %10075 = vmatpush1.bf16.msra.mxu0 %v10074_v10  ;;  %v4145_v10 = vld [vmem:[%s22345_s4 + $0x27d8] sm:$0xff]  ;;  %v10110_v26 = vpack.c.bf16 %v4235_v57, %v4222_v39  ;;  %v4315_v39 = vld [vmem:[%s22345_s4 + $0x2d28] sm:$0xff] }
 0x60d   :  { %10363 = vmatpush1.bf16.msra.mxu1 %v10362_v3  ;;  %10077 = vmatprep.subr.bf16.mxu0 %v10076_v6  ;;  %v4158_v3 = vld [vmem:[%s22345_s4 + $0x2840] sm:$0xff]  ;;  %v4121_v6 = vld [vmem:[%s22345_s4 + $0x2718] sm:$0xff] }
 0x60e   :  { %10365 = vmatprep.subr.bf16.mxu1 %v10364_v2  ;;  %v4120_v2 = vld [vmem:[%s22345_s4 + $0x2710] sm:$0xff]  ;;  %v10096_v60 = vpack.c.bf16 %v4158_v3, %v4145_v10  ;;  %v10384_v40 = vpack.c.bf16 %v4134_v29, %v4121_v6  ;;  %v4261_v3 = vld [vmem:[%s22345_s4 + $0x2b78] sm:$0xff] }
 0x60f   :  { %v10386_v46 = vpack.c.bf16 %v4133_v56, %v4120_v2  ;;  %v4248_v10 = vld [vmem:[%s22345_s4 + $0x2b10] sm:$0xff]  ;;  %v4237_v29 = vld [vmem:[%s22345_s4 + $0x2ab8] sm:$0xff]  ;;  %v4251_v2 = vld [vmem:[%s22345_s4 + $0x2b28] sm:$0xff] }
 0x610   :  { %10079 = vmatpush1.bf16.msra.mxu0 %v10078_v38  ;;  %v4171_v38 = vld [vmem:[%s22345_s4 + $0x28a8] sm:$0xff]  ;;  %v10114_v18 = vpack.c.bf16 %v4261_v3, %v4248_v10  ;;  %v4353_v57 = vld [vmem:[%s22345_s4 + $0x2e58] sm:$0xff] }
 0x611   :  { %10367 = vmatpush1.bf16.msra.mxu1 %v10366_v28  ;;  %10081 = vmatprep.subr.bf16.mxu0 %v10080_v8  ;;  %v4184_v28 = vld [vmem:[%s22345_s4 + $0x2910] sm:$0xff]  ;;  %v4147_v8 = vld [vmem:[%s22345_s4 + $0x27e8] sm:$0xff]  ;;  %v4341_v10 = vld [vmem:[%s22345_s4 + $0x2df8] sm:$0xff] }
 0x612   :  { %10369 = vmatprep.subr.bf16.mxu1 %v10368_v33  ;;  %v4146_v33 = vld [vmem:[%s22345_s4 + $0x27e0] sm:$0xff]  ;;  %v10100_v42 = vpack.c.bf16 %v4184_v28, %v4171_v38  ;;  %v10388_v21 = vpack.c.bf16 %v4160_v34, %v4147_v8  ;;  %v4287_v28 = vld [vmem:[%s22345_s4 + $0x2c48] sm:$0xff] }
 0x613   :  { %v10390_v54 = vpack.c.bf16 %v4159_v7, %v4146_v33  ;;  %v4274_v38 = vld [vmem:[%s22345_s4 + $0x2be0] sm:$0xff]  ;;  %v4379_v3 = vld [vmem:[%s22345_s4 + $0x2f28] sm:$0xff] }
 0x614   :  { %10083 = vmatpush1.bf16.msra.mxu0 %v10082_v0  ;;  %v4197_v0 = vld [vmem:[%s22345_s4 + $0x2978] sm:$0xff]  ;;  %v4314_v33 = vld [vmem:[%s22345_s4 + $0x2d20] sm:$0xff]  ;;  %v10118_v7 = vpack.c.bf16 %v4287_v28, %v4274_v38  ;;  %v4367_v38 = vld [vmem:[%s22345_s4 + $0x2ec8] sm:$0xff] }
 0x615   :  { %10371 = vmatpush1.bf16.msra.mxu1 %v10370_v31  ;;  %10085 = vmatprep.subr.bf16.mxu0 %v10084_v14  ;;  %v4210_v31 = vld [vmem:[%s22345_s4 + $0x29e0] sm:$0xff]  ;;  %v4173_v14 = vld [vmem:[%s22345_s4 + $0x28b8] sm:$0xff] }
 0x616   :  { %10373 = vmatprep.subr.bf16.mxu1 %v10372_v55  ;;  %v4172_v55 = vld [vmem:[%s22345_s4 + $0x28b0] sm:$0xff]  ;;  %v10104_v49 = vpack.c.bf16 %v4210_v31, %v4197_v0  ;;  %v10392_v36 = vpack.c.bf16 %v4186_v23, %v4173_v14  ;;  %v4405_v28 = vld [vmem:[%s22345_s4 + $0x2ff8] sm:$0xff] }
 0x617   :  { %v10394_v45 = vpack.c.bf16 %v4185_v16, %v4172_v55  ;;  %v4276_v31 = vld [vmem:[%s22345_s4 + $0x2bf0] sm:$0xff]  ;;  %v10408_v55 = vpack.c.bf16 %v4290_v43, %v4277_v47  ;;  %v4303_v16 = vld [vmem:[%s22345_s4 + $0x2cc8] sm:$0xff] }
 0x618   :  { %10087 = vmatpush1.bf16.msra.mxu0 %v10086_v41  ;;  %v4223_v41 = vld [vmem:[%s22345_s4 + $0x2a48] sm:$0xff]  ;;  %v4300_v23 = vld [vmem:[%s22345_s4 + $0x2cb0] sm:$0xff] }
 0x619   :  { %10375 = vmatpush1.bf16.msra.mxu1 %v10374_v17  ;;  %10089 = vmatprep.subr.bf16.mxu0 %v10088_v19  ;;  %v4236_v17 = vld [vmem:[%s22345_s4 + $0x2ab0] sm:$0xff]  ;;  %v4199_v19 = vld [vmem:[%s22345_s4 + $0x2988] sm:$0xff] }
 0x61a   :  { %10377 = vmatprep.subr.bf16.mxu1 %v10376_v12  ;;  %v4198_v12 = vld [vmem:[%s22345_s4 + $0x2980] sm:$0xff]  ;;  %v10108_v52 = vpack.c.bf16 %v4236_v17, %v4223_v41  ;;  %v10396_v48 = vpack.c.bf16 %v4212_v44, %v4199_v19  ;;  %v4316_v41 = vld [vmem:[%s22345_s4 + $0x2d30] sm:$0xff] }
 0x61b   :  { %v10398_v59 = vpack.c.bf16 %v4211_v4, %v4198_v12  ;;  %v4302_v44 = vld [vmem:[%s22345_s4 + $0x2cc0] sm:$0xff]  ;;  %v4339_v12 = vld [vmem:[%s22345_s4 + $0x2de8] sm:$0xff]  ;;  %v4329_v4 = vld [vmem:[%s22345_s4 + $0x2d98] sm:$0xff] }
 0x61c   :  { %10091 = vmatpush1.bf16.msra.mxu0 %v10090_v63  ;;  %v4249_v63 = vld [vmem:[%s22345_s4 + $0x2b18] sm:$0xff]  ;;  %v4404_v43 = vld [vmem:[%s22345_s4 + $0x2ff0] sm:$0xff] }
 0x61d   :  { %10379 = vmatpush1.bf16.msra.mxu1 %v10378_v32  ;;  %10093 = vmatprep.subr.bf16.mxu0 %v10092_v53  ;;  %v4262_v32 = vld [vmem:[%s22345_s4 + $0x2b80] sm:$0xff] }
 0x61e   :  { %10381 = vmatprep.subr.bf16.mxu1 %v10380_v15  ;;  %v4238_v53 = vld [vmem:[%s22345_s4 + $0x2ac0] sm:$0xff]  ;;  %v4224_v15 = vld [vmem:[%s22345_s4 + $0x2a50] sm:$0xff]  ;;  %v10112_v50 = vpack.c.bf16 %v4262_v32, %v4249_v63 }
 0x61f   :  { %5060 = vmatmul.mubr.f32.vlgmr.msra.gmra.mrb[6].mxu0 %v15490_v20  ;;  %v10400_v6 = vpack.c.bf16 %v4238_v53, %v4225_v30  ;;  %v10402_v25 = vpack.c.bf16 %v4237_v29, %v4224_v15  ;;  %v4342_v63 = vld [vmem:[%s22345_s4 + $0x2e00] sm:$0xff]  ;;  %v10414_v30 = vpack.c.bf16 %v4315_v39, %v4302_v44  ;;  %v4328_v53 = vld [vmem:[%s22345_s4 + $0x2d90] sm:$0xff]  ;;  %v4365_v15 = vld [vmem:[%s22345_s4 + $0x2eb8] sm:$0xff] }
 0x620   :  { %10095 = vmatpush1.bf16.msra.mxu0 %v10094_v61  ;;  %v4275_v61 = vld [vmem:[%s22345_s4 + $0x2be8] sm:$0xff]  ;;  %v4433_v44 = vld [vmem:[%s22345_s4 + $0x30d8] sm:$0xff] }
 0x621   :  { %10383 = vmatpush1.bf16.msra.mxu1 %v10382_v37  ;;  %10097 = vmatprep.subr.bf16.mxu0 %v10096_v60  ;;  %v4288_v37 = vld [vmem:[%s22345_s4 + $0x2c50] sm:$0xff]  ;;  %v4355_v29 = vld [vmem:[%s22345_s4 + $0x2e68] sm:$0xff] }
 0x622   :  { %10385 = vmatprep.subr.bf16.mxu1 %v10384_v40  ;;  %v4264_v60 = vld [vmem:[%s22345_s4 + $0x2b90] sm:$0xff]  ;;  %v4250_v40 = vld [vmem:[%s22345_s4 + $0x2b20] sm:$0xff]  ;;  %v10116_v56 = vpack.c.bf16 %v4288_v37, %v4275_v61 }
 0x623   :  { %v10404_v34 = vpack.c.bf16 %v4264_v60, %v4251_v2  ;;  %v4368_v61 = vld [vmem:[%s22345_s4 + $0x2ed0] sm:$0xff]  ;;  %v10418_v2 = vpack.c.bf16 %v4341_v10, %v4328_v53  ;;  %v4354_v60 = vld [vmem:[%s22345_s4 + $0x2e60] sm:$0xff]  ;;  %v4459_v53 = vld [vmem:[%s22345_s4 + $0x31a8] sm:$0xff] }
 0x624   :  { %5415 = vmatmul.mubr.f32.vlgmr.msra.gmra.mrb[6].mxu1 %v15490_v20  ;;  %10099 = vmatpush1.bf16.msra.mxu0 %v10098_v1  ;;  %v4263_v1 = vld [vmem:[%s22345_s4 + $0x2b88] sm:$0xff] }
 0x625   :  { %10387 = vmatpush1.bf16.msra.mxu1 %v10386_v46  ;;  %10101 = vmatprep.subr.bf16.mxu0 %v10100_v42  ;;  %v4301_v46 = vld [vmem:[%s22345_s4 + $0x2cb8] sm:$0xff]  ;;  %v10406_v0 = vpack.c.bf16 %v4263_v1, %v4250_v40  ;;  %v4391_v40 = vld [vmem:[%s22345_s4 + $0x2f88] sm:$0xff]  ;;  %v4394_v1 = vld [vmem:[%s22345_s4 + $0x2fa0] sm:$0xff] }
 0x626   :  { %10389 = vmatprep.subr.bf16.mxu1 %v10388_v21  ;;  %v10120_v14 = vpack.c.bf16 %v4314_v33, %v4301_v46  ;;  %v10422_v33 = vpack.c.bf16 %v4367_v38, %v4354_v60  ;;  %v4485_v60 = vld [vmem:[%s22345_s4 + $0x3278] sm:$0xff] }
 0x628   :  { %10103 = vmatpush1.bf16.msra.mxu0 %v10102_v5  ;;  %v4313_v5 = vld [vmem:[%s22345_s4 + $0x2d18] sm:$0xff] }
 0x629   :  { %10391 = vmatpush1.bf16.msra.mxu1 %v10390_v54  ;;  %10105 = vmatprep.subr.bf16.mxu0 %v10104_v49  ;;  %v4289_v49 = vld [vmem:[%s22345_s4 + $0x2c58] sm:$0xff]  ;;  %v10122_v17 = vpack.c.bf16 %v4313_v5, %v4300_v23  ;;  %v4407_v23 = vld [vmem:[%s22345_s4 + $0x3008] sm:$0xff]  ;;  %v4420_v5 = vld [vmem:[%s22345_s4 + $0x3070] sm:$0xff] }
 0x62a   :  { %10393 = vmatprep.subr.bf16.mxu1 %v10392_v36  ;;  %v10410_v19 = vpack.c.bf16 %v4289_v49, %v4276_v31  ;;  %v4431_v31 = vld [vmem:[%s22345_s4 + $0x30c8] sm:$0xff]  ;;  %v4406_v49 = vld [vmem:[%s22345_s4 + $0x3000] sm:$0xff] }
 0x62c   :  { %10107 = vmatpush1.bf16.msra.mxu0 %v10106_v27  ;;  %v10124_v27 = vpack.c.bf16 %v4340_v24, %v4327_v11  ;;  %v4430_v24 = vld [vmem:[%s22345_s4 + $0x30c0] sm:$0xff] }
 0x62d   :  { %10395 = vmatpush1.bf16.msra.mxu1 %v10394_v45  ;;  %10109 = vmatprep.subr.bf16.mxu0 %v10108_v52  ;;  %v4326_v45 = vld [vmem:[%s22345_s4 + $0x2d80] sm:$0xff]  ;;  %v10412_v52 = vpack.c.bf16 %v4316_v41, %v4303_v16  ;;  %v10428_v16 = vpack.c.bf16 %v4420_v5, %v4407_v23  ;;  %v4419_v41 = vld [vmem:[%s22345_s4 + $0x3068] sm:$0xff]  ;;  %v4537_v23 = vld [vmem:[%s22345_s4 + $0x3418] sm:$0xff] }
 0x62e   :  { %10397 = vmatprep.subr.bf16.mxu1 %v10396_v48  ;;  %v4366_v48 = vld [vmem:[%s22345_s4 + $0x2ec0] sm:$0xff]  ;;  %v10126_v32 = vpack.c.bf16 %v4339_v12, %v4326_v45  ;;  %v10430_v12 = vpack.c.bf16 %v4419_v41, %v4406_v49 }
 0x62f   :  { %v4550_v5 = vld [vmem:[%s22345_s4 + $0x3480] sm:$0xff] }
 0x630   :  { %10111 = vmatpush1.bf16.msra.mxu0 %v10110_v26  ;;  %v10128_v26 = vpack.c.bf16 %v4366_v48, %v4353_v57  ;;  %v4456_v57 = vld [vmem:[%s22345_s4 + $0x3190] sm:$0xff]  ;;  %v4469_v48 = vld [vmem:[%s22345_s4 + $0x31f8] sm:$0xff]  ;;  %v4534_v49 = vld [vmem:[%s22345_s4 + $0x3400] sm:$0xff] }
 0x631   :  { %10399 = vmatpush1.bf16.msra.mxu1 %v10398_v59  ;;  %10113 = vmatprep.subr.bf16.mxu0 %v10112_v50  ;;  %v4352_v59 = vld [vmem:[%s22345_s4 + $0x2e50] sm:$0xff]  ;;  %v10416_v50 = vpack.c.bf16 %v4342_v63, %v4329_v4  ;;  %v4445_v63 = vld [vmem:[%s22345_s4 + $0x3138] sm:$0xff] }
 0x632   :  { %v2387_v8 = vpop.f32.mrb[4].mxu0  ;;  %10401 = vmatprep.subr.bf16.mxu1 %v10400_v6  ;;  %v4392_v6 = vld [vmem:[%s22345_s4 + $0x2f90] sm:$0xff]  ;;  %v10130_v37 = vpack.c.bf16 %v4365_v15, %v4352_v59  ;;  %v10146_v59 = vpack.c.bf16 %v4469_v48, %v4456_v57 }
 0x633   :  { %v2389_v42 = vpop.f32.mrb[5].mxu0  ;;  %v4560_v48 = vld [vmem:[%s22345_s4 + $0x34d0] sm:$0xff] }
 0x634   :  { %v12283_v21 = vpack.i.bf16 %v2389_v42, %v2387_v8  ;;  %10115 = vmatpush1.bf16.msra.mxu0 %v10114_v18  ;;  %v10132_v18 = vpack.c.bf16 %v4392_v6, %v4379_v3  ;;  %v4418_v8 = vld [vmem:[%s22345_s4 + $0x3060] sm:$0xff]  ;;  %v4380_v42 = vld [vmem:[%s22345_s4 + $0x2f30] sm:$0xff]  ;;  %v4495_v6 = vld [vmem:[%s22345_s4 + $0x32c8] sm:$0xff] }
 0x635   :  { %10403 = vmatpush1.bf16.msra.mxu1 %v10402_v25  ;;  %10117 = vmatprep.subr.bf16.mxu0 %v10116_v56  ;;  %v4378_v25 = vld [vmem:[%s22345_s4 + $0x2f20] sm:$0xff]  ;;  %v10420_v56 = vpack.c.bf16 %v4368_v61, %v4355_v29  ;;  %v10136_v47 = vpack.c.bf16 %v4418_v8, %v4405_v28  ;;  %v4471_v61 = vld [vmem:[%s22345_s4 + $0x3208] sm:$0xff]  ;;  %v4508_v28 = vld [vmem:[%s22345_s4 + $0x3330] sm:$0xff] }
 0x636   :  { %v2808_v54 = vpop.f32.mrb[4].mxu1  ;;  %12284 = vrot.lane.b32.xlu1 %v12283_v21, %s12413_s18  ;;  %10405 = vmatprep.subr.bf16.mxu1 %v10404_v34  ;;  %v4381_v34 = vld [vmem:[%s22345_s4 + $0x2f38] sm:$0xff]  ;;  %v10134_v46 = vpack.c.bf16 %v4391_v40, %v4378_v25  ;;  %v4482_v3 = vld [vmem:[%s22345_s4 + $0x3260] sm:$0xff] }
 0x637   :  { %v2810_v36 = vpop.f32.mrb[5].mxu1  ;;  %2857 = vrot.lane.b32.xlu0 %v2808_v54, %s12414_s25  ;;  %v4417_v21 = vld [vmem:[%s22345_s4 + $0x3058] sm:$0xff]  ;;  %v10150_v25 = vpack.c.bf16 %v4495_v6, %v4482_v3 }
 0x638   :  { %10119 = vmatpush1.bf16.msra.mxu0 %v10118_v7  ;;  %v10424_v7 = vpack.c.bf16 %v4394_v1, %v4381_v34  ;;  %v10138_v54 = vpack.c.bf16 %v4417_v21, %v4404_v43  ;;  %v4521_v8 = vld [vmem:[%s22345_s4 + $0x3398] sm:$0xff] }
 0x639   :  { %10407 = vmatpush1.bf16.msra.mxu1 %v10406_v0  ;;  %10121 = vmatprep.subr.bf16.mxu0 %v10120_v14  ;;  %v4393_v0 = vld [vmem:[%s22345_s4 + $0x2f98] sm:$0xff]  ;;  %v4444_v14 = vld [vmem:[%s22345_s4 + $0x3130] sm:$0xff]  ;;  %v10154_v43 = vpack.c.bf16 %v4521_v8, %v4508_v28 }
 0x63a   :  { %2859 = vrot.lane.b32.xlu1 %v2810_v36, %s12414_s25  ;;  %10409 = vmatprep.subr.bf16.mxu1 %v10408_v55  ;;  %v10426_v55 = vpack.c.bf16 %v4393_v0, %v4380_v42  ;;  %v10140_v11 = vpack.c.bf16 %v4444_v14, %v4431_v31  ;;  %v4443_v36 = vld [vmem:[%s22345_s4 + $0x3128] sm:$0xff]  ;;  %v4497_v1 = vld [vmem:[%s22345_s4 + $0x32d8] sm:$0xff]  ;;  %v4510_v31 = vld [vmem:[%s22345_s4 + $0x3340] sm:$0xff] }
 0x63b   :  { %v10142_v45 = vpack.c.bf16 %v4443_v36, %v4430_v24  ;;  %v4511_v42 = vld [vmem:[%s22345_s4 + $0x3348] sm:$0xff]  ;;  %v4536_v36 = vld [vmem:[%s22345_s4 + $0x3410] sm:$0xff] }
 0x63c   :  { %10123 = vmatpush1.bf16.msra.mxu0 %v10122_v17  ;;  %v4457_v17 = vld [vmem:[%s22345_s4 + $0x3198] sm:$0xff]  ;;  %v4523_v14 = vld [vmem:[%s22345_s4 + $0x33a8] sm:$0xff] }
 0x63d   :  { %10411 = vmatpush1.bf16.msra.mxu1 %v10410_v19  ;;  %10125 = vmatprep.subr.bf16.mxu0 %v10124_v27  ;;  %v4470_v19 = vld [vmem:[%s22345_s4 + $0x3200] sm:$0xff]  ;;  %v4547_v24 = vld [vmem:[%s22345_s4 + $0x3468] sm:$0xff] }
 0x63e   :  { %10413 = vmatprep.subr.bf16.mxu1 %v10412_v52  ;;  %v4446_v27 = vld [vmem:[%s22345_s4 + $0x3140] sm:$0xff]  ;;  %v4432_v52 = vld [vmem:[%s22345_s4 + $0x30d0] sm:$0xff]  ;;  %v10144_v39 = vpack.c.bf16 %v4470_v19, %v4457_v17  ;;  %v4561_v19 = vld [vmem:[%s22345_s4 + $0x34d8] sm:$0xff] }
 0x63f   :  { %v10432_v4 = vpack.c.bf16 %v4446_v27, %v4433_v44  ;;  %v10434_v15 = vpack.c.bf16 %v4445_v63, %v4432_v52  ;;  %v4574_v44 = vld [vmem:[%s22345_s4 + $0x3540] sm:$0xff]  ;;  %v4563_v27 = vld [vmem:[%s22345_s4 + $0x34e8] sm:$0xff] }
 0x640   :  { %10127 = vmatpush1.bf16.msra.mxu0 %v10126_v32  ;;  %v4483_v32 = vld [vmem:[%s22345_s4 + $0x3268] sm:$0xff] }
 0x641   :  { %10415 = vmatpush1.bf16.msra.mxu1 %v10414_v30  ;;  %10129 = vmatprep.subr.bf16.mxu0 %v10128_v26  ;;  %v4496_v30 = vld [vmem:[%s22345_s4 + $0x32d0] sm:$0xff] }
 0x642   :  { %10417 = vmatprep.subr.bf16.mxu1 %v10416_v50  ;;  %v4472_v26 = vld [vmem:[%s22345_s4 + $0x3210] sm:$0xff]  ;;  %v4458_v50 = vld [vmem:[%s22345_s4 + $0x31a0] sm:$0xff]  ;;  %v10148_v10 = vpack.c.bf16 %v4496_v30, %v4483_v32  ;;  %v4575_v30 = vld [vmem:[%s22345_s4 + $0x3548] sm:$0xff] }
 0x643   :  { %v10436_v29 = vpack.c.bf16 %v4472_v26, %v4459_v53  ;;  %v10438_v40 = vpack.c.bf16 %v4471_v61, %v4458_v50  ;;  %v4562_v32 = vld [vmem:[%s22345_s4 + $0x34e0] sm:$0xff]  ;;  %v4587_v53 = vld [vmem:[%s22345_s4 + $0x35a8] sm:$0xff]  ;;  %v4600_v50 = vld [vmem:[%s22345_s4 + $0x3610] sm:$0xff] }
 0x644   :  { %10131 = vmatpush1.bf16.msra.mxu0 %v10130_v37  ;;  %v4509_v37 = vld [vmem:[%s22345_s4 + $0x3338] sm:$0xff]  ;;  %v10454_v6 = vpack.c.bf16 %v4575_v30, %v4562_v32  ;;  %v4599_v61 = vld [vmem:[%s22345_s4 + $0x3608] sm:$0xff]  ;;  %v4706_v30 = vld [vmem:[%s22345_s4 + $0x3960] sm:$0xff] }
 0x645   :  { %10419 = vmatpush1.bf16.msra.mxu1 %v10418_v2  ;;  %10133 = vmatprep.subr.bf16.mxu0 %v10132_v18  ;;  %v4522_v2 = vld [vmem:[%s22345_s4 + $0x33a0] sm:$0xff]  ;;  %v4693_v32 = vld [vmem:[%s22345_s4 + $0x38f8] sm:$0xff] }
 0x646   :  { %10421 = vmatprep.subr.bf16.mxu1 %v10420_v56  ;;  %v4498_v18 = vld [vmem:[%s22345_s4 + $0x32e0] sm:$0xff]  ;;  %v4484_v56 = vld [vmem:[%s22345_s4 + $0x3270] sm:$0xff]  ;;  %v10152_v38 = vpack.c.bf16 %v4522_v2, %v4509_v37  ;;  %v10164_v37 = vpack.c.bf16 %v4600_v50, %v4587_v53  ;;  %v4703_v50 = vld [vmem:[%s22345_s4 + $0x3948] sm:$0xff] }
 0x647   :  { %v10440_v34 = vpack.c.bf16 %v4498_v18, %v4485_v60  ;;  %v10442_v21 = vpack.c.bf16 %v4497_v1, %v4484_v56  ;;  %v4588_v60 = vld [vmem:[%s22345_s4 + $0x35b0] sm:$0xff]  ;;  %v4601_v18 = vld [vmem:[%s22345_s4 + $0x3618] sm:$0xff]  ;;  %v4615_v56 = vld [vmem:[%s22345_s4 + $0x3688] sm:$0xff] }
 0x648   :  { %10135 = vmatpush1.bf16.msra.mxu0 %v10134_v46  ;;  %v4535_v46 = vld [vmem:[%s22345_s4 + $0x3408] sm:$0xff]  ;;  %v10458_v8 = vpack.c.bf16 %v4601_v18, %v4588_v60  ;;  %v4625_v1 = vld [vmem:[%s22345_s4 + $0x36d8] sm:$0xff] }
 0x649   :  { %10423 = vmatpush1.bf16.msra.mxu1 %v10422_v33  ;;  %10137 = vmatprep.subr.bf16.mxu0 %v10136_v47  ;;  %v4548_v33 = vld [vmem:[%s22345_s4 + $0x3470] sm:$0xff] }
 0x64a   :  { %10425 = vmatprep.subr.bf16.mxu1 %v10424_v7  ;;  %v4524_v47 = vld [vmem:[%s22345_s4 + $0x33b0] sm:$0xff]  ;;  %v10156_v7 = vpack.c.bf16 %v4548_v33, %v4535_v46 }
 0x64b   :  { %v10444_v0 = vpack.c.bf16 %v4524_v47, %v4511_v42  ;;  %v4614_v42 = vld [vmem:[%s22345_s4 + $0x3680] sm:$0xff]  ;;  %v4627_v47 = vld [vmem:[%s22345_s4 + $0x36e8] sm:$0xff] }
 0x64c   :  { %10139 = vmatpush1.bf16.msra.mxu0 %v10138_v54  ;;  %v10446_v54 = vpack.c.bf16 %v4523_v14, %v4510_v31  ;;  %v10462_v14 = vpack.c.bf16 %v4627_v47, %v4614_v42 }
 0x64d   :  { %10427 = vmatpush1.bf16.msra.mxu1 %v10426_v55  ;;  %10141 = vmatprep.subr.bf16.mxu0 %v10140_v11  ;;  %v10448_v55 = vpack.c.bf16 %v4550_v5, %v4537_v23  ;;  %v4638_v23 = vld [vmem:[%s22345_s4 + $0x3740] sm:$0xff]  ;;  %v4651_v5 = vld [vmem:[%s22345_s4 + $0x37a8] sm:$0xff] }
 0x64e   :  { %10429 = vmatprep.subr.bf16.mxu1 %v10428_v16  ;;  %v4549_v16 = vld [vmem:[%s22345_s4 + $0x3478] sm:$0xff] }
 0x64f   :  { %v10450_v57 = vpack.c.bf16 %v4549_v16, %v4536_v36  ;;  %v4678_v36 = vld [vmem:[%s22345_s4 + $0x3880] sm:$0xff]  ;;  %v4667_v16 = vld [vmem:[%s22345_s4 + $0x3828] sm:$0xff] }
 0x650   :  { %10143 = vmatpush1.bf16.msra.mxu0 %v10142_v45  ;;  %v4576_v45 = vld [vmem:[%s22345_s4 + $0x3550] sm:$0xff] }
 0x651   :  { %10431 = vmatpush1.bf16.msra.mxu1 %v10430_v12  ;;  %10145 = vmatprep.subr.bf16.mxu0 %v10144_v39  ;;  %v10158_v39 = vpack.c.bf16 %v4547_v24, %v4534_v49  ;;  %v4640_v49 = vld [vmem:[%s22345_s4 + $0x3750] sm:$0xff]  ;;  %v4665_v24 = vld [vmem:[%s22345_s4 + $0x3818] sm:$0xff] }
 0x652   :  { %10433 = vmatprep.subr.bf16.mxu1 %v10432_v4  ;;  %v4573_v4 = vld [vmem:[%s22345_s4 + $0x3538] sm:$0xff] }
 0x653   :  { %v10162_v3 = vpack.c.bf16 %v4573_v4, %v4560_v48  ;;  %v4691_v48 = vld [vmem:[%s22345_s4 + $0x38e8] sm:$0xff]  ;;  %v4704_v4 = vld [vmem:[%s22345_s4 + $0x3950] sm:$0xff] }
 0x654   :  { %10147 = vmatpush1.bf16.msra.mxu0 %v10146_v59  ;;  %v10160_v59 = vpack.c.bf16 %v4574_v44, %v4561_v19  ;;  %v4664_v44 = vld [vmem:[%s22345_s4 + $0x3810] sm:$0xff] }
 0x655   :  { %10435 = vmatpush1.bf16.msra.mxu1 %v10434_v15  ;;  %10149 = vmatprep.subr.bf16.mxu0 %v10148_v10  ;;  %v10452_v15 = vpack.c.bf16 %v4576_v45, %v4563_v27  ;;  %v4589_v10 = vld [vmem:[%s22345_s4 + $0x35b8] sm:$0xff]  ;;  %v10176_v45 = vpack.c.bf16 %v4678_v36, %v4665_v24  ;;  %v2888_v24 = vld [vmem:[%s22345_s4 + $0x90] sm:$0xff] }
 0x656   :  { %10437 = vmatprep.subr.bf16.mxu1 %v10436_v29  ;;  %v4586_v29 = vld [vmem:[%s22345_s4 + $0x35a0] sm:$0xff]  ;;  %v10456_v2 = vpack.c.bf16 %v4602_v51, %v4589_v10  ;;  %v4677_v27 = vld [vmem:[%s22345_s4 + $0x3878] sm:$0xff]  ;;  %v10180_v10 = vpack.c.bf16 %v4704_v4, %v4691_v48  ;;  %v10472_v51 = vpack.c.bf16 %v4706_v30, %v4693_v32  ;;  %v2903_v48 = vld [vmem:[%s22345_s4 + $0x108] sm:$0xff] }
 0x657   :  { %v10166_v28 = vpack.c.bf16 %v4599_v61, %v4586_v29  ;;  %v10178_v53 = vpack.c.bf16 %v4677_v27, %v4664_v44  ;;  %v4717_v29 = vld [vmem:[%s22345_s4 + $0x39b8] sm:$0xff]  ;;  %v4730_v61 = vld [vmem:[%s22345_s4 + $0x3a20] sm:$0xff]  ;;  %v2876_v44 = vld [vmem:[%s22345_s4 + $0x30] sm:$0xff] }
 0x658   :  { %10151 = vmatpush1.bf16.msra.mxu0 %v10150_v25  ;;  %v4613_v25 = vld [vmem:[%s22345_s4 + $0x3678] sm:$0xff]  ;;  %v2916_v4 = vld [vmem:[%s22345_s4 + $0x170] sm:$0xff] }
 0x659   :  { %10439 = vmatpush1.bf16.msra.mxu1 %v10438_v40  ;;  %10153 = vmatprep.subr.bf16.mxu0 %v10152_v38  ;;  %v4626_v40 = vld [vmem:[%s22345_s4 + $0x36e0] sm:$0xff]  ;;  %v4628_v38 = vld [vmem:[%s22345_s4 + $0x36f0] sm:$0xff]  ;;  %v2877_v36 = vld [vmem:[%s22345_s4 + $0x38] sm:$0xff] }
 0x65a   :  { %10441 = vmatprep.subr.bf16.mxu1 %v10440_v34  ;;  %v4612_v34 = vld [vmem:[%s22345_s4 + $0x3670] sm:$0xff]  ;;  %v10168_v46 = vpack.c.bf16 %v4626_v40, %v4613_v25  ;;  %v10460_v33 = vpack.c.bf16 %v4628_v38, %v4615_v56  ;;  %v4729_v40 = vld [vmem:[%s22345_s4 + $0x3a18] sm:$0xff]  ;;  %v10184_v56 = vpack.c.bf16 %v4730_v61, %v4717_v29  ;;  %v2942_v61 = vld [vmem:[%s22345_s4 + $0x240] sm:$0xff] }
 0x65b   :  { %v10170_v31 = vpack.c.bf16 %v4625_v1, %v4612_v34  ;;  %v4716_v25 = vld [vmem:[%s22345_s4 + $0x39b0] sm:$0xff]  ;;  %v4743_v34 = vld [vmem:[%s22345_s4 + $0x3a88] sm:$0xff]  ;;  %v2889_v27 = vld [vmem:[%s22345_s4 + $0x98] sm:$0xff] }
 0x65c   :  { %10155 = vmatpush1.bf16.msra.mxu0 %v10154_v43  ;;  %v4639_v43 = vld [vmem:[%s22345_s4 + $0x3748] sm:$0xff]  ;;  %v4756_v1 = vld [vmem:[%s22345_s4 + $0x3af0] sm:$0xff]  ;;  %v10186_v42 = vpack.c.bf16 %v4729_v40, %v4716_v25  ;;  %v2929_v29 = vld [vmem:[%s22345_s4 + $0x1d8] sm:$0xff] }
 0x65d   :  { %10443 = vmatpush1.bf16.msra.mxu1 %v10442_v21  ;;  %10157 = vmatprep.subr.bf16.mxu0 %v10156_v7  ;;  %v4652_v21 = vld [vmem:[%s22345_s4 + $0x37b0] sm:$0xff]  ;;  %v4641_v7 = vld [vmem:[%s22345_s4 + $0x3758] sm:$0xff]  ;;  %v2939_v25 = vld [vmem:[%s22345_s4 + $0x228] sm:$0xff] }
 0x65e   :  { %10445 = vmatprep.subr.bf16.mxu1 %v10444_v0  ;;  %v4654_v0 = vld [vmem:[%s22345_s4 + $0x37c0] sm:$0xff]  ;;  %v2928_v40 = vld [vmem:[%s22345_s4 + $0x1d0] sm:$0xff] }
 0x661   :  { %10447 = vmatpush1.bf16.msra.mxu1 %v10446_v54  ;;  %v10172_v54 = vpack.c.bf16 %v4652_v21, %v4639_v43  ;;  %v4742_v43 = vld [vmem:[%s22345_s4 + $0x3a80] sm:$0xff]  ;;  %v10188_v21 = vpack.c.bf16 %v4756_v1, %v4743_v34  ;;  %v2955_v34 = vld [vmem:[%s22345_s4 + $0x2a8] sm:$0xff]  ;;  %v2968_v1 = vld [vmem:[%s22345_s4 + $0x310] sm:$0xff] }
 0x662   :  { %10449 = vmatprep.subr.bf16.mxu1 %v10448_v55  ;;  %v10464_v55 = vpack.c.bf16 %v4654_v0, %v4641_v7  ;;  %v4755_v0 = vld [vmem:[%s22345_s4 + $0x3ae8] sm:$0xff] }
 0x6a8   :  { %v12285_v11 = vpop.permute.xlu1 %12284 }
 0x6a9   :  { %v12287_v41 = vunpack.i.h.bf16 %v12285_v11  ;;  %v12286_v17 = vunpack.i.l.bf16 %v12285_v11  ;;  %v17148_v12 = vpop.permute.xlu0 %2857  ;;  %v4653_v11 = vld [vmem:[%s22345_s4 + $0x37b8] sm:$0xff] }
 0x6aa   :  { %v10466_v19 = vpack.c.bf16 %v4653_v11, %v4640_v49  ;;  %v2875_v49 = vld [vmem:[%s22345_s4 + $0x28] sm:$0xff]  ;;  %v4768_v11 = vld [vmem:[%s22345_s4 + $0x3b50] sm:$0xff] }
 0x6ab   :  { %v2852_v52 = vsel %vm2851_vm9, %v12286_v17, %v12287_v41  ;;  %v17173_v26 = vsel %vm2851_vm9, %v12282_v22, %v12286_v17  ;;  %v4680_v41 = vld [vmem:[%s22345_s4 + $0x3890] sm:$0xff]  ;;  %v10174_v17 = vpack.c.bf16 %v4651_v5, %v4638_v23  ;;  %v10190_v23 = vpack.c.bf16 %v4755_v0, %v4742_v43  ;;  %v2965_v43 = vld [vmem:[%s22345_s4 + $0x2f8] sm:$0xff]  ;;  %v2967_v0 = vld [vmem:[%s22345_s4 + $0x308] sm:$0xff] }
 0x6ac   :  { %v17159_v63 = vsel %vm2861_vm10, %v2852_v52, %v17148_v12  ;;  %v17188_v22 = vpop.permute.xlu1 %2859  ;;  %v10468_v52 = vpack.c.bf16 %v4680_v41, %v4667_v16  ;;  %v2890_v16 = vld [vmem:[%s22345_s4 + $0xa0] sm:$0xff] }
 0x6ad   :  { %5130 = vmatprep.mubr.f32.mxu0 %v17159_v63  ;;  %5485 = vmatprep.mubr.f32.mxu1 %v17159_v63  ;;  %v4770_v41 = vld [vmem:[%s22345_s4 + $0x3b60] sm:$0xff]  ;;  %v17401_v30 = vsel %vm2861_vm10, %v17148_v12, %v17188_v22  ;;  %v10780_v12 = vpack.c.bf16 %v2916_v4, %v2903_v48  ;;  %v3017_v48 = vld [vmem:[%s22345_s4 + $0x498] sm:$0xff] }
 0x6ae   :  { %5131 = vmatmul.mubr.f32.vlgmr.msra.gmra.mrb[6].mxu0 %v17173_v26  ;;  %5486 = vmatmul.mubr.f32.vlgmr.msra.gmra.mrb[6].mxu1 %v17173_v26  ;;  %v3006_v4 = vld [vmem:[%s22345_s4 + $0x440] sm:$0xff] }
 0x6af   :  { %10159 = vmatpush1.bf16.msra.mxu0 %v10158_v39  ;;  %10451 = vmatpush1.bf16.msra.mxu1 %v10450_v57  ;;  %v4666_v39 = vld [vmem:[%s22345_s4 + $0x3820] sm:$0xff]  ;;  %v4679_v57 = vld [vmem:[%s22345_s4 + $0x3888] sm:$0xff] }
 0x6b0   :  { %8357 = vmatprep.mubr.msk.f32.mxu0 %vm4850_vm11, %v17188_v22  ;;  %8358 = vmatprep.mubr.msk.f32.mxu1 %vm4850_vm11, %v17188_v22 }
 0x6b1   :  { %10161 = vmatprep.subr.bf16.mxu0 %v10160_v59  ;;  %10453 = vmatprep.subr.bf16.mxu1 %v10452_v15  ;;  %v10470_v59 = vpack.c.bf16 %v4679_v57, %v4666_v39  ;;  %v4690_v15 = vld [vmem:[%s22345_s4 + $0x38e0] sm:$0xff]  ;;  %v10776_v39 = vpack.c.bf16 %v2890_v16, %v2877_v36  ;;  %v2980_v36 = vld [vmem:[%s22345_s4 + $0x370] sm:$0xff] }
 0x6b2   :  { %v10182_v60 = vpack.c.bf16 %v4703_v50, %v4690_v15  ;;  %v2914_v57 = vld [vmem:[%s22345_s4 + $0x160] sm:$0xff]  ;;  %v2913_v15 = vld [vmem:[%s22345_s4 + $0x158] sm:$0xff] }
 0x6b3   :  { %10163 = vmatpush1.bf16.msra.mxu0 %v10162_v3  ;;  %10455 = vmatpush1.bf16.msra.mxu1 %v10454_v6  ;;  %v4692_v3 = vld [vmem:[%s22345_s4 + $0x38f0] sm:$0xff]  ;;  %v4705_v6 = vld [vmem:[%s22345_s4 + $0x3958] sm:$0xff]  ;;  %v2902_v50 = vld [vmem:[%s22345_s4 + $0x100] sm:$0xff] }
 0x6b4   :  { %10165 = vmatprep.subr.bf16.mxu0 %v10164_v37  ;;  %10457 = vmatprep.subr.bf16.mxu1 %v10456_v2  ;;  %v4719_v37 = vld [vmem:[%s22345_s4 + $0x39c8] sm:$0xff]  ;;  %v4732_v2 = vld [vmem:[%s22345_s4 + $0x3a30] sm:$0xff]  ;;  %v10474_v18 = vpack.c.bf16 %v4705_v6, %v4692_v3 }
 0x6b5   :  { %v10476_v38 = vpack.c.bf16 %v4732_v2, %v4719_v37  ;;  %v2927_v3 = vld [vmem:[%s22345_s4 + $0x1c8] sm:$0xff]  ;;  %v2940_v6 = vld [vmem:[%s22345_s4 + $0x230] sm:$0xff] }
 0x6b7   :  { %10167 = vmatpush1.bf16.msra.mxu0 %v10166_v28  ;;  %10459 = vmatpush1.bf16.msra.mxu1 %v10458_v8  ;;  %v4718_v28 = vld [vmem:[%s22345_s4 + $0x39c0] sm:$0xff]  ;;  %v4731_v8 = vld [vmem:[%s22345_s4 + $0x3a28] sm:$0xff] }
 0x6b8   :  { %10169 = vmatprep.subr.bf16.mxu0 %v10168_v46  ;;  %10461 = vmatprep.subr.bf16.mxu1 %v10460_v33  ;;  %v4745_v46 = vld [vmem:[%s22345_s4 + $0x3a98] sm:$0xff]  ;;  %v4758_v33 = vld [vmem:[%s22345_s4 + $0x3b00] sm:$0xff]  ;;  %v10478_v47 = vpack.c.bf16 %v4731_v8, %v4718_v28 }
 0x6b9   :  { %v10480_v7 = vpack.c.bf16 %v4758_v33, %v4745_v46  ;;  %v2953_v28 = vld [vmem:[%s22345_s4 + $0x298] sm:$0xff]  ;;  %v2966_v8 = vld [vmem:[%s22345_s4 + $0x300] sm:$0xff] }
 0x6bb   :  { %10171 = vmatpush1.bf16.msra.mxu0 %v10170_v31  ;;  %10463 = vmatpush1.bf16.msra.mxu1 %v10462_v14  ;;  %v4744_v31 = vld [vmem:[%s22345_s4 + $0x3a90] sm:$0xff]  ;;  %v4757_v14 = vld [vmem:[%s22345_s4 + $0x3af8] sm:$0xff] }
 0x6bc   :  { %10173 = vmatprep.subr.bf16.mxu0 %v10172_v54  ;;  %10465 = vmatprep.subr.bf16.mxu1 %v10464_v55  ;;  %v10482_v5 = vpack.c.bf16 %v4757_v14, %v4744_v31  ;;  %v4769_v54 = vld [vmem:[%s22345_s4 + $0x3b58] sm:$0xff]  ;;  %v4771_v55 = vld [vmem:[%s22345_s4 + $0x3b68] sm:$0xff]  ;;  %v2992_v14 = vld [vmem:[%s22345_s4 + $0x3d0] sm:$0xff] }
 0x6bd   :  { %v2979_v31 = vld [vmem:[%s22345_s4 + $0x368] sm:$0xff] }
 0x6bf   :  { %10175 = vmatpush1.bf16.msra.mxu0 %v10174_v17  ;;  %10467 = vmatpush1.bf16.msra.mxu1 %v10466_v19  ;;  %v2874_v17 = vld [vmem:[%s22345_s4 + $0x20] sm:$0xff]  ;;  %v2887_v19 = vld [vmem:[%s22345_s4 + $0x88] sm:$0xff] }
 0x6c0   :  { %10177 = vmatprep.subr.bf16.mxu0 %v10176_v45  ;;  %10469 = vmatprep.subr.bf16.mxu1 %v10468_v52  ;;  %v2901_v45 = vld [vmem:[%s22345_s4 + $0xf8] sm:$0xff]  ;;  %v10484_v52 = vpack.c.bf16 %v2888_v24, %v2875_v49  ;;  %v10486_v32 = vpack.c.bf16 %v2887_v19, %v2874_v17  ;;  %v10500_v49 = vpack.c.bf16 %v2992_v14, %v2979_v31  ;;  %v2991_v24 = vld [vmem:[%s22345_s4 + $0x3c8] sm:$0xff]  ;;  %v3018_v19 = vld [vmem:[%s22345_s4 + $0x4a0] sm:$0xff] }
 0x6c1   :  { %v3005_v17 = vld [vmem:[%s22345_s4 + $0x438] sm:$0xff]  ;;  %v3082_v14 = vld [vmem:[%s22345_s4 + $0x6a0] sm:$0xff] }
 0x6c3   :  { %10179 = vmatpush1.bf16.msra.mxu0 %v10178_v53  ;;  %10471 = vmatpush1.bf16.msra.mxu1 %v10470_v59  ;;  %v10778_v53 = vpack.c.bf16 %v2889_v27, %v2876_v44  ;;  %v2900_v59 = vld [vmem:[%s22345_s4 + $0xf0] sm:$0xff]  ;;  %v3007_v44 = vld [vmem:[%s22345_s4 + $0x448] sm:$0xff] }
 0x6c4   :  { %10181 = vmatprep.subr.bf16.mxu0 %v10180_v10  ;;  %10473 = vmatprep.subr.bf16.mxu1 %v10472_v51  ;;  %v10488_v10 = vpack.c.bf16 %v2914_v57, %v2901_v45  ;;  %v2915_v51 = vld [vmem:[%s22345_s4 + $0x168] sm:$0xff]  ;;  %v10490_v37 = vpack.c.bf16 %v2913_v15, %v2900_v59  ;;  %v3020_v27 = vld [vmem:[%s22345_s4 + $0x4b0] sm:$0xff] }
 0x6c5   :  { %v10782_v2 = vpack.c.bf16 %v2915_v51, %v2902_v50  ;;  %v3004_v57 = vld [vmem:[%s22345_s4 + $0x430] sm:$0xff]  ;;  %v3031_v59 = vld [vmem:[%s22345_s4 + $0x508] sm:$0xff]  ;;  %v3033_v50 = vld [vmem:[%s22345_s4 + $0x518] sm:$0xff] }
 0x6c6   :  { %v3044_v15 = vld [vmem:[%s22345_s4 + $0x570] sm:$0xff] }
 0x6c7   :  { %10183 = vmatpush1.bf16.msra.mxu0 %v10182_v60  ;;  %10475 = vmatpush1.bf16.msra.mxu1 %v10474_v18  ;;  %v10492_v60 = vpack.c.bf16 %v2940_v6, %v2927_v3  ;;  %v2926_v18 = vld [vmem:[%s22345_s4 + $0x1c0] sm:$0xff]  ;;  %v10508_v3 = vpack.c.bf16 %v3044_v15, %v3031_v59 }
 0x6c8   :  { %10185 = vmatprep.subr.bf16.mxu0 %v10184_v56  ;;  %10477 = vmatprep.subr.bf16.mxu1 %v10476_v38  ;;  %v10784_v56 = vpack.c.bf16 %v2942_v61, %v2929_v29  ;;  %v2941_v38 = vld [vmem:[%s22345_s4 + $0x238] sm:$0xff]  ;;  %v10494_v46 = vpack.c.bf16 %v2939_v25, %v2926_v18  ;;  %v3030_v6 = vld [vmem:[%s22345_s4 + $0x500] sm:$0xff]  ;;  %v3043_v29 = vld [vmem:[%s22345_s4 + $0x568] sm:$0xff] }
 0x6c9   :  { %v10786_v33 = vpack.c.bf16 %v2941_v38, %v2928_v40  ;;  %v3032_v61 = vld [vmem:[%s22345_s4 + $0x510] sm:$0xff]  ;;  %v3070_v18 = vld [vmem:[%s22345_s4 + $0x640] sm:$0xff]  ;;  %v3059_v25 = vld [vmem:[%s22345_s4 + $0x5e8] sm:$0xff] }
 0x6ca   :  { %v3072_v40 = vld [vmem:[%s22345_s4 + $0x650] sm:$0xff]  ;;  %v3134_v15 = vld [vmem:[%s22345_s4 + $0x840] sm:$0xff] }
 0x6cb   :  { %10187 = vmatpush1.bf16.msra.mxu0 %v10186_v42  ;;  %10479 = vmatpush1.bf16.msra.mxu1 %v10478_v47  ;;  %v10496_v42 = vpack.c.bf16 %v2966_v8, %v2953_v28  ;;  %v2952_v47 = vld [vmem:[%s22345_s4 + $0x290] sm:$0xff] }
 0x6cc   :  { %10189 = vmatprep.subr.bf16.mxu0 %v10188_v21  ;;  %10481 = vmatprep.subr.bf16.mxu1 %v10480_v7  ;;  %v2954_v21 = vld [vmem:[%s22345_s4 + $0x2a0] sm:$0xff]  ;;  %v10788_v7 = vpack.c.bf16 %v2968_v1, %v2955_v34  ;;  %v3056_v8 = vld [vmem:[%s22345_s4 + $0x5d0] sm:$0xff]  ;;  %v3069_v34 = vld [vmem:[%s22345_s4 + $0x638] sm:$0xff] }
 0x6cd   :  { %v3058_v1 = vld [vmem:[%s22345_s4 + $0x5e0] sm:$0xff] }
 0x6cf   :  { %10191 = vmatpush1.bf16.msra.mxu0 %v10190_v23  ;;  %10483 = vmatpush1.bf16.msra.mxu1 %v10482_v5  ;;  %v2981_v23 = vld [vmem:[%s22345_s4 + $0x378] sm:$0xff]  ;;  %v2994_v5 = vld [vmem:[%s22345_s4 + $0x3e0] sm:$0xff] }
 0x6d0   :  { %5173 = vmatprep.subr.mxu0 %v4769_v54  ;;  %5528 = vmatprep.subr.mxu1 %v4771_v55  ;;  %v10498_v54 = vpack.c.bf16 %v2965_v43, %v2952_v47  ;;  %v10790_v55 = vpack.c.bf16 %v2967_v0, %v2954_v21  ;;  %v10792_v16 = vpack.c.bf16 %v2994_v5, %v2981_v23  ;;  %v3096_v47 = vld [vmem:[%s22345_s4 + $0x710] sm:$0xff]  ;;  %v3085_v43 = vld [vmem:[%s22345_s4 + $0x6b8] sm:$0xff]  ;;  %v3098_v21 = vld [vmem:[%s22345_s4 + $0x720] sm:$0xff] }
 0x6d1   :  { %v3095_v23 = vld [vmem:[%s22345_s4 + $0x708] sm:$0xff]  ;;  %v3084_v5 = vld [vmem:[%s22345_s4 + $0x6b0] sm:$0xff] }
 0x6d3   :  { %5174 = vmatpush1.msra.mxu0 %v4768_v11  ;;  %5529 = vmatpush1.msra.mxu1 %v4770_v41  ;;  %v2978_v11 = vld [vmem:[%s22345_s4 + $0x360] sm:$0xff]  ;;  %v2993_v41 = vld [vmem:[%s22345_s4 + $0x3d8] sm:$0xff] }
 0x6d4   :  { %5202 = vmatmul.mubr.f32.vlgmr.msra.gmra.mrb[6].mxu0 %v17401_v30  ;;  %5557 = vmatmul.mubr.f32.vlgmr.msra.gmra.mrb[6].mxu1 %v17401_v30  ;;  %v10502_v45 = vpack.c.bf16 %v2991_v24, %v2978_v11  ;;  %v3122_v11 = vld [vmem:[%s22345_s4 + $0x7e0] sm:$0xff]  ;;  %v3111_v24 = vld [vmem:[%s22345_s4 + $0x788] sm:$0xff] }
 0x6d5   :  { %10485 = vmatprep.subr.bf16.mxu0 %v10484_v52  ;;  %10777 = vmatprep.subr.bf16.mxu1 %v10776_v39  ;;  %v10794_v52 = vpack.c.bf16 %v2993_v41, %v2980_v36  ;;  %v10504_v39 = vpack.c.bf16 %v3018_v19, %v3005_v17  ;;  %v3124_v36 = vld [vmem:[%s22345_s4 + $0x7f0] sm:$0xff] }
 0x6d6   :  { %10487 = vmatpush1.bf16.msra.mxu0 %v10486_v32  ;;  %5627 = vmatprep.mubr.f32.mxu0 %v15586_v58  ;;  %v10796_v32 = vpack.c.bf16 %v3020_v27, %v3007_v44  ;;  %v3108_v19 = vld [vmem:[%s22345_s4 + $0x770] sm:$0xff]  ;;  %v3121_v44 = vld [vmem:[%s22345_s4 + $0x7d8] sm:$0xff]  ;;  %v3110_v27 = vld [vmem:[%s22345_s4 + $0x780] sm:$0xff] }
 0x6d7   :  { %10779 = vmatpush1.bf16.msra.mxu1 %v10778_v53  ;;  %5982 = vmatprep.mubr.f32.mxu1 %v15586_v58  ;;  %v3019_v53 = vld [vmem:[%s22345_s4 + $0x4a8] sm:$0xff] }
 0x6d8   :  { %10489 = vmatprep.subr.bf16.mxu0 %v10488_v10  ;;  %10781 = vmatprep.subr.bf16.mxu1 %v10780_v12  ;;  %v3046_v10 = vld [vmem:[%s22345_s4 + $0x580] sm:$0xff]  ;;  %v10506_v12 = vpack.c.bf16 %v3017_v48, %v3004_v57  ;;  %v10798_v51 = vpack.c.bf16 %v3019_v53, %v3006_v4  ;;  %v3148_v57 = vld [vmem:[%s22345_s4 + $0x8b0] sm:$0xff]  ;;  %v3137_v48 = vld [vmem:[%s22345_s4 + $0x858] sm:$0xff] }
 0x6d9   :  { %v3150_v4 = vld [vmem:[%s22345_s4 + $0x8c0] sm:$0xff] }
 0x6da   :  { %10491 = vmatpush1.bf16.msra.mxu0 %v10490_v37  ;;  %v10800_v37 = vpack.c.bf16 %v3046_v10, %v3033_v50  ;;  %v3147_v50 = vld [vmem:[%s22345_s4 + $0x8a8] sm:$0xff]  ;;  %v3136_v10 = vld [vmem:[%s22345_s4 + $0x850] sm:$0xff] }
 0x6db   :  { %10783 = vmatpush1.bf16.msra.mxu1 %v10782_v2  ;;  %10493 = vmatprep.subr.bf16.mxu0 %v10492_v60  ;;  %v3045_v2 = vld [vmem:[%s22345_s4 + $0x578] sm:$0xff] }
 0x6dc   :  { %10785 = vmatprep.subr.bf16.mxu1 %v10784_v56  ;;  %v3057_v60 = vld [vmem:[%s22345_s4 + $0x5d8] sm:$0xff]  ;;  %v10510_v56 = vpack.c.bf16 %v3043_v29, %v3030_v6  ;;  %v10802_v38 = vpack.c.bf16 %v3045_v2, %v3032_v61  ;;  %v3174_v6 = vld [vmem:[%s22345_s4 + $0x980] sm:$0xff]  ;;  %v3163_v29 = vld [vmem:[%s22345_s4 + $0x928] sm:$0xff] }
 0x6dd   :  { %v10512_v28 = vpack.c.bf16 %v3070_v18, %v3057_v60  ;;  %v3176_v61 = vld [vmem:[%s22345_s4 + $0x990] sm:$0xff] }
 0x6de   :  { %10495 = vmatpush1.bf16.msra.mxu0 %v10494_v46  ;;  %v10804_v46 = vpack.c.bf16 %v3072_v40, %v3059_v25  ;;  %v3160_v18 = vld [vmem:[%s22345_s4 + $0x910] sm:$0xff]  ;;  %v3173_v25 = vld [vmem:[%s22345_s4 + $0x978] sm:$0xff]  ;;  %v3162_v40 = vld [vmem:[%s22345_s4 + $0x920] sm:$0xff] }
 0x6df   :  { %10787 = vmatpush1.bf16.msra.mxu1 %v10786_v33  ;;  %10497 = vmatprep.subr.bf16.mxu0 %v10496_v42  ;;  %v3071_v33 = vld [vmem:[%s22345_s4 + $0x648] sm:$0xff] }
 0x6e0   :  { %10789 = vmatprep.subr.bf16.mxu1 %v10788_v7  ;;  %v3083_v42 = vld [vmem:[%s22345_s4 + $0x6a8] sm:$0xff]  ;;  %v10514_v7 = vpack.c.bf16 %v3069_v34, %v3056_v8  ;;  %v10806_v0 = vpack.c.bf16 %v3071_v33, %v3058_v1  ;;  %v3200_v8 = vld [vmem:[%s22345_s4 + $0xa50] sm:$0xff]  ;;  %v3189_v34 = vld [vmem:[%s22345_s4 + $0x9f8] sm:$0xff] }
 0x6e1   :  { %v10516_v31 = vpack.c.bf16 %v3096_v47, %v3083_v42  ;;  %v3202_v1 = vld [vmem:[%s22345_s4 + $0xa60] sm:$0xff] }
 0x6e2   :  { %10499 = vmatpush1.bf16.msra.mxu0 %v10498_v54  ;;  %v10808_v54 = vpack.c.bf16 %v3098_v21, %v3085_v43  ;;  %v3186_v47 = vld [vmem:[%s22345_s4 + $0x9e0] sm:$0xff]  ;;  %v3199_v43 = vld [vmem:[%s22345_s4 + $0xa48] sm:$0xff]  ;;  %v3188_v21 = vld [vmem:[%s22345_s4 + $0x9f0] sm:$0xff] }
 0x6e3   :  { %10791 = vmatpush1.bf16.msra.mxu1 %v10790_v55  ;;  %10501 = vmatprep.subr.bf16.mxu0 %v10500_v49  ;;  %v3097_v55 = vld [vmem:[%s22345_s4 + $0x718] sm:$0xff] }
 0x6e4   :  { %10793 = vmatprep.subr.bf16.mxu1 %v10792_v16  ;;  %v3109_v49 = vld [vmem:[%s22345_s4 + $0x778] sm:$0xff]  ;;  %v10518_v16 = vpack.c.bf16 %v3095_v23, %v3082_v14  ;;  %v10810_v41 = vpack.c.bf16 %v3097_v55, %v3084_v5  ;;  %v3226_v14 = vld [vmem:[%s22345_s4 + $0xb20] sm:$0xff]  ;;  %v3215_v23 = vld [vmem:[%s22345_s4 + $0xac8] sm:$0xff] }
 0x6e5   :  { %v10520_v17 = vpack.c.bf16 %v3122_v11, %v3109_v49  ;;  %v3228_v5 = vld [vmem:[%s22345_s4 + $0xb30] sm:$0xff] }
 0x6e6   :  { %10503 = vmatpush1.bf16.msra.mxu0 %v10502_v45  ;;  %v10812_v45 = vpack.c.bf16 %v3124_v36, %v3111_v24  ;;  %v3212_v11 = vld [vmem:[%s22345_s4 + $0xab0] sm:$0xff]  ;;  %v3225_v24 = vld [vmem:[%s22345_s4 + $0xb18] sm:$0xff]  ;;  %v3214_v36 = vld [vmem:[%s22345_s4 + $0xac0] sm:$0xff] }
 0x6e7   :  { %10795 = vmatpush1.bf16.msra.mxu1 %v10794_v52  ;;  %10505 = vmatprep.subr.bf16.mxu0 %v10504_v39  ;;  %v3123_v52 = vld [vmem:[%s22345_s4 + $0x7e8] sm:$0xff] }
 0x6e8   :  { %10797 = vmatprep.subr.bf16.mxu1 %v10796_v32  ;;  %v3135_v39 = vld [vmem:[%s22345_s4 + $0x848] sm:$0xff]  ;;  %v10522_v32 = vpack.c.bf16 %v3121_v44, %v3108_v19  ;;  %v10814_v53 = vpack.c.bf16 %v3123_v52, %v3110_v27  ;;  %v3252_v19 = vld [vmem:[%s22345_s4 + $0xbf0] sm:$0xff]  ;;  %v3241_v44 = vld [vmem:[%s22345_s4 + $0xb98] sm:$0xff] }
 0x6e9   :  { %v10524_v59 = vpack.c.bf16 %v3148_v57, %v3135_v39  ;;  %v3254_v27 = vld [vmem:[%s22345_s4 + $0xc00] sm:$0xff] }
 0x6ea   :  { %10507 = vmatpush1.bf16.msra.mxu0 %v10506_v12  ;;  %v10816_v12 = vpack.c.bf16 %v3150_v4, %v3137_v48  ;;  %v3238_v57 = vld [vmem:[%s22345_s4 + $0xb80] sm:$0xff]  ;;  %v3251_v48 = vld [vmem:[%s22345_s4 + $0xbe8] sm:$0xff]  ;;  %v3240_v4 = vld [vmem:[%s22345_s4 + $0xb90] sm:$0xff] }
 0x6eb   :  { %10799 = vmatpush1.bf16.msra.mxu1 %v10798_v51  ;;  %10509 = vmatprep.subr.bf16.mxu0 %v10508_v3  ;;  %v3149_v51 = vld [vmem:[%s22345_s4 + $0x8b8] sm:$0xff] }
 0x6ec   :  { %10801 = vmatprep.subr.bf16.mxu1 %v10800_v37  ;;  %v3161_v3 = vld [vmem:[%s22345_s4 + $0x918] sm:$0xff]  ;;  %v10526_v37 = vpack.c.bf16 %v3147_v50, %v3134_v15  ;;  %v10818_v2 = vpack.c.bf16 %v3149_v51, %v3136_v10  ;;  %v3278_v15 = vld [vmem:[%s22345_s4 + $0xcc0] sm:$0xff]  ;;  %v3267_v50 = vld [vmem:[%s22345_s4 + $0xc68] sm:$0xff] }
 0x6ed   :  { %v10528_v60 = vpack.c.bf16 %v3174_v6, %v3161_v3  ;;  %v3280_v10 = vld [vmem:[%s22345_s4 + $0xcd0] sm:$0xff] }
 0x6ee   :  { %10511 = vmatpush1.bf16.msra.mxu0 %v10510_v56  ;;  %v10820_v56 = vpack.c.bf16 %v3176_v61, %v3163_v29  ;;  %v3264_v6 = vld [vmem:[%s22345_s4 + $0xc50] sm:$0xff]  ;;  %v3277_v29 = vld [vmem:[%s22345_s4 + $0xcb8] sm:$0xff]  ;;  %v3266_v61 = vld [vmem:[%s22345_s4 + $0xc60] sm:$0xff] }
 0x6ef   :  { %10803 = vmatpush1.bf16.msra.mxu1 %v10802_v38  ;;  %10513 = vmatprep.subr.bf16.mxu0 %v10512_v28  ;;  %v3175_v38 = vld [vmem:[%s22345_s4 + $0x988] sm:$0xff] }
 0x6f0   :  { %10805 = vmatprep.subr.bf16.mxu1 %v10804_v46  ;;  %v3187_v28 = vld [vmem:[%s22345_s4 + $0x9e8] sm:$0xff]  ;;  %v10530_v46 = vpack.c.bf16 %v3173_v25, %v3160_v18  ;;  %v10822_v33 = vpack.c.bf16 %v3175_v38, %v3162_v40  ;;  %v3304_v18 = vld [vmem:[%s22345_s4 + $0xd90] sm:$0xff]  ;;  %v3293_v25 = vld [vmem:[%s22345_s4 + $0xd38] sm:$0xff] }
 0x6f1   :  { %v10532_v42 = vpack.c.bf16 %v3200_v8, %v3187_v28  ;;  %v3306_v40 = vld [vmem:[%s22345_s4 + $0xda0] sm:$0xff] }
 0x6f2   :  { %10515 = vmatpush1.bf16.msra.mxu0 %v10514_v7  ;;  %v10824_v7 = vpack.c.bf16 %v3202_v1, %v3189_v34  ;;  %v3290_v8 = vld [vmem:[%s22345_s4 + $0xd20] sm:$0xff]  ;;  %v3303_v34 = vld [vmem:[%s22345_s4 + $0xd88] sm:$0xff]  ;;  %v10840_v1 = vpack.c.bf16 %v3306_v40, %v3293_v25  ;;  %v3396_v40 = vld [vmem:[%s22345_s4 + $0x1070] sm:$0xff] }
 0x6f3   :  { %10807 = vmatpush1.bf16.msra.mxu1 %v10806_v0  ;;  %10517 = vmatprep.subr.bf16.mxu0 %v10516_v31  ;;  %v3201_v0 = vld [vmem:[%s22345_s4 + $0xa58] sm:$0xff]  ;;  %v3407_v25 = vld [vmem:[%s22345_s4 + $0x10c8] sm:$0xff] }
 0x6f4   :  { %10809 = vmatprep.subr.bf16.mxu1 %v10808_v54  ;;  %v3213_v31 = vld [vmem:[%s22345_s4 + $0xab8] sm:$0xff]  ;;  %v10534_v54 = vpack.c.bf16 %v3199_v43, %v3186_v47  ;;  %v10826_v55 = vpack.c.bf16 %v3201_v0, %v3188_v21  ;;  %v3330_v47 = vld [vmem:[%s22345_s4 + $0xe60] sm:$0xff]  ;;  %v10550_v43 = vpack.c.bf16 %v3303_v34, %v3290_v8  ;;  %v3319_v21 = vld [vmem:[%s22345_s4 + $0xe08] sm:$0xff] }
 0x6f5   :  { %v10536_v49 = vpack.c.bf16 %v3226_v14, %v3213_v31  ;;  %v3316_v31 = vld [vmem:[%s22345_s4 + $0xdf0] sm:$0xff]  ;;  %v3329_v14 = vld [vmem:[%s22345_s4 + $0xe58] sm:$0xff]  ;;  %v3434_v8 = vld [vmem:[%s22345_s4 + $0x11a0] sm:$0xff] }
 0x6f6   :  { %10519 = vmatpush1.bf16.msra.mxu0 %v10518_v16  ;;  %v10828_v16 = vpack.c.bf16 %v3228_v5, %v3215_v23  ;;  %v3318_v23 = vld [vmem:[%s22345_s4 + $0xe00] sm:$0xff]  ;;  %v3423_v34 = vld [vmem:[%s22345_s4 + $0x1148] sm:$0xff] }
 0x6f7   :  { %10811 = vmatpush1.bf16.msra.mxu1 %v10810_v41  ;;  %10521 = vmatprep.subr.bf16.mxu0 %v10520_v17  ;;  %v3227_v41 = vld [vmem:[%s22345_s4 + $0xb28] sm:$0xff] }
 0x6f8   :  { %10813 = vmatprep.subr.bf16.mxu1 %v10812_v45  ;;  %v3239_v17 = vld [vmem:[%s22345_s4 + $0xb88] sm:$0xff]  ;;  %v10538_v45 = vpack.c.bf16 %v3225_v24, %v3212_v11  ;;  %v10830_v52 = vpack.c.bf16 %v3227_v41, %v3214_v36  ;;  %v3345_v24 = vld [vmem:[%s22345_s4 + $0xed8] sm:$0xff]  ;;  %v3358_v36 = vld [vmem:[%s22345_s4 + $0xf40] sm:$0xff] }
 0x6f9   :  { %v10540_v39 = vpack.c.bf16 %v3252_v19, %v3239_v17  ;;  %v3342_v19 = vld [vmem:[%s22345_s4 + $0xec0] sm:$0xff] }
 0x6fa   :  { %10523 = vmatpush1.bf16.msra.mxu0 %v10522_v32  ;;  %v10832_v32 = vpack.c.bf16 %v3254_v27, %v3241_v44  ;;  %v3355_v44 = vld [vmem:[%s22345_s4 + $0xf28] sm:$0xff]  ;;  %v3344_v27 = vld [vmem:[%s22345_s4 + $0xed0] sm:$0xff] }
 0x6fb   :  { %10815 = vmatpush1.bf16.msra.mxu1 %v10814_v53  ;;  %10525 = vmatprep.subr.bf16.mxu0 %v10524_v59  ;;  %v3253_v53 = vld [vmem:[%s22345_s4 + $0xbf8] sm:$0xff] }
 0x6fc   :  { %10817 = vmatprep.subr.bf16.mxu1 %v10816_v12  ;;  %v3265_v59 = vld [vmem:[%s22345_s4 + $0xc58] sm:$0xff]  ;;  %v10542_v12 = vpack.c.bf16 %v3251_v48, %v3238_v57  ;;  %v10834_v51 = vpack.c.bf16 %v3253_v53, %v3240_v4  ;;  %v3382_v57 = vld [vmem:[%s22345_s4 + $0x1000] sm:$0xff]  ;;  %v3371_v48 = vld [vmem:[%s22345_s4 + $0xfa8] sm:$0xff] }
 0x6fd   :  { %v10544_v3 = vpack.c.bf16 %v3278_v15, %v3265_v59  ;;  %v3384_v4 = vld [vmem:[%s22345_s4 + $0x1010] sm:$0xff] }
 0x6fe   :  { %10527 = vmatpush1.bf16.msra.mxu0 %v10526_v37  ;;  %v10836_v37 = vpack.c.bf16 %v3280_v10, %v3267_v50  ;;  %v3368_v15 = vld [vmem:[%s22345_s4 + $0xf90] sm:$0xff]  ;;  %v3381_v50 = vld [vmem:[%s22345_s4 + $0xff8] sm:$0xff]  ;;  %v3370_v10 = vld [vmem:[%s22345_s4 + $0xfa0] sm:$0xff] }
 0x6ff   :  { %10819 = vmatpush1.bf16.msra.mxu1 %v10818_v2  ;;  %10529 = vmatprep.subr.bf16.mxu0 %v10528_v60  ;;  %v3279_v2 = vld [vmem:[%s22345_s4 + $0xcc8] sm:$0xff] }
 0x700   :  { %10821 = vmatprep.subr.bf16.mxu1 %v10820_v56  ;;  %v3291_v60 = vld [vmem:[%s22345_s4 + $0xd28] sm:$0xff]  ;;  %v10546_v56 = vpack.c.bf16 %v3277_v29, %v3264_v6  ;;  %v10838_v38 = vpack.c.bf16 %v3279_v2, %v3266_v61  ;;  %v3408_v6 = vld [vmem:[%s22345_s4 + $0x10d0] sm:$0xff]  ;;  %v3397_v29 = vld [vmem:[%s22345_s4 + $0x1078] sm:$0xff] }
 0x701   :  { %v10548_v28 = vpack.c.bf16 %v3304_v18, %v3291_v60  ;;  %v3410_v61 = vld [vmem:[%s22345_s4 + $0x10e0] sm:$0xff] }
 0x702   :  { %10531 = vmatpush1.bf16.msra.mxu0 %v10530_v46  ;;  %v3292_v46 = vld [vmem:[%s22345_s4 + $0xd30] sm:$0xff]  ;;  %v3394_v18 = vld [vmem:[%s22345_s4 + $0x1060] sm:$0xff] }
 0x703   :  { %10823 = vmatpush1.bf16.msra.mxu1 %v10822_v33  ;;  %10533 = vmatprep.subr.bf16.mxu0 %v10532_v42  ;;  %v3305_v33 = vld [vmem:[%s22345_s4 + $0xd98] sm:$0xff] }
 0x704   :  { %10825 = vmatprep.subr.bf16.mxu1 %v10824_v7  ;;  %v3317_v42 = vld [vmem:[%s22345_s4 + $0xdf8] sm:$0xff]  ;;  %v3332_v7 = vld [vmem:[%s22345_s4 + $0xe70] sm:$0xff]  ;;  %v10842_v0 = vpack.c.bf16 %v3305_v33, %v3292_v46  ;;  %v10566_v46 = vpack.c.bf16 %v3407_v25, %v3394_v18  ;;  %v3538_v18 = vld [vmem:[%s22345_s4 + $0x14e0] sm:$0xff] }
 0x705   :  { %v10552_v5 = vpack.c.bf16 %v3330_v47, %v3317_v42  ;;  %v10844_v11 = vpack.c.bf16 %v3332_v7, %v3319_v21  ;;  %v3420_v47 = vld [vmem:[%s22345_s4 + $0x1130] sm:$0xff]  ;;  %v3422_v21 = vld [vmem:[%s22345_s4 + $0x1140] sm:$0xff]  ;;  %v3527_v25 = vld [vmem:[%s22345_s4 + $0x1488] sm:$0xff] }
 0x706   :  { %10535 = vmatpush1.bf16.msra.mxu0 %v10534_v54  ;;  %v3331_v54 = vld [vmem:[%s22345_s4 + $0xe68] sm:$0xff] }
 0x707   :  { %10827 = vmatpush1.bf16.msra.mxu1 %v10826_v55  ;;  %10537 = vmatprep.subr.bf16.mxu0 %v10536_v49  ;;  %v3343_v55 = vld [vmem:[%s22345_s4 + $0xec8] sm:$0xff]  ;;  %v3356_v49 = vld [vmem:[%s22345_s4 + $0xf30] sm:$0xff]  ;;  %v10846_v41 = vpack.c.bf16 %v3331_v54, %v3318_v23  ;;  %v3449_v23 = vld [vmem:[%s22345_s4 + $0x1218] sm:$0xff] }
 0x708   :  { %10829 = vmatprep.subr.bf16.mxu1 %v10828_v16  ;;  %v10554_v16 = vpack.c.bf16 %v3329_v14, %v3316_v31  ;;  %v10556_v17 = vpack.c.bf16 %v3356_v49, %v3343_v55  ;;  %v3447_v31 = vld [vmem:[%s22345_s4 + $0x1208] sm:$0xff]  ;;  %v3460_v14 = vld [vmem:[%s22345_s4 + $0x1270] sm:$0xff] }
 0x709   :  { %v10572_v49 = vpack.c.bf16 %v3460_v14, %v3447_v31  ;;  %v3550_v14 = vld [vmem:[%s22345_s4 + $0x1540] sm:$0xff] }
 0x70a   :  { %10539 = vmatpush1.bf16.msra.mxu0 %v10538_v45  ;;  %v10848_v45 = vpack.c.bf16 %v3358_v36, %v3345_v24  ;;  %v3459_v24 = vld [vmem:[%s22345_s4 + $0x1268] sm:$0xff]  ;;  %v3448_v36 = vld [vmem:[%s22345_s4 + $0x1210] sm:$0xff] }
 0x70b   :  { %10831 = vmatpush1.bf16.msra.mxu1 %v10830_v52  ;;  %10541 = vmatprep.subr.bf16.mxu0 %v10540_v39  ;;  %v3357_v52 = vld [vmem:[%s22345_s4 + $0xf38] sm:$0xff] }
 0x70c   :  { %10833 = vmatprep.subr.bf16.mxu1 %v10832_v32  ;;  %v3369_v39 = vld [vmem:[%s22345_s4 + $0xf98] sm:$0xff]  ;;  %v10558_v32 = vpack.c.bf16 %v3355_v44, %v3342_v19  ;;  %v10850_v53 = vpack.c.bf16 %v3357_v52, %v3344_v27  ;;  %v3486_v19 = vld [vmem:[%s22345_s4 + $0x1340] sm:$0xff]  ;;  %v3475_v44 = vld [vmem:[%s22345_s4 + $0x12e8] sm:$0xff] }
 0x70d   :  { %v10560_v59 = vpack.c.bf16 %v3382_v57, %v3369_v39  ;;  %v3488_v27 = vld [vmem:[%s22345_s4 + $0x1350] sm:$0xff] }
 0x70e   :  { %10543 = vmatpush1.bf16.msra.mxu0 %v10542_v12  ;;  %v10852_v12 = vpack.c.bf16 %v3384_v4, %v3371_v48  ;;  %v3472_v57 = vld [vmem:[%s22345_s4 + $0x12d0] sm:$0xff]  ;;  %v3485_v48 = vld [vmem:[%s22345_s4 + $0x1338] sm:$0xff]  ;;  %v3474_v4 = vld [vmem:[%s22345_s4 + $0x12e0] sm:$0xff] }
 0x70f   :  { %10835 = vmatpush1.bf16.msra.mxu1 %v10834_v51  ;;  %10545 = vmatprep.subr.bf16.mxu0 %v10544_v3  ;;  %v3383_v51 = vld [vmem:[%s22345_s4 + $0x1008] sm:$0xff] }
 0x710   :  { %10837 = vmatprep.subr.bf16.mxu1 %v10836_v37  ;;  %v3395_v3 = vld [vmem:[%s22345_s4 + $0x1068] sm:$0xff]  ;;  %v10562_v37 = vpack.c.bf16 %v3381_v50, %v3368_v15  ;;  %v10854_v2 = vpack.c.bf16 %v3383_v51, %v3370_v10  ;;  %v3512_v15 = vld [vmem:[%s22345_s4 + $0x1410] sm:$0xff]  ;;  %v3501_v50 = vld [vmem:[%s22345_s4 + $0x13b8] sm:$0xff] }
 0x711   :  { %v10564_v60 = vpack.c.bf16 %v3408_v6, %v3395_v3  ;;  %v3514_v10 = vld [vmem:[%s22345_s4 + $0x1420] sm:$0xff] }
 0x712   :  { %10547 = vmatpush1.bf16.msra.mxu0 %v10546_v56  ;;  %v10856_v56 = vpack.c.bf16 %v3410_v61, %v3397_v29  ;;  %v3498_v6 = vld [vmem:[%s22345_s4 + $0x13a0] sm:$0xff]  ;;  %v3511_v29 = vld [vmem:[%s22345_s4 + $0x1408] sm:$0xff]  ;;  %v3500_v61 = vld [vmem:[%s22345_s4 + $0x13b0] sm:$0xff] }
 0x713   :  { %10839 = vmatpush1.bf16.msra.mxu1 %v10838_v38  ;;  %10549 = vmatprep.subr.bf16.mxu0 %v10548_v28  ;;  %v3409_v38 = vld [vmem:[%s22345_s4 + $0x10d8] sm:$0xff] }
 0x714   :  { %10841 = vmatprep.subr.bf16.mxu1 %v10840_v1  ;;  %v3421_v28 = vld [vmem:[%s22345_s4 + $0x1138] sm:$0xff]  ;;  %v3436_v1 = vld [vmem:[%s22345_s4 + $0x11b0] sm:$0xff]  ;;  %v10858_v33 = vpack.c.bf16 %v3409_v38, %v3396_v40 }
 0x715   :  { %5628 = vmatmul.mubr.f32.vlgmr.msra.gmra.mrb[8].mxu0 %v23008_v13  ;;  %v10568_v42 = vpack.c.bf16 %v3434_v8, %v3421_v28  ;;  %v10860_v7 = vpack.c.bf16 %v3436_v1, %v3423_v34  ;;  %v3540_v40 = vld [vmem:[%s22345_s4 + $0x14f0] sm:$0xff]  ;;  %v3537_v34 = vld [vmem:[%s22345_s4 + $0x14d8] sm:$0xff]  ;;  %v3526_v1 = vld [vmem:[%s22345_s4 + $0x1480] sm:$0xff] }
 0x716   :  { %5983 = vmatmul.mubr.f32.vlgmr.msra.gmra.mrb[8].mxu1 %v23008_v13  ;;  %10551 = vmatpush1.bf16.msra.mxu0 %v10550_v43  ;;  %v3433_v43 = vld [vmem:[%s22345_s4 + $0x1198] sm:$0xff]  ;;  %v3524_v8 = vld [vmem:[%s22345_s4 + $0x1470] sm:$0xff] }
 0x717   :  { %5698 = vmatprep.mubr.f32.mxu0 %v15979_v35  ;;  %10843 = vmatpush1.bf16.msra.mxu1 %v10842_v0  ;;  %v3435_v0 = vld [vmem:[%s22345_s4 + $0x11a8] sm:$0xff]  ;;  %v10570_v54 = vpack.c.bf16 %v3433_v43, %v3420_v47  ;;  %v3564_v47 = vld [vmem:[%s22345_s4 + $0x15b0] sm:$0xff]  ;;  %v3553_v43 = vld [vmem:[%s22345_s4 + $0x1558] sm:$0xff] }
 0x718   :  { %6053 = vmatprep.mubr.f32.mxu1 %v15979_v35  ;;  %10553 = vmatprep.subr.bf16.mxu0 %v10552_v5  ;;  %v3462_v5 = vld [vmem:[%s22345_s4 + $0x1280] sm:$0xff]  ;;  %v10862_v55 = vpack.c.bf16 %v3435_v0, %v3422_v21 }
 0x719   :  { %10845 = vmatprep.subr.bf16.mxu1 %v10844_v11  ;;  %v3446_v11 = vld [vmem:[%s22345_s4 + $0x1200] sm:$0xff] }
 0x71a   :  { %10555 = vmatpush1.bf16.msra.mxu0 %v10554_v16  ;;  %v10864_v16 = vpack.c.bf16 %v3462_v5, %v3449_v23  ;;  %v3566_v21 = vld [vmem:[%s22345_s4 + $0x15c0] sm:$0xff]  ;;  %v3563_v23 = vld [vmem:[%s22345_s4 + $0x15a8] sm:$0xff]  ;;  %v3552_v5 = vld [vmem:[%s22345_s4 + $0x1550] sm:$0xff] }
 0x71b   :  { %10847 = vmatpush1.bf16.msra.mxu1 %v10846_v41  ;;  %10557 = vmatprep.subr.bf16.mxu0 %v10556_v17  ;;  %v3461_v41 = vld [vmem:[%s22345_s4 + $0x1278] sm:$0xff] }
 0x71c   :  { %10849 = vmatprep.subr.bf16.mxu1 %v10848_v45  ;;  %v3473_v17 = vld [vmem:[%s22345_s4 + $0x12d8] sm:$0xff]  ;;  %v10574_v45 = vpack.c.bf16 %v3459_v24, %v3446_v11  ;;  %v10866_v52 = vpack.c.bf16 %v3461_v41, %v3448_v36  ;;  %v3590_v11 = vld [vmem:[%s22345_s4 + $0x1680] sm:$0xff]  ;;  %v3579_v24 = vld [vmem:[%s22345_s4 + $0x1628] sm:$0xff] }
 0x71d   :  { %v10576_v39 = vpack.c.bf16 %v3486_v19, %v3473_v17  ;;  %v3592_v36 = vld [vmem:[%s22345_s4 + $0x1690] sm:$0xff] }
 0x71e   :  { %10559 = vmatpush1.bf16.msra.mxu0 %v10558_v32  ;;  %v10868_v32 = vpack.c.bf16 %v3488_v27, %v3475_v44  ;;  %v3576_v19 = vld [vmem:[%s22345_s4 + $0x1610] sm:$0xff]  ;;  %v3589_v44 = vld [vmem:[%s22345_s4 + $0x1678] sm:$0xff]  ;;  %v3578_v27 = vld [vmem:[%s22345_s4 + $0x1620] sm:$0xff] }
 0x71f   :  { %10851 = vmatpush1.bf16.msra.mxu1 %v10850_v53  ;;  %10561 = vmatprep.subr.bf16.mxu0 %v10560_v59  ;;  %v3487_v53 = vld [vmem:[%s22345_s4 + $0x1348] sm:$0xff] }
 0x720   :  { %10853 = vmatprep.subr.bf16.mxu1 %v10852_v12  ;;  %v3499_v59 = vld [vmem:[%s22345_s4 + $0x13a8] sm:$0xff]  ;;  %v10578_v12 = vpack.c.bf16 %v3485_v48, %v3472_v57  ;;  %v10870_v51 = vpack.c.bf16 %v3487_v53, %v3474_v4  ;;  %v3616_v57 = vld [vmem:[%s22345_s4 + $0x1750] sm:$0xff]  ;;  %v3605_v48 = vld [vmem:[%s22345_s4 + $0x16f8] sm:$0xff] }
 0x721   :  { %v10580_v3 = vpack.c.bf16 %v3512_v15, %v3499_v59  ;;  %v3618_v4 = vld [vmem:[%s22345_s4 + $0x1760] sm:$0xff] }
 0x722   :  { %10563 = vmatpush1.bf16.msra.mxu0 %v10562_v37  ;;  %v10872_v37 = vpack.c.bf16 %v3514_v10, %v3501_v50  ;;  %v3602_v15 = vld [vmem:[%s22345_s4 + $0x16e0] sm:$0xff]  ;;  %v3615_v50 = vld [vmem:[%s22345_s4 + $0x1748] sm:$0xff]  ;;  %v3604_v10 = vld [vmem:[%s22345_s4 + $0x16f0] sm:$0xff] }
 0x723   :  { %10855 = vmatpush1.bf16.msra.mxu1 %v10854_v2  ;;  %10565 = vmatprep.subr.bf16.mxu0 %v10564_v60  ;;  %v3513_v2 = vld [vmem:[%s22345_s4 + $0x1418] sm:$0xff] }
 0x724   :  { %10857 = vmatprep.subr.bf16.mxu1 %v10856_v56  ;;  %v3525_v60 = vld [vmem:[%s22345_s4 + $0x1478] sm:$0xff]  ;;  %v10582_v56 = vpack.c.bf16 %v3511_v29, %v3498_v6  ;;  %v10874_v38 = vpack.c.bf16 %v3513_v2, %v3500_v61  ;;  %v3642_v6 = vld [vmem:[%s22345_s4 + $0x1820] sm:$0xff]  ;;  %v3631_v29 = vld [vmem:[%s22345_s4 + $0x17c8] sm:$0xff] }
 0x725   :  { %v10584_v28 = vpack.c.bf16 %v3538_v18, %v3525_v60  ;;  %v3644_v61 = vld [vmem:[%s22345_s4 + $0x1830] sm:$0xff] }
 0x726   :  { %10567 = vmatpush1.bf16.msra.mxu0 %v10566_v46  ;;  %v10876_v46 = vpack.c.bf16 %v3540_v40, %v3527_v25  ;;  %v3628_v18 = vld [vmem:[%s22345_s4 + $0x17b0] sm:$0xff]  ;;  %v3641_v25 = vld [vmem:[%s22345_s4 + $0x1818] sm:$0xff]  ;;  %v3630_v40 = vld [vmem:[%s22345_s4 + $0x17c0] sm:$0xff] }
 0x727   :  { %10859 = vmatpush1.bf16.msra.mxu1 %v10858_v33  ;;  %10569 = vmatprep.subr.bf16.mxu0 %v10568_v42  ;;  %v3539_v33 = vld [vmem:[%s22345_s4 + $0x14e8] sm:$0xff] }
 0x728   :  { %10861 = vmatprep.subr.bf16.mxu1 %v10860_v7  ;;  %v3551_v42 = vld [vmem:[%s22345_s4 + $0x1548] sm:$0xff]  ;;  %v10586_v7 = vpack.c.bf16 %v3537_v34, %v3524_v8  ;;  %v10878_v0 = vpack.c.bf16 %v3539_v33, %v3526_v1  ;;  %v3668_v8 = vld [vmem:[%s22345_s4 + $0x18f0] sm:$0xff]  ;;  %v3657_v34 = vld [vmem:[%s22345_s4 + $0x1898] sm:$0xff] }
 0x729   :  { %v10588_v31 = vpack.c.bf16 %v3564_v47, %v3551_v42  ;;  %v3670_v1 = vld [vmem:[%s22345_s4 + $0x1900] sm:$0xff] }
 0x72a   :  { %10571 = vmatpush1.bf16.msra.mxu0 %v10570_v54  ;;  %v10880_v54 = vpack.c.bf16 %v3566_v21, %v3553_v43  ;;  %v3654_v47 = vld [vmem:[%s22345_s4 + $0x1880] sm:$0xff]  ;;  %v3667_v43 = vld [vmem:[%s22345_s4 + $0x18e8] sm:$0xff]  ;;  %v3656_v21 = vld [vmem:[%s22345_s4 + $0x1890] sm:$0xff] }
 0x72b   :  { %10863 = vmatpush1.bf16.msra.mxu1 %v10862_v55  ;;  %10573 = vmatprep.subr.bf16.mxu0 %v10572_v49  ;;  %v3565_v55 = vld [vmem:[%s22345_s4 + $0x15b8] sm:$0xff] }
 0x72c   :  { %10865 = vmatprep.subr.bf16.mxu1 %v10864_v16  ;;  %v3577_v49 = vld [vmem:[%s22345_s4 + $0x1618] sm:$0xff]  ;;  %v10590_v16 = vpack.c.bf16 %v3563_v23, %v3550_v14  ;;  %v10882_v41 = vpack.c.bf16 %v3565_v55, %v3552_v5  ;;  %v3694_v14 = vld [vmem:[%s22345_s4 + $0x19c0] sm:$0xff]  ;;  %v3683_v23 = vld [vmem:[%s22345_s4 + $0x1968] sm:$0xff] }
 0x72d   :  { %v10592_v17 = vpack.c.bf16 %v3590_v11, %v3577_v49  ;;  %v3696_v5 = vld [vmem:[%s22345_s4 + $0x19d0] sm:$0xff] }
 0x72e   :  { %10575 = vmatpush1.bf16.msra.mxu0 %v10574_v45  ;;  %v10884_v45 = vpack.c.bf16 %v3592_v36, %v3579_v24  ;;  %v3680_v11 = vld [vmem:[%s22345_s4 + $0x1950] sm:$0xff]  ;;  %v3693_v24 = vld [vmem:[%s22345_s4 + $0x19b8] sm:$0xff]  ;;  %v3682_v36 = vld [vmem:[%s22345_s4 + $0x1960] sm:$0xff] }
 0x72f   :  { %10867 = vmatpush1.bf16.msra.mxu1 %v10866_v52  ;;  %10577 = vmatprep.subr.bf16.mxu0 %v10576_v39  ;;  %v3591_v52 = vld [vmem:[%s22345_s4 + $0x1688] sm:$0xff] }
 0x730   :  { %10869 = vmatprep.subr.bf16.mxu1 %v10868_v32  ;;  %v3603_v39 = vld [vmem:[%s22345_s4 + $0x16e8] sm:$0xff]  ;;  %v10594_v32 = vpack.c.bf16 %v3589_v44, %v3576_v19  ;;  %v10886_v53 = vpack.c.bf16 %v3591_v52, %v3578_v27  ;;  %v3720_v19 = vld [vmem:[%s22345_s4 + $0x1a90] sm:$0xff]  ;;  %v3709_v44 = vld [vmem:[%s22345_s4 + $0x1a38] sm:$0xff] }
 0x731   :  { %v10596_v59 = vpack.c.bf16 %v3616_v57, %v3603_v39  ;;  %v3722_v27 = vld [vmem:[%s22345_s4 + $0x1aa0] sm:$0xff] }
 0x732   :  { %10579 = vmatpush1.bf16.msra.mxu0 %v10578_v12  ;;  %v10888_v12 = vpack.c.bf16 %v3618_v4, %v3605_v48  ;;  %v3706_v57 = vld [vmem:[%s22345_s4 + $0x1a20] sm:$0xff]  ;;  %v3719_v48 = vld [vmem:[%s22345_s4 + $0x1a88] sm:$0xff]  ;;  %v10904_v4 = vpack.c.bf16 %v3722_v27, %v3709_v44  ;;  %v3812_v27 = vld [vmem:[%s22345_s4 + $0x1d70] sm:$0xff] }
 0x733   :  { %10871 = vmatpush1.bf16.msra.mxu1 %v10870_v51  ;;  %10581 = vmatprep.subr.bf16.mxu0 %v10580_v3  ;;  %v3617_v51 = vld [vmem:[%s22345_s4 + $0x1758] sm:$0xff]  ;;  %v3823_v44 = vld [vmem:[%s22345_s4 + $0x1dc8] sm:$0xff] }
 0x734   :  { %10873 = vmatprep.subr.bf16.mxu1 %v10872_v37  ;;  %v3629_v3 = vld [vmem:[%s22345_s4 + $0x17b8] sm:$0xff]  ;;  %v10598_v37 = vpack.c.bf16 %v3615_v50, %v3602_v15  ;;  %v10890_v2 = vpack.c.bf16 %v3617_v51, %v3604_v10  ;;  %v3746_v15 = vld [vmem:[%s22345_s4 + $0x1b60] sm:$0xff]  ;;  %v10614_v50 = vpack.c.bf16 %v3719_v48, %v3706_v57  ;;  %v3735_v10 = vld [vmem:[%s22345_s4 + $0x1b08] sm:$0xff] }
 0x735   :  { %v10600_v60 = vpack.c.bf16 %v3642_v6, %v3629_v3  ;;  %v3732_v3 = vld [vmem:[%s22345_s4 + $0x1af0] sm:$0xff]  ;;  %v3745_v6 = vld [vmem:[%s22345_s4 + $0x1b58] sm:$0xff]  ;;  %v3850_v57 = vld [vmem:[%s22345_s4 + $0x1ea0] sm:$0xff] }
 0x736   :  { %10583 = vmatpush1.bf16.msra.mxu0 %v10582_v56  ;;  %v10892_v56 = vpack.c.bf16 %v3644_v61, %v3631_v29  ;;  %v3734_v29 = vld [vmem:[%s22345_s4 + $0x1b00] sm:$0xff]  ;;  %v3839_v48 = vld [vmem:[%s22345_s4 + $0x1e48] sm:$0xff] }
 0x737   :  { %10875 = vmatpush1.bf16.msra.mxu1 %v10874_v38  ;;  %10585 = vmatprep.subr.bf16.mxu0 %v10584_v28  ;;  %v3643_v38 = vld [vmem:[%s22345_s4 + $0x1828] sm:$0xff] }
 0x738   :  { %10877 = vmatprep.subr.bf16.mxu1 %v10876_v46  ;;  %v3655_v28 = vld [vmem:[%s22345_s4 + $0x1888] sm:$0xff]  ;;  %v10602_v46 = vpack.c.bf16 %v3641_v25, %v3628_v18  ;;  %v10894_v33 = vpack.c.bf16 %v3643_v38, %v3630_v40  ;;  %v3761_v25 = vld [vmem:[%s22345_s4 + $0x1bd8] sm:$0xff]  ;;  %v3774_v40 = vld [vmem:[%s22345_s4 + $0x1c40] sm:$0xff] }
 0x739   :  { %v10604_v42 = vpack.c.bf16 %v3668_v8, %v3655_v28  ;;  %v3758_v8 = vld [vmem:[%s22345_s4 + $0x1bc0] sm:$0xff] }
 0x73a   :  { %10587 = vmatpush1.bf16.msra.mxu0 %v10586_v7  ;;  %v10896_v7 = vpack.c.bf16 %v3670_v1, %v3657_v34  ;;  %v3771_v34 = vld [vmem:[%s22345_s4 + $0x1c28] sm:$0xff]  ;;  %v3760_v1 = vld [vmem:[%s22345_s4 + $0x1bd0] sm:$0xff] }
 0x73b   :  { %10879 = vmatpush1.bf16.msra.mxu1 %v10878_v0  ;;  %10589 = vmatprep.subr.bf16.mxu0 %v10588_v31  ;;  %v3669_v0 = vld [vmem:[%s22345_s4 + $0x18f8] sm:$0xff] }
 0x73c   :  { %10881 = vmatprep.subr.bf16.mxu1 %v10880_v54  ;;  %v3681_v31 = vld [vmem:[%s22345_s4 + $0x1958] sm:$0xff]  ;;  %v10606_v54 = vpack.c.bf16 %v3667_v43, %v3654_v47  ;;  %v10898_v55 = vpack.c.bf16 %v3669_v0, %v3656_v21  ;;  %v3798_v47 = vld [vmem:[%s22345_s4 + $0x1d00] sm:$0xff]  ;;  %v3787_v43 = vld [vmem:[%s22345_s4 + $0x1ca8] sm:$0xff] }
 0x73d   :  { %v10608_v49 = vpack.c.bf16 %v3694_v14, %v3681_v31  ;;  %v3800_v21 = vld [vmem:[%s22345_s4 + $0x1d10] sm:$0xff] }
 0x73e   :  { %10591 = vmatpush1.bf16.msra.mxu0 %v10590_v16  ;;  %v10900_v16 = vpack.c.bf16 %v3696_v5, %v3683_v23  ;;  %v3784_v14 = vld [vmem:[%s22345_s4 + $0x1c90] sm:$0xff]  ;;  %v3797_v23 = vld [vmem:[%s22345_s4 + $0x1cf8] sm:$0xff]  ;;  %v3786_v5 = vld [vmem:[%s22345_s4 + $0x1ca0] sm:$0xff] }
 0x73f   :  { %10883 = vmatpush1.bf16.msra.mxu1 %v10882_v41  ;;  %10593 = vmatprep.subr.bf16.mxu0 %v10592_v17  ;;  %v3695_v41 = vld [vmem:[%s22345_s4 + $0x19c8] sm:$0xff] }
 0x740   :  { %10885 = vmatprep.subr.bf16.mxu1 %v10884_v45  ;;  %v3707_v17 = vld [vmem:[%s22345_s4 + $0x1a28] sm:$0xff]  ;;  %v10610_v45 = vpack.c.bf16 %v3693_v24, %v3680_v11  ;;  %v10902_v52 = vpack.c.bf16 %v3695_v41, %v3682_v36  ;;  %v3824_v11 = vld [vmem:[%s22345_s4 + $0x1dd0] sm:$0xff]  ;;  %v3813_v24 = vld [vmem:[%s22345_s4 + $0x1d78] sm:$0xff] }
 0x741   :  { %v10612_v39 = vpack.c.bf16 %v3720_v19, %v3707_v17  ;;  %v3826_v36 = vld [vmem:[%s22345_s4 + $0x1de0] sm:$0xff] }
 0x742   :  { %10595 = vmatpush1.bf16.msra.mxu0 %v10594_v32  ;;  %v3708_v32 = vld [vmem:[%s22345_s4 + $0x1a30] sm:$0xff]  ;;  %v3810_v19 = vld [vmem:[%s22345_s4 + $0x1d60] sm:$0xff] }
 0x743   :  { %10887 = vmatpush1.bf16.msra.mxu1 %v10886_v53  ;;  %10597 = vmatprep.subr.bf16.mxu0 %v10596_v59  ;;  %v3721_v53 = vld [vmem:[%s22345_s4 + $0x1a98] sm:$0xff] }
 0x744   :  { %10889 = vmatprep.subr.bf16.mxu1 %v10888_v12  ;;  %v3733_v59 = vld [vmem:[%s22345_s4 + $0x1af8] sm:$0xff]  ;;  %v3748_v12 = vld [vmem:[%s22345_s4 + $0x1b70] sm:$0xff]  ;;  %v10906_v51 = vpack.c.bf16 %v3721_v53, %v3708_v32  ;;  %v10630_v32 = vpack.c.bf16 %v3823_v44, %v3810_v19  ;;  %v3954_v19 = vld [vmem:[%s22345_s4 + $0x21e0] sm:$0xff] }
 0x745   :  { %v10616_v61 = vpack.c.bf16 %v3746_v15, %v3733_v59  ;;  %v10908_v18 = vpack.c.bf16 %v3748_v12, %v3735_v10  ;;  %v3836_v15 = vld [vmem:[%s22345_s4 + $0x1e30] sm:$0xff]  ;;  %v3838_v10 = vld [vmem:[%s22345_s4 + $0x1e40] sm:$0xff]  ;;  %v3943_v44 = vld [vmem:[%s22345_s4 + $0x2188] sm:$0xff] }
 0x746   :  { %10599 = vmatpush1.bf16.msra.mxu0 %v10598_v37  ;;  %v3747_v37 = vld [vmem:[%s22345_s4 + $0x1b68] sm:$0xff] }
 0x747   :  { %10891 = vmatpush1.bf16.msra.mxu1 %v10890_v2  ;;  %10601 = vmatprep.subr.bf16.mxu0 %v10600_v60  ;;  %v3759_v2 = vld [vmem:[%s22345_s4 + $0x1bc8] sm:$0xff]  ;;  %v3772_v60 = vld [vmem:[%s22345_s4 + $0x1c30] sm:$0xff]  ;;  %v10910_v38 = vpack.c.bf16 %v3747_v37, %v3734_v29  ;;  %v3865_v29 = vld [vmem:[%s22345_s4 + $0x1f18] sm:$0xff] }
 0x748   :  { %10893 = vmatprep.subr.bf16.mxu1 %v10892_v56  ;;  %v10618_v56 = vpack.c.bf16 %v3745_v6, %v3732_v3  ;;  %v10620_v28 = vpack.c.bf16 %v3772_v60, %v3759_v2  ;;  %v3863_v3 = vld [vmem:[%s22345_s4 + $0x1f08] sm:$0xff]  ;;  %v3876_v6 = vld [vmem:[%s22345_s4 + $0x1f70] sm:$0xff] }
 0x749   :  { %v10636_v60 = vpack.c.bf16 %v3876_v6, %v3863_v3  ;;  %v3966_v6 = vld [vmem:[%s22345_s4 + $0x2240] sm:$0xff] }
 0x74a   :  { %10603 = vmatpush1.bf16.msra.mxu0 %v10602_v46  ;;  %v10912_v46 = vpack.c.bf16 %v3774_v40, %v3761_v25  ;;  %v3875_v25 = vld [vmem:[%s22345_s4 + $0x1f68] sm:$0xff]  ;;  %v3864_v40 = vld [vmem:[%s22345_s4 + $0x1f10] sm:$0xff] }
 0x74b   :  { %10895 = vmatpush1.bf16.msra.mxu1 %v10894_v33  ;;  %10605 = vmatprep.subr.bf16.mxu0 %v10604_v42  ;;  %v3773_v33 = vld [vmem:[%s22345_s4 + $0x1c38] sm:$0xff] }
 0x74c   :  { %10897 = vmatprep.subr.bf16.mxu1 %v10896_v7  ;;  %v3785_v42 = vld [vmem:[%s22345_s4 + $0x1c98] sm:$0xff]  ;;  %v10622_v7 = vpack.c.bf16 %v3771_v34, %v3758_v8  ;;  %v10914_v0 = vpack.c.bf16 %v3773_v33, %v3760_v1  ;;  %v3902_v8 = vld [vmem:[%s22345_s4 + $0x2040] sm:$0xff]  ;;  %v3891_v34 = vld [vmem:[%s22345_s4 + $0x1fe8] sm:$0xff] }
 0x74d   :  { %v10624_v31 = vpack.c.bf16 %v3798_v47, %v3785_v42  ;;  %v3904_v1 = vld [vmem:[%s22345_s4 + $0x2050] sm:$0xff] }
 0x74e   :  { %10607 = vmatpush1.bf16.msra.mxu0 %v10606_v54  ;;  %v10916_v54 = vpack.c.bf16 %v3800_v21, %v3787_v43  ;;  %v3888_v47 = vld [vmem:[%s22345_s4 + $0x1fd0] sm:$0xff]  ;;  %v3901_v43 = vld [vmem:[%s22345_s4 + $0x2038] sm:$0xff]  ;;  %v3890_v21 = vld [vmem:[%s22345_s4 + $0x1fe0] sm:$0xff] }
 0x74f   :  { %10899 = vmatpush1.bf16.msra.mxu1 %v10898_v55  ;;  %10609 = vmatprep.subr.bf16.mxu0 %v10608_v49  ;;  %v3799_v55 = vld [vmem:[%s22345_s4 + $0x1d08] sm:$0xff] }
 0x750   :  { %10901 = vmatprep.subr.bf16.mxu1 %v10900_v16  ;;  %v3811_v49 = vld [vmem:[%s22345_s4 + $0x1d68] sm:$0xff]  ;;  %v10626_v16 = vpack.c.bf16 %v3797_v23, %v3784_v14  ;;  %v10918_v41 = vpack.c.bf16 %v3799_v55, %v3786_v5  ;;  %v3928_v14 = vld [vmem:[%s22345_s4 + $0x2110] sm:$0xff]  ;;  %v3917_v23 = vld [vmem:[%s22345_s4 + $0x20b8] sm:$0xff] }
 0x751   :  { %v10628_v17 = vpack.c.bf16 %v3824_v11, %v3811_v49  ;;  %v3930_v5 = vld [vmem:[%s22345_s4 + $0x2120] sm:$0xff] }
 0x752   :  { %10611 = vmatpush1.bf16.msra.mxu0 %v10610_v45  ;;  %v10920_v45 = vpack.c.bf16 %v3826_v36, %v3813_v24  ;;  %v3914_v11 = vld [vmem:[%s22345_s4 + $0x20a0] sm:$0xff]  ;;  %v3927_v24 = vld [vmem:[%s22345_s4 + $0x2108] sm:$0xff]  ;;  %v3916_v36 = vld [vmem:[%s22345_s4 + $0x20b0] sm:$0xff] }
 0x753   :  { %10903 = vmatpush1.bf16.msra.mxu1 %v10902_v52  ;;  %10613 = vmatprep.subr.bf16.mxu0 %v10612_v39  ;;  %v3825_v52 = vld [vmem:[%s22345_s4 + $0x1dd8] sm:$0xff] }
 0x754   :  { %10905 = vmatprep.subr.bf16.mxu1 %v10904_v4  ;;  %v3837_v39 = vld [vmem:[%s22345_s4 + $0x1e38] sm:$0xff]  ;;  %v3852_v4 = vld [vmem:[%s22345_s4 + $0x1eb0] sm:$0xff]  ;;  %v10922_v53 = vpack.c.bf16 %v3825_v52, %v3812_v27 }
 0x755   :  { %5699 = vmatmul.mubr.f32.vlgmr.msra.gmra.mrb[8].mxu0 %v15464_v9  ;;  %v10632_v59 = vpack.c.bf16 %v3850_v57, %v3837_v39  ;;  %v10924_v12 = vpack.c.bf16 %v3852_v4, %v3839_v48  ;;  %v3956_v27 = vld [vmem:[%s22345_s4 + $0x21f0] sm:$0xff]  ;;  %v3953_v48 = vld [vmem:[%s22345_s4 + $0x21d8] sm:$0xff]  ;;  %v3942_v4 = vld [vmem:[%s22345_s4 + $0x2180] sm:$0xff] }
 0x756   :  { %6054 = vmatmul.mubr.f32.vlgmr.msra.gmra.mrb[8].mxu1 %v15464_v9  ;;  %10615 = vmatpush1.bf16.msra.mxu0 %v10614_v50  ;;  %v3849_v50 = vld [vmem:[%s22345_s4 + $0x1e98] sm:$0xff]  ;;  %v3940_v57 = vld [vmem:[%s22345_s4 + $0x2170] sm:$0xff] }
 0x757   :  { %5769 = vmatprep.mubr.f32.mxu0 %v16375_v62  ;;  %10907 = vmatpush1.bf16.msra.mxu1 %v10906_v51  ;;  %v3851_v51 = vld [vmem:[%s22345_s4 + $0x1ea8] sm:$0xff]  ;;  %v10634_v37 = vpack.c.bf16 %v3849_v50, %v3836_v15  ;;  %v3980_v15 = vld [vmem:[%s22345_s4 + $0x22b0] sm:$0xff]  ;;  %v3969_v50 = vld [vmem:[%s22345_s4 + $0x2258] sm:$0xff] }
 0x758   :  { %6124 = vmatprep.mubr.f32.mxu1 %v16375_v62  ;;  %10617 = vmatprep.subr.bf16.mxu0 %v10616_v61  ;;  %v3878_v61 = vld [vmem:[%s22345_s4 + $0x1f80] sm:$0xff]  ;;  %v10926_v2 = vpack.c.bf16 %v3851_v51, %v3838_v10 }
 0x759   :  { %10909 = vmatprep.subr.bf16.mxu1 %v10908_v18  ;;  %v3862_v18 = vld [vmem:[%s22345_s4 + $0x1f00] sm:$0xff] }
 0x75a   :  { %10619 = vmatpush1.bf16.msra.mxu0 %v10618_v56  ;;  %v10928_v56 = vpack.c.bf16 %v3878_v61, %v3865_v29  ;;  %v3982_v10 = vld [vmem:[%s22345_s4 + $0x22c0] sm:$0xff]  ;;  %v3979_v29 = vld [vmem:[%s22345_s4 + $0x22a8] sm:$0xff]  ;;  %v3968_v61 = vld [vmem:[%s22345_s4 + $0x2250] sm:$0xff] }
 0x75b   :  { %10911 = vmatpush1.bf16.msra.mxu1 %v10910_v38  ;;  %10621 = vmatprep.subr.bf16.mxu0 %v10620_v28  ;;  %v3877_v38 = vld [vmem:[%s22345_s4 + $0x1f78] sm:$0xff] }
 0x75c   :  { %10913 = vmatprep.subr.bf16.mxu1 %v10912_v46  ;;  %v3889_v28 = vld [vmem:[%s22345_s4 + $0x1fd8] sm:$0xff]  ;;  %v10638_v46 = vpack.c.bf16 %v3875_v25, %v3862_v18  ;;  %v10930_v33 = vpack.c.bf16 %v3877_v38, %v3864_v40  ;;  %v4006_v18 = vld [vmem:[%s22345_s4 + $0x2380] sm:$0xff]  ;;  %v3995_v25 = vld [vmem:[%s22345_s4 + $0x2328] sm:$0xff] }
 0x75d   :  { %v10640_v42 = vpack.c.bf16 %v3902_v8, %v3889_v28  ;;  %v4008_v40 = vld [vmem:[%s22345_s4 + $0x2390] sm:$0xff] }
 0x75e   :  { %10623 = vmatpush1.bf16.msra.mxu0 %v10622_v7  ;;  %v10932_v7 = vpack.c.bf16 %v3904_v1, %v3891_v34  ;;  %v3992_v8 = vld [vmem:[%s22345_s4 + $0x2310] sm:$0xff]  ;;  %v4005_v34 = vld [vmem:[%s22345_s4 + $0x2378] sm:$0xff]  ;;  %v3994_v1 = vld [vmem:[%s22345_s4 + $0x2320] sm:$0xff] }
 0x75f   :  { %10915 = vmatpush1.bf16.msra.mxu1 %v10914_v0  ;;  %10625 = vmatprep.subr.bf16.mxu0 %v10624_v31  ;;  %v3903_v0 = vld [vmem:[%s22345_s4 + $0x2048] sm:$0xff] }
 0x760   :  { %10917 = vmatprep.subr.bf16.mxu1 %v10916_v54  ;;  %v3915_v31 = vld [vmem:[%s22345_s4 + $0x20a8] sm:$0xff]  ;;  %v10642_v54 = vpack.c.bf16 %v3901_v43, %v3888_v47  ;;  %v10934_v55 = vpack.c.bf16 %v3903_v0, %v3890_v21  ;;  %v4032_v47 = vld [vmem:[%s22345_s4 + $0x2450] sm:$0xff]  ;;  %v4021_v43 = vld [vmem:[%s22345_s4 + $0x23f8] sm:$0xff] }
 0x761   :  { %v10644_v49 = vpack.c.bf16 %v3928_v14, %v3915_v31  ;;  %v4034_v21 = vld [vmem:[%s22345_s4 + $0x2460] sm:$0xff] }
 0x762   :  { %10627 = vmatpush1.bf16.msra.mxu0 %v10626_v16  ;;  %v10936_v16 = vpack.c.bf16 %v3930_v5, %v3917_v23  ;;  %v4018_v14 = vld [vmem:[%s22345_s4 + $0x23e0] sm:$0xff]  ;;  %v4031_v23 = vld [vmem:[%s22345_s4 + $0x2448] sm:$0xff]  ;;  %v4020_v5 = vld [vmem:[%s22345_s4 + $0x23f0] sm:$0xff] }
 0x763   :  { %10919 = vmatpush1.bf16.msra.mxu1 %v10918_v41  ;;  %10629 = vmatprep.subr.bf16.mxu0 %v10628_v17  ;;  %v3929_v41 = vld [vmem:[%s22345_s4 + $0x2118] sm:$0xff] }
 0x764   :  { %10921 = vmatprep.subr.bf16.mxu1 %v10920_v45  ;;  %v3941_v17 = vld [vmem:[%s22345_s4 + $0x2178] sm:$0xff]  ;;  %v10646_v45 = vpack.c.bf16 %v3927_v24, %v3914_v11  ;;  %v10938_v52 = vpack.c.bf16 %v3929_v41, %v3916_v36  ;;  %v4058_v11 = vld [vmem:[%s22345_s4 + $0x2520] sm:$0xff]  ;;  %v4047_v24 = vld [vmem:[%s22345_s4 + $0x24c8] sm:$0xff] }
 0x765   :  { %v10648_v39 = vpack.c.bf16 %v3954_v19, %v3941_v17  ;;  %v4060_v36 = vld [vmem:[%s22345_s4 + $0x2530] sm:$0xff] }
 0x766   :  { %10631 = vmatpush1.bf16.msra.mxu0 %v10630_v32  ;;  %v10940_v32 = vpack.c.bf16 %v3956_v27, %v3943_v44  ;;  %v4044_v19 = vld [vmem:[%s22345_s4 + $0x24b0] sm:$0xff]  ;;  %v4057_v44 = vld [vmem:[%s22345_s4 + $0x2518] sm:$0xff]  ;;  %v4046_v27 = vld [vmem:[%s22345_s4 + $0x24c0] sm:$0xff] }
 0x767   :  { %10923 = vmatpush1.bf16.msra.mxu1 %v10922_v53  ;;  %10633 = vmatprep.subr.bf16.mxu0 %v10632_v59  ;;  %v3955_v53 = vld [vmem:[%s22345_s4 + $0x21e8] sm:$0xff] }
 0x768   :  { %10925 = vmatprep.subr.bf16.mxu1 %v10924_v12  ;;  %v3967_v59 = vld [vmem:[%s22345_s4 + $0x2248] sm:$0xff]  ;;  %v10650_v12 = vpack.c.bf16 %v3953_v48, %v3940_v57  ;;  %v10942_v51 = vpack.c.bf16 %v3955_v53, %v3942_v4  ;;  %v4084_v57 = vld [vmem:[%s22345_s4 + $0x25f0] sm:$0xff]  ;;  %v4073_v48 = vld [vmem:[%s22345_s4 + $0x2598] sm:$0xff] }
 0x769   :  { %v10652_v3 = vpack.c.bf16 %v3980_v15, %v3967_v59  ;;  %v4086_v4 = vld [vmem:[%s22345_s4 + $0x2600] sm:$0xff] }
 0x76a   :  { %10635 = vmatpush1.bf16.msra.mxu0 %v10634_v37  ;;  %v10944_v37 = vpack.c.bf16 %v3982_v10, %v3969_v50  ;;  %v4070_v15 = vld [vmem:[%s22345_s4 + $0x2580] sm:$0xff]  ;;  %v4083_v50 = vld [vmem:[%s22345_s4 + $0x25e8] sm:$0xff]  ;;  %v4072_v10 = vld [vmem:[%s22345_s4 + $0x2590] sm:$0xff] }
 0x76b   :  { %10927 = vmatpush1.bf16.msra.mxu1 %v10926_v2  ;;  %10637 = vmatprep.subr.bf16.mxu0 %v10636_v60  ;;  %v3981_v2 = vld [vmem:[%s22345_s4 + $0x22b8] sm:$0xff] }
 0x76c   :  { %10929 = vmatprep.subr.bf16.mxu1 %v10928_v56  ;;  %v3993_v60 = vld [vmem:[%s22345_s4 + $0x2318] sm:$0xff]  ;;  %v10654_v56 = vpack.c.bf16 %v3979_v29, %v3966_v6  ;;  %v10946_v38 = vpack.c.bf16 %v3981_v2, %v3968_v61  ;;  %v4110_v6 = vld [vmem:[%s22345_s4 + $0x26c0] sm:$0xff]  ;;  %v4099_v29 = vld [vmem:[%s22345_s4 + $0x2668] sm:$0xff] }
 0x76d   :  { %v10656_v28 = vpack.c.bf16 %v4006_v18, %v3993_v60  ;;  %v4112_v61 = vld [vmem:[%s22345_s4 + $0x26d0] sm:$0xff] }
 0x76e   :  { %10639 = vmatpush1.bf16.msra.mxu0 %v10638_v46  ;;  %v10948_v46 = vpack.c.bf16 %v4008_v40, %v3995_v25  ;;  %v4096_v18 = vld [vmem:[%s22345_s4 + $0x2650] sm:$0xff]  ;;  %v4109_v25 = vld [vmem:[%s22345_s4 + $0x26b8] sm:$0xff]  ;;  %v4098_v40 = vld [vmem:[%s22345_s4 + $0x2660] sm:$0xff] }
 0x76f   :  { %10931 = vmatpush1.bf16.msra.mxu1 %v10930_v33  ;;  %10641 = vmatprep.subr.bf16.mxu0 %v10640_v42  ;;  %v4007_v33 = vld [vmem:[%s22345_s4 + $0x2388] sm:$0xff] }
 0x770   :  { %10933 = vmatprep.subr.bf16.mxu1 %v10932_v7  ;;  %v4019_v42 = vld [vmem:[%s22345_s4 + $0x23e8] sm:$0xff]  ;;  %v10658_v7 = vpack.c.bf16 %v4005_v34, %v3992_v8  ;;  %v10950_v0 = vpack.c.bf16 %v4007_v33, %v3994_v1  ;;  %v4136_v8 = vld [vmem:[%s22345_s4 + $0x2790] sm:$0xff]  ;;  %v4125_v34 = vld [vmem:[%s22345_s4 + $0x2738] sm:$0xff] }
 0x771   :  { %v10660_v31 = vpack.c.bf16 %v4032_v47, %v4019_v42  ;;  %v4138_v1 = vld [vmem:[%s22345_s4 + $0x27a0] sm:$0xff] }
 0x772   :  { %10643 = vmatpush1.bf16.msra.mxu0 %v10642_v54  ;;  %v10952_v54 = vpack.c.bf16 %v4034_v21, %v4021_v43  ;;  %v4122_v47 = vld [vmem:[%s22345_s4 + $0x2720] sm:$0xff]  ;;  %v4135_v43 = vld [vmem:[%s22345_s4 + $0x2788] sm:$0xff]  ;;  %v10968_v21 = vpack.c.bf16 %v4138_v1, %v4125_v34 }
 0x773   :  { %10935 = vmatpush1.bf16.msra.mxu1 %v10934_v55  ;;  %10645 = vmatprep.subr.bf16.mxu0 %v10644_v49  ;;  %v4033_v55 = vld [vmem:[%s22345_s4 + $0x2458] sm:$0xff]  ;;  %v4226_v1 = vld [vmem:[%s22345_s4 + $0x2a60] sm:$0xff] }
 0x774   :  { %10937 = vmatprep.subr.bf16.mxu1 %v10936_v16  ;;  %v4045_v49 = vld [vmem:[%s22345_s4 + $0x24b8] sm:$0xff]  ;;  %v10662_v16 = vpack.c.bf16 %v4031_v23, %v4018_v14  ;;  %v10954_v41 = vpack.c.bf16 %v4033_v55, %v4020_v5  ;;  %v4162_v14 = vld [vmem:[%s22345_s4 + $0x2860] sm:$0xff]  ;;  %v10678_v23 = vpack.c.bf16 %v4135_v43, %v4122_v47  ;;  %v4151_v5 = vld [vmem:[%s22345_s4 + $0x2808] sm:$0xff] }
 0x775   :  { %v10664_v17 = vpack.c.bf16 %v4058_v11, %v4045_v49  ;;  %v4148_v49 = vld [vmem:[%s22345_s4 + $0x27f0] sm:$0xff]  ;;  %v4161_v11 = vld [vmem:[%s22345_s4 + $0x2858] sm:$0xff] }
 0x776   :  { %10647 = vmatpush1.bf16.msra.mxu0 %v10646_v45  ;;  %v10956_v45 = vpack.c.bf16 %v4060_v36, %v4047_v24  ;;  %v4150_v24 = vld [vmem:[%s22345_s4 + $0x2800] sm:$0xff]  ;;  %v4241_v47 = vld [vmem:[%s22345_s4 + $0x2ad8] sm:$0xff] }
 0x777   :  { %10939 = vmatpush1.bf16.msra.mxu1 %v10938_v52  ;;  %10649 = vmatprep.subr.bf16.mxu0 %v10648_v39  ;;  %v4059_v52 = vld [vmem:[%s22345_s4 + $0x2528] sm:$0xff] }
 0x778   :  { %10941 = vmatprep.subr.bf16.mxu1 %v10940_v32  ;;  %v4071_v39 = vld [vmem:[%s22345_s4 + $0x2588] sm:$0xff]  ;;  %v10666_v32 = vpack.c.bf16 %v4057_v44, %v4044_v19  ;;  %v10958_v53 = vpack.c.bf16 %v4059_v52, %v4046_v27  ;;  %v4177_v44 = vld [vmem:[%s22345_s4 + $0x28d8] sm:$0xff]  ;;  %v4190_v27 = vld [vmem:[%s22345_s4 + $0x2940] sm:$0xff] }
 0x779   :  { %v10668_v59 = vpack.c.bf16 %v4084_v57, %v4071_v39  ;;  %v4174_v57 = vld [vmem:[%s22345_s4 + $0x28c0] sm:$0xff] }
 0x77a   :  { %10651 = vmatpush1.bf16.msra.mxu0 %v10650_v12  ;;  %v10960_v12 = vpack.c.bf16 %v4086_v4, %v4073_v48  ;;  %v4187_v48 = vld [vmem:[%s22345_s4 + $0x2928] sm:$0xff]  ;;  %v4176_v4 = vld [vmem:[%s22345_s4 + $0x28d0] sm:$0xff] }
 0x77b   :  { %10943 = vmatpush1.bf16.msra.mxu1 %v10942_v51  ;;  %10653 = vmatprep.subr.bf16.mxu0 %v10652_v3  ;;  %v4085_v51 = vld [vmem:[%s22345_s4 + $0x25f8] sm:$0xff] }
 0x77c   :  { %10945 = vmatprep.subr.bf16.mxu1 %v10944_v37  ;;  %v4097_v3 = vld [vmem:[%s22345_s4 + $0x2658] sm:$0xff]  ;;  %v10670_v37 = vpack.c.bf16 %v4083_v50, %v4070_v15  ;;  %v10962_v2 = vpack.c.bf16 %v4085_v51, %v4072_v10  ;;  %v4214_v15 = vld [vmem:[%s22345_s4 + $0x2a00] sm:$0xff]  ;;  %v4785_v50 = vlaneseq  ;;  %v4203_v10 = vld [vmem:[%s22345_s4 + $0x29a8] sm:$0xff]  ;;  %v10686_v51 = vpack.c.bf16 %v4187_v48, %v4174_v57 }
 0x77d   :  { %v10672_v60 = vpack.c.bf16 %v4110_v6, %v4097_v3 }
 0x77e   :  { %10655 = vmatpush1.bf16.msra.mxu0 %v10654_v56  ;;  %v10964_v56 = vpack.c.bf16 %v4112_v61, %v4099_v29  ;;  %v4200_v29 = vld [vmem:[%s22345_s4 + $0x2990] sm:$0xff]  ;;  %v4213_v61 = vld [vmem:[%s22345_s4 + $0x29f8] sm:$0xff] }
 0x77f   :  { %10947 = vmatpush1.bf16.msra.mxu1 %v10946_v38  ;;  %10657 = vmatprep.subr.bf16.mxu0 %v10656_v28  ;;  %v4111_v38 = vld [vmem:[%s22345_s4 + $0x26c8] sm:$0xff] }
 0x780   :  { %10949 = vmatprep.subr.bf16.mxu1 %v10948_v46  ;;  %v4123_v28 = vld [vmem:[%s22345_s4 + $0x2728] sm:$0xff]  ;;  %v10674_v46 = vpack.c.bf16 %v4109_v25, %v4096_v18  ;;  %v10966_v33 = vpack.c.bf16 %v4111_v38, %v4098_v40  ;;  %v4240_v25 = vld [vmem:[%s22345_s4 + $0x2ad0] sm:$0xff]  ;;  %v18638_v40 = vshrl.u32 %v4785_v50, 7  ;;  %v4242_v38 = vld [vmem:[%s22345_s4 + $0x2ae0] sm:$0xff] }
 0x781   :  { %v10676_v42 = vpack.c.bf16 %v4136_v8, %v4123_v28  ;;  %v4227_v18 = vld [vmem:[%s22345_s4 + $0x2a68] sm:$0xff]  ;;  %v10690_v28 = vpack.c.bf16 %v4213_v61, %v4200_v29  ;;  %v4318_v61 = vld [vmem:[%s22345_s4 + $0x2d40] sm:$0xff] }
 0x782   :  { %10659 = vmatpush1.bf16.msra.mxu0 %v10658_v7  ;;  %v4124_v7 = vld [vmem:[%s22345_s4 + $0x2730] sm:$0xff]  ;;  %v10692_v34 = vpack.c.bf16 %v4240_v25, %v4227_v18  ;;  %v4795_v43 = vsub.s32 2, %v18638_v40 }
 0x783   :  { %10951 = vmatpush1.bf16.msra.mxu1 %v10950_v0  ;;  %10661 = vmatprep.subr.bf16.mxu0 %v10660_v31  ;;  %v4137_v0 = vld [vmem:[%s22345_s4 + $0x2798] sm:$0xff] }
 0x784   :  { %10953 = vmatprep.subr.bf16.mxu1 %v10952_v54  ;;  %v4149_v31 = vld [vmem:[%s22345_s4 + $0x27f8] sm:$0xff]  ;;  %v4164_v54 = vld [vmem:[%s22345_s4 + $0x2870] sm:$0xff]  ;;  %v10970_v55 = vpack.c.bf16 %v4137_v0, %v4124_v7  ;;  %v4266_v7 = vld [vmem:[%s22345_s4 + $0x2ba0] sm:$0xff] }
 0x785   :  { %v10680_v36 = vpack.c.bf16 %v4162_v14, %v4149_v31  ;;  %v10972_v19 = vpack.c.bf16 %v4164_v54, %v4151_v5  ;;  %v4781_v0 = vld [vmem:[%s22346_s5] sm:$0xff]  ;;  %v4799_v31 = vsub.s32 3, %v18638_v40  ;;  %v4255_v14 = vld [vmem:[%s22345_s4 + $0x2b48] sm:$0xff] }
 0x786   :  { %10663 = vmatpush1.bf16.msra.mxu0 %v10662_v16  ;;  %v4163_v16 = vld [vmem:[%s22345_s4 + $0x2868] sm:$0xff] }
 0x787   :  { %10955 = vmatpush1.bf16.msra.mxu1 %v10954_v41  ;;  %10665 = vmatprep.subr.bf16.mxu0 %v10664_v17  ;;  %v4175_v41 = vld [vmem:[%s22345_s4 + $0x28c8] sm:$0xff]  ;;  %v4188_v17 = vld [vmem:[%s22345_s4 + $0x2930] sm:$0xff]  ;;  %v10974_v52 = vpack.c.bf16 %v4163_v16, %v4150_v24  ;;  %v4254_v24 = vld [vmem:[%s22345_s4 + $0x2b40] sm:$0xff] }
 0x788   :  { %10957 = vmatprep.subr.bf16.mxu1 %v10956_v45  ;;  %v10682_v45 = vpack.c.bf16 %v4161_v11, %v4148_v49  ;;  %v10684_v39 = vpack.c.bf16 %v4188_v17, %v4175_v41  ;;  %v4252_v49 = vld [vmem:[%s22345_s4 + $0x2b30] sm:$0xff]  ;;  %v4265_v11 = vld [vmem:[%s22345_s4 + $0x2b98] sm:$0xff]  ;;  %v4267_v41 = vld [vmem:[%s22345_s4 + $0x2ba8] sm:$0xff] }
 0x789   :  { %v4279_v17 = vld [vmem:[%s22345_s4 + $0x2c08] sm:$0xff]  ;;  %v10990_v48 = vpack.c.bf16 %v4267_v41, %v4254_v24  ;;  %v4357_v24 = vld [vmem:[%s22345_s4 + $0x2e78] sm:$0xff]  ;;  %v4372_v41 = vld [vmem:[%s22345_s4 + $0x2ef0] sm:$0xff] }
 0x78a   :  { %10667 = vmatpush1.bf16.msra.mxu0 %v10666_v32  ;;  %v10976_v32 = vpack.c.bf16 %v4190_v27, %v4177_v44  ;;  %v4800_v44 = vrot.slane %v4781_v0, %v4799_v31  ;;  %v4281_v27 = vld [vmem:[%s22345_s4 + $0x2c18] sm:$0xff] }
 0x78b   :  { %10959 = vmatpush1.bf16.msra.mxu1 %v10958_v53  ;;  %10669 = vmatprep.subr.bf16.mxu0 %v10668_v59  ;;  %v4189_v53 = vld [vmem:[%s22345_s4 + $0x2938] sm:$0xff] }
 0x78c   :  { %10961 = vmatprep.subr.bf16.mxu1 %v10960_v12  ;;  %v4201_v59 = vld [vmem:[%s22345_s4 + $0x2998] sm:$0xff]  ;;  %v4216_v12 = vld [vmem:[%s22345_s4 + $0x2a10] sm:$0xff]  ;;  %v10978_v3 = vpack.c.bf16 %v4189_v53, %v4176_v4  ;;  %v4291_v53 = vld [vmem:[%s22345_s4 + $0x2c68] sm:$0xff] }
 0x78d   :  { %v10688_v6 = vpack.c.bf16 %v4214_v15, %v4201_v59 }
 0x78e   :  { %10671 = vmatpush1.bf16.msra.mxu0 %v10670_v37  ;;  %v4202_v37 = vld [vmem:[%s22345_s4 + $0x29a0] sm:$0xff] }
 0x78f   :  { %10963 = vmatpush1.bf16.msra.mxu1 %v10962_v2  ;;  %10673 = vmatprep.subr.bf16.mxu0 %v10672_v60  ;;  %v10980_v2 = vpack.c.bf16 %v4216_v12, %v4203_v10  ;;  %v4215_v60 = vld [vmem:[%s22345_s4 + $0x2a08] sm:$0xff] }
 0x790   :  { %10965 = vmatprep.subr.bf16.mxu1 %v10964_v56  ;;  %v4229_v56 = vld [vmem:[%s22345_s4 + $0x2a78] sm:$0xff]  ;;  %v10982_v8 = vpack.c.bf16 %v4215_v60, %v4202_v37  ;;  %v4307_v37 = vld [vmem:[%s22345_s4 + $0x2ce8] sm:$0xff] }
 0x792   :  { %10675 = vmatpush1.bf16.msra.mxu0 %v10674_v46  ;;  %v4239_v46 = vld [vmem:[%s22345_s4 + $0x2ac8] sm:$0xff] }
 0x793   :  { %10967 = vmatpush1.bf16.msra.mxu1 %v10966_v33  ;;  %10677 = vmatprep.subr.bf16.mxu0 %v10676_v42  ;;  %v4228_v33 = vld [vmem:[%s22345_s4 + $0x2a70] sm:$0xff]  ;;  %v10984_v42 = vpack.c.bf16 %v4242_v38, %v4229_v56  ;;  %v10694_v5 = vpack.c.bf16 %v4239_v46, %v4226_v1  ;;  %v4319_v46 = vld [vmem:[%s22345_s4 + $0x2d48] sm:$0xff] }
 0x794   :  { %10969 = vmatprep.subr.bf16.mxu1 %v10968_v21  ;;  %v4253_v21 = vld [vmem:[%s22345_s4 + $0x2b38] sm:$0xff]  ;;  %v10986_v54 = vpack.c.bf16 %v4241_v47, %v4228_v33  ;;  %v4304_v38 = vld [vmem:[%s22345_s4 + $0x2cd0] sm:$0xff]  ;;  %v4331_v33 = vld [vmem:[%s22345_s4 + $0x2da8] sm:$0xff] }
 0x795   :  { %5770 = vmatmul.mubr.f32.vlgmr.msra.gmra.mrb[8].mxu0 %v15490_v20 }
 0x796   :  { %6125 = vmatmul.mubr.f32.vlgmr.msra.gmra.mrb[8].mxu1 %v15490_v20  ;;  %10679 = vmatpush1.bf16.msra.mxu0 %v10678_v23  ;;  %v4268_v23 = vld [vmem:[%s22345_s4 + $0x2bb0] sm:$0xff] }
 0x797   :  { %5840 = vmatprep.mubr.f32.mxu0 %v17159_v63  ;;  %10971 = vmatpush1.bf16.msra.mxu1 %v10970_v55  ;;  %v10696_v55 = vpack.c.bf16 %v4266_v7, %v4253_v21  ;;  %v10988_v16 = vpack.c.bf16 %v4268_v23, %v4255_v14  ;;  %v4333_v21 = vld [vmem:[%s22345_s4 + $0x2db8] sm:$0xff]  ;;  %v4346_v7 = vld [vmem:[%s22345_s4 + $0x2e20] sm:$0xff] }
 0x798   :  { %6195 = vmatprep.mubr.f32.mxu1 %v17159_v63  ;;  %10681 = vmatprep.subr.bf16.mxu0 %v10680_v36  ;;  %v4796_v36 = vrot.slane %v4781_v0, %v4795_v43 }
 0x799   :  { %10973 = vmatprep.subr.bf16.mxu1 %v10972_v19  ;;  %v4292_v19 = vld [vmem:[%s22345_s4 + $0x2c70] sm:$0xff] }
 0x79a   :  { %10683 = vmatpush1.bf16.msra.mxu0 %v10682_v45  ;;  %v4294_v45 = vld [vmem:[%s22345_s4 + $0x2c80] sm:$0xff]  ;;  %v10700_v4 = vpack.c.bf16 %v4292_v19, %v4279_v17 }
 0x79b   :  { %10975 = vmatpush1.bf16.msra.mxu1 %v10974_v52  ;;  %10685 = vmatprep.subr.bf16.mxu0 %v10684_v39  ;;  %v10698_v52 = vpack.c.bf16 %v4265_v11, %v4252_v49  ;;  %v10992_v12 = vpack.c.bf16 %v4294_v45, %v4281_v27  ;;  %v11000_v49 = vpack.c.bf16 %v4346_v7, %v4333_v21  ;;  %v4345_v11 = vld [vmem:[%s22345_s4 + $0x2e18] sm:$0xff]  ;;  %v4356_v27 = vld [vmem:[%s22345_s4 + $0x2e70] sm:$0xff]  ;;  %v4423_v7 = vld [vmem:[%s22345_s4 + $0x3088] sm:$0xff] }
 0x79c   :  { %10977 = vmatprep.subr.bf16.mxu1 %v10976_v32  ;;  %v4278_v32 = vld [vmem:[%s22345_s4 + $0x2c00] sm:$0xff]  ;;  %v4369_v45 = vld [vmem:[%s22345_s4 + $0x2ed8] sm:$0xff] }
 0x79d   :  { %v10702_v18 = vpack.c.bf16 %v4291_v53, %v4278_v32  ;;  %v4396_v32 = vld [vmem:[%s22345_s4 + $0x2fb0] sm:$0xff]  ;;  %v4385_v53 = vld [vmem:[%s22345_s4 + $0x2f58] sm:$0xff] }
 0x79e   :  { %10687 = vmatpush1.bf16.msra.mxu0 %v10686_v51  ;;  %v4280_v51 = vld [vmem:[%s22345_s4 + $0x2c10] sm:$0xff] }
 0x79f   :  { %10979 = vmatpush1.bf16.msra.mxu1 %v10978_v3  ;;  %10689 = vmatprep.subr.bf16.mxu0 %v10688_v6  ;;  %v4293_v3 = vld [vmem:[%s22345_s4 + $0x2c78] sm:$0xff] }
 0x7a0   :  { %10981 = vmatprep.subr.bf16.mxu1 %v10980_v2  ;;  %v4305_v6 = vld [vmem:[%s22345_s4 + $0x2cd8] sm:$0xff]  ;;  %v4320_v2 = vld [vmem:[%s22345_s4 + $0x2d50] sm:$0xff]  ;;  %v10994_v56 = vpack.c.bf16 %v4293_v3, %v4280_v51 }
 0x7a1   :  { %v10996_v1 = vpack.c.bf16 %v4320_v2, %v4307_v37  ;;  %v4384_v37 = vld [vmem:[%s22345_s4 + $0x2f50] sm:$0xff] }
 0x7a2   :  { %10691 = vmatpush1.bf16.msra.mxu0 %v10690_v28  ;;  %v4317_v28 = vld [vmem:[%s22345_s4 + $0x2d38] sm:$0xff] }
 0x7a3   :  { %10983 = vmatpush1.bf16.msra.mxu1 %v10982_v8  ;;  %10693 = vmatprep.subr.bf16.mxu0 %v10692_v34  ;;  %v4306_v8 = vld [vmem:[%s22345_s4 + $0x2ce0] sm:$0xff]  ;;  %v10704_v34 = vpack.c.bf16 %v4318_v61, %v4305_v6  ;;  %v10706_v0 = vpack.c.bf16 %v4317_v28, %v4304_v38  ;;  %v4395_v61 = vld [vmem:[%s22345_s4 + $0x2fa8] sm:$0xff] }
 0x7a4   :  { %10985 = vmatprep.subr.bf16.mxu1 %v10984_v42  ;;  %v4344_v42 = vld [vmem:[%s22345_s4 + $0x2e10] sm:$0xff]  ;;  %v10998_v14 = vpack.c.bf16 %v4319_v46, %v4306_v8  ;;  %v4382_v6 = vld [vmem:[%s22345_s4 + $0x2f40] sm:$0xff]  ;;  %v4411_v28 = vld [vmem:[%s22345_s4 + $0x3028] sm:$0xff] }
 0x7a5   :  { %v10708_v23 = vpack.c.bf16 %v4344_v42, %v4331_v33  ;;  %v4422_v38 = vld [vmem:[%s22345_s4 + $0x3080] sm:$0xff]  ;;  %v4424_v8 = vld [vmem:[%s22345_s4 + $0x3090] sm:$0xff]  ;;  %v4421_v42 = vld [vmem:[%s22345_s4 + $0x3078] sm:$0xff] }
 0x7a6   :  { %10695 = vmatpush1.bf16.msra.mxu0 %v10694_v5  ;;  %v4330_v5 = vld [vmem:[%s22345_s4 + $0x2da0] sm:$0xff]  ;;  %v4408_v33 = vld [vmem:[%s22345_s4 + $0x3010] sm:$0xff]  ;;  %v11012_v21 = vpack.c.bf16 %v4424_v8, %v4411_v28  ;;  %v4501_v8 = vld [vmem:[%s22345_s4 + $0x32f8] sm:$0xff] }
 0x7a7   :  { %10987 = vmatpush1.bf16.msra.mxu1 %v10986_v54  ;;  %v18703_v39 = vpop.f32.mrb[6].mxu0  ;;  %v5558_v57 = vpop.f32.mrb[6].mxu1  ;;  %10697 = vmatprep.subr.bf16.mxu0 %v10696_v55  ;;  %v4343_v54 = vld [vmem:[%s22345_s4 + $0x2e08] sm:$0xff]  ;;  %v4332_v55 = vld [vmem:[%s22345_s4 + $0x2db0] sm:$0xff] }
 0x7a8   :  { %v18711_v59 = vadd.f32 %v5558_v57, %v4796_v36  ;;  %v18713_v15 = vpop.f32.mrb[7].mxu0  ;;  %v5560_v10 = vpop.f32.mrb[7].mxu1  ;;  %10989 = vmatprep.subr.bf16.mxu1 %v10988_v16  ;;  %v4370_v36 = vld [vmem:[%s22345_s4 + $0x2ee0] sm:$0xff]  ;;  %v4359_v16 = vld [vmem:[%s22345_s4 + $0x2e88] sm:$0xff]  ;;  %v10710_v17 = vpack.c.bf16 %v4343_v54, %v4330_v5  ;;  %v11002_v19 = vpack.c.bf16 %v4345_v11, %v4332_v55  ;;  %v10722_v54 = vpack.c.bf16 %v4421_v42, %v4408_v33  ;;  %v4528_v33 = vld [vmem:[%s22345_s4 + $0x33d0] sm:$0xff] }
 0x7a9   :  { %v18724_v29 = vadd.f32 %v5560_v10, %v4800_v44  ;;  %v10712_v44 = vpack.c.bf16 %v4370_v36, %v4357_v24  ;;  %v11004_v57 = vpack.c.bf16 %v4372_v41, %v4359_v16  ;;  %v4398_v10 = vld [vmem:[%s22345_s4 + $0x2fc0] sm:$0xff]  ;;  %v4447_v24 = vld [vmem:[%s22345_s4 + $0x3148] sm:$0xff]  ;;  %v4436_v36 = vld [vmem:[%s22345_s4 + $0x30f0] sm:$0xff] }
 0x7aa   :  { %v7335_v60 = vmax.f32 %v18711_v59, 0.0  ;;  %10699 = vmatpush1.bf16.msra.mxu0 %v10698_v52  ;;  %v4358_v52 = vld [vmem:[%s22345_s4 + $0x2e80] sm:$0xff]  ;;  %v11008_v2 = vpack.c.bf16 %v4398_v10, %v4385_v53  ;;  %v4449_v41 = vld [vmem:[%s22345_s4 + $0x3158] sm:$0xff]  ;;  %v4475_v10 = vld [vmem:[%s22345_s4 + $0x3228] sm:$0xff] }
 0x7ab   :  { %v7336_v25 = vmax.f32 %v18724_v29, 0.0  ;;  %10991 = vmatpush1.bf16.msra.mxu1 %v10990_v48  ;;  %10701 = vmatprep.subr.bf16.mxu0 %v10700_v4  ;;  %v4371_v48 = vld [vmem:[%s22345_s4 + $0x2ee8] sm:$0xff]  ;;  %v4450_v5 = vld [vmem:[%s22345_s4 + $0x3160] sm:$0xff] }
 0x7ac   :  { %10993 = vmatprep.subr.bf16.mxu1 %v10992_v12  ;;  %v4383_v4 = vld [vmem:[%s22345_s4 + $0x2f48] sm:$0xff]  ;;  %v10714_v12 = vpack.c.bf16 %v4369_v45, %v4356_v27  ;;  %v11006_v51 = vpack.c.bf16 %v4371_v48, %v4358_v52  ;;  %v4434_v11 = vld [vmem:[%s22345_s4 + $0x30e0] sm:$0xff]  ;;  %v4476_v27 = vld [vmem:[%s22345_s4 + $0x3230] sm:$0xff]  ;;  %v11018_v52 = vpack.c.bf16 %v4449_v41, %v4436_v36 }
 0x7ad   :  { %v12288_v47 = vpack.i.bf16 %v7336_v25, %v7335_v60  ;;  %v10716_v3 = vpack.c.bf16 %v4396_v32, %v4383_v4  ;;  %v10726_v45 = vpack.c.bf16 %v4447_v24, %v4434_v11  ;;  %v4460_v48 = vld [vmem:[%s22345_s4 + $0x31b0] sm:$0xff]  ;;  %v4473_v4 = vld [vmem:[%s22345_s4 + $0x3218] sm:$0xff]  ;;  %v4462_v32 = vld [vmem:[%s22345_s4 + $0x31c0] sm:$0xff] }
 0x7ae   :  { %10703 = vmatpush1.bf16.msra.mxu0 %v10702_v18  ;;  %v4397_v18 = vld [vmem:[%s22345_s4 + $0x2fb8] sm:$0xff]  ;;  %v4554_v11 = vld [vmem:[%s22345_s4 + $0x34a0] sm:$0xff] }
 0x7af   :  { %10995 = vmatpush1.bf16.msra.mxu1 %v10994_v56  ;;  %12289 = vrot.lane.b32.xlu0 %v12288_v47, %s12406_s21  ;;  %v4409_v56 = vld [vmem:[%s22345_s4 + $0x3018] sm:$0xff]  ;;  %v4410_v47 = vld [vmem:[%s22345_s4 + $0x3020] sm:$0xff] }
 0x7b0   :  { %10705 = vmatprep.subr.bf16.mxu0 %v10704_v34  ;;  %10997 = vmatprep.subr.bf16.mxu1 %v10996_v1  ;;  %v10718_v34 = vpack.c.bf16 %v4395_v61, %v4382_v6  ;;  %v11010_v1 = vpack.c.bf16 %v4397_v18, %v4384_v37  ;;  %v10720_v46 = vpack.c.bf16 %v4422_v38, %v4409_v56  ;;  %v4502_v6 = vld [vmem:[%s22345_s4 + $0x3300] sm:$0xff]  ;;  %v4499_v56 = vld [vmem:[%s22345_s4 + $0x32e8] sm:$0xff]  ;;  %v4488_v38 = vld [vmem:[%s22345_s4 + $0x3290] sm:$0xff] }
 0x7b1   :  { %v11014_v55 = vpack.c.bf16 %v4423_v7, %v4410_v47  ;;  %v10730_v61 = vpack.c.bf16 %v4473_v4, %v4460_v48  ;;  %v11022_v37 = vpack.c.bf16 %v4475_v10, %v4462_v32  ;;  %v4486_v18 = vld [vmem:[%s22345_s4 + $0x3280] sm:$0xff]  ;;  %v11026_v47 = vpack.c.bf16 %v4501_v8, %v4488_v38  ;;  %v4512_v7 = vld [vmem:[%s22345_s4 + $0x3350] sm:$0xff]  ;;  %v4567_v48 = vld [vmem:[%s22345_s4 + $0x3508] sm:$0xff] }
 0x7b2   :  { %10707 = vmatpush1.bf16.msra.mxu0 %v10706_v0  ;;  %v4435_v0 = vld [vmem:[%s22345_s4 + $0x30e8] sm:$0xff]  ;;  %v10734_v42 = vpack.c.bf16 %v4499_v56, %v4486_v18  ;;  %v4538_v41 = vld [vmem:[%s22345_s4 + $0x3420] sm:$0xff]  ;;  %v4580_v4 = vld [vmem:[%s22345_s4 + $0x3570] sm:$0xff] }
 0x7b3   :  { %10999 = vmatpush1.bf16.msra.mxu1 %v10998_v14  ;;  %10709 = vmatprep.subr.bf16.mxu0 %v10708_v23  ;;  %v4448_v14 = vld [vmem:[%s22345_s4 + $0x3150] sm:$0xff]  ;;  %v4437_v23 = vld [vmem:[%s22345_s4 + $0x30f8] sm:$0xff]  ;;  %v4606_v18 = vld [vmem:[%s22345_s4 + $0x3640] sm:$0xff] }
 0x7b4   :  { %11001 = vmatprep.subr.bf16.mxu1 %v11000_v49  ;;  %v10724_v49 = vpack.c.bf16 %v4448_v14, %v4435_v0  ;;  %v11016_v16 = vpack.c.bf16 %v4450_v5, %v4437_v23  ;;  %v4525_v0 = vld [vmem:[%s22345_s4 + $0x33b8] sm:$0xff]  ;;  %v4514_v14 = vld [vmem:[%s22345_s4 + $0x3360] sm:$0xff]  ;;  %v4527_v5 = vld [vmem:[%s22345_s4 + $0x33c8] sm:$0xff] }
 0x7b5   :  { %v10738_v24 = vpack.c.bf16 %v4525_v0, %v4512_v7  ;;  %v11030_v36 = vpack.c.bf16 %v4527_v5, %v4514_v14  ;;  %v4577_v10 = vld [vmem:[%s22345_s4 + $0x3558] sm:$0xff]  ;;  %v4590_v8 = vld [vmem:[%s22345_s4 + $0x35c0] sm:$0xff]  ;;  %v4632_v7 = vld [vmem:[%s22345_s4 + $0x3710] sm:$0xff] }
 0x7b6   :  { %10711 = vmatpush1.bf16.msra.mxu0 %v10710_v17  ;;  %v4461_v17 = vld [vmem:[%s22345_s4 + $0x31b8] sm:$0xff]  ;;  %v4616_v5 = vld [vmem:[%s22345_s4 + $0x3690] sm:$0xff] }
 0x7b7   :  { %11003 = vmatpush1.bf16.msra.mxu1 %v11002_v19  ;;  %10713 = vmatprep.subr.bf16.mxu0 %v10712_v44  ;;  %v4474_v19 = vld [vmem:[%s22345_s4 + $0x3220] sm:$0xff]  ;;  %v4463_v44 = vld [vmem:[%s22345_s4 + $0x31c8] sm:$0xff] }
 0x7b8   :  { %11005 = vmatprep.subr.bf16.mxu1 %v11004_v57  ;;  %v10728_v57 = vpack.c.bf16 %v4474_v19, %v4461_v17  ;;  %v11020_v53 = vpack.c.bf16 %v4476_v27, %v4463_v44  ;;  %v4551_v17 = vld [vmem:[%s22345_s4 + $0x3488] sm:$0xff]  ;;  %v4540_v44 = vld [vmem:[%s22345_s4 + $0x3430] sm:$0xff]  ;;  %v4553_v27 = vld [vmem:[%s22345_s4 + $0x3498] sm:$0xff] }
 0x7b9   :  { %v11034_v32 = vpack.c.bf16 %v4553_v27, %v4540_v44  ;;  %v4642_v27 = vld [vmem:[%s22345_s4 + $0x3760] sm:$0xff] }
 0x7ba   :  { %10715 = vmatpush1.bf16.msra.mxu0 %v10714_v12  ;;  %v4487_v12 = vld [vmem:[%s22345_s4 + $0x3288] sm:$0xff] }
 0x7bb   :  { %11007 = vmatpush1.bf16.msra.mxu1 %v11006_v51  ;;  %10717 = vmatprep.subr.bf16.mxu0 %v10716_v3  ;;  %v4500_v51 = vld [vmem:[%s22345_s4 + $0x32f0] sm:$0xff]  ;;  %v4489_v3 = vld [vmem:[%s22345_s4 + $0x3298] sm:$0xff] }
 0x7bc   :  { %11009 = vmatprep.subr.bf16.mxu1 %v11008_v2  ;;  %v10732_v2 = vpack.c.bf16 %v4500_v51, %v4487_v12  ;;  %v11024_v28 = vpack.c.bf16 %v4502_v6, %v4489_v3  ;;  %v4566_v12 = vld [vmem:[%s22345_s4 + $0x3500] sm:$0xff]  ;;  %v4579_v3 = vld [vmem:[%s22345_s4 + $0x3568] sm:$0xff] }
 0x7bd   :  { %v4591_v6 = vld [vmem:[%s22345_s4 + $0x35c8] sm:$0xff]  ;;  %v11038_v38 = vpack.c.bf16 %v4579_v3, %v4566_v12 }
 0x7be   :  { %10719 = vmatpush1.bf16.msra.mxu0 %v10718_v34  ;;  %v4513_v34 = vld [vmem:[%s22345_s4 + $0x3358] sm:$0xff] }
 0x7bf   :  { %11011 = vmatpush1.bf16.msra.mxu1 %v11010_v1  ;;  %10721 = vmatprep.subr.bf16.mxu0 %v10720_v46  ;;  %v4526_v1 = vld [vmem:[%s22345_s4 + $0x33c0] sm:$0xff]  ;;  %v4515_v46 = vld [vmem:[%s22345_s4 + $0x3368] sm:$0xff] }
 0x7c0   :  { %11013 = vmatprep.subr.bf16.mxu1 %v11012_v21  ;;  %v10736_v21 = vpack.c.bf16 %v4526_v1, %v4513_v34  ;;  %v11028_v23 = vpack.c.bf16 %v4528_v33, %v4515_v46  ;;  %v4603_v34 = vld [vmem:[%s22345_s4 + $0x3628] sm:$0xff]  ;;  %v4592_v1 = vld [vmem:[%s22345_s4 + $0x35d0] sm:$0xff]  ;;  %v4605_v33 = vld [vmem:[%s22345_s4 + $0x3638] sm:$0xff] }
 0x7c1   :  { %v10750_v0 = vpack.c.bf16 %v4603_v34, %v4590_v8  ;;  %v11042_v14 = vpack.c.bf16 %v4605_v33, %v4592_v1  ;;  %v4710_v8 = vld [vmem:[%s22345_s4 + $0x3980] sm:$0xff] }
 0x7c2   :  { %10723 = vmatpush1.bf16.msra.mxu0 %v10722_v54  ;;  %v4539_v54 = vld [vmem:[%s22345_s4 + $0x3428] sm:$0xff]  ;;  %v4694_v33 = vld [vmem:[%s22345_s4 + $0x3900] sm:$0xff] }
 0x7c3   :  { %11015 = vmatpush1.bf16.msra.mxu1 %v11014_v55  ;;  %10725 = vmatprep.subr.bf16.mxu0 %v10724_v49  ;;  %v4552_v55 = vld [vmem:[%s22345_s4 + $0x3490] sm:$0xff]  ;;  %v4541_v49 = vld [vmem:[%s22345_s4 + $0x3438] sm:$0xff] }
 0x7c4   :  { %11017 = vmatprep.subr.bf16.mxu1 %v11016_v16  ;;  %v10740_v16 = vpack.c.bf16 %v4552_v55, %v4539_v54  ;;  %v11032_v19 = vpack.c.bf16 %v4554_v11, %v4541_v49  ;;  %v4629_v54 = vld [vmem:[%s22345_s4 + $0x36f8] sm:$0xff]  ;;  %v4618_v55 = vld [vmem:[%s22345_s4 + $0x36a0] sm:$0xff]  ;;  %v4631_v11 = vld [vmem:[%s22345_s4 + $0x3708] sm:$0xff] }
 0x7c6   :  { %10727 = vmatpush1.bf16.msra.mxu0 %v10726_v45  ;;  %v4565_v45 = vld [vmem:[%s22345_s4 + $0x34f8] sm:$0xff] }
 0x7c7   :  { %11019 = vmatpush1.bf16.msra.mxu1 %v11018_v52  ;;  %10729 = vmatprep.subr.bf16.mxu0 %v10728_v57  ;;  %v4578_v52 = vld [vmem:[%s22345_s4 + $0x3560] sm:$0xff]  ;;  %v10742_v57 = vpack.c.bf16 %v4551_v17, %v4538_v41  ;;  %v10754_v17 = vpack.c.bf16 %v4629_v54, %v4616_v5  ;;  %v4736_v5 = vld [vmem:[%s22345_s4 + $0x3a50] sm:$0xff] }
 0x7c8   :  { %11021 = vmatprep.subr.bf16.mxu1 %v11020_v53  ;;  %v4564_v53 = vld [vmem:[%s22345_s4 + $0x34f0] sm:$0xff]  ;;  %v10744_v51 = vpack.c.bf16 %v4578_v52, %v4565_v45  ;;  %v4658_v41 = vld [vmem:[%s22345_s4 + $0x37e0] sm:$0xff]  ;;  %v4655_v45 = vld [vmem:[%s22345_s4 + $0x37c8] sm:$0xff] }
 0x7c9   :  { %v10746_v56 = vpack.c.bf16 %v4577_v10, %v4564_v53  ;;  %v4644_v52 = vld [vmem:[%s22345_s4 + $0x3770] sm:$0xff]  ;;  %v4671_v53 = vld [vmem:[%s22345_s4 + $0x3848] sm:$0xff]  ;;  %v10758_v12 = vpack.c.bf16 %v4655_v45, %v4642_v27  ;;  %v4762_v27 = vld [vmem:[%s22345_s4 + $0x3b20] sm:$0xff] }
 0x7ca   :  { %10731 = vmatpush1.bf16.msra.mxu0 %v10730_v61  ;;  %v4604_v61 = vld [vmem:[%s22345_s4 + $0x3630] sm:$0xff] }
 0x7cb   :  { %11023 = vmatpush1.bf16.msra.mxu1 %v11022_v37  ;;  %10733 = vmatprep.subr.bf16.mxu0 %v10732_v2  ;;  %v11036_v37 = vpack.c.bf16 %v4580_v4, %v4567_v48  ;;  %v4593_v2 = vld [vmem:[%s22345_s4 + $0x35d8] sm:$0xff]  ;;  %v4684_v10 = vld [vmem:[%s22345_s4 + $0x38b0] sm:$0xff] }
 0x7cc   :  { %11025 = vmatprep.subr.bf16.mxu1 %v11024_v28  ;;  %v10748_v28 = vpack.c.bf16 %v4604_v61, %v4591_v6  ;;  %v11040_v46 = vpack.c.bf16 %v4606_v18, %v4593_v2  ;;  %v4657_v48 = vld [vmem:[%s22345_s4 + $0x37d8] sm:$0xff]  ;;  %v4668_v6 = vld [vmem:[%s22345_s4 + $0x3830] sm:$0xff]  ;;  %v11052_v2 = vpack.c.bf16 %v4684_v10, %v4671_v53  ;;  %v4683_v18 = vld [vmem:[%s22345_s4 + $0x38a8] sm:$0xff] }
 0x7cd   :  { %v4669_v4 = vld [vmem:[%s22345_s4 + $0x3838] sm:$0xff]  ;;  %v4748_v53 = vld [vmem:[%s22345_s4 + $0x3ab0] sm:$0xff] }
 0x7ce   :  { %10735 = vmatpush1.bf16.msra.mxu0 %v10734_v42  ;;  %v4617_v42 = vld [vmem:[%s22345_s4 + $0x3698] sm:$0xff] }
 0x7cf   :  { %11027 = vmatpush1.bf16.msra.mxu1 %v11026_v47  ;;  %10737 = vmatprep.subr.bf16.mxu0 %v10736_v21  ;;  %v4630_v47 = vld [vmem:[%s22345_s4 + $0x3700] sm:$0xff]  ;;  %v4619_v21 = vld [vmem:[%s22345_s4 + $0x36a8] sm:$0xff]  ;;  %v4681_v61 = vld [vmem:[%s22345_s4 + $0x3898] sm:$0xff] }
 0x7d0   :  { %11029 = vmatprep.subr.bf16.mxu1 %v11028_v23  ;;  %v10752_v23 = vpack.c.bf16 %v4630_v47, %v4617_v42  ;;  %v11044_v49 = vpack.c.bf16 %v4632_v7, %v4619_v21  ;;  %v10762_v34 = vpack.c.bf16 %v4681_v61, %v4668_v6  ;;  %v4707_v42 = vld [vmem:[%s22345_s4 + $0x3968] sm:$0xff]  ;;  %v4696_v47 = vld [vmem:[%s22345_s4 + $0x3910] sm:$0xff]  ;;  %v4709_v7 = vld [vmem:[%s22345_s4 + $0x3978] sm:$0xff] }
 0x7d1   :  { %v10766_v54 = vpack.c.bf16 %v4707_v42, %v4694_v33  ;;  %v4761_v10 = vld [vmem:[%s22345_s4 + $0x3b18] sm:$0xff]  ;;  %v4775_v6 = vld [vmem:[%s22345_s4 + $0x3b88] sm:$0xff]  ;;  %v2918_v42 = vld [vmem:[%s22345_s4 + $0x180] sm:$0xff] }
 0x7d2   :  { %10739 = vmatpush1.bf16.msra.mxu0 %v10738_v24  ;;  %v4643_v24 = vld [vmem:[%s22345_s4 + $0x3768] sm:$0xff]  ;;  %v2905_v33 = vld [vmem:[%s22345_s4 + $0x118] sm:$0xff] }
 0x7d3   :  { %11031 = vmatpush1.bf16.msra.mxu1 %v11030_v36  ;;  %10741 = vmatprep.subr.bf16.mxu0 %v10740_v16  ;;  %v4656_v36 = vld [vmem:[%s22345_s4 + $0x37d0] sm:$0xff]  ;;  %v4645_v16 = vld [vmem:[%s22345_s4 + $0x3778] sm:$0xff]  ;;  %v2879_v61 = vld [vmem:[%s22345_s4 + $0x48] sm:$0xff] }
 0x7d4   :  { %11033 = vmatprep.subr.bf16.mxu1 %v11032_v19  ;;  %v11046_v19 = vpack.c.bf16 %v4631_v11, %v4618_v55  ;;  %v10756_v44 = vpack.c.bf16 %v4656_v36, %v4643_v24  ;;  %v11058_v55 = vpack.c.bf16 %v4709_v7, %v4696_v47  ;;  %v4720_v11 = vld [vmem:[%s22345_s4 + $0x39d0] sm:$0xff]  ;;  %v4733_v24 = vld [vmem:[%s22345_s4 + $0x3a38] sm:$0xff]  ;;  %v4722_v36 = vld [vmem:[%s22345_s4 + $0x39e0] sm:$0xff] }
 0x7d5   :  { %5841 = vmatmul.mubr.f32.vlgmr.msra.gmra.mrb[8].mxu0 %v17173_v26  ;;  %v10770_v45 = vpack.c.bf16 %v4733_v24, %v4720_v11  ;;  %v2907_v7 = vld [vmem:[%s22345_s4 + $0x128] sm:$0xff]  ;;  %v2944_v24 = vld [vmem:[%s22345_s4 + $0x250] sm:$0xff] }
 0x7d6   :  { %6196 = vmatmul.mubr.f32.vlgmr.msra.gmra.mrb[8].mxu1 %v17173_v26  ;;  %10743 = vmatpush1.bf16.msra.mxu0 %v10742_v57  ;;  %v11048_v57 = vpack.c.bf16 %v4658_v41, %v4645_v16  ;;  %v4735_v41 = vld [vmem:[%s22345_s4 + $0x3a48] sm:$0xff] }
 0x7d7   :  { %8359 = vmatprep.mubr.msk.f32.mxu0 %vm4850_vm11, %v17188_v22  ;;  %11035 = vmatpush1.bf16.msra.mxu1 %v11034_v32  ;;  %v4682_v32 = vld [vmem:[%s22345_s4 + $0x38a0] sm:$0xff]  ;;  %v2931_v11 = vld [vmem:[%s22345_s4 + $0x1e8] sm:$0xff] }
 0x7d8   :  { %8360 = vmatprep.mubr.msk.f32.mxu1 %vm4850_vm11, %v17188_v22  ;;  %10745 = vmatprep.subr.bf16.mxu0 %v10744_v51  ;;  %v11050_v51 = vpack.c.bf16 %v4657_v48, %v4644_v52  ;;  %v10760_v3 = vpack.c.bf16 %v4682_v32, %v4669_v4  ;;  %v11062_v52 = vpack.c.bf16 %v4735_v41, %v4722_v36  ;;  %v4746_v48 = vld [vmem:[%s22345_s4 + $0x3aa0] sm:$0xff]  ;;  %v4759_v4 = vld [vmem:[%s22345_s4 + $0x3b08] sm:$0xff] }
 0x7d9   :  { %11037 = vmatprep.subr.bf16.mxu1 %v11036_v37  ;;  %v4670_v37 = vld [vmem:[%s22345_s4 + $0x3840] sm:$0xff] }
 0x7da   :  { %10747 = vmatpush1.bf16.msra.mxu0 %v10746_v56  ;;  %v4695_v56 = vld [vmem:[%s22345_s4 + $0x3908] sm:$0xff]  ;;  %v11054_v1 = vpack.c.bf16 %v4683_v18, %v4670_v37  ;;  %v2892_v37 = vld [vmem:[%s22345_s4 + $0xb0] sm:$0xff]  ;;  %v2894_v18 = vld [vmem:[%s22345_s4 + $0xc0] sm:$0xff] }
 0x7db   :  { %11039 = vmatpush1.bf16.msra.mxu1 %v11038_v38  ;;  %10749 = vmatprep.subr.bf16.mxu0 %v10748_v28  ;;  %v4708_v38 = vld [vmem:[%s22345_s4 + $0x3970] sm:$0xff]  ;;  %v4697_v28 = vld [vmem:[%s22345_s4 + $0x3918] sm:$0xff]  ;;  %v2946_v41 = vld [vmem:[%s22345_s4 + $0x260] sm:$0xff] }
 0x7dc   :  { %11041 = vmatprep.subr.bf16.mxu1 %v11040_v46  ;;  %v10764_v46 = vpack.c.bf16 %v4708_v38, %v4695_v56  ;;  %v11056_v21 = vpack.c.bf16 %v4710_v8, %v4697_v28  ;;  %v2878_v56 = vld [vmem:[%s22345_s4 + $0x40] sm:$0xff]  ;;  %v2891_v38 = vld [vmem:[%s22345_s4 + $0xa8] sm:$0xff]  ;;  %v4772_v28 = vld [vmem:[%s22345_s4 + $0x3b70] sm:$0xff] }
 0x7dd   :  { %v2880_v8 = vld [vmem:[%s22345_s4 + $0x50] sm:$0xff] }
 0x7de   :  { %10751 = vmatpush1.bf16.msra.mxu0 %v10750_v0  ;;  %v4721_v0 = vld [vmem:[%s22345_s4 + $0x39d8] sm:$0xff] }
 0x7df   :  { %11043 = vmatpush1.bf16.msra.mxu1 %v11042_v14  ;;  %10753 = vmatprep.subr.bf16.mxu0 %v10752_v23  ;;  %v4734_v14 = vld [vmem:[%s22345_s4 + $0x3a40] sm:$0xff]  ;;  %v4723_v23 = vld [vmem:[%s22345_s4 + $0x39e8] sm:$0xff] }
 0x7e0   :  { %11045 = vmatprep.subr.bf16.mxu1 %v11044_v49  ;;  %v10768_v49 = vpack.c.bf16 %v4734_v14, %v4721_v0  ;;  %v11060_v16 = vpack.c.bf16 %v4736_v5, %v4723_v23  ;;  %v2920_v0 = vld [vmem:[%s22345_s4 + $0x190] sm:$0xff]  ;;  %v2917_v5 = vld [vmem:[%s22345_s4 + $0x178] sm:$0xff] }
 0x7e1   :  { %v2904_v23 = vld [vmem:[%s22345_s4 + $0x110] sm:$0xff]  ;;  %v11364_v36 = vpack.c.bf16 %v2920_v0, %v2907_v7  ;;  %v2997_v7 = vld [vmem:[%s22345_s4 + $0x3f8] sm:$0xff] }
 0x7e2   :  { %10755 = vmatpush1.bf16.msra.mxu0 %v10754_v17  ;;  %v4747_v17 = vld [vmem:[%s22345_s4 + $0x3aa8] sm:$0xff]  ;;  %v3009_v0 = vld [vmem:[%s22345_s4 + $0x458] sm:$0xff] }
 0x7e3   :  { %11047 = vmatpush1.bf16.msra.mxu1 %v11046_v19  ;;  %10757 = vmatprep.subr.bf16.mxu0 %v10756_v44  ;;  %v4760_v19 = vld [vmem:[%s22345_s4 + $0x3b10] sm:$0xff]  ;;  %v4749_v44 = vld [vmem:[%s22345_s4 + $0x3ab8] sm:$0xff] }
 0x7e4   :  { %11049 = vmatprep.subr.bf16.mxu1 %v11048_v57  ;;  %v10772_v57 = vpack.c.bf16 %v4760_v19, %v4747_v17  ;;  %v11064_v32 = vpack.c.bf16 %v4762_v27, %v4749_v44  ;;  %v11074_v17 = vpack.c.bf16 %v2917_v5, %v2904_v23  ;;  %v11076_v44 = vpack.c.bf16 %v2944_v24, %v2931_v11  ;;  %v2930_v27 = vld [vmem:[%s22345_s4 + $0x1e0] sm:$0xff]  ;;  %v3011_v23 = vld [vmem:[%s22345_s4 + $0x468] sm:$0xff]  ;;  %v3024_v5 = vld [vmem:[%s22345_s4 + $0x4d0] sm:$0xff] }
 0x7e5   :  { %v3008_v11 = vld [vmem:[%s22345_s4 + $0x450] sm:$0xff]  ;;  %v3021_v24 = vld [vmem:[%s22345_s4 + $0x4b8] sm:$0xff] }
 0x7e6   :  { %10759 = vmatpush1.bf16.msra.mxu0 %v10758_v12  ;;  %v10774_v12 = vpack.c.bf16 %v4759_v4, %v4746_v48  ;;  %v2945_v48 = vld [vmem:[%s22345_s4 + $0x258] sm:$0xff] }
 0x7e7   :  { %11051 = vmatpush1.bf16.msra.mxu1 %v11050_v51  ;;  %10761 = vmatprep.subr.bf16.mxu0 %v10760_v3  ;;  %v11066_v51 = vpack.c.bf16 %v4761_v10, %v4748_v53  ;;  %v4773_v3 = vld [vmem:[%s22345_s4 + $0x3b78] sm:$0xff]  ;;  %v2959_v53 = vld [vmem:[%s22345_s4 + $0x2c8] sm:$0xff]  ;;  %v2972_v10 = vld [vmem:[%s22345_s4 + $0x330] sm:$0xff] }
 0x7e8   :  { %11053 = vmatprep.subr.bf16.mxu1 %v11052_v2  ;;  %v2881_v2 = vld [vmem:[%s22345_s4 + $0x58] sm:$0xff] }
 0x7e9   :  { %v11360_v47 = vpack.c.bf16 %v2894_v18, %v2881_v2  ;;  %v2957_v4 = vld [vmem:[%s22345_s4 + $0x2b8] sm:$0xff]  ;;  %v11372_v2 = vpack.c.bf16 %v2972_v10, %v2959_v53  ;;  %v2971_v18 = vld [vmem:[%s22345_s4 + $0x328] sm:$0xff] }
 0x7ea   :  { %10763 = vmatpush1.bf16.msra.mxu0 %v10762_v34  ;;  %v2893_v34 = vld [vmem:[%s22345_s4 + $0xb8] sm:$0xff] }
 0x7eb   :  { %11055 = vmatpush1.bf16.msra.mxu1 %v11054_v1  ;;  %10765 = vmatprep.subr.bf16.mxu0 %v10764_v46  ;;  %v4774_v1 = vld [vmem:[%s22345_s4 + $0x3b80] sm:$0xff]  ;;  %v11068_v46 = vpack.c.bf16 %v2892_v37, %v2879_v61  ;;  %v11362_v14 = vpack.c.bf16 %v2893_v34, %v2880_v8  ;;  %v2969_v61 = vld [vmem:[%s22345_s4 + $0x318] sm:$0xff] }
 0x7ec   :  { %11057 = vmatprep.subr.bf16.mxu1 %v11056_v21  ;;  %v11070_v21 = vpack.c.bf16 %v2891_v38, %v2878_v56  ;;  %v2958_v37 = vld [vmem:[%s22345_s4 + $0x2c0] sm:$0xff]  ;;  %v2983_v56 = vld [vmem:[%s22345_s4 + $0x388] sm:$0xff]  ;;  %v2996_v38 = vld [vmem:[%s22345_s4 + $0x3f0] sm:$0xff] }
 0x7ed   :  { %v2998_v8 = vld [vmem:[%s22345_s4 + $0x400] sm:$0xff]  ;;  %v3049_v10 = vld [vmem:[%s22345_s4 + $0x598] sm:$0xff] }
 0x7ee   :  { %10767 = vmatpush1.bf16.msra.mxu0 %v10766_v54  ;;  %v2906_v54 = vld [vmem:[%s22345_s4 + $0x120] sm:$0xff] }
 0x7ef   :  { %11059 = vmatpush1.bf16.msra.mxu1 %v11058_v55  ;;  %10769 = vmatprep.subr.bf16.mxu0 %v10768_v49  ;;  %v11072_v55 = vpack.c.bf16 %v2918_v42, %v2905_v33  ;;  %v2919_v49 = vld [vmem:[%s22345_s4 + $0x188] sm:$0xff]  ;;  %v2982_v33 = vld [vmem:[%s22345_s4 + $0x380] sm:$0xff] }
 0x7f0   :  { %11061 = vmatprep.subr.bf16.mxu1 %v11060_v16  ;;  %v2933_v16 = vld [vmem:[%s22345_s4 + $0x1f8] sm:$0xff]  ;;  %v11366_v19 = vpack.c.bf16 %v2919_v49, %v2906_v54  ;;  %v2995_v42 = vld [vmem:[%s22345_s4 + $0x3e8] sm:$0xff] }
 0x7f1   :  { %v11086_v54 = vpack.c.bf16 %v2995_v42, %v2982_v33  ;;  %v3102_v33 = vld [vmem:[%s22345_s4 + $0x740] sm:$0xff] }
 0x7f2   :  { %10771 = vmatpush1.bf16.msra.mxu0 %v10770_v45  ;;  %v2943_v45 = vld [vmem:[%s22345_s4 + $0x248] sm:$0xff] }
 0x7f3   :  { %11063 = vmatpush1.bf16.msra.mxu1 %v11062_v52  ;;  %10773 = vmatprep.subr.bf16.mxu0 %v10772_v57  ;;  %v2932_v52 = vld [vmem:[%s22345_s4 + $0x1f0] sm:$0xff]  ;;  %v11368_v57 = vpack.c.bf16 %v2946_v41, %v2933_v16  ;;  %v11380_v16 = vpack.c.bf16 %v3024_v5, %v3011_v23  ;;  %v3023_v41 = vld [vmem:[%s22345_s4 + $0x4c8] sm:$0xff]  ;;  %v3101_v5 = vld [vmem:[%s22345_s4 + $0x738] sm:$0xff] }
 0x7f4   :  { %11065 = vmatprep.subr.bf16.mxu1 %v11064_v32  ;;  %v2970_v32 = vld [vmem:[%s22345_s4 + $0x320] sm:$0xff] }
 0x7f6   :  { %10775 = vmatpush1.bf16.msra.mxu0 %v10774_v12  ;;  %v11078_v12 = vpack.c.bf16 %v2943_v45, %v2930_v27  ;;  %v3050_v27 = vld [vmem:[%s22345_s4 + $0x5a0] sm:$0xff]  ;;  %v11090_v45 = vpack.c.bf16 %v3021_v24, %v3008_v11  ;;  %v3128_v11 = vld [vmem:[%s22345_s4 + $0x810] sm:$0xff] }
 0x7f7   :  { %11067 = vmatpush1.bf16.msra.mxu1 %v11066_v51  ;;  %5883 = vmatprep.subr.mxu0 %v4773_v3  ;;  %v11370_v51 = vpack.c.bf16 %v2945_v48, %v2932_v52  ;;  %v11080_v3 = vpack.c.bf16 %v2970_v32, %v2957_v4  ;;  %v3034_v48 = vld [vmem:[%s22345_s4 + $0x520] sm:$0xff]  ;;  %v3047_v4 = vld [vmem:[%s22345_s4 + $0x588] sm:$0xff]  ;;  %v3036_v32 = vld [vmem:[%s22345_s4 + $0x530] sm:$0xff] }
 0x7f8   :  { %6238 = vmatprep.subr.mxu1 %v4775_v6  ;;  %v2956_v6 = vld [vmem:[%s22345_s4 + $0x2b0] sm:$0xff] }
 0x7f9   :  { %v11082_v34 = vpack.c.bf16 %v2969_v61, %v2956_v6  ;;  %v3076_v6 = vld [vmem:[%s22345_s4 + $0x670] sm:$0xff]  ;;  %v11094_v61 = vpack.c.bf16 %v3047_v4, %v3034_v48  ;;  %v3154_v48 = vld [vmem:[%s22345_s4 + $0x8e0] sm:$0xff] }
 0x7fa   :  { %5884 = vmatpush1.msra.mxu0 %v4772_v28  ;;  %v2985_v28 = vld [vmem:[%s22345_s4 + $0x398] sm:$0xff] }
 0x7fb   :  { %6239 = vmatpush1.msra.mxu1 %v4774_v1  ;;  %5912 = vmatmul.mubr.f32.vlgmr.msra.gmra.mrb[8].mxu0 %v17401_v30  ;;  %v11374_v1 = vpack.c.bf16 %v2971_v18, %v2958_v37  ;;  %v11386_v37 = vpack.c.bf16 %v3049_v10, %v3036_v32  ;;  %v3060_v18 = vld [vmem:[%s22345_s4 + $0x5f0] sm:$0xff]  ;;  %v3138_v10 = vld [vmem:[%s22345_s4 + $0x860] sm:$0xff] }
 0x7fc   :  { %6267 = vmatmul.mubr.f32.vlgmr.msra.gmra.mrb[8].mxu1 %v17401_v30  ;;  %11069 = vmatprep.subr.bf16.mxu0 %v11068_v46  ;;  %v11084_v46 = vpack.c.bf16 %v2996_v38, %v2983_v56  ;;  %v3073_v56 = vld [vmem:[%s22345_s4 + $0x658] sm:$0xff]  ;;  %v3062_v38 = vld [vmem:[%s22345_s4 + $0x600] sm:$0xff] }
 0x7fd   :  { %11361 = vmatprep.subr.bf16.mxu1 %v11360_v47  ;;  %11071 = vmatpush1.bf16.msra.mxu0 %v11070_v21  ;;  %v2984_v47 = vld [vmem:[%s22345_s4 + $0x390] sm:$0xff]  ;;  %v11376_v21 = vpack.c.bf16 %v2998_v8, %v2985_v28  ;;  %v3075_v8 = vld [vmem:[%s22345_s4 + $0x668] sm:$0xff]  ;;  %v11098_v42 = vpack.c.bf16 %v3073_v56, %v3060_v18 }
 0x7fe   :  { %6337 = vmatprep.mubr.f32.mxu0 %v15586_v58  ;;  %11363 = vmatpush1.bf16.msra.mxu1 %v11362_v14  ;;  %v3022_v14 = vld [vmem:[%s22345_s4 + $0x4c0] sm:$0xff]  ;;  %v3180_v18 = vld [vmem:[%s22345_s4 + $0x9b0] sm:$0xff] }
 0x7ff   :  { %6692 = vmatprep.mubr.f32.mxu1 %v15586_v58  ;;  %11073 = vmatprep.subr.bf16.mxu0 %v11072_v55  ;;  %v11378_v55 = vpack.c.bf16 %v2997_v7, %v2984_v47  ;;  %v11088_v49 = vpack.c.bf16 %v3022_v14, %v3009_v0  ;;  %v11390_v47 = vpack.c.bf16 %v3075_v8, %v3062_v38  ;;  %v3086_v7 = vld [vmem:[%s22345_s4 + $0x6c0] sm:$0xff]  ;;  %v3099_v0 = vld [vmem:[%s22345_s4 + $0x728] sm:$0xff]  ;;  %v3088_v14 = vld [vmem:[%s22345_s4 + $0x6d0] sm:$0xff] }
 0x800   :  { %11365 = vmatprep.subr.bf16.mxu1 %v11364_v36  ;;  %v3010_v36 = vld [vmem:[%s22345_s4 + $0x460] sm:$0xff]  ;;  %v11102_v24 = vpack.c.bf16 %v3099_v0, %v3086_v7  ;;  %v3164_v8 = vld [vmem:[%s22345_s4 + $0x930] sm:$0xff] }
 0x801   :  { %11075 = vmatpush1.bf16.msra.mxu0 %v11074_v17  ;;  %v3035_v17 = vld [vmem:[%s22345_s4 + $0x528] sm:$0xff]  ;;  %v11382_v52 = vpack.c.bf16 %v3023_v41, %v3010_v36  ;;  %v11394_v36 = vpack.c.bf16 %v3101_v5, %v3088_v14  ;;  %v3112_v41 = vld [vmem:[%s22345_s4 + $0x790] sm:$0xff]  ;;  %v3206_v7 = vld [vmem:[%s22345_s4 + $0xa80] sm:$0xff] }
 0x802   :  { %11367 = vmatpush1.bf16.msra.mxu1 %v11366_v19  ;;  %11077 = vmatprep.subr.bf16.mxu0 %v11076_v44  ;;  %v3048_v19 = vld [vmem:[%s22345_s4 + $0x590] sm:$0xff]  ;;  %v3037_v44 = vld [vmem:[%s22345_s4 + $0x538] sm:$0xff]  ;;  %v3190_v5 = vld [vmem:[%s22345_s4 + $0xa00] sm:$0xff] }
 0x803   :  { %11369 = vmatprep.subr.bf16.mxu1 %v11368_v57  ;;  %v11092_v57 = vpack.c.bf16 %v3048_v19, %v3035_v17  ;;  %v11384_v53 = vpack.c.bf16 %v3050_v27, %v3037_v44  ;;  %v3125_v17 = vld [vmem:[%s22345_s4 + $0x7f8] sm:$0xff]  ;;  %v3114_v19 = vld [vmem:[%s22345_s4 + $0x7a0] sm:$0xff]  ;;  %v3127_v27 = vld [vmem:[%s22345_s4 + $0x808] sm:$0xff] }
 0x804   :  { %v11106_v4 = vpack.c.bf16 %v3125_v17, %v3112_v41  ;;  %v11398_v32 = vpack.c.bf16 %v3127_v27, %v3114_v19  ;;  %v3232_v41 = vld [vmem:[%s22345_s4 + $0xb50] sm:$0xff] }
 0x805   :  { %11079 = vmatpush1.bf16.msra.mxu0 %v11078_v12  ;;  %v3061_v12 = vld [vmem:[%s22345_s4 + $0x5f8] sm:$0xff]  ;;  %v3216_v27 = vld [vmem:[%s22345_s4 + $0xad0] sm:$0xff] }
 0x806   :  { %11371 = vmatpush1.bf16.msra.mxu1 %v11370_v51  ;;  %11081 = vmatprep.subr.bf16.mxu0 %v11080_v3  ;;  %v3074_v51 = vld [vmem:[%s22345_s4 + $0x660] sm:$0xff]  ;;  %v3063_v3 = vld [vmem:[%s22345_s4 + $0x608] sm:$0xff] }
 0x807   :  { %11373 = vmatprep.subr.bf16.mxu1 %v11372_v2  ;;  %v11096_v2 = vpack.c.bf16 %v3074_v51, %v3061_v12  ;;  %v11388_v28 = vpack.c.bf16 %v3076_v6, %v3063_v3  ;;  %v3151_v12 = vld [vmem:[%s22345_s4 + $0x8c8] sm:$0xff]  ;;  %v3140_v51 = vld [vmem:[%s22345_s4 + $0x870] sm:$0xff]  ;;  %v3153_v6 = vld [vmem:[%s22345_s4 + $0x8d8] sm:$0xff] }
 0x808   :  { %v11110_v56 = vpack.c.bf16 %v3151_v12, %v3138_v10  ;;  %v11402_v38 = vpack.c.bf16 %v3153_v6, %v3140_v51  ;;  %v3258_v10 = vld [vmem:[%s22345_s4 + $0xc20] sm:$0xff] }
 0x809   :  { %11083 = vmatpush1.bf16.msra.mxu0 %v11082_v34  ;;  %v3087_v34 = vld [vmem:[%s22345_s4 + $0x6c8] sm:$0xff]  ;;  %v3242_v6 = vld [vmem:[%s22345_s4 + $0xba0] sm:$0xff] }
 0x80a   :  { %11375 = vmatpush1.bf16.msra.mxu1 %v11374_v1  ;;  %11085 = vmatprep.subr.bf16.mxu0 %v11084_v46  ;;  %v3100_v1 = vld [vmem:[%s22345_s4 + $0x730] sm:$0xff]  ;;  %v3089_v46 = vld [vmem:[%s22345_s4 + $0x6d8] sm:$0xff] }
 0x80b   :  { %11377 = vmatprep.subr.bf16.mxu1 %v11376_v21  ;;  %v11100_v21 = vpack.c.bf16 %v3100_v1, %v3087_v34  ;;  %v11392_v23 = vpack.c.bf16 %v3102_v33, %v3089_v46  ;;  %v3177_v34 = vld [vmem:[%s22345_s4 + $0x998] sm:$0xff]  ;;  %v3166_v1 = vld [vmem:[%s22345_s4 + $0x940] sm:$0xff]  ;;  %v3179_v33 = vld [vmem:[%s22345_s4 + $0x9a8] sm:$0xff] }
 0x80c   :  { %v11114_v0 = vpack.c.bf16 %v3177_v34, %v3164_v8  ;;  %v11406_v14 = vpack.c.bf16 %v3179_v33, %v3166_v1  ;;  %v3284_v8 = vld [vmem:[%s22345_s4 + $0xcf0] sm:$0xff] }
 0x80d   :  { %11087 = vmatpush1.bf16.msra.mxu0 %v11086_v54  ;;  %v3113_v54 = vld [vmem:[%s22345_s4 + $0x798] sm:$0xff]  ;;  %v3268_v33 = vld [vmem:[%s22345_s4 + $0xc70] sm:$0xff] }
 0x80e   :  { %11379 = vmatpush1.bf16.msra.mxu1 %v11378_v55  ;;  %11089 = vmatprep.subr.bf16.mxu0 %v11088_v49  ;;  %v3126_v55 = vld [vmem:[%s22345_s4 + $0x800] sm:$0xff]  ;;  %v3115_v49 = vld [vmem:[%s22345_s4 + $0x7a8] sm:$0xff] }
 0x80f   :  { %11381 = vmatprep.subr.bf16.mxu1 %v11380_v16  ;;  %v11104_v16 = vpack.c.bf16 %v3126_v55, %v3113_v54  ;;  %v11396_v44 = vpack.c.bf16 %v3128_v11, %v3115_v49  ;;  %v3203_v54 = vld [vmem:[%s22345_s4 + $0xa68] sm:$0xff]  ;;  %v3192_v55 = vld [vmem:[%s22345_s4 + $0xa10] sm:$0xff]  ;;  %v3205_v11 = vld [vmem:[%s22345_s4 + $0xa78] sm:$0xff] }
 0x810   :  { %v11118_v17 = vpack.c.bf16 %v3203_v54, %v3190_v5  ;;  %v11410_v19 = vpack.c.bf16 %v3205_v11, %v3192_v55  ;;  %v3310_v5 = vld [vmem:[%s22345_s4 + $0xdc0] sm:$0xff] }
 0x811   :  { %11091 = vmatpush1.bf16.msra.mxu0 %v11090_v45  ;;  %v3139_v45 = vld [vmem:[%s22345_s4 + $0x868] sm:$0xff]  ;;  %v3294_v11 = vld [vmem:[%s22345_s4 + $0xd40] sm:$0xff] }
 0x812   :  { %11383 = vmatpush1.bf16.msra.mxu1 %v11382_v52  ;;  %11093 = vmatprep.subr.bf16.mxu0 %v11092_v57  ;;  %v3152_v52 = vld [vmem:[%s22345_s4 + $0x8d0] sm:$0xff]  ;;  %v3141_v57 = vld [vmem:[%s22345_s4 + $0x878] sm:$0xff] }
 0x813   :  { %11385 = vmatprep.subr.bf16.mxu1 %v11384_v53  ;;  %v11108_v53 = vpack.c.bf16 %v3152_v52, %v3139_v45  ;;  %v11400_v3 = vpack.c.bf16 %v3154_v48, %v3141_v57  ;;  %v3229_v45 = vld [vmem:[%s22345_s4 + $0xb38] sm:$0xff]  ;;  %v3218_v52 = vld [vmem:[%s22345_s4 + $0xae0] sm:$0xff]  ;;  %v3231_v48 = vld [vmem:[%s22345_s4 + $0xb48] sm:$0xff] }
 0x814   :  { %v11122_v12 = vpack.c.bf16 %v3229_v45, %v3216_v27  ;;  %v11414_v51 = vpack.c.bf16 %v3231_v48, %v3218_v52  ;;  %v3323_v27 = vld [vmem:[%s22345_s4 + $0xe28] sm:$0xff]  ;;  %v3336_v45 = vld [vmem:[%s22345_s4 + $0xe90] sm:$0xff]  ;;  %v3333_v48 = vld [vmem:[%s22345_s4 + $0xe78] sm:$0xff] }
 0x815   :  { %11095 = vmatpush1.bf16.msra.mxu0 %v11094_v61  ;;  %v3165_v61 = vld [vmem:[%s22345_s4 + $0x938] sm:$0xff] }
 0x816   :  { %11387 = vmatpush1.bf16.msra.mxu1 %v11386_v37  ;;  %11097 = vmatprep.subr.bf16.mxu0 %v11096_v2  ;;  %v3178_v37 = vld [vmem:[%s22345_s4 + $0x9a0] sm:$0xff]  ;;  %v3167_v2 = vld [vmem:[%s22345_s4 + $0x948] sm:$0xff] }
 0x817   :  { %11389 = vmatprep.subr.bf16.mxu1 %v11388_v28  ;;  %v11112_v28 = vpack.c.bf16 %v3178_v37, %v3165_v61  ;;  %v11404_v46 = vpack.c.bf16 %v3180_v18, %v3167_v2  ;;  %v3255_v61 = vld [vmem:[%s22345_s4 + $0xc08] sm:$0xff]  ;;  %v3244_v37 = vld [vmem:[%s22345_s4 + $0xbb0] sm:$0xff]  ;;  %v3257_v18 = vld [vmem:[%s22345_s4 + $0xc18] sm:$0xff] }
 0x818   :  { %v11126_v34 = vpack.c.bf16 %v3255_v61, %v3242_v6  ;;  %v11418_v1 = vpack.c.bf16 %v3257_v18, %v3244_v37  ;;  %v3362_v6 = vld [vmem:[%s22345_s4 + $0xf60] sm:$0xff] }
 0x819   :  { %11099 = vmatpush1.bf16.msra.mxu0 %v11098_v42  ;;  %v3191_v42 = vld [vmem:[%s22345_s4 + $0xa08] sm:$0xff]  ;;  %v3346_v18 = vld [vmem:[%s22345_s4 + $0xee0] sm:$0xff] }
 0x81a   :  { %11391 = vmatpush1.bf16.msra.mxu1 %v11390_v47  ;;  %11101 = vmatprep.subr.bf16.mxu0 %v11100_v21  ;;  %v3204_v47 = vld [vmem:[%s22345_s4 + $0xa70] sm:$0xff]  ;;  %v3193_v21 = vld [vmem:[%s22345_s4 + $0xa18] sm:$0xff] }
 0x81b   :  { %11393 = vmatprep.subr.bf16.mxu1 %v11392_v23  ;;  %v11116_v23 = vpack.c.bf16 %v3204_v47, %v3191_v42  ;;  %v11408_v49 = vpack.c.bf16 %v3206_v7, %v3193_v21  ;;  %v3281_v42 = vld [vmem:[%s22345_s4 + $0xcd8] sm:$0xff]  ;;  %v3270_v47 = vld [vmem:[%s22345_s4 + $0xc80] sm:$0xff]  ;;  %v3283_v7 = vld [vmem:[%s22345_s4 + $0xce8] sm:$0xff] }
 0x81c   :  { %v11130_v54 = vpack.c.bf16 %v3281_v42, %v3268_v33  ;;  %v11422_v55 = vpack.c.bf16 %v3283_v7, %v3270_v47  ;;  %v3388_v33 = vld [vmem:[%s22345_s4 + $0x1030] sm:$0xff] }
 0x81d   :  { %11103 = vmatpush1.bf16.msra.mxu0 %v11102_v24  ;;  %v3217_v24 = vld [vmem:[%s22345_s4 + $0xad8] sm:$0xff]  ;;  %v3372_v7 = vld [vmem:[%s22345_s4 + $0xfb0] sm:$0xff] }
 0x81e   :  { %11395 = vmatpush1.bf16.msra.mxu1 %v11394_v36  ;;  %11105 = vmatprep.subr.bf16.mxu0 %v11104_v16  ;;  %v3230_v36 = vld [vmem:[%s22345_s4 + $0xb40] sm:$0xff]  ;;  %v3219_v16 = vld [vmem:[%s22345_s4 + $0xae8] sm:$0xff] }
 0x81f   :  { %11397 = vmatprep.subr.bf16.mxu1 %v11396_v44  ;;  %v11120_v44 = vpack.c.bf16 %v3230_v36, %v3217_v24  ;;  %v11412_v57 = vpack.c.bf16 %v3232_v41, %v3219_v16  ;;  %v3307_v24 = vld [vmem:[%s22345_s4 + $0xda8] sm:$0xff]  ;;  %v3296_v16 = vld [vmem:[%s22345_s4 + $0xd50] sm:$0xff]  ;;  %v3309_v41 = vld [vmem:[%s22345_s4 + $0xdb8] sm:$0xff] }
 0x820   :  { %v11426_v52 = vpack.c.bf16 %v3309_v41, %v3296_v16  ;;  %v3398_v41 = vld [vmem:[%s22345_s4 + $0x1080] sm:$0xff] }
 0x821   :  { %11107 = vmatpush1.bf16.msra.mxu0 %v11106_v4  ;;  %v3243_v4 = vld [vmem:[%s22345_s4 + $0xba8] sm:$0xff] }
 0x822   :  { %11399 = vmatpush1.bf16.msra.mxu1 %v11398_v32  ;;  %11109 = vmatprep.subr.bf16.mxu0 %v11108_v53  ;;  %v3256_v32 = vld [vmem:[%s22345_s4 + $0xc10] sm:$0xff]  ;;  %v3245_v53 = vld [vmem:[%s22345_s4 + $0xbb8] sm:$0xff] }
 0x823   :  { %11401 = vmatprep.subr.bf16.mxu1 %v11400_v3  ;;  %v11124_v3 = vpack.c.bf16 %v3256_v32, %v3243_v4  ;;  %v11416_v2 = vpack.c.bf16 %v3258_v10, %v3245_v53  ;;  %v3322_v4 = vld [vmem:[%s22345_s4 + $0xe20] sm:$0xff]  ;;  %v3335_v53 = vld [vmem:[%s22345_s4 + $0xe88] sm:$0xff] }
 0x824   :  { %v3347_v10 = vld [vmem:[%s22345_s4 + $0xee8] sm:$0xff]  ;;  %v11430_v37 = vpack.c.bf16 %v3335_v53, %v3322_v4 }
 0x825   :  { %11111 = vmatpush1.bf16.msra.mxu0 %v11110_v56  ;;  %v3269_v56 = vld [vmem:[%s22345_s4 + $0xc78] sm:$0xff] }
 0x826   :  { %11403 = vmatpush1.bf16.msra.mxu1 %v11402_v38  ;;  %11113 = vmatprep.subr.bf16.mxu0 %v11112_v28  ;;  %v3282_v38 = vld [vmem:[%s22345_s4 + $0xce0] sm:$0xff]  ;;  %v3271_v28 = vld [vmem:[%s22345_s4 + $0xc88] sm:$0xff] }
 0x827   :  { %11405 = vmatprep.subr.bf16.mxu1 %v11404_v46  ;;  %v11128_v46 = vpack.c.bf16 %v3282_v38, %v3269_v56  ;;  %v11420_v21 = vpack.c.bf16 %v3284_v8, %v3271_v28  ;;  %v3359_v56 = vld [vmem:[%s22345_s4 + $0xf48] sm:$0xff]  ;;  %v3348_v38 = vld [vmem:[%s22345_s4 + $0xef0] sm:$0xff]  ;;  %v3361_v8 = vld [vmem:[%s22345_s4 + $0xf58] sm:$0xff] }
 0x828   :  { %v11142_v42 = vpack.c.bf16 %v3359_v56, %v3346_v18  ;;  %v11434_v47 = vpack.c.bf16 %v3361_v8, %v3348_v38  ;;  %v3466_v18 = vld [vmem:[%s22345_s4 + $0x12a0] sm:$0xff] }
 0x829   :  { %11115 = vmatpush1.bf16.msra.mxu0 %v11114_v0  ;;  %v3295_v0 = vld [vmem:[%s22345_s4 + $0xd48] sm:$0xff]  ;;  %v3450_v8 = vld [vmem:[%s22345_s4 + $0x1220] sm:$0xff] }
 0x82a   :  { %11407 = vmatpush1.bf16.msra.mxu1 %v11406_v14  ;;  %11117 = vmatprep.subr.bf16.mxu0 %v11116_v23  ;;  %v3308_v14 = vld [vmem:[%s22345_s4 + $0xdb0] sm:$0xff]  ;;  %v3297_v23 = vld [vmem:[%s22345_s4 + $0xd58] sm:$0xff] }
 0x82b   :  { %11409 = vmatprep.subr.bf16.mxu1 %v11408_v49  ;;  %v11132_v49 = vpack.c.bf16 %v3308_v14, %v3295_v0  ;;  %v11424_v36 = vpack.c.bf16 %v3310_v5, %v3297_v23  ;;  %v3385_v0 = vld [vmem:[%s22345_s4 + $0x1018] sm:$0xff]  ;;  %v3374_v14 = vld [vmem:[%s22345_s4 + $0xfc0] sm:$0xff]  ;;  %v3387_v5 = vld [vmem:[%s22345_s4 + $0x1028] sm:$0xff] }
 0x82d   :  { %11119 = vmatpush1.bf16.msra.mxu0 %v11118_v17  ;;  %v3321_v17 = vld [vmem:[%s22345_s4 + $0xe18] sm:$0xff] }
 0x82e   :  { %11411 = vmatpush1.bf16.msra.mxu1 %v11410_v19  ;;  %11121 = vmatprep.subr.bf16.mxu0 %v11120_v44  ;;  %v3334_v19 = vld [vmem:[%s22345_s4 + $0xe80] sm:$0xff]  ;;  %v11134_v44 = vpack.c.bf16 %v3307_v24, %v3294_v11  ;;  %v11146_v24 = vpack.c.bf16 %v3385_v0, %v3372_v7  ;;  %v3492_v7 = vld [vmem:[%s22345_s4 + $0x1370] sm:$0xff] }
 0x82f   :  { %11413 = vmatprep.subr.bf16.mxu1 %v11412_v57  ;;  %v3320_v57 = vld [vmem:[%s22345_s4 + $0xe10] sm:$0xff]  ;;  %v11136_v32 = vpack.c.bf16 %v3334_v19, %v3321_v17  ;;  %v3414_v11 = vld [vmem:[%s22345_s4 + $0x1100] sm:$0xff]  ;;  %v3411_v17 = vld [vmem:[%s22345_s4 + $0x10e8] sm:$0xff] }
 0x830   :  { %v11138_v61 = vpack.c.bf16 %v3333_v48, %v3320_v57  ;;  %v3400_v19 = vld [vmem:[%s22345_s4 + $0x1090] sm:$0xff]  ;;  %v3427_v57 = vld [vmem:[%s22345_s4 + $0x1168] sm:$0xff]  ;;  %v11150_v4 = vpack.c.bf16 %v3411_v17, %v3398_v41  ;;  %v3518_v41 = vld [vmem:[%s22345_s4 + $0x1440] sm:$0xff] }
 0x831   :  { %11123 = vmatpush1.bf16.msra.mxu0 %v11122_v12  ;;  %v3360_v12 = vld [vmem:[%s22345_s4 + $0xf50] sm:$0xff] }
 0x832   :  { %11415 = vmatpush1.bf16.msra.mxu1 %v11414_v51  ;;  %11125 = vmatprep.subr.bf16.mxu0 %v11124_v3  ;;  %v11428_v51 = vpack.c.bf16 %v3336_v45, %v3323_v27  ;;  %v3349_v3 = vld [vmem:[%s22345_s4 + $0xef8] sm:$0xff]  ;;  %v3440_v48 = vld [vmem:[%s22345_s4 + $0x11d0] sm:$0xff] }
 0x833   :  { %11417 = vmatprep.subr.bf16.mxu1 %v11416_v2  ;;  %v11140_v2 = vpack.c.bf16 %v3360_v12, %v3347_v10  ;;  %v11432_v28 = vpack.c.bf16 %v3362_v6, %v3349_v3  ;;  %v3413_v27 = vld [vmem:[%s22345_s4 + $0x10f8] sm:$0xff]  ;;  %v3424_v10 = vld [vmem:[%s22345_s4 + $0x1150] sm:$0xff]  ;;  %v11444_v3 = vpack.c.bf16 %v3440_v48, %v3427_v57  ;;  %v3439_v6 = vld [vmem:[%s22345_s4 + $0x11c8] sm:$0xff] }
 0x834   :  { %v3425_v45 = vld [vmem:[%s22345_s4 + $0x1158] sm:$0xff] }
 0x835   :  { %11127 = vmatpush1.bf16.msra.mxu0 %v11126_v34  ;;  %v3373_v34 = vld [vmem:[%s22345_s4 + $0xfb8] sm:$0xff] }
 0x836   :  { %11419 = vmatpush1.bf16.msra.mxu1 %v11418_v1  ;;  %11129 = vmatprep.subr.bf16.mxu0 %v11128_v46  ;;  %v3386_v1 = vld [vmem:[%s22345_s4 + $0x1020] sm:$0xff]  ;;  %v3375_v46 = vld [vmem:[%s22345_s4 + $0xfc8] sm:$0xff]  ;;  %v3437_v12 = vld [vmem:[%s22345_s4 + $0x11b8] sm:$0xff] }
 0x837   :  { %11421 = vmatprep.subr.bf16.mxu1 %v11420_v21  ;;  %v11144_v21 = vpack.c.bf16 %v3386_v1, %v3373_v34  ;;  %v11436_v23 = vpack.c.bf16 %v3388_v33, %v3375_v46  ;;  %v11154_v56 = vpack.c.bf16 %v3437_v12, %v3424_v10  ;;  %v3463_v34 = vld [vmem:[%s22345_s4 + $0x1288] sm:$0xff]  ;;  %v3452_v1 = vld [vmem:[%s22345_s4 + $0x1230] sm:$0xff]  ;;  %v3465_v33 = vld [vmem:[%s22345_s4 + $0x1298] sm:$0xff] }
 0x838   :  { %v11158_v0 = vpack.c.bf16 %v3463_v34, %v3450_v8  ;;  %v3517_v48 = vld [vmem:[%s22345_s4 + $0x1438] sm:$0xff]  ;;  %v3544_v10 = vld [vmem:[%s22345_s4 + $0x1510] sm:$0xff]  ;;  %v3570_v8 = vld [vmem:[%s22345_s4 + $0x15e0] sm:$0xff] }
 0x839   :  { %11131 = vmatpush1.bf16.msra.mxu0 %v11130_v54  ;;  %v3399_v54 = vld [vmem:[%s22345_s4 + $0x1088] sm:$0xff] }
 0x83a   :  { %11423 = vmatpush1.bf16.msra.mxu1 %v11422_v55  ;;  %11133 = vmatprep.subr.bf16.mxu0 %v11132_v49  ;;  %v3412_v55 = vld [vmem:[%s22345_s4 + $0x10f0] sm:$0xff]  ;;  %v3401_v49 = vld [vmem:[%s22345_s4 + $0x1098] sm:$0xff] }
 0x83b   :  { %11425 = vmatprep.subr.bf16.mxu1 %v11424_v36  ;;  %v11438_v36 = vpack.c.bf16 %v3387_v5, %v3374_v14  ;;  %v11148_v16 = vpack.c.bf16 %v3412_v55, %v3399_v54  ;;  %v11450_v14 = vpack.c.bf16 %v3465_v33, %v3452_v1  ;;  %v3476_v5 = vld [vmem:[%s22345_s4 + $0x12f0] sm:$0xff]  ;;  %v3489_v54 = vld [vmem:[%s22345_s4 + $0x1358] sm:$0xff]  ;;  %v3478_v55 = vld [vmem:[%s22345_s4 + $0x1300] sm:$0xff] }
 0x83c   :  { %6338 = vmatmul.mubr.f32.vlgmr.msra.gmra.mrb[10].mxu0 %v23008_v13  ;;  %v11162_v17 = vpack.c.bf16 %v3489_v54, %v3476_v5  ;;  %v3554_v33 = vld [vmem:[%s22345_s4 + $0x1560] sm:$0xff]  ;;  %v3596_v5 = vld [vmem:[%s22345_s4 + $0x16b0] sm:$0xff] }
 0x83d   :  { %6693 = vmatmul.mubr.f32.vlgmr.msra.gmra.mrb[10].mxu1 %v23008_v13  ;;  %11135 = vmatpush1.bf16.msra.mxu0 %v11134_v44  ;;  %v11440_v44 = vpack.c.bf16 %v3414_v11, %v3401_v49  ;;  %v3491_v11 = vld [vmem:[%s22345_s4 + $0x1368] sm:$0xff] }
 0x83e   :  { %6408 = vmatprep.mubr.f32.mxu0 %v15979_v35  ;;  %11427 = vmatpush1.bf16.msra.mxu1 %v11426_v52  ;;  %v3438_v52 = vld [vmem:[%s22345_s4 + $0x11c0] sm:$0xff] }
 0x83f   :  { %6763 = vmatprep.mubr.f32.mxu1 %v15979_v35  ;;  %11137 = vmatprep.subr.bf16.mxu0 %v11136_v32  ;;  %v11442_v32 = vpack.c.bf16 %v3413_v27, %v3400_v19  ;;  %v11152_v53 = vpack.c.bf16 %v3438_v52, %v3425_v45  ;;  %v11454_v19 = vpack.c.bf16 %v3491_v11, %v3478_v55  ;;  %v3502_v27 = vld [vmem:[%s22345_s4 + $0x13c0] sm:$0xff]  ;;  %v3515_v45 = vld [vmem:[%s22345_s4 + $0x1428] sm:$0xff]  ;;  %v3504_v52 = vld [vmem:[%s22345_s4 + $0x13d0] sm:$0xff] }
 0x840   :  { %11429 = vmatprep.subr.bf16.mxu1 %v11428_v51  ;;  %v3426_v51 = vld [vmem:[%s22345_s4 + $0x1160] sm:$0xff]  ;;  %v11166_v12 = vpack.c.bf16 %v3515_v45, %v3502_v27  ;;  %v3580_v11 = vld [vmem:[%s22345_s4 + $0x1630] sm:$0xff] }
 0x841   :  { %11139 = vmatpush1.bf16.msra.mxu0 %v11138_v61  ;;  %v3451_v61 = vld [vmem:[%s22345_s4 + $0x1228] sm:$0xff]  ;;  %v11446_v38 = vpack.c.bf16 %v3439_v6, %v3426_v51  ;;  %v11458_v51 = vpack.c.bf16 %v3517_v48, %v3504_v52  ;;  %v3528_v6 = vld [vmem:[%s22345_s4 + $0x1490] sm:$0xff]  ;;  %v3622_v27 = vld [vmem:[%s22345_s4 + $0x1780] sm:$0xff] }
 0x842   :  { %11431 = vmatpush1.bf16.msra.mxu1 %v11430_v37  ;;  %11141 = vmatprep.subr.bf16.mxu0 %v11140_v2  ;;  %v3464_v37 = vld [vmem:[%s22345_s4 + $0x1290] sm:$0xff]  ;;  %v3453_v2 = vld [vmem:[%s22345_s4 + $0x1238] sm:$0xff]  ;;  %v3606_v48 = vld [vmem:[%s22345_s4 + $0x1700] sm:$0xff] }
 0x843   :  { %11433 = vmatprep.subr.bf16.mxu1 %v11432_v28  ;;  %v11156_v28 = vpack.c.bf16 %v3464_v37, %v3451_v61  ;;  %v11448_v46 = vpack.c.bf16 %v3466_v18, %v3453_v2  ;;  %v3541_v61 = vld [vmem:[%s22345_s4 + $0x14f8] sm:$0xff]  ;;  %v3530_v37 = vld [vmem:[%s22345_s4 + $0x14a0] sm:$0xff]  ;;  %v3543_v18 = vld [vmem:[%s22345_s4 + $0x1508] sm:$0xff] }
 0x844   :  { %v11170_v34 = vpack.c.bf16 %v3541_v61, %v3528_v6  ;;  %v11462_v1 = vpack.c.bf16 %v3543_v18, %v3530_v37  ;;  %v3648_v6 = vld [vmem:[%s22345_s4 + $0x1850] sm:$0xff] }
 0x845   :  { %11143 = vmatpush1.bf16.msra.mxu0 %v11142_v42  ;;  %v3477_v42 = vld [vmem:[%s22345_s4 + $0x12f8] sm:$0xff]  ;;  %v3632_v18 = vld [vmem:[%s22345_s4 + $0x17d0] sm:$0xff] }
 0x846   :  { %11435 = vmatpush1.bf16.msra.mxu1 %v11434_v47  ;;  %11145 = vmatprep.subr.bf16.mxu0 %v11144_v21  ;;  %v3490_v47 = vld [vmem:[%s22345_s4 + $0x1360] sm:$0xff]  ;;  %v3479_v21 = vld [vmem:[%s22345_s4 + $0x1308] sm:$0xff] }
 0x847   :  { %11437 = vmatprep.subr.bf16.mxu1 %v11436_v23  ;;  %v11160_v23 = vpack.c.bf16 %v3490_v47, %v3477_v42  ;;  %v11452_v49 = vpack.c.bf16 %v3492_v7, %v3479_v21  ;;  %v3567_v42 = vld [vmem:[%s22345_s4 + $0x15c8] sm:$0xff]  ;;  %v3556_v47 = vld [vmem:[%s22345_s4 + $0x1570] sm:$0xff]  ;;  %v3569_v7 = vld [vmem:[%s22345_s4 + $0x15d8] sm:$0xff] }
 0x848   :  { %v11174_v54 = vpack.c.bf16 %v3567_v42, %v3554_v33  ;;  %v11466_v55 = vpack.c.bf16 %v3569_v7, %v3556_v47  ;;  %v3674_v33 = vld [vmem:[%s22345_s4 + $0x1920] sm:$0xff] }
 0x849   :  { %11147 = vmatpush1.bf16.msra.mxu0 %v11146_v24  ;;  %v3503_v24 = vld [vmem:[%s22345_s4 + $0x13c8] sm:$0xff]  ;;  %v3658_v7 = vld [vmem:[%s22345_s4 + $0x18a0] sm:$0xff] }
 0x84a   :  { %11439 = vmatpush1.bf16.msra.mxu1 %v11438_v36  ;;  %11149 = vmatprep.subr.bf16.mxu0 %v11148_v16  ;;  %v3516_v36 = vld [vmem:[%s22345_s4 + $0x1430] sm:$0xff]  ;;  %v3505_v16 = vld [vmem:[%s22345_s4 + $0x13d8] sm:$0xff] }
 0x84b   :  { %11441 = vmatprep.subr.bf16.mxu1 %v11440_v44  ;;  %v11164_v44 = vpack.c.bf16 %v3516_v36, %v3503_v24  ;;  %v11456_v57 = vpack.c.bf16 %v3518_v41, %v3505_v16  ;;  %v3593_v24 = vld [vmem:[%s22345_s4 + $0x1698] sm:$0xff]  ;;  %v3582_v36 = vld [vmem:[%s22345_s4 + $0x1640] sm:$0xff]  ;;  %v3595_v41 = vld [vmem:[%s22345_s4 + $0x16a8] sm:$0xff] }
 0x84c   :  { %v11178_v45 = vpack.c.bf16 %v3593_v24, %v3580_v11  ;;  %v11470_v52 = vpack.c.bf16 %v3595_v41, %v3582_v36  ;;  %v3700_v11 = vld [vmem:[%s22345_s4 + $0x19f0] sm:$0xff] }
 0x84d   :  { %11151 = vmatpush1.bf16.msra.mxu0 %v11150_v4  ;;  %v3529_v4 = vld [vmem:[%s22345_s4 + $0x1498] sm:$0xff]  ;;  %v3684_v41 = vld [vmem:[%s22345_s4 + $0x1970] sm:$0xff] }
 0x84e   :  { %11443 = vmatpush1.bf16.msra.mxu1 %v11442_v32  ;;  %11153 = vmatprep.subr.bf16.mxu0 %v11152_v53  ;;  %v3542_v32 = vld [vmem:[%s22345_s4 + $0x1500] sm:$0xff]  ;;  %v3531_v53 = vld [vmem:[%s22345_s4 + $0x14a8] sm:$0xff] }
 0x84f   :  { %11445 = vmatprep.subr.bf16.mxu1 %v11444_v3  ;;  %v11168_v3 = vpack.c.bf16 %v3542_v32, %v3529_v4  ;;  %v11460_v2 = vpack.c.bf16 %v3544_v10, %v3531_v53  ;;  %v3619_v4 = vld [vmem:[%s22345_s4 + $0x1768] sm:$0xff]  ;;  %v3608_v32 = vld [vmem:[%s22345_s4 + $0x1710] sm:$0xff]  ;;  %v3621_v10 = vld [vmem:[%s22345_s4 + $0x1778] sm:$0xff] }
 0x850   :  { %v11182_v61 = vpack.c.bf16 %v3619_v4, %v3606_v48  ;;  %v11474_v37 = vpack.c.bf16 %v3621_v10, %v3608_v32  ;;  %v3726_v48 = vld [vmem:[%s22345_s4 + $0x1ac0] sm:$0xff] }
 0x851   :  { %11155 = vmatpush1.bf16.msra.mxu0 %v11154_v56  ;;  %v3555_v56 = vld [vmem:[%s22345_s4 + $0x1568] sm:$0xff]  ;;  %v3710_v10 = vld [vmem:[%s22345_s4 + $0x1a40] sm:$0xff] }
 0x852   :  { %11447 = vmatpush1.bf16.msra.mxu1 %v11446_v38  ;;  %11157 = vmatprep.subr.bf16.mxu0 %v11156_v28  ;;  %v3568_v38 = vld [vmem:[%s22345_s4 + $0x15d0] sm:$0xff]  ;;  %v3557_v28 = vld [vmem:[%s22345_s4 + $0x1578] sm:$0xff] }
 0x853   :  { %11449 = vmatprep.subr.bf16.mxu1 %v11448_v46  ;;  %v11172_v46 = vpack.c.bf16 %v3568_v38, %v3555_v56  ;;  %v11464_v21 = vpack.c.bf16 %v3570_v8, %v3557_v28  ;;  %v3645_v56 = vld [vmem:[%s22345_s4 + $0x1838] sm:$0xff]  ;;  %v3634_v38 = vld [vmem:[%s22345_s4 + $0x17e0] sm:$0xff]  ;;  %v3647_v8 = vld [vmem:[%s22345_s4 + $0x1848] sm:$0xff] }
 0x854   :  { %v11186_v42 = vpack.c.bf16 %v3645_v56, %v3632_v18  ;;  %v11478_v47 = vpack.c.bf16 %v3647_v8, %v3634_v38  ;;  %v3739_v18 = vld [vmem:[%s22345_s4 + $0x1b28] sm:$0xff]  ;;  %v3752_v56 = vld [vmem:[%s22345_s4 + $0x1b90] sm:$0xff]  ;;  %v3749_v8 = vld [vmem:[%s22345_s4 + $0x1b78] sm:$0xff] }
 0x855   :  { %11159 = vmatpush1.bf16.msra.mxu0 %v11158_v0  ;;  %v3581_v0 = vld [vmem:[%s22345_s4 + $0x1638] sm:$0xff] }
 0x856   :  { %11451 = vmatpush1.bf16.msra.mxu1 %v11450_v14  ;;  %11161 = vmatprep.subr.bf16.mxu0 %v11160_v23  ;;  %v3594_v14 = vld [vmem:[%s22345_s4 + $0x16a0] sm:$0xff]  ;;  %v3583_v23 = vld [vmem:[%s22345_s4 + $0x1648] sm:$0xff] }
 0x857   :  { %11453 = vmatprep.subr.bf16.mxu1 %v11452_v49  ;;  %v11176_v49 = vpack.c.bf16 %v3594_v14, %v3581_v0  ;;  %v11468_v16 = vpack.c.bf16 %v3596_v5, %v3583_v23  ;;  %v3671_v0 = vld [vmem:[%s22345_s4 + $0x1908] sm:$0xff]  ;;  %v3660_v14 = vld [vmem:[%s22345_s4 + $0x18b0] sm:$0xff]  ;;  %v3673_v5 = vld [vmem:[%s22345_s4 + $0x1918] sm:$0xff] }
 0x858   :  { %v11190_v24 = vpack.c.bf16 %v3671_v0, %v3658_v7  ;;  %v11482_v36 = vpack.c.bf16 %v3673_v5, %v3660_v14  ;;  %v3778_v7 = vld [vmem:[%s22345_s4 + $0x1c60] sm:$0xff] }
 0x859   :  { %11163 = vmatpush1.bf16.msra.mxu0 %v11162_v17  ;;  %v3607_v17 = vld [vmem:[%s22345_s4 + $0x1708] sm:$0xff]  ;;  %v3762_v5 = vld [vmem:[%s22345_s4 + $0x1be0] sm:$0xff] }
 0x85a   :  { %11455 = vmatpush1.bf16.msra.mxu1 %v11454_v19  ;;  %11165 = vmatprep.subr.bf16.mxu0 %v11164_v44  ;;  %v3620_v19 = vld [vmem:[%s22345_s4 + $0x1770] sm:$0xff]  ;;  %v3609_v44 = vld [vmem:[%s22345_s4 + $0x1718] sm:$0xff] }
 0x85b   :  { %11457 = vmatprep.subr.bf16.mxu1 %v11456_v57  ;;  %v11180_v57 = vpack.c.bf16 %v3620_v19, %v3607_v17  ;;  %v11472_v53 = vpack.c.bf16 %v3622_v27, %v3609_v44  ;;  %v3697_v17 = vld [vmem:[%s22345_s4 + $0x19d8] sm:$0xff]  ;;  %v3686_v19 = vld [vmem:[%s22345_s4 + $0x1980] sm:$0xff]  ;;  %v3699_v27 = vld [vmem:[%s22345_s4 + $0x19e8] sm:$0xff] }
 0x85c   :  { %v11194_v4 = vpack.c.bf16 %v3697_v17, %v3684_v41  ;;  %v11486_v32 = vpack.c.bf16 %v3699_v27, %v3686_v19  ;;  %v3804_v41 = vld [vmem:[%s22345_s4 + $0x1d30] sm:$0xff] }
 0x85d   :  { %11167 = vmatpush1.bf16.msra.mxu0 %v11166_v12  ;;  %v3633_v12 = vld [vmem:[%s22345_s4 + $0x17d8] sm:$0xff]  ;;  %v3788_v27 = vld [vmem:[%s22345_s4 + $0x1cb0] sm:$0xff] }
 0x85e   :  { %11459 = vmatpush1.bf16.msra.mxu1 %v11458_v51  ;;  %11169 = vmatprep.subr.bf16.mxu0 %v11168_v3  ;;  %v3646_v51 = vld [vmem:[%s22345_s4 + $0x1840] sm:$0xff]  ;;  %v3635_v3 = vld [vmem:[%s22345_s4 + $0x17e8] sm:$0xff] }
 0x85f   :  { %11461 = vmatprep.subr.bf16.mxu1 %v11460_v2  ;;  %v11184_v2 = vpack.c.bf16 %v3646_v51, %v3633_v12  ;;  %v11476_v28 = vpack.c.bf16 %v3648_v6, %v3635_v3  ;;  %v3723_v12 = vld [vmem:[%s22345_s4 + $0x1aa8] sm:$0xff]  ;;  %v3712_v3 = vld [vmem:[%s22345_s4 + $0x1a50] sm:$0xff]  ;;  %v3725_v6 = vld [vmem:[%s22345_s4 + $0x1ab8] sm:$0xff] }
 0x860   :  { %v11490_v38 = vpack.c.bf16 %v3725_v6, %v3712_v3  ;;  %v3814_v6 = vld [vmem:[%s22345_s4 + $0x1d80] sm:$0xff] }
 0x861   :  { %11171 = vmatpush1.bf16.msra.mxu0 %v11170_v34  ;;  %v3659_v34 = vld [vmem:[%s22345_s4 + $0x18a8] sm:$0xff] }
 0x862   :  { %11463 = vmatpush1.bf16.msra.mxu1 %v11462_v1  ;;  %11173 = vmatprep.subr.bf16.mxu0 %v11172_v46  ;;  %v3672_v1 = vld [vmem:[%s22345_s4 + $0x1910] sm:$0xff]  ;;  %v3661_v46 = vld [vmem:[%s22345_s4 + $0x18b8] sm:$0xff] }
 0x863   :  { %11465 = vmatprep.subr.bf16.mxu1 %v11464_v21  ;;  %v11188_v21 = vpack.c.bf16 %v3672_v1, %v3659_v34  ;;  %v11480_v23 = vpack.c.bf16 %v3674_v33, %v3661_v46  ;;  %v3738_v34 = vld [vmem:[%s22345_s4 + $0x1b20] sm:$0xff]  ;;  %v3751_v46 = vld [vmem:[%s22345_s4 + $0x1b88] sm:$0xff] }
 0x864   :  { %v3763_v33 = vld [vmem:[%s22345_s4 + $0x1be8] sm:$0xff]  ;;  %v11494_v14 = vpack.c.bf16 %v3751_v46, %v3738_v34 }
 0x865   :  { %11175 = vmatpush1.bf16.msra.mxu0 %v11174_v54  ;;  %v3685_v54 = vld [vmem:[%s22345_s4 + $0x1978] sm:$0xff] }
 0x866   :  { %11467 = vmatpush1.bf16.msra.mxu1 %v11466_v55  ;;  %11177 = vmatprep.subr.bf16.mxu0 %v11176_v49  ;;  %v3698_v55 = vld [vmem:[%s22345_s4 + $0x19e0] sm:$0xff]  ;;  %v3687_v49 = vld [vmem:[%s22345_s4 + $0x1988] sm:$0xff] }
 0x867   :  { %11469 = vmatprep.subr.bf16.mxu1 %v11468_v16  ;;  %v11192_v16 = vpack.c.bf16 %v3698_v55, %v3685_v54  ;;  %v11484_v44 = vpack.c.bf16 %v3700_v11, %v3687_v49  ;;  %v3775_v54 = vld [vmem:[%s22345_s4 + $0x1c48] sm:$0xff]  ;;  %v3764_v55 = vld [vmem:[%s22345_s4 + $0x1bf0] sm:$0xff]  ;;  %v3777_v11 = vld [vmem:[%s22345_s4 + $0x1c58] sm:$0xff] }
 0x868   :  { %v11206_v17 = vpack.c.bf16 %v3775_v54, %v3762_v5  ;;  %v11498_v19 = vpack.c.bf16 %v3777_v11, %v3764_v55  ;;  %v3882_v5 = vld [vmem:[%s22345_s4 + $0x1fa0] sm:$0xff] }
 0x869   :  { %11179 = vmatpush1.bf16.msra.mxu0 %v11178_v45  ;;  %v3711_v45 = vld [vmem:[%s22345_s4 + $0x1a48] sm:$0xff]  ;;  %v3866_v11 = vld [vmem:[%s22345_s4 + $0x1f20] sm:$0xff] }
 0x86a   :  { %11471 = vmatpush1.bf16.msra.mxu1 %v11470_v52  ;;  %11181 = vmatprep.subr.bf16.mxu0 %v11180_v57  ;;  %v3724_v52 = vld [vmem:[%s22345_s4 + $0x1ab0] sm:$0xff]  ;;  %v3713_v57 = vld [vmem:[%s22345_s4 + $0x1a58] sm:$0xff] }
 0x86b   :  { %11473 = vmatprep.subr.bf16.mxu1 %v11472_v53  ;;  %v11196_v53 = vpack.c.bf16 %v3724_v52, %v3711_v45  ;;  %v11488_v51 = vpack.c.bf16 %v3726_v48, %v3713_v57  ;;  %v3801_v45 = vld [vmem:[%s22345_s4 + $0x1d18] sm:$0xff]  ;;  %v3790_v52 = vld [vmem:[%s22345_s4 + $0x1cc0] sm:$0xff]  ;;  %v3803_v48 = vld [vmem:[%s22345_s4 + $0x1d28] sm:$0xff] }
 0x86d   :  { %11183 = vmatpush1.bf16.msra.mxu0 %v11182_v61  ;;  %v3737_v61 = vld [vmem:[%s22345_s4 + $0x1b18] sm:$0xff] }
 0x86e   :  { %11475 = vmatpush1.bf16.msra.mxu1 %v11474_v37  ;;  %11185 = vmatprep.subr.bf16.mxu0 %v11184_v2  ;;  %v3750_v37 = vld [vmem:[%s22345_s4 + $0x1b80] sm:$0xff]  ;;  %v11198_v2 = vpack.c.bf16 %v3723_v12, %v3710_v10  ;;  %v11210_v12 = vpack.c.bf16 %v3801_v45, %v3788_v27  ;;  %v3908_v27 = vld [vmem:[%s22345_s4 + $0x2070] sm:$0xff] }
 0x86f   :  { %11477 = vmatprep.subr.bf16.mxu1 %v11476_v28  ;;  %v3736_v28 = vld [vmem:[%s22345_s4 + $0x1b10] sm:$0xff]  ;;  %v11200_v1 = vpack.c.bf16 %v3750_v37, %v3737_v61  ;;  %v3830_v10 = vld [vmem:[%s22345_s4 + $0x1e00] sm:$0xff]  ;;  %v3827_v61 = vld [vmem:[%s22345_s4 + $0x1de8] sm:$0xff] }
 0x870   :  { %v11202_v0 = vpack.c.bf16 %v3749_v8, %v3736_v28  ;;  %v3816_v37 = vld [vmem:[%s22345_s4 + $0x1d90] sm:$0xff]  ;;  %v3843_v28 = vld [vmem:[%s22345_s4 + $0x1e68] sm:$0xff]  ;;  %v11214_v34 = vpack.c.bf16 %v3827_v61, %v3814_v6  ;;  %v3934_v6 = vld [vmem:[%s22345_s4 + $0x2140] sm:$0xff] }
 0x871   :  { %11187 = vmatpush1.bf16.msra.mxu0 %v11186_v42  ;;  %v3776_v42 = vld [vmem:[%s22345_s4 + $0x1c50] sm:$0xff] }
 0x872   :  { %11479 = vmatpush1.bf16.msra.mxu1 %v11478_v47  ;;  %11189 = vmatprep.subr.bf16.mxu0 %v11188_v21  ;;  %v11492_v47 = vpack.c.bf16 %v3752_v56, %v3739_v18  ;;  %v3765_v21 = vld [vmem:[%s22345_s4 + $0x1bf8] sm:$0xff]  ;;  %v3856_v8 = vld [vmem:[%s22345_s4 + $0x1ed0] sm:$0xff] }
 0x873   :  { %11481 = vmatprep.subr.bf16.mxu1 %v11480_v23  ;;  %v11204_v23 = vpack.c.bf16 %v3776_v42, %v3763_v33  ;;  %v11496_v49 = vpack.c.bf16 %v3778_v7, %v3765_v21  ;;  %v3829_v18 = vld [vmem:[%s22345_s4 + $0x1df8] sm:$0xff]  ;;  %v3840_v33 = vld [vmem:[%s22345_s4 + $0x1e50] sm:$0xff]  ;;  %v11508_v21 = vpack.c.bf16 %v3856_v8, %v3843_v28  ;;  %v3855_v7 = vld [vmem:[%s22345_s4 + $0x1ec8] sm:$0xff] }
 0x874   :  { %v3841_v56 = vld [vmem:[%s22345_s4 + $0x1e58] sm:$0xff] }
 0x875   :  { %11191 = vmatpush1.bf16.msra.mxu0 %v11190_v24  ;;  %v3789_v24 = vld [vmem:[%s22345_s4 + $0x1cb8] sm:$0xff] }
 0x876   :  { %11483 = vmatpush1.bf16.msra.mxu1 %v11482_v36  ;;  %11193 = vmatprep.subr.bf16.mxu0 %v11192_v16  ;;  %v3802_v36 = vld [vmem:[%s22345_s4 + $0x1d20] sm:$0xff]  ;;  %v3791_v16 = vld [vmem:[%s22345_s4 + $0x1cc8] sm:$0xff]  ;;  %v3853_v42 = vld [vmem:[%s22345_s4 + $0x1eb8] sm:$0xff] }
 0x877   :  { %11485 = vmatprep.subr.bf16.mxu1 %v11484_v44  ;;  %v11208_v44 = vpack.c.bf16 %v3802_v36, %v3789_v24  ;;  %v11500_v57 = vpack.c.bf16 %v3804_v41, %v3791_v16  ;;  %v11218_v54 = vpack.c.bf16 %v3853_v42, %v3840_v33  ;;  %v3879_v24 = vld [vmem:[%s22345_s4 + $0x1f88] sm:$0xff]  ;;  %v3868_v36 = vld [vmem:[%s22345_s4 + $0x1f30] sm:$0xff]  ;;  %v3881_v41 = vld [vmem:[%s22345_s4 + $0x1f98] sm:$0xff] }
 0x878   :  { %v11222_v45 = vpack.c.bf16 %v3879_v24, %v3866_v11  ;;  %v3933_v8 = vld [vmem:[%s22345_s4 + $0x2138] sm:$0xff]  ;;  %v3960_v33 = vld [vmem:[%s22345_s4 + $0x2210] sm:$0xff]  ;;  %v3986_v11 = vld [vmem:[%s22345_s4 + $0x22e0] sm:$0xff] }
 0x879   :  { %11195 = vmatpush1.bf16.msra.mxu0 %v11194_v4  ;;  %v3815_v4 = vld [vmem:[%s22345_s4 + $0x1d88] sm:$0xff] }
 0x87a   :  { %11487 = vmatpush1.bf16.msra.mxu1 %v11486_v32  ;;  %11197 = vmatprep.subr.bf16.mxu0 %v11196_v53  ;;  %v3828_v32 = vld [vmem:[%s22345_s4 + $0x1df0] sm:$0xff]  ;;  %v3817_v53 = vld [vmem:[%s22345_s4 + $0x1d98] sm:$0xff] }
 0x87b   :  { %11489 = vmatprep.subr.bf16.mxu1 %v11488_v51  ;;  %v11502_v51 = vpack.c.bf16 %v3803_v48, %v3790_v52  ;;  %v11212_v3 = vpack.c.bf16 %v3828_v32, %v3815_v4  ;;  %v11514_v52 = vpack.c.bf16 %v3881_v41, %v3868_v36  ;;  %v3892_v48 = vld [vmem:[%s22345_s4 + $0x1ff0] sm:$0xff]  ;;  %v3905_v4 = vld [vmem:[%s22345_s4 + $0x2058] sm:$0xff]  ;;  %v3894_v32 = vld [vmem:[%s22345_s4 + $0x2000] sm:$0xff] }
 0x87c   :  { %6409 = vmatmul.mubr.f32.vlgmr.msra.gmra.mrb[10].mxu0 %v15464_v9  ;;  %v11226_v61 = vpack.c.bf16 %v3905_v4, %v3892_v48  ;;  %v3970_v41 = vld [vmem:[%s22345_s4 + $0x2260] sm:$0xff]  ;;  %v4012_v48 = vld [vmem:[%s22345_s4 + $0x23b0] sm:$0xff] }
 0x87d   :  { %6764 = vmatmul.mubr.f32.vlgmr.msra.gmra.mrb[10].mxu1 %v15464_v9  ;;  %11199 = vmatpush1.bf16.msra.mxu0 %v11198_v2  ;;  %v11504_v2 = vpack.c.bf16 %v3830_v10, %v3817_v53  ;;  %v3907_v10 = vld [vmem:[%s22345_s4 + $0x2068] sm:$0xff] }
 0x87e   :  { %6479 = vmatprep.mubr.f32.mxu0 %v16375_v62  ;;  %11491 = vmatpush1.bf16.msra.mxu1 %v11490_v38  ;;  %v3854_v38 = vld [vmem:[%s22345_s4 + $0x1ec0] sm:$0xff] }
 0x87f   :  { %6834 = vmatprep.mubr.f32.mxu1 %v16375_v62  ;;  %11201 = vmatprep.subr.bf16.mxu0 %v11200_v1  ;;  %v11506_v1 = vpack.c.bf16 %v3829_v18, %v3816_v37  ;;  %v11216_v46 = vpack.c.bf16 %v3854_v38, %v3841_v56  ;;  %v11518_v37 = vpack.c.bf16 %v3907_v10, %v3894_v32  ;;  %v3918_v18 = vld [vmem:[%s22345_s4 + $0x20c0] sm:$0xff]  ;;  %v3931_v56 = vld [vmem:[%s22345_s4 + $0x2128] sm:$0xff]  ;;  %v3920_v38 = vld [vmem:[%s22345_s4 + $0x20d0] sm:$0xff] }
 0x880   :  { %11493 = vmatprep.subr.bf16.mxu1 %v11492_v47  ;;  %v3842_v47 = vld [vmem:[%s22345_s4 + $0x1e60] sm:$0xff]  ;;  %v11230_v42 = vpack.c.bf16 %v3931_v56, %v3918_v18  ;;  %v3996_v10 = vld [vmem:[%s22345_s4 + $0x2330] sm:$0xff] }
 0x881   :  { %11203 = vmatpush1.bf16.msra.mxu0 %v11202_v0  ;;  %v3867_v0 = vld [vmem:[%s22345_s4 + $0x1f28] sm:$0xff]  ;;  %v11510_v55 = vpack.c.bf16 %v3855_v7, %v3842_v47  ;;  %v11522_v47 = vpack.c.bf16 %v3933_v8, %v3920_v38  ;;  %v3944_v7 = vld [vmem:[%s22345_s4 + $0x2190] sm:$0xff]  ;;  %v4038_v18 = vld [vmem:[%s22345_s4 + $0x2480] sm:$0xff] }
 0x882   :  { %11495 = vmatpush1.bf16.msra.mxu1 %v11494_v14  ;;  %11205 = vmatprep.subr.bf16.mxu0 %v11204_v23  ;;  %v3880_v14 = vld [vmem:[%s22345_s4 + $0x1f90] sm:$0xff]  ;;  %v3869_v23 = vld [vmem:[%s22345_s4 + $0x1f38] sm:$0xff]  ;;  %v4022_v8 = vld [vmem:[%s22345_s4 + $0x2400] sm:$0xff] }
 0x883   :  { %11497 = vmatprep.subr.bf16.mxu1 %v11496_v49  ;;  %v11220_v49 = vpack.c.bf16 %v3880_v14, %v3867_v0  ;;  %v11512_v16 = vpack.c.bf16 %v3882_v5, %v3869_v23  ;;  %v3957_v0 = vld [vmem:[%s22345_s4 + $0x21f8] sm:$0xff]  ;;  %v3946_v14 = vld [vmem:[%s22345_s4 + $0x21a0] sm:$0xff]  ;;  %v3959_v5 = vld [vmem:[%s22345_s4 + $0x2208] sm:$0xff] }
 0x884   :  { %v11234_v24 = vpack.c.bf16 %v3957_v0, %v3944_v7  ;;  %v11526_v36 = vpack.c.bf16 %v3959_v5, %v3946_v14  ;;  %v4064_v7 = vld [vmem:[%s22345_s4 + $0x2550] sm:$0xff] }
 0x885   :  { %11207 = vmatpush1.bf16.msra.mxu0 %v11206_v17  ;;  %v3893_v17 = vld [vmem:[%s22345_s4 + $0x1ff8] sm:$0xff]  ;;  %v4048_v5 = vld [vmem:[%s22345_s4 + $0x24d0] sm:$0xff] }
 0x886   :  { %11499 = vmatpush1.bf16.msra.mxu1 %v11498_v19  ;;  %11209 = vmatprep.subr.bf16.mxu0 %v11208_v44  ;;  %v3906_v19 = vld [vmem:[%s22345_s4 + $0x2060] sm:$0xff]  ;;  %v3895_v44 = vld [vmem:[%s22345_s4 + $0x2008] sm:$0xff] }
 0x887   :  { %11501 = vmatprep.subr.bf16.mxu1 %v11500_v57  ;;  %v11224_v57 = vpack.c.bf16 %v3906_v19, %v3893_v17  ;;  %v11516_v53 = vpack.c.bf16 %v3908_v27, %v3895_v44  ;;  %v3983_v17 = vld [vmem:[%s22345_s4 + $0x22c8] sm:$0xff]  ;;  %v3972_v19 = vld [vmem:[%s22345_s4 + $0x2270] sm:$0xff]  ;;  %v3985_v27 = vld [vmem:[%s22345_s4 + $0x22d8] sm:$0xff] }
 0x888   :  { %v11238_v4 = vpack.c.bf16 %v3983_v17, %v3970_v41  ;;  %v11530_v32 = vpack.c.bf16 %v3985_v27, %v3972_v19  ;;  %v4090_v41 = vld [vmem:[%s22345_s4 + $0x2620] sm:$0xff] }
 0x889   :  { %11211 = vmatpush1.bf16.msra.mxu0 %v11210_v12  ;;  %v3919_v12 = vld [vmem:[%s22345_s4 + $0x20c8] sm:$0xff]  ;;  %v4074_v27 = vld [vmem:[%s22345_s4 + $0x25a0] sm:$0xff] }
 0x88a   :  { %11503 = vmatpush1.bf16.msra.mxu1 %v11502_v51  ;;  %11213 = vmatprep.subr.bf16.mxu0 %v11212_v3  ;;  %v3932_v51 = vld [vmem:[%s22345_s4 + $0x2130] sm:$0xff]  ;;  %v3921_v3 = vld [vmem:[%s22345_s4 + $0x20d8] sm:$0xff] }
 0x88b   :  { %11505 = vmatprep.subr.bf16.mxu1 %v11504_v2  ;;  %v11228_v2 = vpack.c.bf16 %v3932_v51, %v3919_v12  ;;  %v11520_v28 = vpack.c.bf16 %v3934_v6, %v3921_v3  ;;  %v4009_v12 = vld [vmem:[%s22345_s4 + $0x2398] sm:$0xff]  ;;  %v3998_v51 = vld [vmem:[%s22345_s4 + $0x2340] sm:$0xff]  ;;  %v4011_v6 = vld [vmem:[%s22345_s4 + $0x23a8] sm:$0xff] }
 0x88c   :  { %v11242_v56 = vpack.c.bf16 %v4009_v12, %v3996_v10  ;;  %v11534_v38 = vpack.c.bf16 %v4011_v6, %v3998_v51  ;;  %v4116_v10 = vld [vmem:[%s22345_s4 + $0x26f0] sm:$0xff] }
 0x88d   :  { %11215 = vmatpush1.bf16.msra.mxu0 %v11214_v34  ;;  %v3945_v34 = vld [vmem:[%s22345_s4 + $0x2198] sm:$0xff]  ;;  %v4100_v6 = vld [vmem:[%s22345_s4 + $0x2670] sm:$0xff] }
 0x88e   :  { %11507 = vmatpush1.bf16.msra.mxu1 %v11506_v1  ;;  %11217 = vmatprep.subr.bf16.mxu0 %v11216_v46  ;;  %v3958_v1 = vld [vmem:[%s22345_s4 + $0x2200] sm:$0xff]  ;;  %v3947_v46 = vld [vmem:[%s22345_s4 + $0x21a8] sm:$0xff] }
 0x88f   :  { %11509 = vmatprep.subr.bf16.mxu1 %v11508_v21  ;;  %v11232_v21 = vpack.c.bf16 %v3958_v1, %v3945_v34  ;;  %v11524_v23 = vpack.c.bf16 %v3960_v33, %v3947_v46  ;;  %v4035_v34 = vld [vmem:[%s22345_s4 + $0x2468] sm:$0xff]  ;;  %v4024_v1 = vld [vmem:[%s22345_s4 + $0x2410] sm:$0xff]  ;;  %v4037_v33 = vld [vmem:[%s22345_s4 + $0x2478] sm:$0xff] }
 0x890   :  { %v11246_v0 = vpack.c.bf16 %v4035_v34, %v4022_v8  ;;  %v11538_v14 = vpack.c.bf16 %v4037_v33, %v4024_v1  ;;  %v4142_v8 = vld [vmem:[%s22345_s4 + $0x27c0] sm:$0xff] }
 0x891   :  { %11219 = vmatpush1.bf16.msra.mxu0 %v11218_v54  ;;  %v3971_v54 = vld [vmem:[%s22345_s4 + $0x2268] sm:$0xff]  ;;  %v4126_v33 = vld [vmem:[%s22345_s4 + $0x2740] sm:$0xff] }
 0x892   :  { %11511 = vmatpush1.bf16.msra.mxu1 %v11510_v55  ;;  %11221 = vmatprep.subr.bf16.mxu0 %v11220_v49  ;;  %v3984_v55 = vld [vmem:[%s22345_s4 + $0x22d0] sm:$0xff]  ;;  %v3973_v49 = vld [vmem:[%s22345_s4 + $0x2278] sm:$0xff] }
 0x893   :  { %11513 = vmatprep.subr.bf16.mxu1 %v11512_v16  ;;  %v11236_v16 = vpack.c.bf16 %v3984_v55, %v3971_v54  ;;  %v11528_v44 = vpack.c.bf16 %v3986_v11, %v3973_v49  ;;  %v4061_v54 = vld [vmem:[%s22345_s4 + $0x2538] sm:$0xff]  ;;  %v4050_v55 = vld [vmem:[%s22345_s4 + $0x24e0] sm:$0xff]  ;;  %v4063_v11 = vld [vmem:[%s22345_s4 + $0x2548] sm:$0xff] }
 0x894   :  { %v11250_v17 = vpack.c.bf16 %v4061_v54, %v4048_v5  ;;  %v11542_v19 = vpack.c.bf16 %v4063_v11, %v4050_v55  ;;  %v4155_v5 = vld [vmem:[%s22345_s4 + $0x2828] sm:$0xff]  ;;  %v4168_v54 = vld [vmem:[%s22345_s4 + $0x2890] sm:$0xff]  ;;  %v4165_v11 = vld [vmem:[%s22345_s4 + $0x2878] sm:$0xff] }
 0x895   :  { %11223 = vmatpush1.bf16.msra.mxu0 %v11222_v45  ;;  %v3997_v45 = vld [vmem:[%s22345_s4 + $0x2338] sm:$0xff] }
 0x896   :  { %11515 = vmatpush1.bf16.msra.mxu1 %v11514_v52  ;;  %11225 = vmatprep.subr.bf16.mxu0 %v11224_v57  ;;  %v4010_v52 = vld [vmem:[%s22345_s4 + $0x23a0] sm:$0xff]  ;;  %v3999_v57 = vld [vmem:[%s22345_s4 + $0x2348] sm:$0xff] }
 0x897   :  { %11517 = vmatprep.subr.bf16.mxu1 %v11516_v53  ;;  %v11240_v53 = vpack.c.bf16 %v4010_v52, %v3997_v45  ;;  %v11532_v3 = vpack.c.bf16 %v4012_v48, %v3999_v57  ;;  %v4087_v45 = vld [vmem:[%s22345_s4 + $0x2608] sm:$0xff]  ;;  %v4076_v52 = vld [vmem:[%s22345_s4 + $0x25b0] sm:$0xff]  ;;  %v4089_v48 = vld [vmem:[%s22345_s4 + $0x2618] sm:$0xff] }
 0x898   :  { %v11254_v12 = vpack.c.bf16 %v4087_v45, %v4074_v27  ;;  %v11546_v51 = vpack.c.bf16 %v4089_v48, %v4076_v52  ;;  %v4194_v27 = vld [vmem:[%s22345_s4 + $0x2960] sm:$0xff] }
 0x899   :  { %11227 = vmatpush1.bf16.msra.mxu0 %v11226_v61  ;;  %v4023_v61 = vld [vmem:[%s22345_s4 + $0x2408] sm:$0xff]  ;;  %v4178_v48 = vld [vmem:[%s22345_s4 + $0x28e0] sm:$0xff] }
 0x89a   :  { %11519 = vmatpush1.bf16.msra.mxu1 %v11518_v37  ;;  %11229 = vmatprep.subr.bf16.mxu0 %v11228_v2  ;;  %v4036_v37 = vld [vmem:[%s22345_s4 + $0x2470] sm:$0xff]  ;;  %v4025_v2 = vld [vmem:[%s22345_s4 + $0x2418] sm:$0xff] }
 0x89b   :  { %11521 = vmatprep.subr.bf16.mxu1 %v11520_v28  ;;  %v11244_v28 = vpack.c.bf16 %v4036_v37, %v4023_v61  ;;  %v11536_v46 = vpack.c.bf16 %v4038_v18, %v4025_v2  ;;  %v4113_v61 = vld [vmem:[%s22345_s4 + $0x26d8] sm:$0xff]  ;;  %v4102_v37 = vld [vmem:[%s22345_s4 + $0x2680] sm:$0xff]  ;;  %v4115_v18 = vld [vmem:[%s22345_s4 + $0x26e8] sm:$0xff] }
 0x89c   :  { %v11258_v34 = vpack.c.bf16 %v4113_v61, %v4100_v6  ;;  %v11550_v1 = vpack.c.bf16 %v4115_v18, %v4102_v37  ;;  %v4220_v6 = vld [vmem:[%s22345_s4 + $0x2a30] sm:$0xff] }
 0x89d   :  { %11231 = vmatpush1.bf16.msra.mxu0 %v11230_v42  ;;  %v4049_v42 = vld [vmem:[%s22345_s4 + $0x24d8] sm:$0xff]  ;;  %v4204_v18 = vld [vmem:[%s22345_s4 + $0x29b0] sm:$0xff] }
 0x89e   :  { %11523 = vmatpush1.bf16.msra.mxu1 %v11522_v47  ;;  %11233 = vmatprep.subr.bf16.mxu0 %v11232_v21  ;;  %v4062_v47 = vld [vmem:[%s22345_s4 + $0x2540] sm:$0xff]  ;;  %v4051_v21 = vld [vmem:[%s22345_s4 + $0x24e8] sm:$0xff] }
 0x89f   :  { %11525 = vmatprep.subr.bf16.mxu1 %v11524_v23  ;;  %v11248_v23 = vpack.c.bf16 %v4062_v47, %v4049_v42  ;;  %v11540_v49 = vpack.c.bf16 %v4064_v7, %v4051_v21  ;;  %v4139_v42 = vld [vmem:[%s22345_s4 + $0x27a8] sm:$0xff]  ;;  %v4128_v21 = vld [vmem:[%s22345_s4 + $0x2750] sm:$0xff]  ;;  %v4141_v7 = vld [vmem:[%s22345_s4 + $0x27b8] sm:$0xff] }
 0x8a0   :  { %v11554_v55 = vpack.c.bf16 %v4141_v7, %v4128_v21 }
 0x8a1   :  { %11235 = vmatpush1.bf16.msra.mxu0 %v11234_v24  ;;  %v4075_v24 = vld [vmem:[%s22345_s4 + $0x25a8] sm:$0xff] }
 0x8a2   :  { %11527 = vmatpush1.bf16.msra.mxu1 %v11526_v36  ;;  %11237 = vmatprep.subr.bf16.mxu0 %v11236_v16  ;;  %v4088_v36 = vld [vmem:[%s22345_s4 + $0x2610] sm:$0xff]  ;;  %v4077_v16 = vld [vmem:[%s22345_s4 + $0x25b8] sm:$0xff] }
 0x8a3   :  { %11529 = vmatprep.subr.bf16.mxu1 %v11528_v44  ;;  %v11252_v44 = vpack.c.bf16 %v4088_v36, %v4075_v24  ;;  %v11544_v57 = vpack.c.bf16 %v4090_v41, %v4077_v16  ;;  %v4154_v24 = vld [vmem:[%s22345_s4 + $0x2820] sm:$0xff]  ;;  %v4167_v16 = vld [vmem:[%s22345_s4 + $0x2888] sm:$0xff] }
 0x8a4   :  { %v4179_v41 = vld [vmem:[%s22345_s4 + $0x28e8] sm:$0xff]  ;;  %v11558_v52 = vpack.c.bf16 %v4167_v16, %v4154_v24  ;;  %v4811_v24 = vsub.s32 6, %v18638_v40 }
 0x8a5   :  { %11239 = vmatpush1.bf16.msra.mxu0 %v11238_v4  ;;  %v4101_v4 = vld [vmem:[%s22345_s4 + $0x2678] sm:$0xff]  ;;  %v4259_v16 = vld [vmem:[%s22345_s4 + $0x2b68] sm:$0xff] }
 0x8a6   :  { %11531 = vmatpush1.bf16.msra.mxu1 %v11530_v32  ;;  %11241 = vmatprep.subr.bf16.mxu0 %v11240_v53  ;;  %v4114_v32 = vld [vmem:[%s22345_s4 + $0x26e0] sm:$0xff]  ;;  %v4103_v53 = vld [vmem:[%s22345_s4 + $0x2688] sm:$0xff] }
 0x8a7   :  { %11533 = vmatprep.subr.bf16.mxu1 %v11532_v3  ;;  %v11256_v3 = vpack.c.bf16 %v4114_v32, %v4101_v4  ;;  %v11548_v2 = vpack.c.bf16 %v4116_v10, %v4103_v53  ;;  %v4191_v4 = vld [vmem:[%s22345_s4 + $0x2948] sm:$0xff]  ;;  %v4180_v32 = vld [vmem:[%s22345_s4 + $0x28f0] sm:$0xff]  ;;  %v4193_v10 = vld [vmem:[%s22345_s4 + $0x2958] sm:$0xff] }
 0x8a8   :  { %v11270_v61 = vpack.c.bf16 %v4191_v4, %v4178_v48  ;;  %v11562_v37 = vpack.c.bf16 %v4193_v10, %v4180_v32  ;;  %v4258_v48 = vld [vmem:[%s22345_s4 + $0x2b60] sm:$0xff]  ;;  %v4283_v10 = vld [vmem:[%s22345_s4 + $0x2c28] sm:$0xff] }
 0x8a9   :  { %11243 = vmatpush1.bf16.msra.mxu0 %v11242_v56  ;;  %v4127_v56 = vld [vmem:[%s22345_s4 + $0x2748] sm:$0xff] }
 0x8aa   :  { %11535 = vmatpush1.bf16.msra.mxu1 %v11534_v38  ;;  %11245 = vmatprep.subr.bf16.mxu0 %v11244_v28  ;;  %v4140_v38 = vld [vmem:[%s22345_s4 + $0x27b0] sm:$0xff]  ;;  %v4129_v28 = vld [vmem:[%s22345_s4 + $0x2758] sm:$0xff] }
 0x8ab   :  { %11537 = vmatprep.subr.bf16.mxu1 %v11536_v46  ;;  %v11260_v46 = vpack.c.bf16 %v4140_v38, %v4127_v56  ;;  %v11552_v47 = vpack.c.bf16 %v4142_v8, %v4129_v28  ;;  %v4217_v56 = vld [vmem:[%s22345_s4 + $0x2a18] sm:$0xff]  ;;  %v4206_v38 = vld [vmem:[%s22345_s4 + $0x29c0] sm:$0xff]  ;;  %v4219_v8 = vld [vmem:[%s22345_s4 + $0x2a28] sm:$0xff] }
 0x8ac   :  { %v11566_v21 = vpack.c.bf16 %v4219_v8, %v4206_v38  ;;  %v4295_v8 = vld [vmem:[%s22345_s4 + $0x2c88] sm:$0xff] }
 0x8ad   :  { %11247 = vmatpush1.bf16.msra.mxu0 %v11246_v0  ;;  %v4153_v0 = vld [vmem:[%s22345_s4 + $0x2818] sm:$0xff] }
 0x8ae   :  { %11539 = vmatpush1.bf16.msra.mxu1 %v11538_v14  ;;  %11249 = vmatprep.subr.bf16.mxu0 %v11248_v23  ;;  %v4166_v14 = vld [vmem:[%s22345_s4 + $0x2880] sm:$0xff]  ;;  %v11262_v23 = vpack.c.bf16 %v4139_v42, %v4126_v33  ;;  %v4791_v42 = vsub.s32 1, %v18638_v40 }
 0x8af   :  { %11541 = vmatprep.subr.bf16.mxu1 %v11540_v49  ;;  %v4152_v49 = vld [vmem:[%s22345_s4 + $0x2810] sm:$0xff]  ;;  %v11264_v36 = vpack.c.bf16 %v4166_v14, %v4153_v0  ;;  %v4246_v33 = vld [vmem:[%s22345_s4 + $0x2b00] sm:$0xff]  ;;  %v4243_v14 = vld [vmem:[%s22345_s4 + $0x2ae8] sm:$0xff] }
 0x8b0   :  { %v11266_v45 = vpack.c.bf16 %v4165_v11, %v4152_v49  ;;  %v4230_v0 = vld [vmem:[%s22345_s4 + $0x2a80] sm:$0xff]  ;;  %v4257_v49 = vld [vmem:[%s22345_s4 + $0x2b58] sm:$0xff] }
 0x8b1   :  { %11251 = vmatpush1.bf16.msra.mxu0 %v11250_v17  ;;  %v4192_v17 = vld [vmem:[%s22345_s4 + $0x2950] sm:$0xff]  ;;  %v4270_v11 = vld [vmem:[%s22345_s4 + $0x2bc0] sm:$0xff] }
 0x8b2   :  { %11543 = vmatpush1.bf16.msra.mxu1 %v11542_v19  ;;  %11253 = vmatprep.subr.bf16.mxu0 %v11252_v44  ;;  %v11556_v19 = vpack.c.bf16 %v4168_v54, %v4155_v5  ;;  %v4181_v44 = vld [vmem:[%s22345_s4 + $0x28f8] sm:$0xff] }
 0x8b3   :  { %11545 = vmatprep.subr.bf16.mxu1 %v11544_v57  ;;  %v11268_v57 = vpack.c.bf16 %v4192_v17, %v4179_v41  ;;  %v11560_v53 = vpack.c.bf16 %v4194_v27, %v4181_v44  ;;  %v4245_v54 = vld [vmem:[%s22345_s4 + $0x2af8] sm:$0xff]  ;;  %v4272_v41 = vld [vmem:[%s22345_s4 + $0x2bd0] sm:$0xff]  ;;  %v12374_v17 = vld [vmem:[%s22346_s5] sm:$0xff]  ;;  %v11278_v44 = vpack.c.bf16 %v4243_v14, %v4230_v0 }
 0x8b4   :  { %v11572_v32 = vpack.c.bf16 %v4272_v41, %v4259_v16 }
 0x8b5   :  { %11255 = vmatpush1.bf16.msra.mxu0 %v11254_v12  ;;  %v4205_v12 = vld [vmem:[%s22345_s4 + $0x29b8] sm:$0xff] }
 0x8b6   :  { %11547 = vmatpush1.bf16.msra.mxu1 %v11546_v51  ;;  %11257 = vmatprep.subr.bf16.mxu0 %v11256_v3  ;;  %v4218_v51 = vld [vmem:[%s22345_s4 + $0x2a20] sm:$0xff]  ;;  %v4207_v3 = vld [vmem:[%s22345_s4 + $0x29c8] sm:$0xff] }
 0x8b7   :  { %11549 = vmatprep.subr.bf16.mxu1 %v11548_v2  ;;  %v11272_v2 = vpack.c.bf16 %v4218_v51, %v4205_v12  ;;  %v11564_v28 = vpack.c.bf16 %v4220_v6, %v4207_v3  ;;  %v4296_v12 = vld [vmem:[%s22345_s4 + $0x2c90] sm:$0xff]  ;;  %v4812_v51 = vrot.slane %v12374_v17, %v4811_v24  ;;  %v4285_v6 = vld [vmem:[%s22345_s4 + $0x2c38] sm:$0xff] }
 0x8b8   :  { %v11284_v38 = vpack.c.bf16 %v4296_v12, %v4283_v10  ;;  %v4350_v10 = vld [vmem:[%s22345_s4 + $0x2e40] sm:$0xff] }
 0x8b9   :  { %11259 = vmatpush1.bf16.msra.mxu0 %v11258_v34  ;;  %v4231_v34 = vld [vmem:[%s22345_s4 + $0x2a88] sm:$0xff] }
 0x8ba   :  { %11551 = vmatpush1.bf16.msra.mxu1 %v11550_v1  ;;  %11261 = vmatprep.subr.bf16.mxu0 %v11260_v46  ;;  %v4244_v1 = vld [vmem:[%s22345_s4 + $0x2af0] sm:$0xff]  ;;  %v4233_v46 = vld [vmem:[%s22345_s4 + $0x2a98] sm:$0xff] }
 0x8bb   :  { %11553 = vmatprep.subr.bf16.mxu1 %v11552_v47  ;;  %v11274_v47 = vpack.c.bf16 %v4217_v56, %v4204_v18  ;;  %v11276_v7 = vpack.c.bf16 %v4244_v1, %v4231_v34  ;;  %v11568_v5 = vpack.c.bf16 %v4246_v33, %v4233_v46  ;;  %v4284_v33 = vld [vmem:[%s22345_s4 + $0x2c30] sm:$0xff] }
 0x8bc   :  { %6480 = vmatmul.mubr.f32.vlgmr.msra.gmra.mrb[10].mxu0 %v15490_v20 }
 0x8bd   :  { %6835 = vmatmul.mubr.f32.vlgmr.msra.gmra.mrb[10].mxu1 %v15490_v20  ;;  %11263 = vmatpush1.bf16.msra.mxu0 %v11262_v23  ;;  %v4232_v23 = vld [vmem:[%s22345_s4 + $0x2a90] sm:$0xff] }
 0x8be   :  { %6550 = vmatprep.mubr.f32.mxu0 %v17159_v63  ;;  %11555 = vmatpush1.bf16.msra.mxu1 %v11554_v55  ;;  %v4803_v55 = vsub.s32 4, %v18638_v40  ;;  %v11570_v27 = vpack.c.bf16 %v4245_v54, %v4232_v23  ;;  %v4322_v23 = vld [vmem:[%s22345_s4 + $0x2d60] sm:$0xff]  ;;  %v4324_v54 = vld [vmem:[%s22345_s4 + $0x2d70] sm:$0xff] }
 0x8bf   :  { %6905 = vmatprep.mubr.f32.mxu1 %v17159_v63  ;;  %11265 = vmatprep.subr.bf16.mxu0 %v11264_v36  ;;  %v4807_v36 = vsub.s32 5, %v18638_v40 }
 0x8c0   :  { %11557 = vmatprep.subr.bf16.mxu1 %v11556_v19  ;;  %v4792_v19 = vrot.slane %v12374_v17, %v4791_v42  ;;  %v4804_v4 = vrot.slane %v12374_v17, %v4803_v55 }
 0x8c1   :  { %11267 = vmatpush1.bf16.msra.mxu0 %v11266_v45  ;;  %v11280_v45 = vpack.c.bf16 %v4270_v11, %v4257_v49  ;;  %v4808_v3 = vrot.slane %v12374_v17, %v4807_v36  ;;  %v4308_v17 = vld [vmem:[%s22345_s4 + $0x2cf0] sm:$0xff] }
 0x8c2   :  { %11559 = vmatpush1.bf16.msra.mxu1 %v11558_v52  ;;  %11269 = vmatprep.subr.bf16.mxu0 %v11268_v57  ;;  %v4256_v52 = vld [vmem:[%s22345_s4 + $0x2b50] sm:$0xff]  ;;  %v4269_v57 = vld [vmem:[%s22345_s4 + $0x2bb8] sm:$0xff] }
 0x8c3   :  { %11561 = vmatprep.subr.bf16.mxu1 %v11560_v53  ;;  %v4271_v53 = vld [vmem:[%s22345_s4 + $0x2bc8] sm:$0xff] }
 0x8c4   :  { %v11574_v56 = vpack.c.bf16 %v4271_v53, %v4258_v48  ;;  %v4335_v48 = vld [vmem:[%s22345_s4 + $0x2dc8] sm:$0xff]  ;;  %v4337_v53 = vld [vmem:[%s22345_s4 + $0x2dd8] sm:$0xff] }
 0x8c5   :  { %11271 = vmatpush1.bf16.msra.mxu0 %v11270_v61  ;;  %v4298_v61 = vld [vmem:[%s22345_s4 + $0x2ca0] sm:$0xff] }
 0x8c6   :  { %11563 = vmatpush1.bf16.msra.mxu1 %v11562_v37  ;;  %11273 = vmatprep.subr.bf16.mxu0 %v11272_v2  ;;  %v20516_v37 = vadd.f32 %v18713_v15, %v4792_v19  ;;  %v11282_v2 = vpack.c.bf16 %v4269_v57, %v4256_v52  ;;  %v11576_v46 = vpack.c.bf16 %v4298_v61, %v4285_v6  ;;  %v4321_v19 = vld [vmem:[%s22345_s4 + $0x2d58] sm:$0xff]  ;;  %v4323_v57 = vld [vmem:[%s22345_s4 + $0x2d68] sm:$0xff]  ;;  %v4334_v6 = vld [vmem:[%s22345_s4 + $0x2dc0] sm:$0xff] }
 0x8c7   :  { %11565 = vmatprep.subr.bf16.mxu1 %v11564_v28  ;;  %v4282_v28 = vld [vmem:[%s22345_s4 + $0x2c20] sm:$0xff]  ;;  %v11290_v12 = vpack.c.bf16 %v4321_v19, %v4308_v17  ;;  %v4347_v61 = vld [vmem:[%s22345_s4 + $0x2e28] sm:$0xff]  ;;  %v4389_v17 = vld [vmem:[%s22345_s4 + $0x2f78] sm:$0xff] }
 0x8c8   :  { %v7334_v49 = vmax.f32 %v20516_v37, 0.0  ;;  %v11286_v24 = vpack.c.bf16 %v4295_v8, %v4282_v28  ;;  %v4374_v28 = vld [vmem:[%s22345_s4 + $0x2f00] sm:$0xff]  ;;  %v4363_v8 = vld [vmem:[%s22345_s4 + $0x2ea8] sm:$0xff] }
 0x8c9   :  { %11275 = vmatpush1.bf16.msra.mxu0 %v11274_v47  ;;  %v4297_v47 = vld [vmem:[%s22345_s4 + $0x2c98] sm:$0xff]  ;;  %v4402_v19 = vld [vmem:[%s22345_s4 + $0x2fe0] sm:$0xff] }
 0x8ca   :  { %11567 = vmatpush1.bf16.msra.mxu1 %v11566_v21  ;;  %11277 = vmatprep.subr.bf16.mxu0 %v11276_v7  ;;  %v4309_v21 = vld [vmem:[%s22345_s4 + $0x2cf8] sm:$0xff]  ;;  %v11578_v41 = vpack.c.bf16 %v4297_v47, %v4284_v33  ;;  %v4360_v47 = vld [vmem:[%s22345_s4 + $0x2e90] sm:$0xff] }
 0x8cb   :  { %11569 = vmatprep.subr.bf16.mxu1 %v11568_v5  ;;  %v4311_v5 = vld [vmem:[%s22345_s4 + $0x2d08] sm:$0xff] }
 0x8cc   :  { %v11580_v52 = vpack.c.bf16 %v4324_v54, %v4311_v5  ;;  %v4375_v54 = vld [vmem:[%s22345_s4 + $0x2f08] sm:$0xff] }
 0x8cd   :  { %11279 = vmatpush1.bf16.msra.mxu0 %v11278_v44  ;;  %v4310_v44 = vld [vmem:[%s22345_s4 + $0x2d00] sm:$0xff] }
 0x8ce   :  { %11571 = vmatpush1.bf16.msra.mxu1 %v11570_v27  ;;  %v5913_v18 = vpop.f32.mrb[8].mxu0  ;;  %11281 = vmatprep.subr.bf16.mxu0 %v11280_v45  ;;  %v11288_v45 = vpack.c.bf16 %v4322_v23, %v4309_v21  ;;  %v4373_v21 = vld [vmem:[%s22345_s4 + $0x2ef8] sm:$0xff]  ;;  %v4362_v23 = vld [vmem:[%s22345_s4 + $0x2ea0] sm:$0xff] }
 0x8cf   :  { %v20524_v34 = vadd.f32 %v5913_v18, %v4804_v4  ;;  %v6268_v1 = vpop.f32.mrb[8].mxu1  ;;  %v5915_v15 = vpop.f32.mrb[9].mxu0  ;;  %11573 = vmatprep.subr.bf16.mxu1 %v11572_v32  ;;  %v4348_v4 = vld [vmem:[%s22345_s4 + $0x2e30] sm:$0xff]  ;;  %v11584_v18 = vpack.c.bf16 %v4350_v10, %v4337_v53  ;;  %v4413_v53 = vld [vmem:[%s22345_s4 + $0x3038] sm:$0xff]  ;;  %v4426_v10 = vld [vmem:[%s22345_s4 + $0x30a0] sm:$0xff] }
 0x8d0   :  { %v20535_v7 = vadd.f32 %v6268_v1, %v4812_v51  ;;  %v20537_v0 = vadd.f32 %v5915_v15, %v4808_v3  ;;  %v20539_v14 = vpop.f32.mrb[9].mxu1  ;;  %v11582_v51 = vpack.c.bf16 %v4323_v57, %v4310_v44  ;;  %v11292_v3 = vpack.c.bf16 %v4348_v4, %v4335_v48  ;;  %v4376_v1 = vld [vmem:[%s22345_s4 + $0x2f10] sm:$0xff]  ;;  %v4399_v57 = vld [vmem:[%s22345_s4 + $0x2fc8] sm:$0xff] }
 0x8d1   :  { %v7337_v11 = vmax.f32 %v20524_v34, 0.0  ;;  %11283 = vmatpush1.bf16.msra.mxu0 %v11282_v2  ;;  %v4336_v2 = vld [vmem:[%s22345_s4 + $0x2dd0] sm:$0xff]  ;;  %v11294_v15 = vpack.c.bf16 %v4347_v61, %v4334_v6  ;;  %v11588_v5 = vpack.c.bf16 %v4376_v1, %v4363_v8  ;;  %v11298_v44 = vpack.c.bf16 %v4373_v21, %v4360_v47  ;;  %v4439_v8 = vld [vmem:[%s22345_s4 + $0x3108] sm:$0xff] }
 0x8d2   :  { %v7339_v36 = vmax.f32 %v20535_v7, 0.0  ;;  %v7338_v16 = vmax.f32 %v20537_v0, 0.0  ;;  %11575 = vmatpush1.bf16.msra.mxu1 %v11574_v56  ;;  %11285 = vmatprep.subr.bf16.mxu0 %v11284_v38  ;;  %v4349_v56 = vld [vmem:[%s22345_s4 + $0x2e38] sm:$0xff]  ;;  %v4388_v48 = vld [vmem:[%s22345_s4 + $0x2f70] sm:$0xff]  ;;  %v11592_v4 = vpack.c.bf16 %v4402_v19, %v4389_v17  ;;  %v11304_v61 = vpack.c.bf16 %v4426_v10, %v4413_v53  ;;  %v4478_v19 = vld [vmem:[%s22345_s4 + $0x3240] sm:$0xff] }
 0x8d3   :  { %v12293_v27 = vpack.i.bf16 %v7334_v49, %v7337_v11  ;;  %11577 = vmatprep.subr.bf16.mxu1 %v11576_v46  ;;  %v4361_v38 = vld [vmem:[%s22345_s4 + $0x2e98] sm:$0xff]  ;;  %v11586_v46 = vpack.c.bf16 %v4349_v56, %v4336_v2  ;;  %v4412_v2 = vld [vmem:[%s22345_s4 + $0x3030] sm:$0xff]  ;;  %v4414_v56 = vld [vmem:[%s22345_s4 + $0x3040] sm:$0xff] }
 0x8d4   :  { %v12298_v32 = vpack.i.bf16 %v7339_v36, %v7338_v16  ;;  %v11296_v33 = vpack.c.bf16 %v4374_v28, %v4361_v38  ;;  %v4427_v28 = vld [vmem:[%s22345_s4 + $0x30a8] sm:$0xff]  ;;  %v4452_v1 = vld [vmem:[%s22345_s4 + $0x3170] sm:$0xff]  ;;  %v4465_v17 = vld [vmem:[%s22345_s4 + $0x31d8] sm:$0xff] }
 0x8d5   :  { %11287 = vmatpush1.bf16.msra.mxu0 %v11286_v24  ;;  %12294 = vrot.lane.b32.xlu1 %v12293_v27, %s12406_s21  ;;  %v4387_v24 = vld [vmem:[%s22345_s4 + $0x2f68] sm:$0xff]  ;;  %v11590_v27 = vpack.c.bf16 %v4375_v54, %v4362_v23  ;;  %v11598_v47 = vpack.c.bf16 %v4427_v28, %v4414_v56  ;;  %v11308_v21 = vpack.c.bf16 %v4452_v1, %v4439_v8  ;;  %v4438_v23 = vld [vmem:[%s22345_s4 + $0x3100] sm:$0xff]  ;;  %v4440_v54 = vld [vmem:[%s22345_s4 + $0x3110] sm:$0xff] }
 0x8d6   :  { %11579 = vmatpush1.bf16.msra.mxu1 %v11578_v41  ;;  %12299 = vrot.lane.b32.xlu0 %v12298_v32, %s12406_s21  ;;  %v4400_v41 = vld [vmem:[%s22345_s4 + $0x2fd0] sm:$0xff]  ;;  %v4401_v32 = vld [vmem:[%s22345_s4 + $0x2fd8] sm:$0xff]  ;;  %v4479_v10 = vld [vmem:[%s22345_s4 + $0x3248] sm:$0xff] }
 0x8d7   :  { %11289 = vmatprep.subr.bf16.mxu0 %v11288_v45  ;;  %11581 = vmatprep.subr.bf16.mxu1 %v11580_v52  ;;  %v11300_v45 = vpack.c.bf16 %v4400_v41, %v4387_v24  ;;  %v4386_v52 = vld [vmem:[%s22345_s4 + $0x2f60] sm:$0xff]  ;;  %v11594_v6 = vpack.c.bf16 %v4401_v32, %v4388_v48  ;;  %v4453_v41 = vld [vmem:[%s22345_s4 + $0x3178] sm:$0xff]  ;;  %v4464_v48 = vld [vmem:[%s22345_s4 + $0x31d0] sm:$0xff] }
 0x8d8   :  { %v4466_v32 = vld [vmem:[%s22345_s4 + $0x31e0] sm:$0xff]  ;;  %v4492_v28 = vld [vmem:[%s22345_s4 + $0x32b0] sm:$0xff]  ;;  %v4505_v1 = vld [vmem:[%s22345_s4 + $0x3318] sm:$0xff] }
 0x8d9   :  { %11291 = vmatpush1.bf16.msra.mxu0 %v11290_v12  ;;  %v4415_v12 = vld [vmem:[%s22345_s4 + $0x3048] sm:$0xff]  ;;  %v4490_v56 = vld [vmem:[%s22345_s4 + $0x32a0] sm:$0xff] }
 0x8da   :  { %11583 = vmatpush1.bf16.msra.mxu1 %v11582_v51  ;;  %11293 = vmatprep.subr.bf16.mxu0 %v11292_v3  ;;  %v4428_v51 = vld [vmem:[%s22345_s4 + $0x30b0] sm:$0xff]  ;;  %v11302_v3 = vpack.c.bf16 %v4399_v57, %v4386_v52  ;;  %v11602_v52 = vpack.c.bf16 %v4453_v41, %v4440_v54  ;;  %v11312_v57 = vpack.c.bf16 %v4478_v19, %v4465_v17  ;;  %v4518_v41 = vld [vmem:[%s22345_s4 + $0x3380] sm:$0xff]  ;;  %v4531_v19 = vld [vmem:[%s22345_s4 + $0x33e8] sm:$0xff] }
 0x8db   :  { %11585 = vmatprep.subr.bf16.mxu1 %v11584_v18  ;;  %v4425_v18 = vld [vmem:[%s22345_s4 + $0x3098] sm:$0xff]  ;;  %v11596_v38 = vpack.c.bf16 %v4428_v51, %v4415_v12  ;;  %v4491_v12 = vld [vmem:[%s22345_s4 + $0x32a8] sm:$0xff]  ;;  %v4504_v51 = vld [vmem:[%s22345_s4 + $0x3310] sm:$0xff] }
 0x8dc   :  { %v4516_v54 = vld [vmem:[%s22345_s4 + $0x3370] sm:$0xff] }
 0x8dd   :  { %11295 = vmatpush1.bf16.msra.mxu0 %v11294_v15  ;;  %v4441_v15 = vld [vmem:[%s22345_s4 + $0x3118] sm:$0xff] }
 0x8de   :  { %11587 = vmatpush1.bf16.msra.mxu1 %v11586_v46  ;;  %11297 = vmatprep.subr.bf16.mxu0 %v11296_v33  ;;  %v4454_v46 = vld [vmem:[%s22345_s4 + $0x3180] sm:$0xff]  ;;  %v11306_v33 = vpack.c.bf16 %v4425_v18, %v4412_v2  ;;  %v11606_v2 = vpack.c.bf16 %v4479_v10, %v4466_v32  ;;  %v11316_v18 = vpack.c.bf16 %v4504_v51, %v4491_v12  ;;  %v4544_v12 = vld [vmem:[%s22345_s4 + $0x3450] sm:$0xff]  ;;  %v4557_v51 = vld [vmem:[%s22345_s4 + $0x34b8] sm:$0xff] }
 0x8df   :  { %11589 = vmatprep.subr.bf16.mxu1 %v11588_v5  ;;  %v4451_v5 = vld [vmem:[%s22345_s4 + $0x3168] sm:$0xff]  ;;  %v11600_v24 = vpack.c.bf16 %v4454_v46, %v4441_v15  ;;  %v4517_v15 = vld [vmem:[%s22345_s4 + $0x3378] sm:$0xff]  ;;  %v4530_v46 = vld [vmem:[%s22345_s4 + $0x33e0] sm:$0xff] }
 0x8e0   :  { %v4542_v32 = vld [vmem:[%s22345_s4 + $0x3440] sm:$0xff] }
 0x8e1   :  { %11299 = vmatpush1.bf16.msra.mxu0 %v11298_v44  ;;  %v4467_v44 = vld [vmem:[%s22345_s4 + $0x31e8] sm:$0xff] }
 0x8e2   :  { %11591 = vmatpush1.bf16.msra.mxu1 %v11590_v27  ;;  %11301 = vmatprep.subr.bf16.mxu0 %v11300_v45  ;;  %v4480_v27 = vld [vmem:[%s22345_s4 + $0x3250] sm:$0xff]  ;;  %v11310_v45 = vpack.c.bf16 %v4451_v5, %v4438_v23  ;;  %v11610_v23 = vpack.c.bf16 %v4505_v1, %v4492_v28  ;;  %v11320_v5 = vpack.c.bf16 %v4530_v46, %v4517_v15  ;;  %v4581_v28 = vld [vmem:[%s22345_s4 + $0x3578] sm:$0xff]  ;;  %v4583_v15 = vld [vmem:[%s22345_s4 + $0x3588] sm:$0xff] }
 0x8e3   :  { %11593 = vmatprep.subr.bf16.mxu1 %v11592_v4  ;;  %v4477_v4 = vld [vmem:[%s22345_s4 + $0x3238] sm:$0xff]  ;;  %v11604_v53 = vpack.c.bf16 %v4480_v27, %v4467_v44  ;;  %v4543_v44 = vld [vmem:[%s22345_s4 + $0x3448] sm:$0xff]  ;;  %v4556_v27 = vld [vmem:[%s22345_s4 + $0x34b0] sm:$0xff] }
 0x8e4   :  { %v4595_v46 = vld [vmem:[%s22345_s4 + $0x35e8] sm:$0xff] }
 0x8e5   :  { %11303 = vmatpush1.bf16.msra.mxu0 %v11302_v3  ;;  %v4493_v3 = vld [vmem:[%s22345_s4 + $0x32b8] sm:$0xff] }
 0x8e6   :  { %11595 = vmatpush1.bf16.msra.mxu1 %v11594_v6  ;;  %11305 = vmatprep.subr.bf16.mxu0 %v11304_v61  ;;  %v4506_v6 = vld [vmem:[%s22345_s4 + $0x3320] sm:$0xff]  ;;  %v11314_v61 = vpack.c.bf16 %v4477_v4, %v4464_v48  ;;  %v11614_v48 = vpack.c.bf16 %v4531_v19, %v4518_v41  ;;  %v11324_v4 = vpack.c.bf16 %v4556_v27, %v4543_v44  ;;  %v4596_v19 = vld [vmem:[%s22345_s4 + $0x35f0] sm:$0xff]  ;;  %v4609_v27 = vld [vmem:[%s22345_s4 + $0x3658] sm:$0xff] }
 0x8e7   :  { %11597 = vmatprep.subr.bf16.mxu1 %v11596_v38  ;;  %v4503_v38 = vld [vmem:[%s22345_s4 + $0x3308] sm:$0xff]  ;;  %v11608_v8 = vpack.c.bf16 %v4506_v6, %v4493_v3  ;;  %v4569_v3 = vld [vmem:[%s22345_s4 + $0x3518] sm:$0xff]  ;;  %v4582_v6 = vld [vmem:[%s22345_s4 + $0x3580] sm:$0xff] }
 0x8e8   :  { %v11328_v1 = vpack.c.bf16 %v4582_v6, %v4569_v3  ;;  %v4594_v41 = vld [vmem:[%s22345_s4 + $0x35e0] sm:$0xff]  ;;  %v4635_v6 = vld [vmem:[%s22345_s4 + $0x3728] sm:$0xff] }
 0x8e9   :  { %11307 = vmatpush1.bf16.msra.mxu0 %v11306_v33  ;;  %v4519_v33 = vld [vmem:[%s22345_s4 + $0x3388] sm:$0xff] }
 0x8ea   :  { %11599 = vmatpush1.bf16.msra.mxu1 %v11598_v47  ;;  %11309 = vmatprep.subr.bf16.mxu0 %v11308_v21  ;;  %v4532_v47 = vld [vmem:[%s22345_s4 + $0x33f0] sm:$0xff]  ;;  %v11318_v21 = vpack.c.bf16 %v4503_v38, %v4490_v56  ;;  %v11618_v56 = vpack.c.bf16 %v4557_v51, %v4544_v12  ;;  %v4633_v12 = vld [vmem:[%s22345_s4 + $0x3718] sm:$0xff]  ;;  %v4622_v51 = vld [vmem:[%s22345_s4 + $0x36c0] sm:$0xff] }
 0x8eb   :  { %11601 = vmatprep.subr.bf16.mxu1 %v11600_v24  ;;  %v4529_v24 = vld [vmem:[%s22345_s4 + $0x33d8] sm:$0xff]  ;;  %v11612_v17 = vpack.c.bf16 %v4532_v47, %v4519_v33  ;;  %v4568_v38 = vld [vmem:[%s22345_s4 + $0x3510] sm:$0xff] }
 0x8ec   :  { %v4608_v33 = vld [vmem:[%s22345_s4 + $0x3650] sm:$0xff] }
 0x8ed   :  { %11311 = vmatpush1.bf16.msra.mxu0 %v11310_v45  ;;  %v4545_v45 = vld [vmem:[%s22345_s4 + $0x3458] sm:$0xff] }
 0x8ee   :  { %11603 = vmatpush1.bf16.msra.mxu1 %v11602_v52  ;;  %11313 = vmatprep.subr.bf16.mxu0 %v11312_v57  ;;  %v4558_v52 = vld [vmem:[%s22345_s4 + $0x34c0] sm:$0xff]  ;;  %v11322_v57 = vpack.c.bf16 %v4529_v24, %v4516_v54  ;;  %v11332_v24 = vpack.c.bf16 %v4608_v33, %v4595_v46  ;;  %v4648_v46 = vld [vmem:[%s22345_s4 + $0x3790] sm:$0xff] }
 0x8ef   :  { %11605 = vmatprep.subr.bf16.mxu1 %v11604_v53  ;;  %v4555_v53 = vld [vmem:[%s22345_s4 + $0x34a8] sm:$0xff]  ;;  %v11616_v10 = vpack.c.bf16 %v4558_v52, %v4545_v45  ;;  %v4621_v45 = vld [vmem:[%s22345_s4 + $0x36b8] sm:$0xff]  ;;  %v4634_v52 = vld [vmem:[%s22345_s4 + $0x3720] sm:$0xff] }
 0x8f1   :  { %11315 = vmatpush1.bf16.msra.mxu0 %v11314_v61  ;;  %v11326_v61 = vpack.c.bf16 %v4555_v53, %v4542_v32  ;;  %v11626_v32 = vpack.c.bf16 %v4609_v27, %v4596_v19  ;;  %v11336_v53 = vpack.c.bf16 %v4634_v52, %v4621_v45  ;;  %v4672_v19 = vld [vmem:[%s22345_s4 + $0x3850] sm:$0xff]  ;;  %v4674_v27 = vld [vmem:[%s22345_s4 + $0x3860] sm:$0xff]  ;;  %v4687_v52 = vld [vmem:[%s22345_s4 + $0x38c8] sm:$0xff] }
 0x8f2   :  { %11607 = vmatpush1.bf16.msra.mxu1 %v11606_v2  ;;  %11317 = vmatprep.subr.bf16.mxu0 %v11316_v18  ;;  %v4571_v2 = vld [vmem:[%s22345_s4 + $0x3528] sm:$0xff]  ;;  %v4584_v18 = vld [vmem:[%s22345_s4 + $0x3590] sm:$0xff] }
 0x8f3   :  { %11609 = vmatprep.subr.bf16.mxu1 %v11608_v8  ;;  %v4570_v8 = vld [vmem:[%s22345_s4 + $0x3520] sm:$0xff]  ;;  %v11620_v47 = vpack.c.bf16 %v4584_v18, %v4571_v2  ;;  %v4660_v2 = vld [vmem:[%s22345_s4 + $0x37f0] sm:$0xff]  ;;  %v4649_v18 = vld [vmem:[%s22345_s4 + $0x3798] sm:$0xff] }
 0x8f4   :  { %v11622_v54 = vpack.c.bf16 %v4583_v15, %v4570_v8  ;;  %v4659_v15 = vld [vmem:[%s22345_s4 + $0x37e8] sm:$0xff] }
 0x8f5   :  { %11319 = vmatpush1.bf16.msra.mxu0 %v11318_v21  ;;  %v4597_v21 = vld [vmem:[%s22345_s4 + $0x35f8] sm:$0xff] }
 0x8f6   :  { %11611 = vmatpush1.bf16.msra.mxu1 %v11610_v23  ;;  %11321 = vmatprep.subr.bf16.mxu0 %v11320_v5  ;;  %v4610_v23 = vld [vmem:[%s22345_s4 + $0x3660] sm:$0xff]  ;;  %v11330_v5 = vpack.c.bf16 %v4581_v28, %v4568_v38  ;;  %v11630_v28 = vpack.c.bf16 %v4635_v6, %v4622_v51  ;;  %v4700_v6 = vld [vmem:[%s22345_s4 + $0x3930] sm:$0xff] }
 0x8f7   :  { %11613 = vmatprep.subr.bf16.mxu1 %v11612_v17  ;;  %v4607_v17 = vld [vmem:[%s22345_s4 + $0x3648] sm:$0xff]  ;;  %v11624_v44 = vpack.c.bf16 %v4610_v23, %v4597_v21  ;;  %v4673_v21 = vld [vmem:[%s22345_s4 + $0x3858] sm:$0xff]  ;;  %v4686_v23 = vld [vmem:[%s22345_s4 + $0x38c0] sm:$0xff] }
 0x8f8   :  { %v4698_v51 = vld [vmem:[%s22345_s4 + $0x3920] sm:$0xff] }
 0x8f9   :  { %11323 = vmatpush1.bf16.msra.mxu0 %v11322_v57  ;;  %v4623_v57 = vld [vmem:[%s22345_s4 + $0x36c8] sm:$0xff] }
 0x8fa   :  { %11615 = vmatpush1.bf16.msra.mxu1 %v11614_v48  ;;  %11325 = vmatprep.subr.bf16.mxu0 %v11324_v4  ;;  %v4636_v48 = vld [vmem:[%s22345_s4 + $0x3730] sm:$0xff]  ;;  %v11334_v4 = vpack.c.bf16 %v4607_v17, %v4594_v41  ;;  %v11344_v17 = vpack.c.bf16 %v4686_v23, %v4673_v21  ;;  %v4739_v23 = vld [vmem:[%s22345_s4 + $0x3a68] sm:$0xff] }
 0x8fb   :  { %11617 = vmatprep.subr.bf16.mxu1 %v11616_v10  ;;  %v4620_v10 = vld [vmem:[%s22345_s4 + $0x36b0] sm:$0xff]  ;;  %v11628_v3 = vpack.c.bf16 %v4636_v48, %v4623_v57  ;;  %v4699_v57 = vld [vmem:[%s22345_s4 + $0x3928] sm:$0xff] }
 0x8fc   :  { %6551 = vmatmul.mubr.f32.vlgmr.msra.gmra.mrb[10].mxu0 %v17173_v26  ;;  %v11338_v38 = vpack.c.bf16 %v4633_v12, %v4620_v10  ;;  %v4712_v48 = vld [vmem:[%s22345_s4 + $0x3990] sm:$0xff]  ;;  %v11638_v10 = vpack.c.bf16 %v4687_v52, %v4674_v27  ;;  %v4750_v27 = vld [vmem:[%s22345_s4 + $0x3ac0] sm:$0xff] }
 0x8fd   :  { %6906 = vmatmul.mubr.f32.vlgmr.msra.gmra.mrb[10].mxu1 %v17173_v26  ;;  %11327 = vmatpush1.bf16.msra.mxu0 %v11326_v61  ;;  %v4647_v61 = vld [vmem:[%s22345_s4 + $0x3788] sm:$0xff]  ;;  %v11348_v12 = vpack.c.bf16 %v4712_v48, %v4699_v57  ;;  %v4752_v57 = vld [vmem:[%s22345_s4 + $0x3ad0] sm:$0xff]  ;;  %v4765_v48 = vld [vmem:[%s22345_s4 + $0x3b38] sm:$0xff] }
 0x8fe   :  { %8361 = vmatprep.mubr.msk.f32.mxu0 %vm4850_vm11, %v17188_v22  ;;  %11619 = vmatpush1.bf16.msra.mxu1 %v11618_v56  ;;  %v4662_v56 = vld [vmem:[%s22345_s4 + $0x3800] sm:$0xff]  ;;  %v11340_v8 = vpack.c.bf16 %v4660_v2, %v4647_v61  ;;  %v4713_v2 = vld [vmem:[%s22345_s4 + $0x3998] sm:$0xff] }
 0x8ff   :  { %8362 = vmatprep.mubr.msk.f32.mxu1 %vm4850_vm11, %v17188_v22  ;;  %11329 = vmatprep.subr.bf16.mxu0 %v11328_v1  ;;  %v4646_v1 = vld [vmem:[%s22345_s4 + $0x3780] sm:$0xff]  ;;  %v11632_v33 = vpack.c.bf16 %v4662_v56, %v4649_v18  ;;  %v4725_v18 = vld [vmem:[%s22345_s4 + $0x39f8] sm:$0xff] }
 0x900   :  { %11621 = vmatprep.subr.bf16.mxu1 %v11620_v47  ;;  %v4661_v47 = vld [vmem:[%s22345_s4 + $0x37f8] sm:$0xff]  ;;  %v4738_v56 = vld [vmem:[%s22345_s4 + $0x3a60] sm:$0xff] }
 0x901   :  { %11331 = vmatpush1.bf16.msra.mxu0 %v11330_v5  ;;  %v4675_v5 = vld [vmem:[%s22345_s4 + $0x3868] sm:$0xff]  ;;  %v11634_v41 = vpack.c.bf16 %v4661_v47, %v4648_v46  ;;  %v4724_v46 = vld [vmem:[%s22345_s4 + $0x39f0] sm:$0xff]  ;;  %v4726_v47 = vld [vmem:[%s22345_s4 + $0x3a00] sm:$0xff] }
 0x902   :  { %11623 = vmatpush1.bf16.msra.mxu1 %v11622_v54  ;;  %11333 = vmatprep.subr.bf16.mxu0 %v11332_v24  ;;  %v4688_v54 = vld [vmem:[%s22345_s4 + $0x38d0] sm:$0xff]  ;;  %v11342_v24 = vpack.c.bf16 %v4659_v15, %v4646_v1  ;;  %v11642_v1 = vpack.c.bf16 %v4713_v2, %v4700_v6  ;;  %v11352_v15 = vpack.c.bf16 %v4738_v56, %v4725_v18  ;;  %v3519_v6 = vld [vmem:[%s22345_s4 + $0x1448] sm:$0xff]  ;;  %v3298_v56 = vld [vmem:[%s22345_s4 + $0xd60] sm:$0xff] }
 0x903   :  { %11625 = vmatprep.subr.bf16.mxu1 %v11624_v44  ;;  %v4685_v44 = vld [vmem:[%s22345_s4 + $0x38b8] sm:$0xff]  ;;  %v11636_v45 = vpack.c.bf16 %v4688_v54, %v4675_v5  ;;  %v4751_v5 = vld [vmem:[%s22345_s4 + $0x3ac8] sm:$0xff]  ;;  %v4764_v54 = vld [vmem:[%s22345_s4 + $0x3b30] sm:$0xff] }
 0x904   :  { %v2895_v2 = vld [vmem:[%s22345_s4 + $0xc8] sm:$0xff]  ;;  %v4776_v18 = vld [vmem:[%s22345_s4 + $0x3b90] sm:$0xff] }
 0x905   :  { %11335 = vmatpush1.bf16.msra.mxu0 %v11334_v4  ;;  %v4701_v4 = vld [vmem:[%s22345_s4 + $0x3938] sm:$0xff] }
 0x906   :  { %11627 = vmatpush1.bf16.msra.mxu1 %v11626_v32  ;;  %11337 = vmatprep.subr.bf16.mxu0 %v11336_v53  ;;  %v4714_v32 = vld [vmem:[%s22345_s4 + $0x39a0] sm:$0xff]  ;;  %v11346_v53 = vpack.c.bf16 %v4685_v44, %v4672_v19  ;;  %v11646_v19 = vpack.c.bf16 %v4739_v23, %v4726_v47  ;;  %v11356_v44 = vpack.c.bf16 %v4764_v54, %v4751_v5  ;;  %v3532_v47 = vld [vmem:[%s22345_s4 + $0x14b0] sm:$0xff]  ;;  %v2921_v54 = vld [vmem:[%s22345_s4 + $0x198] sm:$0xff] }
 0x907   :  { %11629 = vmatprep.subr.bf16.mxu1 %v11628_v3  ;;  %v4711_v3 = vld [vmem:[%s22345_s4 + $0x3988] sm:$0xff]  ;;  %v11640_v61 = vpack.c.bf16 %v4714_v32, %v4701_v4  ;;  %v11650_v32 = vpack.c.bf16 %v4765_v48, %v4752_v57  ;;  %v2908_v5 = vld [vmem:[%s22345_s4 + $0x130] sm:$0xff] }
 0x908   :  { %v11658_v57 = vpack.c.bf16 %v2921_v54, %v2908_v5  ;;  %v2986_v54 = vld [vmem:[%s22345_s4 + $0x3a0] sm:$0xff] }
 0x909   :  { %11339 = vmatpush1.bf16.msra.mxu0 %v11338_v38  ;;  %v4727_v38 = vld [vmem:[%s22345_s4 + $0x3a08] sm:$0xff] }
 0x90a   :  { %11631 = vmatpush1.bf16.msra.mxu1 %v11630_v28  ;;  %11341 = vmatprep.subr.bf16.mxu0 %v11340_v8  ;;  %v4740_v28 = vld [vmem:[%s22345_s4 + $0x3a70] sm:$0xff]  ;;  %v11350_v8 = vpack.c.bf16 %v4711_v3, %v4698_v51  ;;  %v3103_v51 = vld [vmem:[%s22345_s4 + $0x748] sm:$0xff]  ;;  %v3506_v3 = vld [vmem:[%s22345_s4 + $0x13e0] sm:$0xff] }
 0x90b   :  { %11633 = vmatprep.subr.bf16.mxu1 %v11632_v33  ;;  %v4737_v33 = vld [vmem:[%s22345_s4 + $0x3a58] sm:$0xff]  ;;  %v11644_v21 = vpack.c.bf16 %v4740_v28, %v4727_v38  ;;  %v3311_v38 = vld [vmem:[%s22345_s4 + $0xdc8] sm:$0xff]  ;;  %v4778_v28 = vld [vmem:[%s22345_s4 + $0x3ba0] sm:$0xff] }
 0x90c   :  { %v11686_v23 = vpack.c.bf16 %v3311_v38, %v3298_v56  ;;  %v2960_v56 = vld [vmem:[%s22345_s4 + $0x2d0] sm:$0xff]  ;;  %v2973_v38 = vld [vmem:[%s22345_s4 + $0x338] sm:$0xff] }
 0x90d   :  { %11343 = vmatpush1.bf16.msra.mxu0 %v11342_v24  ;;  %v4753_v24 = vld [vmem:[%s22345_s4 + $0x3ad8] sm:$0xff] }
 0x90e   :  { %11635 = vmatpush1.bf16.msra.mxu1 %v11634_v41  ;;  %11345 = vmatprep.subr.bf16.mxu0 %v11344_v17  ;;  %v4766_v41 = vld [vmem:[%s22345_s4 + $0x3b40] sm:$0xff]  ;;  %v11354_v17 = vpack.c.bf16 %v4737_v33, %v4724_v46  ;;  %v11684_v46 = vpack.c.bf16 %v3519_v6, %v3506_v3  ;;  %v3181_v3 = vld [vmem:[%s22345_s4 + $0x9b8] sm:$0xff]  ;;  %v3584_v6 = vld [vmem:[%s22345_s4 + $0x1650] sm:$0xff] }
 0x90f   :  { %11637 = vmatprep.subr.bf16.mxu1 %v11636_v45  ;;  %v4763_v45 = vld [vmem:[%s22345_s4 + $0x3b28] sm:$0xff]  ;;  %v11648_v52 = vpack.c.bf16 %v4766_v41, %v4753_v24  ;;  %v3324_v24 = vld [vmem:[%s22345_s4 + $0xe30] sm:$0xff] }
 0x910   :  { %v11358_v4 = vpack.c.bf16 %v4763_v45, %v4750_v27  ;;  %v3558_v45 = vld [vmem:[%s22345_s4 + $0x1580] sm:$0xff] }
 0x911   :  { %11347 = vmatpush1.bf16.msra.mxu0 %v11346_v53  ;;  %v4777_v53 = vld [vmem:[%s22345_s4 + $0x3b98] sm:$0xff] }
 0x912   :  { %11639 = vmatpush1.bf16.msra.mxu1 %v11638_v10  ;;  %11349 = vmatprep.subr.bf16.mxu0 %v11348_v12  ;;  %v4779_v10 = vld [vmem:[%s22345_s4 + $0x3ba8] sm:$0xff]  ;;  %v3090_v12 = vld [vmem:[%s22345_s4 + $0x6e0] sm:$0xff] }
 0x913   :  { %11641 = vmatprep.subr.bf16.mxu1 %v11640_v61  ;;  %v2882_v61 = vld [vmem:[%s22345_s4 + $0x60] sm:$0xff] }
 0x914   :  { %v11654_v33 = vpack.c.bf16 %v2895_v2, %v2882_v61 }
 0x915   :  { %11351 = vmatpush1.bf16.msra.mxu0 %v11350_v8  ;;  %v11652_v8 = vpack.c.bf16 %v3103_v51, %v3090_v12  ;;  %v3168_v51 = vld [vmem:[%s22345_s4 + $0x950] sm:$0xff] }
 0x916   :  { %11643 = vmatpush1.bf16.msra.mxu1 %v11642_v1  ;;  %11353 = vmatprep.subr.bf16.mxu0 %v11352_v15  ;;  %v3116_v1 = vld [vmem:[%s22345_s4 + $0x7b0] sm:$0xff]  ;;  %v3129_v15 = vld [vmem:[%s22345_s4 + $0x818] sm:$0xff] }
 0x917   :  { %11645 = vmatprep.subr.bf16.mxu1 %v11644_v21  ;;  %v3545_v21 = vld [vmem:[%s22345_s4 + $0x1518] sm:$0xff]  ;;  %v11656_v41 = vpack.c.bf16 %v3129_v15, %v3116_v1  ;;  %v3194_v15 = vld [vmem:[%s22345_s4 + $0xa20] sm:$0xff] }
 0x918   :  { %v11688_v27 = vpack.c.bf16 %v3545_v21, %v3532_v47  ;;  %v3389_v1 = vld [vmem:[%s22345_s4 + $0x1038] sm:$0xff]  ;;  %v3623_v47 = vld [vmem:[%s22345_s4 + $0x1788] sm:$0xff]  ;;  %v11666_v21 = vpack.c.bf16 %v2973_v38, %v2960_v56  ;;  %v3038_v56 = vld [vmem:[%s22345_s4 + $0x540] sm:$0xff] }
 0x919   :  { %11355 = vmatpush1.bf16.msra.mxu0 %v11354_v17  ;;  %v3337_v17 = vld [vmem:[%s22345_s4 + $0xe98] sm:$0xff]  ;;  %v3051_v38 = vld [vmem:[%s22345_s4 + $0x5a8] sm:$0xff] }
 0x91a   :  { %11647 = vmatpush1.bf16.msra.mxu1 %v11646_v19  ;;  %11357 = vmatprep.subr.bf16.mxu0 %v11356_v44  ;;  %v3142_v19 = vld [vmem:[%s22345_s4 + $0x880] sm:$0xff]  ;;  %v3155_v44 = vld [vmem:[%s22345_s4 + $0x8e8] sm:$0xff]  ;;  %v11690_v48 = vpack.c.bf16 %v3337_v17, %v3324_v24 }
 0x91b   :  { %11649 = vmatprep.subr.bf16.mxu1 %v11648_v52  ;;  %v3571_v52 = vld [vmem:[%s22345_s4 + $0x15e8] sm:$0xff] }
 0x91c   :  { %v11692_v12 = vpack.c.bf16 %v3571_v52, %v3558_v45  ;;  %v2999_v24 = vld [vmem:[%s22345_s4 + $0x408] sm:$0xff]  ;;  %v3636_v45 = vld [vmem:[%s22345_s4 + $0x17f0] sm:$0xff]  ;;  %v3649_v52 = vld [vmem:[%s22345_s4 + $0x1858] sm:$0xff] }
 0x91d   :  { %11359 = vmatpush1.bf16.msra.mxu0 %v11358_v4  ;;  %v11660_v4 = vpack.c.bf16 %v3155_v44, %v3142_v19  ;;  %v3415_v19 = vld [vmem:[%s22345_s4 + $0x1108] sm:$0xff]  ;;  %v3220_v44 = vld [vmem:[%s22345_s4 + $0xaf0] sm:$0xff] }
 0x91e   :  { %11651 = vmatpush1.bf16.msra.mxu1 %v11650_v32  ;;  %6593 = vmatprep.subr.mxu0 %v4777_v53  ;;  %v2934_v32 = vld [vmem:[%s22345_s4 + $0x200] sm:$0xff]  ;;  %v2947_v53 = vld [vmem:[%s22345_s4 + $0x268] sm:$0xff] }
 0x91f   :  { %6948 = vmatprep.subr.mxu1 %v4779_v10  ;;  %v3350_v10 = vld [vmem:[%s22345_s4 + $0xf00] sm:$0xff]  ;;  %v11662_v61 = vpack.c.bf16 %v2947_v53, %v2934_v32  ;;  %v3012_v32 = vld [vmem:[%s22345_s4 + $0x470] sm:$0xff]  ;;  %v3025_v53 = vld [vmem:[%s22345_s4 + $0x4d8] sm:$0xff] }
 0x921   :  { %6594 = vmatpush1.msra.mxu0 %v4776_v18  ;;  %v11664_v18 = vpack.c.bf16 %v3181_v3, %v3168_v51  ;;  %v3246_v51 = vld [vmem:[%s22345_s4 + $0xbc0] sm:$0xff]  ;;  %v3259_v3 = vld [vmem:[%s22345_s4 + $0xc28] sm:$0xff] }
 0x922   :  { %6949 = vmatpush1.msra.mxu1 %v4778_v28  ;;  %6622 = vmatmul.mubr.f32.vlgmr.msra.gmra.mrb[10].mxu0 %v17401_v30  ;;  %v3376_v28 = vld [vmem:[%s22345_s4 + $0xfd0] sm:$0xff] }
 0x923   :  { %6977 = vmatmul.mubr.f32.vlgmr.msra.gmra.mrb[10].mxu1 %v17401_v30  ;;  %11653 = vmatprep.subr.bf16.mxu0 %v11652_v8 }
 0x924   :  { %11685 = vmatprep.subr.bf16.mxu1 %v11684_v46  ;;  %11655 = vmatpush3.bf16.msra.mxu0 %v11654_v33  ;;  %v3207_v46 = vld [vmem:[%s22345_s4 + $0xa88] sm:$0xff]  ;;  %v3610_v33 = vld [vmem:[%s22345_s4 + $0x1720] sm:$0xff] }
 0x925   :  { %7047 = vmatprep.mubr.f32.mxu0 %v15586_v58  ;;  %11687 = vmatpush3.bf16.msra.mxu1 %v11686_v23  ;;  %v3363_v58 = vld [vmem:[%s22345_s4 + $0xf68] sm:$0xff]  ;;  %v11698_v23 = vpack.c.bf16 %v3389_v1, %v3376_v28  ;;  %v11668_v5 = vpack.c.bf16 %v3207_v46, %v3194_v15  ;;  %v11700_v17 = vpack.c.bf16 %v3623_v47, %v3610_v33  ;;  %v3454_v28 = vld [vmem:[%s22345_s4 + $0x1240] sm:$0xff]  ;;  %v3272_v15 = vld [vmem:[%s22345_s4 + $0xc90] sm:$0xff] }
 0x926   :  { %7117 = vmatprep.mubr.f32.mxu1 %v15979_v35  ;;  %11657 = vmatprep.subr.bf16.mxu0 %v11656_v41  ;;  %v3597_v35 = vld [vmem:[%s22345_s4 + $0x16b8] sm:$0xff]  ;;  %v11694_v2 = vpack.c.bf16 %v3363_v58, %v3350_v10  ;;  %v3402_v41 = vld [vmem:[%s22345_s4 + $0x10a0] sm:$0xff]  ;;  %v3428_v10 = vld [vmem:[%s22345_s4 + $0x1170] sm:$0xff] }
 0x927   :  { %11689 = vmatprep.subr.bf16.mxu1 %v11688_v27  ;;  %v11696_v8 = vpack.c.bf16 %v3597_v35, %v3584_v6  ;;  %v3233_v27 = vld [vmem:[%s22345_s4 + $0xb58] sm:$0xff]  ;;  %v3662_v6 = vld [vmem:[%s22345_s4 + $0x18c0] sm:$0xff]  ;;  %v3675_v35 = vld [vmem:[%s22345_s4 + $0x1928] sm:$0xff] }
 0x928   :  { %11659 = vmatpush3.bf16.msra.mxu0 %v11658_v57  ;;  %v11670_v57 = vpack.c.bf16 %v2999_v24, %v2986_v54  ;;  %v3441_v58 = vld [vmem:[%s22345_s4 + $0x11d8] sm:$0xff]  ;;  %v3467_v1 = vld [vmem:[%s22345_s4 + $0x12a8] sm:$0xff]  ;;  %v3688_v33 = vld [vmem:[%s22345_s4 + $0x1990] sm:$0xff] }
 0x929   :  { %11691 = vmatpush3.bf16.msra.mxu1 %v11690_v48  ;;  %11661 = vmatprep.subr.bf16.mxu0 %v11660_v4  ;;  %v11702_v48 = vpack.c.bf16 %v3415_v19, %v3402_v41  ;;  %v11672_v4 = vpack.c.bf16 %v3233_v27, %v3220_v44  ;;  %v3285_v46 = vld [vmem:[%s22345_s4 + $0xcf8] sm:$0xff]  ;;  %v3064_v54 = vld [vmem:[%s22345_s4 + $0x610] sm:$0xff]  ;;  %v3922_v44 = vld [vmem:[%s22345_s4 + $0x20e0] sm:$0xff] }
 0x92a   :  { %11693 = vmatprep.subr.bf16.mxu1 %v11692_v12  ;;  %v11704_v12 = vpack.c.bf16 %v3649_v52, %v3636_v45  ;;  %v3701_v47 = vld [vmem:[%s22345_s4 + $0x19f8] sm:$0xff]  ;;  %v3480_v41 = vld [vmem:[%s22345_s4 + $0x1310] sm:$0xff]  ;;  %v3935_v27 = vld [vmem:[%s22345_s4 + $0x2148] sm:$0xff] }
 0x92b   :  { %v3077_v24 = vld [vmem:[%s22345_s4 + $0x678] sm:$0xff]  ;;  %v4338_v45 = vld [vmem:[%s22345_s4 + $0x2de0] sm:$0xff]  ;;  %v4351_v52 = vld [vmem:[%s22345_s4 + $0x2e48] sm:$0xff] }
 0x92c   :  { %11663 = vmatpush3.bf16.msra.mxu0 %v11662_v61  ;;  %v11674_v61 = vpack.c.bf16 %v3025_v53, %v3012_v32  ;;  %v3493_v19 = vld [vmem:[%s22345_s4 + $0x1378] sm:$0xff]  ;;  %v3714_v32 = vld [vmem:[%s22345_s4 + $0x1a60] sm:$0xff]  ;;  %v3727_v53 = vld [vmem:[%s22345_s4 + $0x1ac8] sm:$0xff] }
 0x92d   :  { %11695 = vmatpush3.bf16.msra.mxu1 %v11694_v2  ;;  %11665 = vmatprep.subr.bf16.mxu0 %v11664_v18  ;;  %v11706_v2 = vpack.c.bf16 %v3441_v58, %v3428_v10  ;;  %v11676_v18 = vpack.c.bf16 %v3259_v3, %v3246_v51  ;;  %v11748_v10 = vpack.c.bf16 %v4351_v52, %v4338_v45  ;;  %v4143_v58 = vld [vmem:[%s22345_s4 + $0x27c8] sm:$0xff]  ;;  %v3948_v51 = vld [vmem:[%s22345_s4 + $0x21b0] sm:$0xff]  ;;  %v3961_v3 = vld [vmem:[%s22345_s4 + $0x2218] sm:$0xff] }
 0x92e   :  { %11697 = vmatprep.subr.bf16.mxu1 %v11696_v8  ;;  %v11708_v8 = vpack.c.bf16 %v3675_v35, %v3662_v6  ;;  %v21228_v6 = vpop.permute.xlu0 %12289  ;;  %v4815_v35 = vsub.s32 7, %v18638_v40  ;;  %v3779_v45 = vld [vmem:[%s22345_s4 + $0x1c68] sm:$0xff]  ;;  %v4182_v52 = vld [vmem:[%s22345_s4 + $0x2900] sm:$0xff] }
 0x930   :  { %11667 = vmatpush3.bf16.msra.mxu0 %v11666_v21  ;;  %v11678_v21 = vpack.c.bf16 %v3051_v38, %v3038_v56  ;;  %v3740_v38 = vld [vmem:[%s22345_s4 + $0x1b30] sm:$0xff] }
 0x931   :  { %11699 = vmatpush3.bf16.msra.mxu1 %v11698_v23  ;;  %11669 = vmatprep.subr.bf16.mxu0 %v11668_v5  ;;  %v11710_v23 = vpack.c.bf16 %v3467_v1, %v3454_v28  ;;  %v11680_v5 = vpack.c.bf16 %v3285_v46, %v3272_v15  ;;  %v3753_v28 = vld [vmem:[%s22345_s4 + $0x1b98] sm:$0xff]  ;;  %v4787_v1 = vsub.s32 0, %v18638_v40  ;;  %v11720_v15 = vpack.c.bf16 %v3961_v3, %v3948_v51  ;;  %v7606_v40 = vld [vmem:[%s22347_s6 + $0x380] sm:$0xff] }
 0x932   :  { %11701 = vmatprep.subr.bf16.mxu1 %v11700_v17  ;;  %v11712_v17 = vpack.c.bf16 %v3701_v47, %v3688_v33  ;;  %v4169_v46 = vld [vmem:[%s22345_s4 + $0x2898] sm:$0xff]  ;;  %v3974_v33 = vld [vmem:[%s22345_s4 + $0x2280] sm:$0xff]  ;;  %v3987_v47 = vld [vmem:[%s22345_s4 + $0x22e8] sm:$0xff] }
 0x934   :  { %11671 = vmatpush3.bf16.msra.mxu0 %v11670_v57  ;;  %v11682_v57 = vpack.c.bf16 %v3077_v24, %v3064_v54  ;;  %v4390_v54 = vld [vmem:[%s22345_s4 + $0x2f80] sm:$0xff]  ;;  %v4403_v24 = vld [vmem:[%s22345_s4 + $0x2fe8] sm:$0xff] }
 0x935   :  { %11703 = vmatpush3.bf16.msra.mxu1 %v11702_v48  ;;  %11673 = vmatprep.subr.bf16.mxu0 %v11672_v4  ;;  %v11714_v48 = vpack.c.bf16 %v3493_v19, %v3480_v41  ;;  %v11716_v4 = vpack.c.bf16 %v3935_v27, %v3922_v44  ;;  %v12375_v41 = vld [vmem:[%s22346_s5] sm:$0xff]  ;;  %v11722_v19 = vpack.c.bf16 %v3753_v28, %v3740_v38 }
 0x936   :  { %11705 = vmatprep.subr.bf16.mxu1 %v11704_v12  ;;  %v4130_v12 = vld [vmem:[%s22345_s4 + $0x2760] sm:$0xff]  ;;  %v11724_v44 = vpack.c.bf16 %v3987_v47, %v3974_v33 }
 0x937   :  { %v11750_v56 = vpack.c.bf16 %v4143_v58, %v4130_v12  ;;  %v3766_v27 = vld [vmem:[%s22345_s4 + $0x1c00] sm:$0xff] }
 0x938   :  { %11675 = vmatpush3.bf16.msra.mxu0 %v11674_v61  ;;  %v11718_v61 = vpack.c.bf16 %v3727_v53, %v3714_v32  ;;  %v11726_v3 = vpack.c.bf16 %v3779_v45, %v3766_v27  ;;  %v4481_v27 = vld [vmem:[%s22345_s4 + $0x3258] sm:$0xff] }
 0x939   :  { %11707 = vmatpush3.bf16.msra.mxu1 %v11706_v2  ;;  %11677 = vmatprep.subr.bf16.mxu0 %v11676_v18  ;;  %v4364_v2 = vld [vmem:[%s22345_s4 + $0x2eb0] sm:$0xff]  ;;  %v4377_v18 = vld [vmem:[%s22345_s4 + $0x2f18] sm:$0xff] }
 0x93a   :  { %11709 = vmatprep.subr.bf16.mxu1 %v11708_v8  ;;  %v4156_v8 = vld [vmem:[%s22345_s4 + $0x2830] sm:$0xff] }
 0x93c   :  { %11679 = vmatpush3.bf16.msra.mxu0 %v11678_v21  ;;  %v12292_v21 = vunpack.i.h.bf16 %v21228_v6 }
 0x93d   :  { %11711 = vmatpush3.bf16.msra.mxu1 %v11710_v23  ;;  %11681 = vmatprep.subr.bf16.mxu0 %v11680_v5  ;;  %v12291_v23 = vunpack.i.l.bf16 %v21228_v6  ;;  %v11752_v5 = vpack.c.bf16 %v4377_v18, %v4364_v2  ;;  %v3805_v2 = vld [vmem:[%s22345_s4 + $0x1d38] sm:$0xff] }
 0x93e   :  { %11713 = vmatprep.subr.bf16.mxu1 %v11712_v17  ;;  %v4816_v17 = vrot.slane %v12375_v41, %v4815_v35 }
 0x93f   :  { %v7387_v32 = vsel %vm323_vm0, %v12291_v23, %v12292_v21 }
 0x940   :  { %11683 = vmatpush3.bf16.msra.mxu0 %v11682_v57  ;;  %v4195_v57 = vld [vmem:[%s22345_s4 + $0x2968] sm:$0xff]  ;;  %v21301_v12 = vadd.f32 %v20539_v14, %v4816_v17  ;;  %v4208_v14 = vld [vmem:[%s22345_s4 + $0x29d0] sm:$0xff] }
 0x941   :  { %11715 = vmatpush3.bf16.msra.mxu1 %v11714_v48  ;;  %11717 = vmatprep.subr.bf16.mxu0 %v11716_v4  ;;  %v4000_v48 = vld [vmem:[%s22345_s4 + $0x2350] sm:$0xff]  ;;  %v4013_v4 = vld [vmem:[%s22345_s4 + $0x23b8] sm:$0xff]  ;;  %v11758_v6 = vpack.c.bf16 %v4195_v57, %v4182_v52  ;;  %v4247_v17 = vld [vmem:[%s22345_s4 + $0x2b08] sm:$0xff] }
 0x942   :  { %11749 = vmatprep.subr.bf16.mxu1 %v11748_v10  ;;  %v4429_v10 = vld [vmem:[%s22345_s4 + $0x30b8] sm:$0xff]  ;;  %v11728_v35 = vpack.c.bf16 %v4013_v4, %v4000_v48  ;;  %v7340_v59 = vmax.f32 %v21301_v12, 0.0  ;;  %v3844_v57 = vld [vmem:[%s22345_s4 + $0x1e70] sm:$0xff]  ;;  %v7591_v12 = vld [vmem:[%s22347_s6 + $0x308] sm:$0xff] }
 0x943   :  { %7048 = vmatmul.mubr.f32.vlgmr.msra.gmra.mrb[12].mxu0 %v23008_v13  ;;  %v11754_v13 = vpack.c.bf16 %v4169_v46, %v4156_v8  ;;  %v4221_v8 = vld [vmem:[%s22345_s4 + $0x2a38] sm:$0xff]  ;;  %v21334_v46 = vmax.f32 %v7335_v60, %v7387_v32  ;;  %v4260_v4 = vld [vmem:[%s22345_s4 + $0x2b70] sm:$0xff] }
 0x944   :  { %7118 = vmatmul.mubr.f32.vlgmr.msra.gmra.mrb[12].mxu1 %v15464_v9  ;;  %11719 = vmatpush3.bf16.msra.mxu0 %v11718_v61  ;;  %v4788_v9 = vrot.slane %v12375_v41, %v4787_v1  ;;  %v3792_v61 = vld [vmem:[%s22345_s4 + $0x1cd0] sm:$0xff]  ;;  %v11762_v37 = vpack.c.bf16 %v4221_v8, %v4208_v14  ;;  %v3857_v48 = vld [vmem:[%s22345_s4 + $0x1ed8] sm:$0xff] }
 0x945   :  { %7187 = vmatprep.mubr.f32.mxu0 %v16375_v62  ;;  %11751 = vmatpush3.bf16.msra.mxu1 %v11750_v56  ;;  %v11756_v62 = vpack.c.bf16 %v4403_v24, %v4390_v54  ;;  %v11730_v60 = vpack.c.bf16 %v3805_v2, %v3792_v61  ;;  %v4234_v54 = vld [vmem:[%s22345_s4 + $0x2aa0] sm:$0xff]  ;;  %v11738_v61 = vpack.c.bf16 %v3857_v48, %v3844_v57  ;;  %v7495_v57 = vld [vmem:[%s22347_s6 + $0x8] sm:$0xff] }
 0x946   :  { %7257 = vmatprep.mubr.f32.mxu1 %v17159_v63  ;;  %11721 = vmatprep.subr.bf16.mxu0 %v11720_v15  ;;  %v4416_v63 = vld [vmem:[%s22345_s4 + $0x3050] sm:$0xff]  ;;  %v21315_v18 = vadd.f32 %v18703_v39, %v4788_v9  ;;  %v4026_v15 = vld [vmem:[%s22345_s4 + $0x2420] sm:$0xff]  ;;  %v4039_v39 = vld [vmem:[%s22345_s4 + $0x2488] sm:$0xff]  ;;  %v11766_v9 = vpack.c.bf16 %v4247_v17, %v4234_v54 }
 0x947   :  { %11753 = vmatprep.subr.bf16.mxu1 %v11752_v5  ;;  %v21292_v53 = vpop.permute.xlu1 %12294  ;;  %v11760_v28 = vpack.c.bf16 %v4429_v10, %v4416_v63  ;;  %v3831_v5 = vld [vmem:[%s22345_s4 + $0x1e08] sm:$0xff]  ;;  %v4273_v63 = vld [vmem:[%s22345_s4 + $0x2bd8] sm:$0xff]  ;;  %v4078_v10 = vld [vmem:[%s22345_s4 + $0x25c0] sm:$0xff] }
 0x948   :  { %11723 = vmatpush3.bf16.msra.mxu0 %v11722_v19  ;;  %v12297_v58 = vunpack.i.h.bf16 %v21292_v53  ;;  %v12296_v51 = vunpack.i.l.bf16 %v21292_v53  ;;  %v7333_v24 = vmax.f32 %v21315_v18, 0.0  ;;  %v4052_v19 = vld [vmem:[%s22345_s4 + $0x24f0] sm:$0xff]  ;;  %v11770_v2 = vpack.c.bf16 %v4273_v63, %v4260_v4  ;;  %v4325_v17 = vld [vmem:[%s22345_s4 + $0x2d78] sm:$0xff] }
 0x949   :  { %11755 = vmatpush3.bf16.msra.mxu1 %v11754_v13  ;;  %11725 = vmatprep.subr.bf16.mxu0 %v11724_v44  ;;  %v4065_v13 = vld [vmem:[%s22345_s4 + $0x2558] sm:$0xff]  ;;  %v4468_v44 = vld [vmem:[%s22345_s4 + $0x31f0] sm:$0xff]  ;;  %v12415_v63 = vmov 0.0|0.0  }
 0x94a   :  { %v7386_v56 = vsel %vm323_vm0, %v12297_v58, %v12291_v23  ;;  %v7388_v38 = vsel %vm323_vm0, %v12292_v21, %v12296_v51  ;;  %11757 = vmatprep.subr.bf16.mxu1 %v11756_v62  ;;  %v4442_v21 = vld [vmem:[%s22345_s4 + $0x3120] sm:$0xff]  ;;  %v4455_v23 = vld [vmem:[%s22345_s4 + $0x3188] sm:$0xff]  ;;  %v12303_v45 = vpack.i.bf16 %v7340_v59, %v7333_v24  ;;  %v11736_v62 = vpack.c.bf16 %v4065_v13, %v4052_v19  ;;  %v7512_v4 = vld [vmem:[%s22347_s6 + $0x90] sm:$0xff] }
 0x94b   :  { %v21338_v33 = vmax.f32 %v7334_v49, %v7386_v56  ;;  %v21342_v47 = vmax.f32 %v7336_v25, %v7388_v38  ;;  %v11732_v25 = vpack.c.bf16 %v4039_v39, %v4026_v15  ;;  %v3818_v49 = vld [vmem:[%s22345_s4 + $0x1da0] sm:$0xff]  ;;  %v11764_v41 = vpack.c.bf16 %v4455_v23, %v4442_v21  ;;  %v3883_v38 = vld [vmem:[%s22345_s4 + $0x1fa8] sm:$0xff]  ;;  %v4104_v39 = vld [vmem:[%s22345_s4 + $0x2690] sm:$0xff] }
 0x94c   :  { %11727 = vmatpush3.bf16.msra.mxu0 %v11726_v3  ;;  %v11734_v52 = vpack.c.bf16 %v3831_v5, %v3818_v49  ;;  %v11768_v32 = vpack.c.bf16 %v4481_v27, %v4468_v44  ;;  %v4091_v3 = vld [vmem:[%s22345_s4 + $0x2628] sm:$0xff]  ;;  %v3870_v56 = vld [vmem:[%s22345_s4 + $0x1f40] sm:$0xff]  ;;  %v4117_v21 = vld [vmem:[%s22345_s4 + $0x26f8] sm:$0xff] }
 0x94d   :  { %11759 = vmatpush3.bf16.msra.mxu1 %v11758_v6  ;;  %11729 = vmatprep.subr.bf16.mxu0 %v11728_v35  ;;  %v12308_v29 = vpack.i.bf16 %v21342_v47, %v21334_v46  ;;  %v4494_v6 = vld [vmem:[%s22345_s4 + $0x32c0] sm:$0xff]  ;;  %v4507_v35 = vld [vmem:[%s22345_s4 + $0x3328] sm:$0xff]  ;;  %v11740_v14 = vpack.c.bf16 %v4091_v3, %v4078_v10  ;;  %v4520_v23 = vld [vmem:[%s22345_s4 + $0x3390] sm:$0xff] }
 0x94e   :  { %11761 = vmatprep.subr.bf16.mxu1 %v11760_v28  ;;  %7435 = vrot.lane.b32.xlu1 %v21338_v33, %s12407_s2  ;;  %v4286_v28 = vld [vmem:[%s22345_s4 + $0x2c40] sm:$0xff]  ;;  %v11772_v8 = vpack.c.bf16 %v4507_v35, %v4494_v6  ;;  %v4299_v15 = vld [vmem:[%s22345_s4 + $0x2ca8] sm:$0xff]  ;;  %v3896_v49 = vld [vmem:[%s22345_s4 + $0x2010] sm:$0xff] }
 0x94f   :  { %12309 = vrot.lane.b32.xlu0 %v12308_v29, %s12407_s2  ;;  %v11774_v29 = vpack.c.bf16 %v4299_v15, %v4286_v28  ;;  %v3909_v5 = vld [vmem:[%s22345_s4 + $0x2078] sm:$0xff]  ;;  %v7510_v19 = vld [vmem:[%s22347_s6 + $0x80] sm:$0xff]  ;;  %v7511_v13 = vld [vmem:[%s22347_s6 + $0x88] sm:$0xff] }
 0x950   :  { %11731 = vmatpush3.bf16.msra.mxu0 %v11730_v60  ;;  %v4533_v60 = vld [vmem:[%s22345_s4 + $0x33f8] sm:$0xff]  ;;  %v11746_v44 = vpack.c.bf16 %v3909_v5, %v3896_v49  ;;  %v4572_v10 = vld [vmem:[%s22345_s4 + $0x3530] sm:$0xff]  ;;  %v7498_v15 = vld [vmem:[%s22347_s6 + $0x20] sm:$0xff] }
 0x951   :  { %11763 = vmatpush3.bf16.msra.mxu1 %v11762_v37  ;;  %11733 = vmatprep.subr.bf16.mxu0 %v11732_v25  ;;  %v11742_v37 = vpack.c.bf16 %v3883_v38, %v3870_v56  ;;  %v11744_v25 = vpack.c.bf16 %v4117_v21, %v4104_v39  ;;  %v11776_v54 = vpack.c.bf16 %v4533_v60, %v4520_v23  ;;  %v4585_v3 = vld [vmem:[%s22345_s4 + $0x3598] sm:$0xff]  ;;  %v7514_v56 = vld [vmem:[%s22347_s6 + $0xa0] sm:$0xff]  ;;  %v7516_v21 = vld [vmem:[%s22347_s6 + $0xb0] sm:$0xff] }
 0x952   :  { %11765 = vmatprep.subr.bf16.mxu1 %v11764_v41  ;;  %12304 = vrot.lane.b32.xlu1 %v12303_v45, %s12406_s21  ;;  %v4312_v41 = vld [vmem:[%s22345_s4 + $0x2d10] sm:$0xff]  ;;  %v4546_v45 = vld [vmem:[%s22345_s4 + $0x3460] sm:$0xff]  ;;  %v7517_v23 = vld [vmem:[%s22347_s6 + $0xb8] sm:$0xff] }
 0x953   :  { %v11778_v27 = vpack.c.bf16 %v4325_v17, %v4312_v41  ;;  %v4598_v38 = vld [vmem:[%s22345_s4 + $0x3600] sm:$0xff]  ;;  %v4624_v60 = vld [vmem:[%s22345_s4 + $0x36d0] sm:$0xff]  ;;  %v7501_v5 = vld [vmem:[%s22347_s6 + $0x38] sm:$0xff] }
 0x954   :  { %11735 = vmatpush3.bf16.msra.mxu0 %v11734_v52  ;;  %v4559_v52 = vld [vmem:[%s22345_s4 + $0x34c8] sm:$0xff]  ;;  %v7500_v49 = vld [vmem:[%s22347_s6 + $0x30] sm:$0xff]  ;;  %v7518_v41 = vld [vmem:[%s22347_s6 + $0xc0] sm:$0xff] }
 0x955   :  { %11767 = vmatpush3.bf16.msra.mxu1 %v11766_v9  ;;  %11737 = vmatprep.subr.bf16.mxu0 %v11736_v62  ;;  %v11807_v9 = vpack.c.bf16 %v7511_v13, %v7510_v19  ;;  %v7494_v62 = vld [vmem:[%s22347_s6] sm:$0xff]  ;;  %v11781_v48 = vpack.c.bf16 %v4559_v52, %v4546_v45  ;;  %v7519_v17 = vld [vmem:[%s22347_s6 + $0xc8] sm:$0xff]  ;;  %v7545_v18 = vld [vmem:[%s22347_s6 + $0x198] sm:$0xff] }
 0x956   :  { %11769 = vmatprep.subr.bf16.mxu1 %v11768_v32  ;;  %v7513_v32 = vld [vmem:[%s22347_s6 + $0x98] sm:$0xff]  ;;  %v11809_v6 = vpack.c.bf16 %v7495_v57, %v7494_v62  ;;  %v4650_v19 = vld [vmem:[%s22345_s4 + $0x37a0] sm:$0xff]  ;;  %v4663_v13 = vld [vmem:[%s22345_s4 + $0x3808] sm:$0xff] }
 0x957   :  { %v11811_v35 = vpack.c.bf16 %v7513_v32, %v7512_v4  ;;  %v7502_v45 = vld [vmem:[%s22347_s6 + $0x40] sm:$0xff]  ;;  %v7503_v52 = vld [vmem:[%s22347_s6 + $0x48] sm:$0xff]  ;;  %v7520_v62 = vld [vmem:[%s22347_s6 + $0xd0] sm:$0xff] }
 0x958   :  { %11739 = vmatpush3.bf16.msra.mxu0 %v11738_v61  ;;  %v7496_v61 = vld [vmem:[%s22347_s6 + $0x10] sm:$0xff]  ;;  %v7521_v57 = vld [vmem:[%s22347_s6 + $0xd8] sm:$0xff]  ;;  %v11825_v32 = vpack.c.bf16 %v7503_v52, %v7502_v45  ;;  %v21620_v45 = vpop.permute.xlu0 %12299 }
 0x959   :  { %11771 = vmatpush3.bf16.msra.mxu1 %v11770_v2  ;;  %11741 = vmatprep.subr.bf16.mxu0 %v11740_v14  ;;  %v7497_v2 = vld [vmem:[%s22347_s6 + $0x18] sm:$0xff]  ;;  %v11784_v14 = vpack.c.bf16 %v4585_v3, %v4572_v10  ;;  %v11827_v10 = vpack.c.bf16 %v7521_v57, %v7520_v62  ;;  %v7504_v3 = vld [vmem:[%s22347_s6 + $0x50] sm:$0xff] }
 0x95a   :  { %11773 = vmatprep.subr.bf16.mxu1 %v11772_v8  ;;  %v11813_v28 = vpack.c.bf16 %v7497_v2, %v7496_v61  ;;  %v4689_v4 = vld [vmem:[%s22345_s4 + $0x38d8] sm:$0xff]  ;;  %v7522_v61 = vld [vmem:[%s22347_s6 + $0xe0] sm:$0xff]  ;;  %v7523_v2 = vld [vmem:[%s22347_s6 + $0xe8] sm:$0xff] }
 0x95c   :  { %11743 = vmatpush3.bf16.msra.mxu0 %v11742_v37  ;;  %v4637_v37 = vld [vmem:[%s22345_s4 + $0x3738] sm:$0xff] }
 0x95d   :  { %11775 = vmatpush3.bf16.msra.mxu1 %v11774_v29  ;;  %11745 = vmatprep.subr.bf16.mxu0 %v11744_v25  ;;  %v11819_v25 = vpack.c.bf16 %v7517_v23, %v7516_v21  ;;  %v4741_v21 = vld [vmem:[%s22345_s4 + $0x3a78] sm:$0xff] }
 0x95e   :  { %11777 = vmatprep.subr.bf16.mxu1 %v11776_v54  ;;  %v11790_v54 = vpack.c.bf16 %v4637_v37, %v4624_v60  ;;  %v7508_v37 = vld [vmem:[%s22347_s6 + $0x70] sm:$0xff] }
 0x960   :  { %11747 = vmatpush3.bf16.msra.mxu0 %v11746_v44  ;;  %v11821_v44 = vpack.c.bf16 %v7501_v5, %v7500_v49  ;;  %v4754_v49 = vld [vmem:[%s22345_s4 + $0x3ae0] sm:$0xff]  ;;  %v4767_v5 = vld [vmem:[%s22345_s4 + $0x3b48] sm:$0xff] }
 0x961   :  { %11779 = vmatpush3.bf16.msra.mxu1 %v11778_v27  ;;  %11780 = vmatprep.subr.bf16.mxu0 %v12415_v63  ;;  %v11823_v27 = vpack.c.bf16 %v7519_v17, %v7518_v41  ;;  %v11805_v41 = vpack.c.bf16 %v4767_v5, %v4754_v49  ;;  %v12416_v17 = vmov 0.0  }
 0x962   :  { %11808 = vmatprep.subr.bf16.mxu1 %v11807_v9  ;;  %v11793_v9 = vpack.c.bf16 %v4663_v13, %v4650_v19  ;;  %v4780_v19 = vld [vmem:[%s22345_s4 + $0x3bb0] sm:$0xff]  ;;  %v7542_v13 = vld [vmem:[%s22347_s6 + $0x180] sm:$0xff] }
 0x963   :  { %7188 = vmatmul.mubr.f32.vlgmr.msra.gmra.mrb[14].mxu0 %v15490_v20  ;;  %v7515_v20 = vld [vmem:[%s22347_s6 + $0xa8] sm:$0xff] }
 0x964   :  { %7258 = vmatmul.mubr.f32.vlgmr.msra.gmra.mrb[14].mxu1 %v17173_v26  ;;  %11782 = vmatpush1.bf16.msra.mxu0 %v11781_v48  ;;  %v4611_v26 = vld [vmem:[%s22345_s4 + $0x3668] sm:$0xff]  ;;  %v11815_v8 = vpack.c.bf16 %v7515_v20, %v7514_v56  ;;  %v4676_v48 = vld [vmem:[%s22345_s4 + $0x3870] sm:$0xff] }
 0x965   :  { %8363 = vmatprep.mubr.msk.f32.mxu0 %vm4850_vm11, %v17188_v22  ;;  %11783 = vmatprep.subr.bf16.mxu0 %v12415_v63  ;;  %v7499_v22 = vld [vmem:[%s22347_s6 + $0x28] sm:$0xff]  ;;  %v11787_v39 = vpack.c.bf16 %v4611_v26, %v4598_v38  ;;  %v11831_v38 = vpack.c.bf16 %v7523_v2, %v7522_v61  ;;  %v7506_v26 = vld [vmem:[%s22347_s6 + $0x60] sm:$0xff] }
 0x966   :  { %11810 = vmatpush3.bf16.msra.mxu1 %v11809_v6  ;;  %v11817_v29 = vpack.c.bf16 %v7499_v22, %v7498_v15  ;;  %v7505_v6 = vld [vmem:[%s22347_s6 + $0x58] sm:$0xff]  ;;  %v4715_v56 = vld [vmem:[%s22345_s4 + $0x39a8] sm:$0xff]  ;;  %v7524_v15 = vld [vmem:[%s22347_s6 + $0xf0] sm:$0xff] }
 0x967   :  { %11812 = vmatprep.subr.bf16.mxu1 %v11811_v35  ;;  %v11796_v35 = vpack.c.bf16 %v4689_v4, %v4676_v48  ;;  %v11829_v20 = vpack.c.bf16 %v7505_v6, %v7504_v3  ;;  %v7525_v22 = vld [vmem:[%s22347_s6 + $0xf8] sm:$0xff]  ;;  %v7526_v61 = vld [vmem:[%s22347_s6 + $0x100] sm:$0xff] }
 0x968   :  { %11785 = vmatpush1.bf16.msra.mxu0 %v11784_v14  ;;  %v4702_v14 = vld [vmem:[%s22345_s4 + $0x3940] sm:$0xff]  ;;  %v11835_v60 = vpack.c.bf16 %v7525_v22, %v7524_v15  ;;  %v7531_v15 = vld [vmem:[%s22347_s6 + $0x128] sm:$0xff]  ;;  %v7548_v22 = vld [vmem:[%s22347_s6 + $0x1b0] sm:$0xff] }
 0x969   :  { %11786 = vmatprep.subr.bf16.mxu0 %v12415_v63 }
 0x96a   :  { %11814 = vmatpush3.bf16.msra.mxu1 %v11813_v28  ;;  %v7507_v28 = vld [vmem:[%s22347_s6 + $0x68] sm:$0xff] }
 0x96b   :  { %11816 = vmatprep.subr.bf16.mxu1 %v11815_v8  ;;  %v11799_v8 = vpack.c.bf16 %v4715_v56, %v4702_v14  ;;  %v11833_v23 = vpack.c.bf16 %v7507_v28, %v7506_v26  ;;  %v7528_v14 = vld [vmem:[%s22347_s6 + $0x110] sm:$0xff]  ;;  %v7529_v56 = vld [vmem:[%s22347_s6 + $0x118] sm:$0xff]  ;;  %v7547_v26 = vld [vmem:[%s22347_s6 + $0x1a8] sm:$0xff] }
 0x96c   :  { %11788 = vmatpush1.bf16.msra.mxu0 %v11787_v39  ;;  %v4728_v39 = vld [vmem:[%s22345_s4 + $0x3a10] sm:$0xff]  ;;  %v7530_v28 = vld [vmem:[%s22347_s6 + $0x120] sm:$0xff] }
 0x96d   :  { %11789 = vmatprep.subr.bf16.mxu0 %v12415_v63 }
 0x96e   :  { %11818 = vmatpush3.bf16.msra.mxu1 %v11817_v29  ;;  %v7509_v29 = vld [vmem:[%s22347_s6 + $0x78] sm:$0xff] }
 0x96f   :  { %11820 = vmatprep.subr.bf16.mxu1 %v11819_v25  ;;  %v11802_v25 = vpack.c.bf16 %v4741_v21, %v4728_v39  ;;  %v7549_v39 = vld [vmem:[%s22347_s6 + $0x1b8] sm:$0xff]  ;;  %v11849_v21 = vpack.c.bf16 %v7531_v15, %v7530_v28  ;;  %v7540_v15 = vld [vmem:[%s22347_s6 + $0x170] sm:$0xff] }
 0x970   :  { %11791 = vmatpush1.bf16.msra.mxu0 %v11790_v54  ;;  %v11837_v54 = vpack.c.bf16 %v7509_v29, %v7508_v37  ;;  %v7533_v37 = vld [vmem:[%s22347_s6 + $0x138] sm:$0xff]  ;;  %v7550_v29 = vld [vmem:[%s22347_s6 + $0x1c0] sm:$0xff] }
 0x971   :  { %11792 = vmatprep.subr.bf16.mxu0 %v12415_v63 }
 0x972   :  { %11822 = vmatpush3.bf16.msra.mxu1 %v11821_v44  ;;  %v7543_v44 = vld [vmem:[%s22347_s6 + $0x188] sm:$0xff] }
 0x973   :  { %11824 = vmatprep.subr.bf16.mxu1 %v11823_v27  ;;  %v11839_v27 = vpack.c.bf16 %v7543_v44, %v7542_v13  ;;  %v7552_v13 = vld [vmem:[%s22347_s6 + $0x1d0] sm:$0xff]  ;;  %v7553_v44 = vld [vmem:[%s22347_s6 + $0x1d8] sm:$0xff] }
 0x974   :  { %11794 = vmatpush1.bf16.msra.mxu0 %v11793_v9 }
 0x975   :  { %11795 = vmatprep.subr.bf16.mxu0 %v12415_v63 }
 0x976   :  { %11826 = vmatpush3.bf16.msra.mxu1 %v11825_v32 }
 0x977   :  { %11828 = vmatprep.subr.bf16.mxu1 %v11827_v10 }
 0x978   :  { %11797 = vmatpush1.bf16.msra.mxu0 %v11796_v35 }
 0x979   :  { %11798 = vmatprep.subr.bf16.mxu0 %v12415_v63 }
 0x97a   :  { %11830 = vmatpush3.bf16.msra.mxu1 %v11829_v20  ;;  %v11845_v20 = vpack.c.bf16 %v7529_v56, %v7528_v14 }
 0x97b   :  { %11832 = vmatprep.subr.bf16.mxu1 %v11831_v38  ;;  %v7546_v38 = vld [vmem:[%s22347_s6 + $0x1a0] sm:$0xff] }
 0x97c   :  { %11800 = vmatpush1.bf16.msra.mxu0 %v11799_v8  ;;  %v11847_v8 = vpack.c.bf16 %v7547_v26, %v7546_v38  ;;  %v7557_v38 = vld [vmem:[%s22347_s6 + $0x1f8] sm:$0xff] }
 0x97d   :  { %11801 = vmatprep.subr.bf16.mxu0 %v12415_v63 }
 0x97e   :  { %11834 = vmatpush3.bf16.msra.mxu1 %v11833_v23  ;;  %v11851_v23 = vpack.c.bf16 %v7549_v39, %v7548_v22  ;;  %v7541_v22 = vld [vmem:[%s22347_s6 + $0x178] sm:$0xff] }
 0x97f   :  { %11836 = vmatprep.subr.bf16.mxu1 %v11835_v60  ;;  %v7532_v60 = vld [vmem:[%s22347_s6 + $0x130] sm:$0xff] }
 0x980   :  { %11803 = vmatpush1.bf16.msra.mxu0 %v11802_v25  ;;  %v7551_v25 = vld [vmem:[%s22347_s6 + $0x1c8] sm:$0xff]  ;;  %v11853_v49 = vpack.c.bf16 %v7533_v37, %v7532_v60  ;;  %v11869_v60 = vpack.c.bf16 %v7541_v22, %v7540_v15 }
 0x981   :  { %11804 = vmatprep.subr.bf16.mxu0 %v12415_v63  ;;  %v11855_v5 = vpack.c.bf16 %v7551_v25, %v7550_v29  ;;  %v7579_v15 = vld [vmem:[%s22347_s6 + $0x2a8] sm:$0xff] }
 0x982   :  { %11838 = vmatpush3.bf16.msra.mxu1 %v11837_v54  ;;  %v7534_v54 = vld [vmem:[%s22347_s6 + $0x140] sm:$0xff] }
 0x983   :  { %11840 = vmatprep.subr.bf16.mxu1 %v11839_v27  ;;  %v11859_v27 = vpack.c.bf16 %v7553_v44, %v7552_v13 }
 0x984   :  { %11806 = vmatpush1.bf16.msra.mxu0 %v11805_v41  ;;  %v7535_v41 = vld [vmem:[%s22347_s6 + $0x148] sm:$0xff] }
 0x985   :  { %7299 = vmatprep.subr.mxu0 %v12416_v17 }
 0x988   :  { %7300 = vmatpush1.msra.mxu0 %v4780_v19  ;;  %v11857_v19 = vpack.c.bf16 %v7535_v41, %v7534_v54 }
 0x989   :  { %7328 = vmatmul.mubr.f32.vlgmr.msra.gmra.mrb[16].mxu0 %v17401_v30 }
 0x9c0   :  { %v7436_v52 = vpop.permute.xlu1 %7435 }
 0x9c1   :  { %v21622_v9 = vpop.permute.xlu0 %12309 }
 0x9c2   :  { %v12312_v62 = vunpack.i.h.bf16 %v21622_v9  ;;  %v12311_v57 = vunpack.i.l.bf16 %v21622_v9  ;;  %v7592_v9 = vld [vmem:[%s22347_s6 + $0x310] sm:$0xff] }
 0x9c4   :  { %v21626_v30 = vpop.permute.xlu1 %12304  ;;  %v7460_v48 = vsel %vm374_vm1, %v12311_v57, %v12312_v62  ;;  %v7459_v6 = vsel %vm374_vm1, %v7436_v52, %v12311_v57  ;;  %v4782_v52 = vld [vmem:[%s22346_s5 + $0x8] sm:$0x1f]  ;;  %v7536_v57 = vld [vmem:[%s22347_s6 + $0x150] sm:$0xff] }
 0x9c5   :  { %v12306_v4 = vunpack.i.l.bf16 %v21626_v30  ;;  %v7483_v32 = vmax.f32 %v21338_v33, %v7460_v48  ;;  %v7527_v33 = vld [vmem:[%s22347_s6 + $0x108] sm:$0xff]  ;;  %v7537_v48 = vld [vmem:[%s22347_s6 + $0x158] sm:$0xff] }
 0x9c6   :  { %v11841_v2 = vpack.c.bf16 %v7527_v33, %v7526_v61  ;;  %v7539_v33 = vld [vmem:[%s22347_s6 + $0x168] sm:$0xff] }
 0x9c7   :  { %v7385_v10 = vsel %vm323_vm0, %v12306_v4, %v12297_v58  ;;  %7746 = vmatprep.mubr.f32.mxu1 %v7483_v32  ;;  %v7544_v58 = vld [vmem:[%s22347_s6 + $0x190] sm:$0xff]  ;;  %v11861_v4 = vpack.c.bf16 %v7537_v48, %v7536_v57  ;;  %v4820_v32 = vrot.slane %v4782_v52, %v4787_v1  ;;  %v7538_v1 = vld [vmem:[%s22347_s6 + $0x160] sm:$0xff]  ;;  %v7575_v48 = vld [vmem:[%s22347_s6 + $0x288] sm:$0xff] }
 0x9c8   :  { %v7410_v3 = vmax.f32 %v7333_v24, %v7385_v10  ;;  %v11843_v24 = vpack.c.bf16 %v7545_v18, %v7544_v58  ;;  %v7554_v10 = vld [vmem:[%s22347_s6 + $0x1e0] sm:$0xff]  ;;  %v12301_v58 = vunpack.i.l.bf16 %v21620_v45  ;;  %v11865_v18 = vpack.c.bf16 %v7539_v33, %v7538_v1 }
 0x9c9   :  { %v7574_v57 = vld [vmem:[%s22347_s6 + $0x280] sm:$0xff] }
 0x9ca   :  { %v7482_v35 = vmax.f32 %v7410_v3, %v7459_v6  ;;  %v7555_v3 = vld [vmem:[%s22347_s6 + $0x1e8] sm:$0xff]  ;;  %v4828_v6 = vrot.slane %v4782_v52, %v4795_v43  ;;  %v4832_v43 = vrot.slane %v4782_v52, %v4799_v31  ;;  %v7389_v39 = vsel %vm323_vm0, %v12296_v51, %v12301_v58 }
 0x9cb   :  { %v11863_v61 = vpack.c.bf16 %v7555_v3, %v7554_v10  ;;  %v21761_v53 = vmax.f32 %v7337_v11, %v7389_v39  ;;  %v4836_v11 = vrot.slane %v4782_v52, %v4803_v55  ;;  %v11871_v55 = vpack.c.bf16 %v7575_v48, %v7574_v57  ;;  %v7562_v39 = vld [vmem:[%s22347_s6 + $0x220] sm:$0xff] }
 0x9cc   :  { %7747 = vmatmul.mubr.f32.vlgmr.msra.gmra.mrb[16].mxu1 %v7482_v35  ;;  %v4824_v35 = vrot.slane %v4782_v52, %v4791_v42  ;;  %v7607_v52 = vld [vmem:[%s22347_s6 + $0x388] sm:$0xff]  ;;  %v7566_v48 = vld [vmem:[%s22347_s6 + $0x240] sm:$0xff] }
 0x9cd   :  { %11842 = vmatpush3.bf16.msra.mxu1 %v11841_v2  ;;  %v12302_v2 = vunpack.i.h.bf16 %v21620_v45  ;;  %v11903_v10 = vpack.c.bf16 %v7607_v52, %v7606_v40  ;;  %11872 = vmatprep.subr.bf16.mxu0 %v11871_v55  ;;  %v7567_v40 = vld [vmem:[%s22347_s6 + $0x248] sm:$0xff]  ;;  %v7584_v52 = vld [vmem:[%s22347_s6 + $0x2d0] sm:$0xff] }
 0x9ce   :  { %11844 = vmatprep.subr.bf16.mxu1 %v11843_v24  ;;  %v7639_v45 = vld [vmem:[%s22347_s6 + $0x488] sm:$0xff] }
 0x9d1   :  { %11846 = vmatpush3.bf16.msra.mxu1 %v11845_v20  ;;  %v7556_v20 = vld [vmem:[%s22347_s6 + $0x1f0] sm:$0xff] }
 0x9d2   :  { %11848 = vmatprep.subr.bf16.mxu1 %v11847_v8  ;;  %v11867_v31 = vpack.c.bf16 %v7557_v38, %v7556_v20  ;;  %v7560_v20 = vld [vmem:[%s22347_s6 + $0x210] sm:$0xff]  ;;  %v7561_v38 = vld [vmem:[%s22347_s6 + $0x218] sm:$0xff] }
 0x9d5   :  { %11850 = vmatpush3.bf16.msra.mxu1 %v11849_v21  ;;  %v7390_v21 = vsel %vm323_vm0, %v12301_v58, %v12302_v2 }
 0x9d6   :  { %11852 = vmatprep.subr.bf16.mxu1 %v11851_v23  ;;  %v21765_v51 = vmax.f32 %v7338_v16, %v7390_v21  ;;  %v7563_v21 = vld [vmem:[%s22347_s6 + $0x228] sm:$0xff] }
 0x9d8   :  { %v12318_v34 = vpack.i.bf16 %v21765_v51, %v21761_v53 }
 0x9d9   :  { %11854 = vmatpush3.bf16.msra.mxu1 %v11853_v49 }
 0x9da   :  { %11856 = vmatprep.subr.bf16.mxu1 %v11855_v5 }
 0x9dd   :  { %11858 = vmatpush3.bf16.msra.mxu1 %v11857_v19 }
 0x9de   :  { %11860 = vmatprep.subr.bf16.mxu1 %v11859_v27 }
 0x9e1   :  { %11862 = vmatpush3.bf16.msra.mxu1 %v11861_v4  ;;  %v7558_v4 = vld [vmem:[%s22347_s6 + $0x200] sm:$0xff] }
 0x9e2   :  { %11864 = vmatprep.subr.bf16.mxu1 %v11863_v61 }
 0x9e5   :  { %11866 = vmatpush3.bf16.msra.mxu1 %v11865_v18 }
 0x9e6   :  { %11868 = vmatprep.subr.bf16.mxu1 %v11867_v31  ;;  %v7578_v31 = vld [vmem:[%s22347_s6 + $0x2a0] sm:$0xff] }
 0x9e7   :  { %v11879_v22 = vpack.c.bf16 %v7579_v15, %v7578_v31 }
 0x9e9   :  { %11870 = vmatpush3.bf16.msra.mxu1 %v11869_v60  ;;  %v11881_v60 = vpack.c.bf16 %v7563_v21, %v7562_v39 }
 0x9ea   :  { %11904 = vmatprep.subr.bf16.mxu1 %v11903_v10 }
 0x9f5   :  { %v6623_v24 = vpop.f32.mrb[10].mxu0 }
 0x9f6   :  { %v21730_v42 = vadd.f32 %v6623_v24, %v4820_v32  ;;  %v6978_v14 = vpop.f32.mrb[10].mxu1  ;;  %v6625_v56 = vpop.f32.mrb[11].mxu0  ;;  %v7559_v32 = vld [vmem:[%s22347_s6 + $0x208] sm:$0xff] }
 0x9f7   :  { %v21738_v26 = vadd.f32 %v6978_v14, %v4828_v6  ;;  %v21740_v28 = vadd.f32 %v6625_v56, %v4824_v35  ;;  %v6980_v8 = vpop.f32.mrb[11].mxu1  ;;  %v11873_v3 = vpack.c.bf16 %v7559_v32, %v7558_v4  ;;  %v7577_v14 = vld [vmem:[%s22347_s6 + $0x298] sm:$0xff]  ;;  %v11889_v4 = vpack.c.bf16 %v7567_v40, %v7566_v48 }
 0x9f8   :  { %v7341_v23 = vmax.f32 %v21730_v42, 0.0  ;;  %v21757_v25 = vadd.f32 %v6980_v8, %v4832_v43  ;;  %v7576_v43 = vld [vmem:[%s22347_s6 + $0x290] sm:$0xff]  ;;  %v11877_v8 = vpack.c.bf16 %v7561_v38, %v7560_v20  ;;  %v7585_v32 = vld [vmem:[%s22347_s6 + $0x2d8] sm:$0xff] }
 0x9f9   :  { %v7343_v37 = vmax.f32 %v21738_v26, 0.0  ;;  %v7342_v29 = vmax.f32 %v21740_v28, 0.0  ;;  %11874 = vmatpush3.bf16.msra.mxu0 %v11873_v3  ;;  %v11875_v56 = vpack.c.bf16 %v7577_v14, %v7576_v43  ;;  %v11891_v10 = vpack.c.bf16 %v7585_v32, %v7584_v52  ;;  %v7568_v3 = vld [vmem:[%s22347_s6 + $0x250] sm:$0xff]  ;;  %v7655_v26 = vld [vmem:[%s22347_s6 + $0x508] sm:$0xff] }
 0x9fa   :  { %v7344_v5 = vmax.f32 %v21757_v25, 0.0  ;;  %v12307_v43 = vunpack.i.h.bf16 %v21626_v30  ;;  %v7588_v14 = vld [vmem:[%s22347_s6 + $0x2f0] sm:$0xff]  ;;  %v7623_v25 = vld [vmem:[%s22347_s6 + $0x408] sm:$0xff] }
 0x9fb   :  { %v12313_v49 = vpack.i.bf16 %v7342_v29, %v7341_v23  ;;  %7379 = vrot.lane.b32.xlu1 %v7343_v37, %s12406_s21  ;;  %11876 = vmatprep.subr.bf16.mxu0 %v11875_v56  ;;  %v7589_v56 = vld [vmem:[%s22347_s6 + $0x2f8] sm:$0xff]  ;;  %v7572_v38 = vld [vmem:[%s22347_s6 + $0x270] sm:$0xff] }
 0x9fc   :  { %v11899_v20 = vpack.c.bf16 %v7589_v56, %v7588_v14  ;;  %v7391_v15 = vsel %vm323_vm0, %v12302_v2, %v12307_v43  ;;  %v7598_v56 = vld [vmem:[%s22347_s6 + $0x340] sm:$0xff] }
 0x9fd   :  { %12314 = vrot.lane.b32.xlu0 %v12313_v49, %s12406_s21  ;;  %11878 = vmatpush3.bf16.msra.mxu0 %v11877_v8  ;;  %v7580_v49 = vld [vmem:[%s22347_s6 + $0x2b0] sm:$0xff]  ;;  %v7573_v8 = vld [vmem:[%s22347_s6 + $0x278] sm:$0xff]  ;;  %v21910_v2 = vmax.f32 %v7339_v36, %v7391_v15  ;;  %v7590_v36 = vld [vmem:[%s22347_s6 + $0x300] sm:$0xff] }
 0x9fe   :  { %11880 = vmatprep.subr.bf16.mxu0 %v11879_v22  ;;  %v11901_v31 = vpack.c.bf16 %v7573_v8, %v7572_v38  ;;  %v11905_v40 = vpack.c.bf16 %v7591_v12, %v7590_v36  ;;  %v7616_v38 = vld [vmem:[%s22347_s6 + $0x3d0] sm:$0xff]  ;;  %v7617_v8 = vld [vmem:[%s22347_s6 + $0x3d8] sm:$0xff] }
 0x9ff   :  { %7381 = vrot.lane.b32.xlu1 %v7344_v5, %s12406_s21  ;;  %v7600_v15 = vld [vmem:[%s22347_s6 + $0x350] sm:$0xff]  ;;  %v7621_v36 = vld [vmem:[%s22347_s6 + $0x3f8] sm:$0xff] }
 0xa01   :  { %12319 = vrot.lane.b32.xlu0 %v12318_v34, %s12407_s2  ;;  %v7581_v34 = vld [vmem:[%s22347_s6 + $0x2b8] sm:$0xff]  ;;  %11882 = vmatpush3.bf16.msra.mxu0 %v11881_v60 }
 0xa16   :  { %v8403_v0 = vpop.f32.mrb[12].mxu0 }
 0xa17   :  { %v8438_v16 = vpop.f32.mrb[12].mxu1  ;;  %v8404_v54 = vpop.f32.mrb[13].mxu0 }
 0xa18   :  { %v8405_v41 = vadd.f32 %v8404_v54, %v8403_v0  ;;  %v8439_v19 = vpop.f32.mrb[13].mxu1  ;;  %v11883_v0 = vpack.c.bf16 %v7581_v34, %v7580_v49  ;;  %v7565_v54 = vld [vmem:[%s22347_s6 + $0x238] sm:$0xff] }
 0xa19   :  { %v8440_v13 = vadd.f32 %v8439_v19, %v8438_v16 }
 0xa1a   :  { %v7050_v44 = vadd.f32 %v8405_v41, %v4836_v11  ;;  %v7564_v11 = vld [vmem:[%s22347_s6 + $0x230] sm:$0xff]  ;;  %11884 = vmatprep.subr.bf16.mxu0 %v11883_v0  ;;  %v7638_v0 = vld [vmem:[%s22347_s6 + $0x480] sm:$0xff] }
 0xa1c   :  { %v7120_v27 = vadd.f32 %v8440_v13, %v7050_v44  ;;  %v11885_v13 = vpack.c.bf16 %v7565_v54, %v7564_v11  ;;  %v7582_v44 = vld [vmem:[%s22347_s6 + $0x2c0] sm:$0xff] }
 0xa1e   :  { %11886 = vmatpush3.bf16.msra.mxu0 %v11885_v13 }
 0xa36   :  { %v8473_v6 = vpop.f32.mrb[14].mxu0 }
 0xa37   :  { %v8508_v35 = vpop.f32.mrb[14].mxu1  ;;  %v8474_v61 = vpop.f32.mrb[15].mxu0 }
 0xa38   :  { %v8475_v1 = vadd.f32 %v8474_v61, %v8473_v6  ;;  %v8509_v33 = vpop.f32.mrb[15].mxu1  ;;  %v7569_v6 = vld [vmem:[%s22347_s6 + $0x258] sm:$0xff]  ;;  %v7587_v61 = vld [vmem:[%s22347_s6 + $0x2e8] sm:$0xff] }
 0xa39   :  { %v8510_v58 = vadd.f32 %v8509_v33, %v8508_v35  ;;  %v7586_v35 = vld [vmem:[%s22347_s6 + $0x2e0] sm:$0xff] }
 0xa3a   :  { %v7190_v18 = vadd.f32 %v8475_v1, %v7120_v27  ;;  %v7583_v27 = vld [vmem:[%s22347_s6 + $0x2c8] sm:$0xff]  ;;  %v11893_v1 = vpack.c.bf16 %v7569_v6, %v7568_v3  ;;  %v11895_v33 = vpack.c.bf16 %v7587_v61, %v7586_v35  ;;  %v7612_v6 = vld [vmem:[%s22347_s6 + $0x3b0] sm:$0xff]  ;;  %v7613_v35 = vld [vmem:[%s22347_s6 + $0x3b8] sm:$0xff] }
 0xa3b   :  { %v11887_v57 = vpack.c.bf16 %v7583_v27, %v7582_v44  ;;  %v7595_v3 = vld [vmem:[%s22347_s6 + $0x328] sm:$0xff] }
 0xa3c   :  { %v7260_v24 = vadd.f32 %v8510_v58, %v7190_v18  ;;  %v7570_v58 = vld [vmem:[%s22347_s6 + $0x260] sm:$0xff]  ;;  %v7571_v18 = vld [vmem:[%s22347_s6 + $0x268] sm:$0xff] }
 0xa3d   :  { %11888 = vmatprep.subr.bf16.mxu0 %v11887_v57 }
 0xa3e   :  { %11890 = vmatpush3.bf16.msra.mxu0 %v11889_v4  ;;  %v7611_v4 = vld [vmem:[%s22347_s6 + $0x3a8] sm:$0xff] }
 0xa3f   :  { %11892 = vmatprep.subr.bf16.mxu0 %v11891_v10  ;;  %v7594_v10 = vld [vmem:[%s22347_s6 + $0x320] sm:$0xff] }
 0xa40   :  { %v11913_v61 = vpack.c.bf16 %v7595_v3, %v7594_v10 }
 0xa42   :  { %11894 = vmatpush3.bf16.msra.mxu0 %v11893_v1  ;;  %v11915_v1 = vpack.c.bf16 %v7613_v35, %v7612_v6  ;;  %v7640_v35 = vld [vmem:[%s22347_s6 + $0x490] sm:$0xff] }
 0xa43   :  { %11896 = vmatprep.subr.bf16.mxu0 %v11895_v33  ;;  %v7596_v33 = vld [vmem:[%s22347_s6 + $0x330] sm:$0xff] }
 0xa5c   :  { %v7329_v16 = vpop.f32.mrb[16].mxu0 }
 0xa5d   :  { %v21838_v41 = vadd.f32 %v7329_v16, %v7260_v24  ;;  %v7331_v19 = vpop.f32.mrb[17].mxu0  ;;  %v11897_v24 = vpack.c.bf16 %v7571_v18, %v7570_v58  ;;  %v7597_v58 = vld [vmem:[%s22347_s6 + $0x338] sm:$0xff]  ;;  %v7614_v18 = vld [vmem:[%s22347_s6 + $0x3c0] sm:$0xff] }
 0xa5f   :  { %v7345_v55 = vmax.f32 %v21838_v41, 0.0  ;;  %11898 = vmatpush3.bf16.msra.mxu0 %v11897_v24  ;;  %v7615_v24 = vld [vmem:[%s22347_s6 + $0x3c8] sm:$0xff]  ;;  %v7654_v41 = vld [vmem:[%s22347_s6 + $0x500] sm:$0xff] }
 0xa60   :  { %11900 = vmatprep.subr.bf16.mxu0 %v11899_v20  ;;  %v11919_v14 = vpack.c.bf16 %v7615_v24, %v7614_v18  ;;  %v7599_v20 = vld [vmem:[%s22347_s6 + $0x348] sm:$0xff]  ;;  %v11968_v3 = vpack.c.bf16 %v7655_v26, %v7654_v41  ;;  %v7664_v26 = vld [vmem:[%s22347_s6 + $0x550] sm:$0xff] }
 0xa61   :  { %7383 = vrot.lane.b32.xlu0 %v7345_v55, %s12406_s21 }
 0xa63   :  { %11902 = vmatpush3.bf16.msra.mxu0 %v11901_v31  ;;  %v11921_v31 = vpack.c.bf16 %v7599_v20, %v7598_v56 }
 0xa6d   :  { %v21896_v21 = vpop.permute.xlu1 %7379 }
 0xa6f   :  { %v12315_v30 = vpop.permute.xlu0 %12314 }
 0xa70   :  { %v12317_v22 = vunpack.i.h.bf16 %v12315_v30  ;;  %v12316_v39 = vunpack.i.l.bf16 %v12315_v30  ;;  %v11923_v30 = vpack.c.bf16 %v7617_v8, %v7616_v38  ;;  %v7624_v38 = vld [vmem:[%s22347_s6 + $0x410] sm:$0xff]  ;;  %v7658_v8 = vld [vmem:[%s22347_s6 + $0x520] sm:$0xff] }
 0xa72   :  { %v7392_v60 = vsel %vm323_vm0, %v12307_v43, %v12316_v39  ;;  %v7393_v49 = vsel %vm323_vm0, %v12316_v39, %v12317_v22  ;;  %v7394_v34 = vsel %vm323_vm0, %v12317_v22, %v21896_v21  ;;  %v11917_v43 = vpack.c.bf16 %v7597_v58, %v7596_v33  ;;  %v7601_v22 = vld [vmem:[%s22347_s6 + $0x358] sm:$0xff]  ;;  %v7618_v39 = vld [vmem:[%s22347_s6 + $0x3e0] sm:$0xff] }
 0xa73   :  { %v21914_v11 = vmax.f32 %v7340_v59, %v7392_v60  ;;  %v21918_v16 = vmax.f32 %v7341_v23, %v7393_v49  ;;  %v21922_v54 = vmax.f32 %v7342_v29, %v7394_v34  ;;  %v21924_v19 = vpop.permute.xlu0 %12319  ;;  %v11935_v59 = vpack.c.bf16 %v7639_v45, %v7638_v0  ;;  %v7608_v23 = vld [vmem:[%s22347_s6 + $0x390] sm:$0xff]  ;;  %v7609_v29 = vld [vmem:[%s22347_s6 + $0x398] sm:$0xff]  ;;  %v7619_v60 = vld [vmem:[%s22347_s6 + $0x3e8] sm:$0xff] }
 0xa74   :  { %v12322_v13 = vunpack.i.h.bf16 %v21924_v19  ;;  %v12321_v7 = vunpack.i.l.bf16 %v21924_v19  ;;  %v11907_v52 = vpack.c.bf16 %v7609_v29, %v7608_v23  ;;  %v11925_v49 = vpack.c.bf16 %v7601_v22, %v7600_v15  ;;  %v7602_v0 = vld [vmem:[%s22347_s6 + $0x360] sm:$0xff]  ;;  %v7603_v45 = vld [vmem:[%s22347_s6 + $0x368] sm:$0xff]  ;;  %v7656_v19 = vld [vmem:[%s22347_s6 + $0x510] sm:$0xff] }
 0xa75   :  { %v12328_v42 = vpack.i.bf16 %v21922_v54, %v21918_v16  ;;  %v12323_v28 = vpack.i.bf16 %v21914_v11, %v21910_v2  ;;  %11936 = vmatprep.subr.bf16.mxu0 %v11935_v59  ;;  %v11927_v34 = vpack.c.bf16 %v7619_v60, %v7618_v39  ;;  %v11929_v12 = vpack.c.bf16 %v7603_v45, %v7602_v0  ;;  %v7626_v22 = vld [vmem:[%s22347_s6 + $0x420] sm:$0xff]  ;;  %v7627_v39 = vld [vmem:[%s22347_s6 + $0x428] sm:$0xff]  ;;  %v7644_v60 = vld [vmem:[%s22347_s6 + $0x4b0] sm:$0xff] }
 0xa76   :  { %v7461_v44 = vsel %vm374_vm1, %v12312_v62, %v12321_v7  ;;  %v7462_v27 = vsel %vm374_vm1, %v12321_v7, %v12322_v13  ;;  %v7593_v62 = vld [vmem:[%s22347_s6 + $0x318] sm:$0xff]  ;;  %v7620_v7 = vld [vmem:[%s22347_s6 + $0x3f0] sm:$0xff]  ;;  %v11945_v45 = vpack.c.bf16 %v7627_v39, %v7626_v22  ;;  %v8364_v22 = vld [vmem:[%s22348_s7] ss:$0 sm:$0xff] }
 0xa77   :  { %v7484_v57 = vmax.f32 %v21334_v46, %v7461_v44  ;;  %12329 = vrot.lane.b32.xlu0 %v12328_v42, %s12407_s2  ;;  %12324 = vrot.lane.b32.xlu1 %v12323_v28, %s12407_s2  ;;  %v7485_v48 = vmax.f32 %v21342_v47, %v7462_v27  ;;  %v7610_v46 = vld [vmem:[%s22347_s6 + $0x3a0] sm:$0xff]  ;;  %v11909_v47 = vpack.c.bf16 %v7593_v62, %v7592_v9  ;;  %v7604_v42 = vld [vmem:[%s22347_s6 + $0x370] sm:$0xff] }
 0xa78   :  { %v11911_v32 = vpack.c.bf16 %v7611_v4, %v7610_v46  ;;  %v11931_v59 = vpack.c.bf16 %v7621_v36, %v7620_v7  ;;  %v7605_v28 = vld [vmem:[%s22347_s6 + $0x378] sm:$0xff]  ;;  %v7660_v0 = vld [vmem:[%s22347_s6 + $0x530] sm:$0xff] }
 0xa79   :  { %7816 = vmatprep.mubr.f32.mxu1 %v7485_v48  ;;  %v11933_v23 = vpack.c.bf16 %v7605_v28, %v7604_v42  ;;  %v7661_v7 = vld [vmem:[%s22347_s6 + $0x538] sm:$0xff]  ;;  %v7646_v42 = vld [vmem:[%s22347_s6 + $0x4c0] sm:$0xff]  ;;  %v7647_v28 = vld [vmem:[%s22347_s6 + $0x4c8] sm:$0xff] }
 0xa7a   :  { %7817 = vmatmul.mubr.f32.vlgmr.msra.gmra.mrb[18].mxu1 %v7484_v57  ;;  %v7382_v57 = vpop.permute.xlu1 %7381 }
 0xa7b   :  { %11906 = vmatpush3.bf16.msra.mxu1 %v11905_v40  ;;  %v7395_v48 = vsel %vm323_vm0, %v21896_v21, %v7382_v57 }
 0xa7c   :  { %11908 = vmatprep.subr.bf16.mxu1 %v11907_v52  ;;  %v22042_v62 = vmax.f32 %v7343_v37, %v7395_v48  ;;  %v7622_v37 = vld [vmem:[%s22347_s6 + $0x400] sm:$0xff]  ;;  %v11951_v48 = vpack.c.bf16 %v7647_v28, %v7646_v42 }
 0xa7d   :  { %v11937_v6 = vpack.c.bf16 %v7623_v25, %v7622_v37  ;;  %v7665_v25 = vld [vmem:[%s22347_s6 + $0x558] sm:$0xff] }
 0xa7f   :  { %11910 = vmatpush3.bf16.msra.mxu1 %v11909_v47 }
 0xa80   :  { %11912 = vmatprep.subr.bf16.mxu1 %v11911_v32 }
 0xa83   :  { %11914 = vmatpush3.bf16.msra.mxu1 %v11913_v61  ;;  %v7641_v61 = vld [vmem:[%s22347_s6 + $0x498] sm:$0xff] }
 0xa84   :  { %11916 = vmatprep.subr.bf16.mxu1 %v11915_v1  ;;  %v11939_v20 = vpack.c.bf16 %v7641_v61, %v7640_v35  ;;  %v7666_v35 = vld [vmem:[%s22347_s6 + $0x560] sm:$0xff] }
 0xa87   :  { %11918 = vmatpush3.bf16.msra.mxu1 %v11917_v43 }
 0xa88   :  { %11920 = vmatprep.subr.bf16.mxu1 %v11919_v14 }
 0xa8b   :  { %11922 = vmatpush3.bf16.msra.mxu1 %v11921_v31 }
 0xa8c   :  { %11924 = vmatprep.subr.bf16.mxu1 %v11923_v30  ;;  %v7659_v30 = vld [vmem:[%s22347_s6 + $0x528] sm:$0xff] }
 0xa8f   :  { %11926 = vmatpush3.bf16.msra.mxu1 %v11925_v49  ;;  %v7645_v49 = vld [vmem:[%s22347_s6 + $0x4b8] sm:$0xff] }
 0xa90   :  { %11928 = vmatprep.subr.bf16.mxu1 %v11927_v34  ;;  %v11974_v34 = vpack.c.bf16 %v7659_v30, %v7658_v8  ;;  %v11947_v36 = vpack.c.bf16 %v7645_v49, %v7644_v60  ;;  %v7671_v8 = vld [vmem:[%s22347_s6 + $0x588] sm:$0xff]  ;;  %v8103_v60 = vld [vmem:[%s22349_s8] sm:$0xff] }
 0xa91   :  { %v8104_v49 = vld [vmem:[%s22349_s8 + $0x8] sm:$0xff] }
 0xa92   :  { %v11995_v42 = vpack.c.bf16 %v8104_v49, %v8103_v60  ;;  %v8207_v60 = vld [vmem:[%s22351_s10 + $0x38] sm:$0xff] }
 0xa93   :  { %11930 = vmatpush3.bf16.msra.mxu1 %v11929_v12  ;;  %v7628_v12 = vld [vmem:[%s22347_s6 + $0x430] sm:$0xff] }
 0xa94   :  { %11932 = vmatprep.subr.bf16.mxu1 %v11931_v59  ;;  %v7629_v59 = vld [vmem:[%s22347_s6 + $0x438] sm:$0xff] }
 0xa97   :  { %11934 = vmatpush3.bf16.msra.mxu1 %v11933_v23  ;;  %v11977_v23 = vpack.c.bf16 %v7661_v7, %v7660_v0 }
 0xa98   :  { %11967 = vmatprep.subr.bf16.mxu1 %v12415_v63 }
 0xa9f   :  { %v8543_v29 = vpop.f32.mrb[16].mxu1 }
 0xaa0   :  { %v8544_v44 = vpop.f32.mrb[17].mxu1 }
 0xaa1   :  { %v22033_v27 = vadd.f32 %v8544_v44, %v8543_v29  ;;  %v7662_v29 = vld [vmem:[%s22347_s6 + $0x540] sm:$0xff]  ;;  %v11949_v44 = vpack.c.bf16 %v7629_v59, %v7628_v12 }
 0xad3   :  { %v7384_v40 = vpop.permute.xlu0 %7383 }
 0xad4   :  { %v7396_v52 = vsel %vm323_vm0, %v7382_v57, %v7384_v40  ;;  %v7422_v9 = vmax.f32 %v7345_v55, %v7384_v40  ;;  %v7663_v57 = vld [vmem:[%s22347_s6 + $0x548] sm:$0xff]  ;;  %v7630_v40 = vld [vmem:[%s22347_s6 + $0x440] sm:$0xff] }
 0xad5   :  { %v22046_v46 = vmax.f32 %v7344_v5, %v7396_v52  ;;  %v7631_v52 = vld [vmem:[%s22347_s6 + $0x448] sm:$0xff]  ;;  %v11980_v41 = vpack.c.bf16 %v7663_v57, %v7662_v29 }
 0xad6   :  { %7457 = vrot.lane.b32.xlu0 %v7422_v9, %s12407_s2  ;;  %v7648_v9 = vld [vmem:[%s22347_s6 + $0x4d0] sm:$0xff]  ;;  %v11953_v37 = vpack.c.bf16 %v7631_v52, %v7630_v40  ;;  %v8110_v40 = vld [vmem:[%s22349_s8 + $0x38] sm:$0xff] }
 0xad7   :  { %v12333_v4 = vpack.i.bf16 %v22046_v46, %v22042_v62 }
 0xad9   :  { %12334 = vrot.lane.b32.xlu1 %v12333_v4, %s12407_s2  ;;  %v7649_v4 = vld [vmem:[%s22347_s6 + $0x4d8] sm:$0xff] }
 0xae9   :  { %v22064_v5 = vpop.permute.xlu0 %12329  ;;  %v12325_v55 = vpop.permute.xlu1 %12324 }
 0xaea   :  { %v12332_v21 = vunpack.i.h.bf16 %v22064_v5  ;;  %v12331_v47 = vunpack.i.l.bf16 %v22064_v5  ;;  %v12327_v32 = vunpack.i.h.bf16 %v12325_v55  ;;  %v12326_v10 = vunpack.i.l.bf16 %v12325_v55  ;;  %v8106_v5 = vld [vmem:[%s22349_s8 + $0x18] sm:$0xff] }
 0xaeb   :  { %v11955_v55 = vpack.c.bf16 %v7649_v4, %v7648_v9  ;;  %v8111_v9 = vld [vmem:[%s22349_s8 + $0x40] sm:$0xff]  ;;  %v8112_v4 = vld [vmem:[%s22349_s8 + $0x48] sm:$0xff] }
 0xaec   :  { %v7465_v1 = vsel %vm374_vm1, %v12327_v32, %v12331_v47  ;;  %v7463_v33 = vsel %vm374_vm1, %v12322_v13, %v12326_v10  ;;  %v7464_v58 = vsel %vm374_vm1, %v12326_v10, %v12327_v32  ;;  %v7466_v18 = vsel %vm374_vm1, %v12331_v47, %v12332_v21  ;;  %v7657_v13 = vld [vmem:[%s22347_s6 + $0x518] sm:$0xff]  ;;  %v7632_v47 = vld [vmem:[%s22347_s6 + $0x450] sm:$0xff]  ;;  %v7650_v10 = vld [vmem:[%s22347_s6 + $0x4e0] sm:$0xff] }
 0xaed   :  { %v7488_v24 = vmax.f32 %v21910_v2, %v7465_v1  ;;  %v7486_v43 = vmax.f32 %v21761_v53, %v7463_v33  ;;  %v7487_v14 = vmax.f32 %v21765_v51, %v7464_v58  ;;  %v7489_v56 = vmax.f32 %v21914_v11, %v7466_v18  ;;  %v7625_v53 = vld [vmem:[%s22347_s6 + $0x418] sm:$0xff]  ;;  %v7642_v51 = vld [vmem:[%s22347_s6 + $0x4a0] sm:$0xff]  ;;  %v7643_v2 = vld [vmem:[%s22347_s6 + $0x4a8] sm:$0xff] }
 0xaee   :  { %v11971_v11 = vpack.c.bf16 %v7657_v13, %v7656_v19  ;;  %v11941_v31 = vpack.c.bf16 %v7625_v53, %v7624_v38  ;;  %v11943_v15 = vpack.c.bf16 %v7643_v2, %v7642_v51  ;;  %v7633_v32 = vld [vmem:[%s22347_s6 + $0x458] sm:$0xff]  ;;  %v7667_v1 = vld [vmem:[%s22347_s6 + $0x568] sm:$0xff]  ;;  %v7634_v58 = vld [vmem:[%s22347_s6 + $0x460] sm:$0xff] }
 0xaef   :  { %7886 = vmatprep.mubr.f32.mxu0 %v7487_v14  ;;  %7956 = vmatprep.mubr.f32.mxu1 %v7489_v56  ;;  %v11957_v61 = vpack.c.bf16 %v7633_v32, %v7632_v47  ;;  %v7635_v18 = vld [vmem:[%s22347_s6 + $0x468] sm:$0xff]  ;;  %v11986_v14 = vpack.c.bf16 %v7667_v1, %v7666_v35  ;;  %v7668_v56 = vld [vmem:[%s22347_s6 + $0x570] sm:$0xff]  ;;  %v7669_v13 = vld [vmem:[%s22347_s6 + $0x578] sm:$0xff] }
 0xaf0   :  { %7887 = vmatmul.mubr.f32.vlgmr.msra.gmra.mrb[18].mxu0 %v7486_v43  ;;  %7957 = vmatmul.mubr.f32.vlgmr.msra.gmra.mrb[20].mxu1 %v7488_v24  ;;  %v7652_v24 = vld [vmem:[%s22347_s6 + $0x4f0] sm:$0xff]  ;;  %v7653_v43 = vld [vmem:[%s22347_s6 + $0x4f8] sm:$0xff]  ;;  %v11961_v19 = vpack.c.bf16 %v7635_v18, %v7634_v58  ;;  %v11989_v51 = vpack.c.bf16 %v7669_v13, %v7668_v56  ;;  %v8116_v47 = vld [vmem:[%s22349_s8 + $0x68] sm:$0xff] }
 0xaf1   :  { %11969 = vmatpush1.bf16.msra.mxu1 %v11968_v3  ;;  %11938 = vmatpush3.bf16.msra.mxu0 %v11937_v6  ;;  %v7651_v3 = vld [vmem:[%s22347_s6 + $0x4e8] sm:$0xff]  ;;  %v11983_v6 = vpack.c.bf16 %v7665_v25, %v7664_v26  ;;  %v7636_v38 = vld [vmem:[%s22347_s6 + $0x470] sm:$0xff]  ;;  %v7637_v53 = vld [vmem:[%s22347_s6 + $0x478] sm:$0xff] }
 0xaf2   :  { %11970 = vmatprep.subr.bf16.mxu1 %v12415_v63  ;;  %11940 = vmatprep.subr.bf16.mxu0 %v11939_v20  ;;  %v11959_v33 = vpack.c.bf16 %v7651_v3, %v7650_v10  ;;  %v11963_v20 = vpack.c.bf16 %v7653_v43, %v7652_v24  ;;  %v11965_v2 = vpack.c.bf16 %v7637_v53, %v7636_v38  ;;  %v8113_v26 = vld [vmem:[%s22349_s8 + $0x50] sm:$0xff]  ;;  %v8201_v38 = vld [vmem:[%s22351_s10 + $0x8] sm:$0xff] }
 0xaf3   :  { %v8117_v10 = vld [vmem:[%s22349_s8 + $0x70] sm:$0xff] }
 0xaf5   :  { %11972 = vmatpush1.bf16.msra.mxu1 %v11971_v11  ;;  %11942 = vmatpush3.bf16.msra.mxu0 %v11941_v31  ;;  %v7670_v11 = vld [vmem:[%s22347_s6 + $0x580] sm:$0xff] }
 0xaf6   :  { %11973 = vmatprep.subr.bf16.mxu1 %v12415_v63  ;;  %11944 = vmatprep.subr.bf16.mxu0 %v11943_v15  ;;  %v11992_v31 = vpack.c.bf16 %v7671_v8, %v7670_v11  ;;  %v8202_v11 = vld [vmem:[%s22351_s10 + $0x10] sm:$0xff]  ;;  %v8203_v8 = vld [vmem:[%s22351_s10 + $0x18] sm:$0xff] }
 0xaf9   :  { %11975 = vmatpush1.bf16.msra.mxu1 %v11974_v34  ;;  %11946 = vmatpush3.bf16.msra.mxu0 %v11945_v45  ;;  %v7749_v45 = vadd.f32 %v22033_v27, %v8364_v22  ;;  %v8105_v27 = vld [vmem:[%s22349_s8 + $0x10] sm:$0xff] }
 0xafa   :  { %11976 = vmatprep.subr.bf16.mxu1 %v12415_v63  ;;  %11948 = vmatprep.subr.bf16.mxu0 %v11947_v36  ;;  %v11998_v57 = vpack.c.bf16 %v8106_v5, %v8105_v27 }
 0xafd   :  { %11978 = vmatpush1.bf16.msra.mxu1 %v11977_v23  ;;  %11950 = vmatpush3.bf16.msra.mxu0 %v11949_v44 }
 0xafe   :  { %11979 = vmatprep.subr.bf16.mxu1 %v12415_v63  ;;  %11952 = vmatprep.subr.bf16.mxu0 %v11951_v48  ;;  %v8109_v48 = vld [vmem:[%s22349_s8 + $0x30] sm:$0xff] }
 0xaff   :  { %v12004_v52 = vpack.c.bf16 %v8110_v40, %v8109_v48 }
 0xb01   :  { %11981 = vmatpush1.bf16.msra.mxu1 %v11980_v41  ;;  %11954 = vmatpush3.bf16.msra.mxu0 %v11953_v37  ;;  %v12007_v41 = vpack.c.bf16 %v8112_v4, %v8111_v9  ;;  %v8114_v37 = vld [vmem:[%s22349_s8 + $0x58] sm:$0xff] }
 0xb02   :  { %11982 = vmatprep.subr.bf16.mxu1 %v12415_v63  ;;  %11956 = vmatprep.subr.bf16.mxu0 %v11955_v55  ;;  %v12010_v25 = vpack.c.bf16 %v8114_v37, %v8113_v26  ;;  %v8115_v55 = vld [vmem:[%s22349_s8 + $0x60] sm:$0xff] }
 0xb03   :  { %v12013_v32 = vpack.c.bf16 %v8116_v47, %v8115_v55 }
 0xb05   :  { %11984 = vmatpush1.bf16.msra.mxu1 %v11983_v6  ;;  %11958 = vmatpush3.bf16.msra.mxu0 %v11957_v61 }
 0xb06   :  { %11985 = vmatprep.subr.bf16.mxu1 %v12415_v63  ;;  %11960 = vmatprep.subr.bf16.mxu0 %v11959_v33 }
 0xb09   :  { %11987 = vmatpush1.bf16.msra.mxu1 %v11986_v14  ;;  %11962 = vmatpush3.bf16.msra.mxu0 %v11961_v19 }
 0xb0a   :  { %11988 = vmatprep.subr.bf16.mxu1 %v12415_v63  ;;  %11964 = vmatprep.subr.bf16.mxu0 %v11963_v20  ;;  %v8200_v20 = vld [vmem:[%s22351_s10] sm:$0xff] }
 0xb0d   :  { %11990 = vmatpush1.bf16.msra.mxu1 %v11989_v51  ;;  %11966 = vmatpush3.bf16.msra.mxu0 %v11965_v2  ;;  %v12016_v51 = vpack.c.bf16 %v8201_v38, %v8200_v20 }
 0xb0e   :  { %11991 = vmatprep.subr.bf16.mxu1 %v12415_v63  ;;  %11994 = vmatprep.subr.bf16.mxu0 %v12415_v63 }
 0xb11   :  { %11993 = vmatpush1.bf16.msra.mxu1 %v11992_v31  ;;  %v12019_v31 = vpack.c.bf16 %v8203_v8, %v8202_v11 }
 0xb48   :  { %v7458_v30 = vpop.permute.xlu0 %7457 }
 0xb49   :  { %v7493_v15 = vmax.f32 %v22046_v46, %v7458_v30 }
 0xb4b   :  { %v12335_v39 = vpop.permute.xlu1 %12334  ;;  %8365 = vmatprep.mubr.msk.f32.mxu1 %vm2851_vm9, %v7493_v15  ;;  %v8205_v15 = vld [vmem:[%s22351_s10 + $0x28] sm:$0xff] }
 0xb4c   :  { %v12337_v34 = vunpack.i.h.bf16 %v12335_v39  ;;  %v12336_v0 = vunpack.i.l.bf16 %v12335_v39  ;;  %v8206_v39 = vld [vmem:[%s22351_s10 + $0x30] sm:$0xff] }
 0xb4d   :  { %v8578_v46 = vpop.f32.mrb[18].mxu1  ;;  %v12025_v49 = vpack.c.bf16 %v8207_v60, %v8206_v39 }
 0xb4e   :  { %v7469_v7 = vsel %vm374_vm1, %v12337_v34, %v7458_v30  ;;  %v7467_v36 = vsel %vm374_vm1, %v12332_v21, %v12336_v0  ;;  %v8579_v12 = vpop.f32.mrb[19].mxu1  ;;  %v7468_v59 = vsel %vm374_vm1, %v12336_v0, %v12337_v34  ;;  %v8204_v30 = vld [vmem:[%s22351_s10 + $0x20] sm:$0xff]  ;;  %v8209_v0 = vld [vmem:[%s22351_s10 + $0x48] sm:$0xff] }
 0xb4f   :  { %v7492_v28 = vmax.f32 %v22042_v62, %v7469_v7  ;;  %v7490_v23 = vmax.f32 %v21918_v16, %v7467_v36  ;;  %v8580_v29 = vadd.f32 %v8579_v12, %v8578_v46  ;;  %v7491_v44 = vmax.f32 %v21922_v54, %v7468_v59  ;;  %v8107_v16 = vld [vmem:[%s22349_s8 + $0x20] sm:$0xff]  ;;  %v8108_v54 = vld [vmem:[%s22349_s8 + $0x28] sm:$0xff]  ;;  %v8210_v46 = vld [vmem:[%s22351_s10 + $0x50] sm:$0xf] }
 0xb50   :  { %v12001_v62 = vpack.c.bf16 %v8108_v54, %v8107_v16  ;;  %v12022_v22 = vpack.c.bf16 %v8205_v15, %v8204_v30  ;;  %v8208_v34 = vld [vmem:[%s22351_s10 + $0x40] sm:$0xff] }
 0xb51   :  { %v7819_v21 = vadd.f32 %v8580_v29, %v7749_v45  ;;  %8026 = vmatprep.mubr.f32.mxu0 %v7491_v44  ;;  %8097 = vmatmul.mubr.f32.vlgmr.msra.gmra.mrb[22].mxu1 %v7492_v28  ;;  %v12028_v45 = vpack.c.bf16 %v8209_v0, %v8208_v34 }
 0xb52   :  { %8027 = vmatmul.mubr.f32.vlgmr.msra.gmra.mrb[20].mxu0 %v7490_v23 }
 0xb53   :  { %11996 = vmatpush3.bf16.msra.mxu0 %v11995_v42  ;;  %8744 = vmatprep.mubr.msk.f32.mxu0 %vm12417_vm12, %v12416_v17  ;;  %v8296_v42 = vand.u32 127, %v4785_v50 }
 0xb54   :  { %11997 = vmatprep.subr.bf16.mxu0 %v12415_v63 }
 0xb55   :  { %vm8297_vm15 = vcmp.lt.s32.totalorder %v8296_v42, 10 }
 0xb57   :  { %11999 = vmatpush3.bf16.msra.mxu0 %v11998_v57 }
 0xb58   :  { %12000 = vmatprep.subr.bf16.mxu0 %v12415_v63 }
 0xb5b   :  { %12002 = vmatpush3.bf16.msra.mxu0 %v12001_v62 }
 0xb5c   :  { %12003 = vmatprep.subr.bf16.mxu0 %v12415_v63 }
 0xb5f   :  { %12005 = vmatpush3.bf16.msra.mxu0 %v12004_v52 }
 0xb60   :  { %12006 = vmatprep.subr.bf16.mxu0 %v12415_v63 }
 0xb63   :  { %12008 = vmatpush3.bf16.msra.mxu0 %v12007_v41 }
 0xb64   :  { %12009 = vmatprep.subr.bf16.mxu0 %v12415_v63 }
 0xb67   :  { %12011 = vmatpush3.bf16.msra.mxu0 %v12010_v25 }
 0xb68   :  { %12012 = vmatprep.subr.bf16.mxu0 %v12415_v63 }
 0xb6b   :  { %12014 = vmatpush3.bf16.msra.mxu0 %v12013_v32 }
 0xb6c   :  { %8742 = vmatprep.subr.mxu0 %v12416_v17 }
 0xb6f   :  { %8743 = vmatpush3.msra.mxu0 %v8117_v10 }
 0xb70   :  { %12015 = vmatprep.subr.bf16.mxu0 %v12415_v63 }
 0xbc3   :  { %v8613_v3 = vpop.f32.mrb[18].mxu0  ;;  %v8648_v6 = vpop.f32.mrb[20].mxu1 }
 0xbc4   :  { %v8614_v35 = vpop.f32.mrb[19].mxu0  ;;  %v8649_v61 = vpop.f32.mrb[21].mxu1 }
 0xbc5   :  { %v8615_v1 = vadd.f32 %v8614_v35, %v8613_v3  ;;  %v8650_v33 = vadd.f32 %v8649_v61, %v8648_v6 }
 0xbc7   :  { %v7889_v58 = vadd.f32 %v8615_v1, %v7819_v21 }
 0xbc9   :  { %v7959_v18 = vadd.f32 %v8650_v33, %v7889_v58 }
 0xc24   :  { %v8098_v24 = vpop.f32.mrb[22].mxu1 }
 0xc25   :  { %v8683_v43 = vpop.f32.mrb[20].mxu0  ;;  %v8100_v14 = vpop.f32.mrb[23].mxu1 }
 0xc26   :  { %v8684_v56 = vpop.f32.mrb[21].mxu0 }
 0xc27   :  { %v8685_v19 = vadd.f32 %v8684_v56, %v8683_v43 }
 0xc29   :  { %v8029_v13 = vadd.f32 %v8685_v19, %v7959_v18 }
 0xc2b   :  { %v8099_v53 = vadd.f32 %v8098_v24, %v8029_v13 }
 0xc2d   :  { %v8102_v2 = vmax.f32 %v8099_v53, 0.0 }
 0xc2f   :  { %8745 = vmatmul.mubr.msk.f32.vlgmr.msra.gmra.mrb[22].mxu0 %vm8125_vm13, %v8102_v2 }
 0xc30   :  { %12017 = vmatpush3.bf16.msra.mxu0 %v12016_v51  ;;  %8769 = vmatprep.mubr.msk.f32.mxu0 %vm12417_vm12, %v12416_v17 }
 0xc31   :  { %12018 = vmatprep.subr.bf16.mxu0 %v12415_v63 }
 0xc34   :  { %12020 = vmatpush3.bf16.msra.mxu0 %v12019_v31 }
 0xc35   :  { %12021 = vmatprep.subr.bf16.mxu0 %v12415_v63 }
 0xc38   :  { %12023 = vmatpush3.bf16.msra.mxu0 %v12022_v22 }
 0xc39   :  { %12024 = vmatprep.subr.bf16.mxu0 %v12415_v63 }
 0xc3c   :  { %12026 = vmatpush3.bf16.msra.mxu0 %v12025_v49 }
 0xc3d   :  { %12027 = vmatprep.subr.bf16.mxu0 %v12415_v63  ;;  %v8366_v63 = vld [vmem:[%s22350_s9] ss:$0 sm:$0xff] }
 0xc40   :  { %12029 = vmatpush3.bf16.msra.mxu0 %v12028_v45 }
 0xc41   :  { %8767 = vmatprep.subr.mxu0 %v12416_v17  ;;  %v8368_v17 = vld [vmem:[%s22352_s11] ss:$0 sm:$0xff] }
 0xc44   :  { %8768 = vmatpush3.msk.msra.mxu0 %vm8221_vm14, %v8210_v46 }
 0xd02   :  { %v8195_v7 = vpop.f32.mrb[22].mxu0 }
 0xd03   :  { %v8196_v36 = vadd.f32 %v8366_v63, %v8195_v7  ;;  %v8746_v12 = vpop.f32.mrb[23].mxu0 }
 0xd05   :  { %v8199_v59 = vmax.f32 %v8196_v36, 0.0 }
 0xd07   :  { %8770 = vmatmul.mubr.msk.f32.vlgmr.msra.gmra.mrb[24].mxu0 %vm2861_vm10, %v8199_v59 }
 0xdda   :  { %v8291_v28 = vpop.f32.mrb[24].mxu0 }
 0xddb   :  { %v8292_v23 = vadd.f32 %v8368_v17, %v8291_v28  ;;  %v8771_v29 = vpop.f32.mrb[25].mxu0 }
 0xddd   :  { %v8298_v44 = vsel %vm8297_vm15, %v8292_v23, -1e+30 }
 0xdde   :  { %8299 = vmax.xlane.f32.xlu1 %v8298_v44 }
 0xe6b   :  { %v8300_v27 = vpop.xlane.xlu1 %8299 }
 0xe6c   :  { %v8301_v5 = vsub.f32 %v8292_v23, %v8300_v27 }
 0xe6e   :  { %v8302_v21 = vmul.f32 1.442695, %v8301_v5 }
 0xe70   :  { %12338 = vpow2.f32 %v8302_v21 }
 0xe7a   :  { %v12339_v57 = vpop.eup %12338 }
 0xe7b   :  { %v8304_v16 = vsel %vm8297_vm15, %v12339_v57, 0.0 }
 0xe7c   :  { %8305 = vadd.xlane.f32.xlu0 %v8304_v16 }
 0xf09   :  { %v8306_v54 = vpop.xlane.xlu0 %8305 }
 0xf0a   :  { %12340 = vlog2.f32 %v8306_v54 }
 0xf14   :  { %v12341_v50 = vpop.eup %12340 }
 0xf15   :  { %v8308_v62 = vmul.f32 0.6931472, %v12341_v50 }
 0xf17   :  { %v8309_v48 = vsub.f32 %v8301_v5, %v8308_v62 }
 0xf19   :  { %8310 = vst [vmem:[%s22353_s12] sm:$0xff] %v8309_v48 }
 0xf1a   :  { %8315 = vsyncpa [#allocation3], 1 }
 0xf1b   :  { %8316 = vsyncpa [#allocation5], 1 }

</bundles_post_ra>
